<compile_context>
chip_gen: v7x
topology: tpu7x:2x2x1
jax: 0.10.0
libtpu: 0.0.40
codegen_flags: <defaults>
</compile_context>

<pallas_src>
import functools

import numpy as np
import jax
import jax.numpy as jnp
from jax.experimental import pallas as pl
from jax.experimental.pallas import tpu as pltpu


_CPARAMS = pltpu.CompilerParams(
    dimension_semantics=("parallel",),
    vmem_limit_bytes=32 * 1024 * 1024,
)


# ---------------------------------------------------------------------------
# Pallas kernels (activations are (H, N, W*C) bf16 slabs)
# ---------------------------------------------------------------------------
def _conv_pool_kernel(a0_ref, a1_ref, w_ref, b_ref, o_ref, *, tb, ho):
    """Fused conv3x3(pad=1) + bias + ReLU + maxpool2x2, M-batched over (row, image).

    a0_ref/a1_ref: (ho+1, tb, K) even/odd height-padded input rows (bf16).
    w_ref:         (3, 2, K, Nout) banded weights, index (dy, rx) (bf16).
    b_ref:         (1, Nout) bias tiled over output columns (f32).
    o_ref:         (ho, tb, Nout) pooled output (bf16).
    """
    k = a0_ref.shape[-1]
    nout = o_ref.shape[-1]
    bias = b_ref[...]
    slabs = (a0_ref[...], a1_ref[...])
    # Four distinct conv-row windows c = ry + dy: parity c & 1, plane offset c >> 1.
    # tb is a multiple of 16 so (ho, tb, K) -> (ho*tb, K) is layout-preserving and
    # every matmul sees M = ho*tb rows (amortizes MXU weight pushes).
    lhs = [slabs[c & 1][(c >> 1):(c >> 1) + ho].reshape(ho * tb, k)
           for c in range(4)]
    out = None
    for rx in range(2):
        for ry in range(2):
            acc = None
            for dy in range(3):
                part = jnp.dot(lhs[ry + dy], w_ref[dy, rx],
                               preferred_element_type=jnp.float32)
                acc = part if acc is None else acc + part
            phase = jnp.maximum(acc + bias, 0.0)
            out = phase if out is None else jnp.maximum(out, phase)
    o_ref[...] = out.reshape(ho, tb, nout).astype(o_ref.dtype)


def _conv3_kernel(x_ref, w_ref, b_ref, o_ref, *, tb, ho):
    """Conv3x3(pad=1) + bias + ReLU (no pool), M-batched over (row, image).

    x_ref: (ho+2, tb, K) height-padded input rows (bf16).
    w_ref: (3, K, Nout) banded weights, index dy (bf16).
    """
    k = x_ref.shape[-1]
    nout = o_ref.shape[-1]
    bias = b_ref[...]
    x = x_ref[...]
    acc = None
    for dy in range(3):
        lhs = x[dy:dy + ho].reshape(ho * tb, k)
        part = jnp.dot(lhs, w_ref[dy], preferred_element_type=jnp.float32)
        acc = part if acc is None else acc + part
    out = jnp.maximum(acc + bias, 0.0)
    o_ref[...] = out.reshape(ho, tb, nout).astype(o_ref.dtype)


def _fc_head_kernel(x_ref, w4_ref, b4_ref, w5_ref, b5_ref, o_ref):
    """Fused Linear(3136->128)+ReLU+Linear(128->128 padded logits).

    x_ref:  (7, tb, 512) conv3 output rows (bf16, lanes >= 448 are zero).
    w4_ref: (7, 512, 128) fc1 weight with torch flatten + lane-pad folded in (bf16).
    """
    h = None
    for r in range(x_ref.shape[0]):
        part = jnp.dot(x_ref[r], w4_ref[r], preferred_element_type=jnp.float32)
        h = part if h is None else h + part
    h = jnp.maximum(h + b4_ref[...], 0.0)
    o_ref[...] = jnp.dot(h.astype(jnp.bfloat16), w5_ref[...],
                         preferred_element_type=jnp.float32) + b5_ref[...]


# ---------------------------------------------------------------------------
# pallas_call wrappers
# ---------------------------------------------------------------------------
def _pick_batch_tile(n, cap=64):
    """Batch tile (always a multiple of 16) and zero-padded batch size.

    Keeps >=2 grid steps when the batch allows (v7x has 2 TensorCores)."""
    n16 = ((n + 15) // 16) * 16
    if n16 <= 16:
        return n16, n16
    half = (n16 + 1) // 2
    tb = min(cap, ((half + 15) // 16) * 16)
    n_pad = ((n16 + tb - 1) // tb) * tb
    return tb, n_pad


def conv_pool_layer(y_hnk, wb, bias_row, *, tb):
    """(H, Npad, K) bf16 -> (H//2, Npad, Nout) bf16."""
    h, n, k = y_hnk.shape
    ho = h // 2
    nout = bias_row.shape[-1]
    yp = jnp.pad(y_hnk, ((1, 1), (0, 0), (0, 0)))      # height pad only
    a0, a1 = yp[0::2], yp[1::2]                        # (ho+1, n, k) each
    return pl.pallas_call(
        functools.partial(_conv_pool_kernel, tb=tb, ho=ho),
        out_shape=jax.ShapeDtypeStruct((ho, n, nout), jnp.bfloat16),
        grid=(n // tb,),
        in_specs=[
            pl.BlockSpec((ho + 1, tb, k), lambda i: (0, i, 0)),
            pl.BlockSpec((ho + 1, tb, k), lambda i: (0, i, 0)),
            pl.BlockSpec(wb.shape, lambda i: (0, 0, 0, 0)),
            pl.BlockSpec(bias_row.shape, lambda i: (0, 0)),
        ],
        out_specs=pl.BlockSpec((ho, tb, nout), lambda i: (0, i, 0)),
        compiler_params=_CPARAMS,
    )(a0, a1, wb, bias_row)


def conv_layer(y_hnk, wb, bias_row, *, tb):
    """(H, Npad, K) bf16 -> (H, Npad, Nout) bf16 (conv + bias + ReLU)."""
    h, n, k = y_hnk.shape
    nout = bias_row.shape[-1]
    yp = jnp.pad(y_hnk, ((1, 1), (0, 0), (0, 0)))
    return pl.pallas_call(
        functools.partial(_conv3_kernel, tb=tb, ho=h),
        out_shape=jax.ShapeDtypeStruct((h, n, nout), jnp.bfloat16),
        grid=(n // tb,),
        in_specs=[
            pl.BlockSpec((h + 2, tb, k), lambda i: (0, i, 0)),
            pl.BlockSpec(wb.shape, lambda i: (0, 0, 0)),
            pl.BlockSpec(bias_row.shape, lambda i: (0, 0)),
        ],
        out_specs=pl.BlockSpec((h, tb, nout), lambda i: (0, i, 0)),
        compiler_params=_CPARAMS,
    )(yp, wb, bias_row)


def fc_head(y_hnk, w4, b4, w5, b5, *, tb):
    """(7, Npad, 512) bf16 -> (Npad, 128) f32 padded logits."""
    h, n, k = y_hnk.shape
    nout = w5.shape[1]
    return pl.pallas_call(
        _fc_head_kernel,
        out_shape=jax.ShapeDtypeStruct((n, nout), jnp.float32),
        grid=(n // tb,),
        in_specs=[
            pl.BlockSpec((h, tb, k), lambda i: (0, i, 0)),
            pl.BlockSpec(w4.shape, lambda i: (0, 0, 0)),
            pl.BlockSpec(b4.shape, lambda i: (0, 0)),
            pl.BlockSpec(w5.shape, lambda i: (0, 0)),
            pl.BlockSpec(b5.shape, lambda i: (0, 0)),
        ],
        out_specs=pl.BlockSpec((tb, nout), lambda i: (i, 0)),
        compiler_params=_CPARAMS,
    )(y_hnk, w4, b4, w5, b5)


# ---------------------------------------------------------------------------
# Weight preparation (init-time): banded conv matrices, folded flatten/pad
# ---------------------------------------------------------------------------
def _banded_conv_pool(w_oihw, w_in, k_lanes, n_lanes):
    """(3, 2, k_lanes, n_lanes) matrices M[dy, rx] for conv3x3(pad1)+pool2x2.

    Width padding is folded in by dropping out-of-range taps; extra input /
    output lanes beyond w_in*Cin / (w_in//2)*Cout stay zero."""
    w = np.transpose(np.asarray(w_oihw, np.float32), (2, 3, 1, 0))   # (dy,dx,ci,co)
    cin, cout = w.shape[2], w.shape[3]
    wo2 = w_in // 2
    mats = np.zeros((3, 2, k_lanes, n_lanes), np.float32)
    for dy in range(3):
        for rx in range(2):
            for x2 in range(wo2):
                for dx in range(3):
                    col = 2 * x2 + rx + dx - 1          # unpadded input column
                    if 0 <= col < w_in:
                        mats[dy, rx, col * cin:(col + 1) * cin,
                             x2 * cout:(x2 + 1) * cout] = w[dy, dx]
    return mats


def _banded_conv(w_oihw, w_in, k_lanes, n_lanes):
    """(3, k_lanes, n_lanes) matrices M[dy] for a plain conv3x3(pad1)."""
    w = np.transpose(np.asarray(w_oihw, np.float32), (2, 3, 1, 0))
    cin, cout = w.shape[2], w.shape[3]
    mats = np.zeros((3, k_lanes, n_lanes), np.float32)
    for dy in range(3):
        for x in range(w_in):
            for dx in range(3):
                col = x + dx - 1
                if 0 <= col < w_in:
                    mats[dy, col * cin:(col + 1) * cin,
                         x * cout:(x + 1) * cout] = w[dy, dx]
    return mats


def _bias_row(b, reps, n_lanes):
    row = np.zeros((1, n_lanes), np.float32)
    t = np.tile(np.asarray(b, np.float32), reps)
    row[0, :t.size] = t
    return row


def init_torch_params():
    """Deterministic synthetic parameters in PyTorch layouts."""
    keys = jax.random.split(jax.random.PRNGKey(42), 10)

    def _w(k, shape, fan_in):
        return jax.random.normal(k, shape, jnp.float32) / np.sqrt(fan_in)

    return {
        "conv1_w": _w(keys[0], (16, 1, 3, 3), 9),     "conv1_b": _w(keys[1], (16,), 9),
        "conv2_w": _w(keys[2], (32, 16, 3, 3), 144),  "conv2_b": _w(keys[3], (32,), 144),
        "conv3_w": _w(keys[4], (64, 32, 3, 3), 288),  "conv3_b": _w(keys[5], (64,), 288),
        "fc1_w":   _w(keys[6], (128, 3136), 3136),    "fc1_b":  _w(keys[7], (128,), 3136),
        "fc2_w":   _w(keys[8], (10, 128), 128),       "fc2_b":  _w(keys[9], (10,), 128),
    }


def prepare_params(tp):
    """Convert torch-layout params into kernel layouts (done once)."""
    wb1 = _banded_conv_pool(tp["conv1_w"], 28, 28, 256)    # K=28,  Nout=256 (224 used)
    wb2 = _banded_conv_pool(tp["conv2_w"], 14, 256, 256)   # K=256, Nout=256 (224 used)
    wb3 = _banded_conv(tp["conv3_w"], 7, 256, 512)         # K=256, Nout=512 (448 used)
    b1 = _bias_row(tp["conv1_b"], 14, 256)
    b2 = _bias_row(tp["conv2_b"], 7, 256)
    b3 = _bias_row(tp["conv3_b"], 7, 512)
    # fc1: fold torch's (C,H,W) flatten and the 448->512 lane pad into the weight,
    # stored as (7, 512, 128) so the fc kernel contracts per conv3 output row.
    t = np.asarray(tp["fc1_w"], np.float32).reshape(128, 64, 7, 7)   # (out,c,h,w)
    t = np.transpose(t, (2, 3, 1, 0))                                # (h,w,c,out)
    w4 = np.zeros((7, 512, 128), np.float32)
    w4[:, :7 * 64, :] = t.reshape(7, 7 * 64, 128)
    b4 = np.asarray(tp["fc1_b"], np.float32)[None, :]
    # fc2: pad 10 -> 128 output lanes for lane-dense stores.
    w5 = np.zeros((128, 128), np.float32)
    w5[:, :10] = np.asarray(tp["fc2_w"], np.float32).T
    b5 = np.zeros((1, 128), np.float32)
    b5[0, :10] = np.asarray(tp["fc2_b"], np.float32)

    bf16 = lambda a: jnp.asarray(a, jnp.bfloat16)
    f32 = lambda a: jnp.asarray(a, jnp.float32)
    return {
        "wb1": bf16(wb1), "bias1": f32(b1),
        "wb2": bf16(wb2), "bias2": f32(b2),
        "wb3": bf16(wb3), "bias3": f32(b3),
        "w4": bf16(w4), "b4": f32(b4),
        "w5": bf16(w5), "b5": f32(b5),
    }


# ---------------------------------------------------------------------------
# Forward pass
# ---------------------------------------------------------------------------
@jax.jit
def net_forward(x_nchw, kp):
    n = x_nchw.shape[0]
    tb, n_pad = _pick_batch_tile(n)
    # (N,1,28,28) -> (H=28, N, W*Cin=28), bf16, batch padded to a tile multiple.
    x = jnp.transpose(x_nchw.reshape(n, 28, 28), (1, 0, 2)).astype(jnp.bfloat16)
    if n_pad != n:
        x = jnp.pad(x, ((0, 0), (0, n_pad - n), (0, 0)))
    y = conv_pool_layer(x, kp["wb1"], kp["bias1"], tb=tb)            # (14, Np, 256)
    y = conv_pool_layer(y, kp["wb2"], kp["bias2"], tb=tb)            # (7,  Np, 256)
    y = conv_layer(y, kp["wb3"], kp["bias3"], tb=tb)                 # (7,  Np, 512)
    logits = fc_head(y, kp["w4"], kp["b4"], kp["w5"], kp["b5"], tb=tb)  # (Np, 128)
    return logits[:n, :10]


def reference_forward(x_nchw, tp):
    """Pure-JAX f32 reference (matches the PyTorch module) for a sanity check."""
    x = jnp.transpose(x_nchw, (0, 2, 3, 1)).astype(jnp.float32)

    def conv(x, w_oihw, b):
        n, h, wd, c = x.shape
        xp = jnp.pad(x, ((0, 0), (1, 1), (1, 1), (0, 0)))
        w = jnp.transpose(w_oihw, (2, 3, 1, 0))
        acc = jnp.zeros((n, h, wd, w.shape[3]), jnp.float32)
        for dy in range(3):
            for dx in range(3):
                acc = acc + jnp.einsum("nhwc,cd->nhwd",
                                       xp[:, dy:dy + h, dx:dx + wd, :], w[dy, dx])
        return jnp.maximum(acc + b, 0.0)

    def pool(x):
        n, h, wd, c = x.shape
        return x.reshape(n, h // 2, 2, wd // 2, 2, c).max(axis=(2, 4))

    y = pool(conv(x, tp["conv1_w"], tp["conv1_b"]))
    y = pool(conv(y, tp["conv2_w"], tp["conv2_b"]))
    y = conv(y, tp["conv3_w"], tp["conv3_b"])
    y = jnp.transpose(y, (0, 3, 1, 2)).reshape(y.shape[0], -1)       # torch flatten
    y = jnp.maximum(y @ tp["fc1_w"].T + tp["fc1_b"], 0.0)
    return y @ tp["fc2_w"].T + tp["fc2_b"]


if __name__ == "__main__":
    torch_params = init_torch_params()
    kparams = prepare_params(torch_params)

    x = jax.random.normal(jax.random.PRNGKey(0), (2, 1, 28, 28), jnp.float32)
    out = jax.block_until_ready(net_forward(x, kparams))
    assert out.shape == (2, 10) and out.dtype == jnp.float32

    ref = jax.block_until_ready(reference_forward(x, torch_params))
    max_err = float(jnp.max(jnp.abs(out - ref)))
    assert max_err < 0.25, f"mismatch vs reference: {max_err}"
    print("KERNEL_OK")
</pallas_src>

<mosaic_0001>
module attributes {stable_mosaic.version = 11 : i64} {
  func.func @_conv_pool_kernel(%arg0: i32, %arg1: memref<15x16x28xbf16, #tpu.memory_space<vmem>>, %arg2: memref<15x16x28xbf16, #tpu.memory_space<vmem>>, %arg3: memref<3x2x28x256xbf16, #tpu.memory_space<vmem>>, %arg4: memref<1x256xf32, #tpu.memory_space<vmem>>, %arg5: memref<14x16x256xbf16, #tpu.memory_space<vmem>>) attributes {dimension_semantics = [#tpu.dimension_semantics<parallel>], iteration_bounds = array<i64: 1>, scalar_prefetch = 0 : i64, scratch_operands = 0 : i64, tpu.core_type = #tpu.core_type<tc>, window_params = [{transform_indices = @transform_0, window_bounds = array<i64: 15, 16, 28>}, {transform_indices = @transform_1, window_bounds = array<i64: 15, 16, 28>}, {pipeline_mode = #tpu.pipeline_mode<synchronous>, transform_indices = @transform_2, window_bounds = array<i64: 3, 2, 28, 256>}, {pipeline_mode = #tpu.pipeline_mode<synchronous>, transform_indices = @transform_3, window_bounds = array<i64: 1, 256>}, {transform_indices = @transform_4, window_bounds = array<i64: 14, 16, 256>}]} {
    %c0 = arith.constant 0 : index
    %c0_0 = arith.constant 0 : index
    %0 = vector.load %arg4[%c0, %c0_0] : memref<1x256xf32, #tpu.memory_space<vmem>>, vector<1x256xf32>
    %c0_1 = arith.constant 0 : index
    %c0_2 = arith.constant 0 : index
    %c0_3 = arith.constant 0 : index
    %1 = vector.load %arg1[%c0_1, %c0_2, %c0_3] : memref<15x16x28xbf16, #tpu.memory_space<vmem>>, vector<15x16x28xbf16>
    %c0_4 = arith.constant 0 : index
    %c0_5 = arith.constant 0 : index
    %c0_6 = arith.constant 0 : index
    %2 = vector.load %arg2[%c0_4, %c0_5, %c0_6] : memref<15x16x28xbf16, #tpu.memory_space<vmem>>, vector<15x16x28xbf16>
    %3 = vector.extract_strided_slice %1 {offsets = [0, 0, 0], sizes = [14, 16, 28], strides = [1, 1, 1]} : vector<15x16x28xbf16> to vector<14x16x28xbf16>
    %4 = vector.shape_cast %3 : vector<14x16x28xbf16> to vector<224x28xbf16>
    %5 = vector.extract_strided_slice %2 {offsets = [0, 0, 0], sizes = [14, 16, 28], strides = [1, 1, 1]} : vector<15x16x28xbf16> to vector<14x16x28xbf16>
    %6 = vector.shape_cast %5 : vector<14x16x28xbf16> to vector<224x28xbf16>
    %7 = vector.extract_strided_slice %1 {offsets = [1, 0, 0], sizes = [14, 16, 28], strides = [1, 1, 1]} : vector<15x16x28xbf16> to vector<14x16x28xbf16>
    %8 = vector.shape_cast %7 : vector<14x16x28xbf16> to vector<224x28xbf16>
    %9 = vector.extract_strided_slice %2 {offsets = [1, 0, 0], sizes = [14, 16, 28], strides = [1, 1, 1]} : vector<15x16x28xbf16> to vector<14x16x28xbf16>
    %10 = vector.shape_cast %9 : vector<14x16x28xbf16> to vector<224x28xbf16>
    %c0_7 = arith.constant 0 : index
    %c0_8 = arith.constant 0 : index
    %c0_9 = arith.constant 0 : index
    %c0_10 = arith.constant 0 : index
    %11 = vector.load %arg3[%c0_7, %c0_8, %c0_9, %c0_10] : memref<3x2x28x256xbf16, #tpu.memory_space<vmem>>, vector<1x1x28x256xbf16>
    %12 = vector.shape_cast %11 : vector<1x1x28x256xbf16> to vector<28x256xbf16>
    %cst = arith.constant dense<0.000000e+00> : vector<224x256xf32>
    %13 = tpu.matmul %4, %12, %cst {dimension_numbers = #tpu.dot_dimension_numbers<[1], [0], [0], [1], [0, 0, 1, 1], [], []>} : vector<224x28xbf16>, vector<28x256xbf16>, vector<224x256xf32> -> vector<224x256xf32>
    %c1 = arith.constant 1 : index
    %c0_11 = arith.constant 0 : index
    %c0_12 = arith.constant 0 : index
    %c0_13 = arith.constant 0 : index
    %14 = vector.load %arg3[%c1, %c0_11, %c0_12, %c0_13] : memref<3x2x28x256xbf16, #tpu.memory_space<vmem>>, vector<1x1x28x256xbf16>
    %15 = vector.shape_cast %14 : vector<1x1x28x256xbf16> to vector<28x256xbf16>
    %cst_14 = arith.constant dense<0.000000e+00> : vector<224x256xf32>
    %16 = tpu.matmul %6, %15, %cst_14 {dimension_numbers = #tpu.dot_dimension_numbers<[1], [0], [0], [1], [0, 0, 1, 1], [], []>} : vector<224x28xbf16>, vector<28x256xbf16>, vector<224x256xf32> -> vector<224x256xf32>
    %17 = arith.addf %13, %16 : vector<224x256xf32>
    %c2 = arith.constant 2 : index
    %c0_15 = arith.constant 0 : index
    %c0_16 = arith.constant 0 : index
    %c0_17 = arith.constant 0 : index
    %18 = vector.load %arg3[%c2, %c0_15, %c0_16, %c0_17] : memref<3x2x28x256xbf16, #tpu.memory_space<vmem>>, vector<1x1x28x256xbf16>
    %19 = vector.shape_cast %18 : vector<1x1x28x256xbf16> to vector<28x256xbf16>
    %cst_18 = arith.constant dense<0.000000e+00> : vector<224x256xf32>
    %20 = tpu.matmul %8, %19, %cst_18 {dimension_numbers = #tpu.dot_dimension_numbers<[1], [0], [0], [1], [0, 0, 1, 1], [], []>} : vector<224x28xbf16>, vector<28x256xbf16>, vector<224x256xf32> -> vector<224x256xf32>
    %21 = arith.addf %17, %20 : vector<224x256xf32>
    %22 = vector.broadcast %0 : vector<1x256xf32> to vector<224x256xf32>
    %23 = arith.addf %21, %22 : vector<224x256xf32>
    %cst_19 = arith.constant 0.000000e+00 : f32
    %24 = vector.broadcast %cst_19 : f32 to vector<224x256xf32>
    %25 = arith.maximumf %23, %24 : vector<224x256xf32>
    %c0_20 = arith.constant 0 : index
    %c0_21 = arith.constant 0 : index
    %c0_22 = arith.constant 0 : index
    %c0_23 = arith.constant 0 : index
    %26 = vector.load %arg3[%c0_20, %c0_21, %c0_22, %c0_23] : memref<3x2x28x256xbf16, #tpu.memory_space<vmem>>, vector<1x1x28x256xbf16>
    %27 = vector.shape_cast %26 : vector<1x1x28x256xbf16> to vector<28x256xbf16>
    %cst_24 = arith.constant dense<0.000000e+00> : vector<224x256xf32>
    %28 = tpu.matmul %6, %27, %cst_24 {dimension_numbers = #tpu.dot_dimension_numbers<[1], [0], [0], [1], [0, 0, 1, 1], [], []>} : vector<224x28xbf16>, vector<28x256xbf16>, vector<224x256xf32> -> vector<224x256xf32>
    %c1_25 = arith.constant 1 : index
    %c0_26 = arith.constant 0 : index
    %c0_27 = arith.constant 0 : index
    %c0_28 = arith.constant 0 : index
    %29 = vector.load %arg3[%c1_25, %c0_26, %c0_27, %c0_28] : memref<3x2x28x256xbf16, #tpu.memory_space<vmem>>, vector<1x1x28x256xbf16>
    %30 = vector.shape_cast %29 : vector<1x1x28x256xbf16> to vector<28x256xbf16>
    %cst_29 = arith.constant dense<0.000000e+00> : vector<224x256xf32>
    %31 = tpu.matmul %8, %30, %cst_29 {dimension_numbers = #tpu.dot_dimension_numbers<[1], [0], [0], [1], [0, 0, 1, 1], [], []>} : vector<224x28xbf16>, vector<28x256xbf16>, vector<224x256xf32> -> vector<224x256xf32>
    %32 = arith.addf %28, %31 : vector<224x256xf32>
    %c2_30 = arith.constant 2 : index
    %c0_31 = arith.constant 0 : index
    %c0_32 = arith.constant 0 : index
    %c0_33 = arith.constant 0 : index
    %33 = vector.load %arg3[%c2_30, %c0_31, %c0_32, %c0_33] : memref<3x2x28x256xbf16, #tpu.memory_space<vmem>>, vector<1x1x28x256xbf16>
    %34 = vector.shape_cast %33 : vector<1x1x28x256xbf16> to vector<28x256xbf16>
    %cst_34 = arith.constant dense<0.000000e+00> : vector<224x256xf32>
    %35 = tpu.matmul %10, %34, %cst_34 {dimension_numbers = #tpu.dot_dimension_numbers<[1], [0], [0], [1], [0, 0, 1, 1], [], []>} : vector<224x28xbf16>, vector<28x256xbf16>, vector<224x256xf32> -> vector<224x256xf32>
    %36 = arith.addf %32, %35 : vector<224x256xf32>
    %37 = vector.broadcast %0 : vector<1x256xf32> to vector<224x256xf32>
    %38 = arith.addf %36, %37 : vector<224x256xf32>
    %cst_35 = arith.constant 0.000000e+00 : f32
    %39 = vector.broadcast %cst_35 : f32 to vector<224x256xf32>
    %40 = arith.maximumf %38, %39 : vector<224x256xf32>
    %41 = arith.maximumf %25, %40 : vector<224x256xf32>
    %c0_36 = arith.constant 0 : index
    %c1_37 = arith.constant 1 : index
    %c0_38 = arith.constant 0 : index
    %c0_39 = arith.constant 0 : index
    %42 = vector.load %arg3[%c0_36, %c1_37, %c0_38, %c0_39] : memref<3x2x28x256xbf16, #tpu.memory_space<vmem>>, vector<1x1x28x256xbf16>
    %43 = vector.shape_cast %42 : vector<1x1x28x256xbf16> to vector<28x256xbf16>
    %cst_40 = arith.constant dense<0.000000e+00> : vector<224x256xf32>
    %44 = tpu.matmul %4, %43, %cst_40 {dimension_numbers = #tpu.dot_dimension_numbers<[1], [0], [0], [1], [0, 0, 1, 1], [], []>} : vector<224x28xbf16>, vector<28x256xbf16>, vector<224x256xf32> -> vector<224x256xf32>
    %c1_41 = arith.constant 1 : index
    %c1_42 = arith.constant 1 : index
    %c0_43 = arith.constant 0 : index
    %c0_44 = arith.constant 0 : index
    %45 = vector.load %arg3[%c1_41, %c1_42, %c0_43, %c0_44] : memref<3x2x28x256xbf16, #tpu.memory_space<vmem>>, vector<1x1x28x256xbf16>
    %46 = vector.shape_cast %45 : vector<1x1x28x256xbf16> to vector<28x256xbf16>
    %cst_45 = arith.constant dense<0.000000e+00> : vector<224x256xf32>
    %47 = tpu.matmul %6, %46, %cst_45 {dimension_numbers = #tpu.dot_dimension_numbers<[1], [0], [0], [1], [0, 0, 1, 1], [], []>} : vector<224x28xbf16>, vector<28x256xbf16>, vector<224x256xf32> -> vector<224x256xf32>
    %48 = arith.addf %44, %47 : vector<224x256xf32>
    %c2_46 = arith.constant 2 : index
    %c1_47 = arith.constant 1 : index
    %c0_48 = arith.constant 0 : index
    %c0_49 = arith.constant 0 : index
    %49 = vector.load %arg3[%c2_46, %c1_47, %c0_48, %c0_49] : memref<3x2x28x256xbf16, #tpu.memory_space<vmem>>, vector<1x1x28x256xbf16>
    %50 = vector.shape_cast %49 : vector<1x1x28x256xbf16> to vector<28x256xbf16>
    %cst_50 = arith.constant dense<0.000000e+00> : vector<224x256xf32>
    %51 = tpu.matmul %8, %50, %cst_50 {dimension_numbers = #tpu.dot_dimension_numbers<[1], [0], [0], [1], [0, 0, 1, 1], [], []>} : vector<224x28xbf16>, vector<28x256xbf16>, vector<224x256xf32> -> vector<224x256xf32>
    %52 = arith.addf %48, %51 : vector<224x256xf32>
    %53 = vector.broadcast %0 : vector<1x256xf32> to vector<224x256xf32>
    %54 = arith.addf %52, %53 : vector<224x256xf32>
    %cst_51 = arith.constant 0.000000e+00 : f32
    %55 = vector.broadcast %cst_51 : f32 to vector<224x256xf32>
    %56 = arith.maximumf %54, %55 : vector<224x256xf32>
    %57 = arith.maximumf %41, %56 : vector<224x256xf32>
    %c0_52 = arith.constant 0 : index
    %c1_53 = arith.constant 1 : index
    %c0_54 = arith.constant 0 : index
    %c0_55 = arith.constant 0 : index
    %58 = vector.load %arg3[%c0_52, %c1_53, %c0_54, %c0_55] : memref<3x2x28x256xbf16, #tpu.memory_space<vmem>>, vector<1x1x28x256xbf16>
    %59 = vector.shape_cast %58 : vector<1x1x28x256xbf16> to vector<28x256xbf16>
    %cst_56 = arith.constant dense<0.000000e+00> : vector<224x256xf32>
    %60 = tpu.matmul %6, %59, %cst_56 {dimension_numbers = #tpu.dot_dimension_numbers<[1], [0], [0], [1], [0, 0, 1, 1], [], []>} : vector<224x28xbf16>, vector<28x256xbf16>, vector<224x256xf32> -> vector<224x256xf32>
    %c1_57 = arith.constant 1 : index
    %c1_58 = arith.constant 1 : index
    %c0_59 = arith.constant 0 : index
    %c0_60 = arith.constant 0 : index
    %61 = vector.load %arg3[%c1_57, %c1_58, %c0_59, %c0_60] : memref<3x2x28x256xbf16, #tpu.memory_space<vmem>>, vector<1x1x28x256xbf16>
    %62 = vector.shape_cast %61 : vector<1x1x28x256xbf16> to vector<28x256xbf16>
    %cst_61 = arith.constant dense<0.000000e+00> : vector<224x256xf32>
    %63 = tpu.matmul %8, %62, %cst_61 {dimension_numbers = #tpu.dot_dimension_numbers<[1], [0], [0], [1], [0, 0, 1, 1], [], []>} : vector<224x28xbf16>, vector<28x256xbf16>, vector<224x256xf32> -> vector<224x256xf32>
    %64 = arith.addf %60, %63 : vector<224x256xf32>
    %c2_62 = arith.constant 2 : index
    %c1_63 = arith.constant 1 : index
    %c0_64 = arith.constant 0 : index
    %c0_65 = arith.constant 0 : index
    %65 = vector.load %arg3[%c2_62, %c1_63, %c0_64, %c0_65] : memref<3x2x28x256xbf16, #tpu.memory_space<vmem>>, vector<1x1x28x256xbf16>
    %66 = vector.shape_cast %65 : vector<1x1x28x256xbf16> to vector<28x256xbf16>
    %cst_66 = arith.constant dense<0.000000e+00> : vector<224x256xf32>
    %67 = tpu.matmul %10, %66, %cst_66 {dimension_numbers = #tpu.dot_dimension_numbers<[1], [0], [0], [1], [0, 0, 1, 1], [], []>} : vector<224x28xbf16>, vector<28x256xbf16>, vector<224x256xf32> -> vector<224x256xf32>
    %68 = arith.addf %64, %67 : vector<224x256xf32>
    %69 = vector.broadcast %0 : vector<1x256xf32> to vector<224x256xf32>
    %70 = arith.addf %68, %69 : vector<224x256xf32>
    %cst_67 = arith.constant 0.000000e+00 : f32
    %71 = vector.broadcast %cst_67 : f32 to vector<224x256xf32>
    %72 = arith.maximumf %70, %71 : vector<224x256xf32>
    %73 = arith.maximumf %57, %72 : vector<224x256xf32>
    %74 = vector.shape_cast %73 : vector<224x256xf32> to vector<14x16x256xf32>
    %75 = arith.truncf %74 : vector<14x16x256xf32> to vector<14x16x256xbf16>
    %c0_68 = arith.constant 0 : index
    %c0_69 = arith.constant 0 : index
    %c0_70 = arith.constant 0 : index
    %76 = vector.load %arg5[%c0_68, %c0_69, %c0_70] : memref<14x16x256xbf16, #tpu.memory_space<vmem>>, vector<14x16x256xbf16>
    tpu.vector_store %arg5[%c0_68, %c0_69, %c0_70], %75 {strides = array<i32>} : memref<14x16x256xbf16, #tpu.memory_space<vmem>>, vector<14x16x256xbf16>,
    return
  }
  func.func @transform_0(%arg0: i32) -> (i32, i32, i32) {
    %c0_i32 = arith.constant 0 : i32
    %c0_i32_0 = arith.constant 0 : i32
    %c0_i32_1 = arith.constant 0 : i32
    return %c0_i32, %arg0, %c0_i32_0 : i32, i32, i32
  }
  func.func @transform_1(%arg0: i32) -> (i32, i32, i32) {
    %c0_i32 = arith.constant 0 : i32
    %c0_i32_0 = arith.constant 0 : i32
    %c0_i32_1 = arith.constant 0 : i32
    return %c0_i32, %arg0, %c0_i32_0 : i32, i32, i32
  }
  func.func @transform_2(%arg0: i32) -> (i32, i32, i32, i32) {
    %c0_i32 = arith.constant 0 : i32
    %c0_i32_0 = arith.constant 0 : i32
    %c0_i32_1 = arith.constant 0 : i32
    %c0_i32_2 = arith.constant 0 : i32
    %c0_i32_3 = arith.constant 0 : i32
    return %c0_i32, %c0_i32_0, %c0_i32_1, %c0_i32_2 : i32, i32, i32, i32
  }
  func.func @transform_3(%arg0: i32) -> (i32, i32) {
    %c0_i32 = arith.constant 0 : i32
    %c0_i32_0 = arith.constant 0 : i32
    %c0_i32_1 = arith.constant 0 : i32
    return %c0_i32, %c0_i32_0 : i32, i32
  }
  func.func @transform_4(%arg0: i32) -> (i32, i32, i32) {
    %c0_i32 = arith.constant 0 : i32
    %c0_i32_0 = arith.constant 0 : i32
    %c0_i32_1 = arith.constant 0 : i32
    return %c0_i32, %arg0, %c0_i32_0 : i32, i32, i32
  }
}

module attributes {stable_mosaic.version = 11 : i64} {
  func.func @_conv_pool_kernel(%arg0: i32, %arg1: memref<8x16x256xbf16, #tpu.memory_space<vmem>>, %arg2: memref<8x16x256xbf16, #tpu.memory_space<vmem>>, %arg3: memref<3x2x256x256xbf16, #tpu.memory_space<vmem>>, %arg4: memref<1x256xf32, #tpu.memory_space<vmem>>, %arg5: memref<7x16x256xbf16, #tpu.memory_space<vmem>>) attributes {dimension_semantics = [#tpu.dimension_semantics<parallel>], iteration_bounds = array<i64: 1>, scalar_prefetch = 0 : i64, scratch_operands = 0 : i64, tpu.core_type = #tpu.core_type<tc>, window_params = [{transform_indices = @transform_0, window_bounds = array<i64: 8, 16, 256>}, {transform_indices = @transform_1, window_bounds = array<i64: 8, 16, 256>}, {pipeline_mode = #tpu.pipeline_mode<synchronous>, transform_indices = @transform_2, window_bounds = array<i64: 3, 2, 256, 256>}, {pipeline_mode = #tpu.pipeline_mode<synchronous>, transform_indices = @transform_3, window_bounds = array<i64: 1, 256>}, {transform_indices = @transform_4, window_bounds = array<i64: 7, 16, 256>}]} {
    %c0 = arith.constant 0 : index
    %c0_0 = arith.constant 0 : index
    %0 = vector.load %arg4[%c0, %c0_0] : memref<1x256xf32, #tpu.memory_space<vmem>>, vector<1x256xf32>
    %c0_1 = arith.constant 0 : index
    %c0_2 = arith.constant 0 : index
    %c0_3 = arith.constant 0 : index
    %1 = vector.load %arg1[%c0_1, %c0_2, %c0_3] : memref<8x16x256xbf16, #tpu.memory_space<vmem>>, vector<8x16x256xbf16>
    %c0_4 = arith.constant 0 : index
    %c0_5 = arith.constant 0 : index
    %c0_6 = arith.constant 0 : index
    %2 = vector.load %arg2[%c0_4, %c0_5, %c0_6] : memref<8x16x256xbf16, #tpu.memory_space<vmem>>, vector<8x16x256xbf16>
    %3 = vector.extract_strided_slice %1 {offsets = [0, 0, 0], sizes = [7, 16, 256], strides = [1, 1, 1]} : vector<8x16x256xbf16> to vector<7x16x256xbf16>
    %4 = vector.shape_cast %3 : vector<7x16x256xbf16> to vector<112x256xbf16>
    %5 = vector.extract_strided_slice %2 {offsets = [0, 0, 0], sizes = [7, 16, 256], strides = [1, 1, 1]} : vector<8x16x256xbf16> to vector<7x16x256xbf16>
    %6 = vector.shape_cast %5 : vector<7x16x256xbf16> to vector<112x256xbf16>
    %7 = vector.extract_strided_slice %1 {offsets = [1, 0, 0], sizes = [7, 16, 256], strides = [1, 1, 1]} : vector<8x16x256xbf16> to vector<7x16x256xbf16>
    %8 = vector.shape_cast %7 : vector<7x16x256xbf16> to vector<112x256xbf16>
    %9 = vector.extract_strided_slice %2 {offsets = [1, 0, 0], sizes = [7, 16, 256], strides = [1, 1, 1]} : vector<8x16x256xbf16> to vector<7x16x256xbf16>
    %10 = vector.shape_cast %9 : vector<7x16x256xbf16> to vector<112x256xbf16>
    %c0_7 = arith.constant 0 : index
    %c0_8 = arith.constant 0 : index
    %c0_9 = arith.constant 0 : index
    %c0_10 = arith.constant 0 : index
    %11 = vector.load %arg3[%c0_7, %c0_8, %c0_9, %c0_10] : memref<3x2x256x256xbf16, #tpu.memory_space<vmem>>, vector<1x1x256x256xbf16>
    %12 = vector.shape_cast %11 : vector<1x1x256x256xbf16> to vector<256x256xbf16>
    %cst = arith.constant dense<0.000000e+00> : vector<112x256xf32>
    %13 = tpu.matmul %4, %12, %cst {dimension_numbers = #tpu.dot_dimension_numbers<[1], [0], [0], [1], [0, 0, 1, 1], [], []>} : vector<112x256xbf16>, vector<256x256xbf16>, vector<112x256xf32> -> vector<112x256xf32>
    %c1 = arith.constant 1 : index
    %c0_11 = arith.constant 0 : index
    %c0_12 = arith.constant 0 : index
    %c0_13 = arith.constant 0 : index
    %14 = vector.load %arg3[%c1, %c0_11, %c0_12, %c0_13] : memref<3x2x256x256xbf16, #tpu.memory_space<vmem>>, vector<1x1x256x256xbf16>
    %15 = vector.shape_cast %14 : vector<1x1x256x256xbf16> to vector<256x256xbf16>
    %cst_14 = arith.constant dense<0.000000e+00> : vector<112x256xf32>
    %16 = tpu.matmul %6, %15, %cst_14 {dimension_numbers = #tpu.dot_dimension_numbers<[1], [0], [0], [1], [0, 0, 1, 1], [], []>} : vector<112x256xbf16>, vector<256x256xbf16>, vector<112x256xf32> -> vector<112x256xf32>
    %17 = arith.addf %13, %16 : vector<112x256xf32>
    %c2 = arith.constant 2 : index
    %c0_15 = arith.constant 0 : index
    %c0_16 = arith.constant 0 : index
    %c0_17 = arith.constant 0 : index
    %18 = vector.load %arg3[%c2, %c0_15, %c0_16, %c0_17] : memref<3x2x256x256xbf16, #tpu.memory_space<vmem>>, vector<1x1x256x256xbf16>
    %19 = vector.shape_cast %18 : vector<1x1x256x256xbf16> to vector<256x256xbf16>
    %cst_18 = arith.constant dense<0.000000e+00> : vector<112x256xf32>
    %20 = tpu.matmul %8, %19, %cst_18 {dimension_numbers = #tpu.dot_dimension_numbers<[1], [0], [0], [1], [0, 0, 1, 1], [], []>} : vector<112x256xbf16>, vector<256x256xbf16>, vector<112x256xf32> -> vector<112x256xf32>
    %21 = arith.addf %17, %20 : vector<112x256xf32>
    %22 = vector.broadcast %0 : vector<1x256xf32> to vector<112x256xf32>
    %23 = arith.addf %21, %22 : vector<112x256xf32>
    %cst_19 = arith.constant 0.000000e+00 : f32
    %24 = vector.broadcast %cst_19 : f32 to vector<112x256xf32>
    %25 = arith.maximumf %23, %24 : vector<112x256xf32>
    %c0_20 = arith.constant 0 : index
    %c0_21 = arith.constant 0 : index
    %c0_22 = arith.constant 0 : index
    %c0_23 = arith.constant 0 : index
    %26 = vector.load %arg3[%c0_20, %c0_21, %c0_22, %c0_23] : memref<3x2x256x256xbf16, #tpu.memory_space<vmem>>, vector<1x1x256x256xbf16>
    %27 = vector.shape_cast %26 : vector<1x1x256x256xbf16> to vector<256x256xbf16>
    %cst_24 = arith.constant dense<0.000000e+00> : vector<112x256xf32>
    %28 = tpu.matmul %6, %27, %cst_24 {dimension_numbers = #tpu.dot_dimension_numbers<[1], [0], [0], [1], [0, 0, 1, 1], [], []>} : vector<112x256xbf16>, vector<256x256xbf16>, vector<112x256xf32> -> vector<112x256xf32>
    %c1_25 = arith.constant 1 : index
    %c0_26 = arith.constant 0 : index
    %c0_27 = arith.constant 0 : index
    %c0_28 = arith.constant 0 : index
    %29 = vector.load %arg3[%c1_25, %c0_26, %c0_27, %c0_28] : memref<3x2x256x256xbf16, #tpu.memory_space<vmem>>, vector<1x1x256x256xbf16>
    %30 = vector.shape_cast %29 : vector<1x1x256x256xbf16> to vector<256x256xbf16>
    %cst_29 = arith.constant dense<0.000000e+00> : vector<112x256xf32>
    %31 = tpu.matmul %8, %30, %cst_29 {dimension_numbers = #tpu.dot_dimension_numbers<[1], [0], [0], [1], [0, 0, 1, 1], [], []>} : vector<112x256xbf16>, vector<256x256xbf16>, vector<112x256xf32> -> vector<112x256xf32>
    %32 = arith.addf %28, %31 : vector<112x256xf32>
    %c2_30 = arith.constant 2 : index
    %c0_31 = arith.constant 0 : index
    %c0_32 = arith.constant 0 : index
    %c0_33 = arith.constant 0 : index
    %33 = vector.load %arg3[%c2_30, %c0_31, %c0_32, %c0_33] : memref<3x2x256x256xbf16, #tpu.memory_space<vmem>>, vector<1x1x256x256xbf16>
    %34 = vector.shape_cast %33 : vector<1x1x256x256xbf16> to vector<256x256xbf16>
    %cst_34 = arith.constant dense<0.000000e+00> : vector<112x256xf32>
    %35 = tpu.matmul %10, %34, %cst_34 {dimension_numbers = #tpu.dot_dimension_numbers<[1], [0], [0], [1], [0, 0, 1, 1], [], []>} : vector<112x256xbf16>, vector<256x256xbf16>, vector<112x256xf32> -> vector<112x256xf32>
    %36 = arith.addf %32, %35 : vector<112x256xf32>
    %37 = vector.broadcast %0 : vector<1x256xf32> to vector<112x256xf32>
    %38 = arith.addf %36, %37 : vector<112x256xf32>
    %cst_35 = arith.constant 0.000000e+00 : f32
    %39 = vector.broadcast %cst_35 : f32 to vector<112x256xf32>
    %40 = arith.maximumf %38, %39 : vector<112x256xf32>
    %41 = arith.maximumf %25, %40 : vector<112x256xf32>
    %c0_36 = arith.constant 0 : index
    %c1_37 = arith.constant 1 : index
    %c0_38 = arith.constant 0 : index
    %c0_39 = arith.constant 0 : index
    %42 = vector.load %arg3[%c0_36, %c1_37, %c0_38, %c0_39] : memref<3x2x256x256xbf16, #tpu.memory_space<vmem>>, vector<1x1x256x256xbf16>
    %43 = vector.shape_cast %42 : vector<1x1x256x256xbf16> to vector<256x256xbf16>
    %cst_40 = arith.constant dense<0.000000e+00> : vector<112x256xf32>
    %44 = tpu.matmul %4, %43, %cst_40 {dimension_numbers = #tpu.dot_dimension_numbers<[1], [0], [0], [1], [0, 0, 1, 1], [], []>} : vector<112x256xbf16>, vector<256x256xbf16>, vector<112x256xf32> -> vector<112x256xf32>
    %c1_41 = arith.constant 1 : index
    %c1_42 = arith.constant 1 : index
    %c0_43 = arith.constant 0 : index
    %c0_44 = arith.constant 0 : index
    %45 = vector.load %arg3[%c1_41, %c1_42, %c0_43, %c0_44] : memref<3x2x256x256xbf16, #tpu.memory_space<vmem>>, vector<1x1x256x256xbf16>
    %46 = vector.shape_cast %45 : vector<1x1x256x256xbf16> to vector<256x256xbf16>
    %cst_45 = arith.constant dense<0.000000e+00> : vector<112x256xf32>
    %47 = tpu.matmul %6, %46, %cst_45 {dimension_numbers = #tpu.dot_dimension_numbers<[1], [0], [0], [1], [0, 0, 1, 1], [], []>} : vector<112x256xbf16>, vector<256x256xbf16>, vector<112x256xf32> -> vector<112x256xf32>
    %48 = arith.addf %44, %47 : vector<112x256xf32>
    %c2_46 = arith.constant 2 : index
    %c1_47 = arith.constant 1 : index
    %c0_48 = arith.constant 0 : index
    %c0_49 = arith.constant 0 : index
    %49 = vector.load %arg3[%c2_46, %c1_47, %c0_48, %c0_49] : memref<3x2x256x256xbf16, #tpu.memory_space<vmem>>, vector<1x1x256x256xbf16>
    %50 = vector.shape_cast %49 : vector<1x1x256x256xbf16> to vector<256x256xbf16>
    %cst_50 = arith.constant dense<0.000000e+00> : vector<112x256xf32>
    %51 = tpu.matmul %8, %50, %cst_50 {dimension_numbers = #tpu.dot_dimension_numbers<[1], [0], [0], [1], [0, 0, 1, 1], [], []>} : vector<112x256xbf16>, vector<256x256xbf16>, vector<112x256xf32> -> vector<112x256xf32>
    %52 = arith.addf %48, %51 : vector<112x256xf32>
    %53 = vector.broadcast %0 : vector<1x256xf32> to vector<112x256xf32>
    %54 = arith.addf %52, %53 : vector<112x256xf32>
    %cst_51 = arith.constant 0.000000e+00 : f32
    %55 = vector.broadcast %cst_51 : f32 to vector<112x256xf32>
    %56 = arith.maximumf %54, %55 : vector<112x256xf32>
    %57 = arith.maximumf %41, %56 : vector<112x256xf32>
    %c0_52 = arith.constant 0 : index
    %c1_53 = arith.constant 1 : index
    %c0_54 = arith.constant 0 : index
    %c0_55 = arith.constant 0 : index
    %58 = vector.load %arg3[%c0_52, %c1_53, %c0_54, %c0_55] : memref<3x2x256x256xbf16, #tpu.memory_space<vmem>>, vector<1x1x256x256xbf16>
    %59 = vector.shape_cast %58 : vector<1x1x256x256xbf16> to vector<256x256xbf16>
    %cst_56 = arith.constant dense<0.000000e+00> : vector<112x256xf32>
    %60 = tpu.matmul %6, %59, %cst_56 {dimension_numbers = #tpu.dot_dimension_numbers<[1], [0], [0], [1], [0, 0, 1, 1], [], []>} : vector<112x256xbf16>, vector<256x256xbf16>, vector<112x256xf32> -> vector<112x256xf32>
    %c1_57 = arith.constant 1 : index
    %c1_58 = arith.constant 1 : index
    %c0_59 = arith.constant 0 : index
    %c0_60 = arith.constant 0 : index
    %61 = vector.load %arg3[%c1_57, %c1_58, %c0_59, %c0_60] : memref<3x2x256x256xbf16, #tpu.memory_space<vmem>>, vector<1x1x256x256xbf16>
    %62 = vector.shape_cast %61 : vector<1x1x256x256xbf16> to vector<256x256xbf16>
    %cst_61 = arith.constant dense<0.000000e+00> : vector<112x256xf32>
    %63 = tpu.matmul %8, %62, %cst_61 {dimension_numbers = #tpu.dot_dimension_numbers<[1], [0], [0], [1], [0, 0, 1, 1], [], []>} : vector<112x256xbf16>, vector<256x256xbf16>, vector<112x256xf32> -> vector<112x256xf32>
    %64 = arith.addf %60, %63 : vector<112x256xf32>
    %c2_62 = arith.constant 2 : index
    %c1_63 = arith.constant 1 : index
    %c0_64 = arith.constant 0 : index
    %c0_65 = arith.constant 0 : index
    %65 = vector.load %arg3[%c2_62, %c1_63, %c0_64, %c0_65] : memref<3x2x256x256xbf16, #tpu.memory_space<vmem>>, vector<1x1x256x256xbf16>
    %66 = vector.shape_cast %65 : vector<1x1x256x256xbf16> to vector<256x256xbf16>
    %cst_66 = arith.constant dense<0.000000e+00> : vector<112x256xf32>
    %67 = tpu.matmul %10, %66, %cst_66 {dimension_numbers = #tpu.dot_dimension_numbers<[1], [0], [0], [1], [0, 0, 1, 1], [], []>} : vector<112x256xbf16>, vector<256x256xbf16>, vector<112x256xf32> -> vector<112x256xf32>
    %68 = arith.addf %64, %67 : vector<112x256xf32>
    %69 = vector.broadcast %0 : vector<1x256xf32> to vector<112x256xf32>
    %70 = arith.addf %68, %69 : vector<112x256xf32>
    %cst_67 = arith.constant 0.000000e+00 : f32
    %71 = vector.broadcast %cst_67 : f32 to vector<112x256xf32>
    %72 = arith.maximumf %70, %71 : vector<112x256xf32>
    %73 = arith.maximumf %57, %72 : vector<112x256xf32>
    %74 = vector.shape_cast %73 : vector<112x256xf32> to vector<7x16x256xf32>
    %75 = arith.truncf %74 : vector<7x16x256xf32> to vector<7x16x256xbf16>
    %c0_68 = arith.constant 0 : index
    %c0_69 = arith.constant 0 : index
    %c0_70 = arith.constant 0 : index
    %76 = vector.load %arg5[%c0_68, %c0_69, %c0_70] : memref<7x16x256xbf16, #tpu.memory_space<vmem>>, vector<7x16x256xbf16>
    tpu.vector_store %arg5[%c0_68, %c0_69, %c0_70], %75 {strides = array<i32>} : memref<7x16x256xbf16, #tpu.memory_space<vmem>>, vector<7x16x256xbf16>,
    return
  }
  func.func @transform_0(%arg0: i32) -> (i32, i32, i32) {
    %c0_i32 = arith.constant 0 : i32
    %c0_i32_0 = arith.constant 0 : i32
    %c0_i32_1 = arith.constant 0 : i32
    return %c0_i32, %arg0, %c0_i32_0 : i32, i32, i32
  }
  func.func @transform_1(%arg0: i32) -> (i32, i32, i32) {
    %c0_i32 = arith.constant 0 : i32
    %c0_i32_0 = arith.constant 0 : i32
    %c0_i32_1 = arith.constant 0 : i32
    return %c0_i32, %arg0, %c0_i32_0 : i32, i32, i32
  }
  func.func @transform_2(%arg0: i32) -> (i32, i32, i32, i32) {
    %c0_i32 = arith.constant 0 : i32
    %c0_i32_0 = arith.constant 0 : i32
    %c0_i32_1 = arith.constant 0 : i32
    %c0_i32_2 = arith.constant 0 : i32
    %c0_i32_3 = arith.constant 0 : i32
    return %c0_i32, %c0_i32_0, %c0_i32_1, %c0_i32_2 : i32, i32, i32, i32
  }
  func.func @transform_3(%arg0: i32) -> (i32, i32) {
    %c0_i32 = arith.constant 0 : i32
    %c0_i32_0 = arith.constant 0 : i32
    %c0_i32_1 = arith.constant 0 : i32
    return %c0_i32, %c0_i32_0 : i32, i32
  }
  func.func @transform_4(%arg0: i32) -> (i32, i32, i32) {
    %c0_i32 = arith.constant 0 : i32
    %c0_i32_0 = arith.constant 0 : i32
    %c0_i32_1 = arith.constant 0 : i32
    return %c0_i32, %arg0, %c0_i32_0 : i32, i32, i32
  }
}

module attributes {stable_mosaic.version = 11 : i64} {
  func.func @_conv3_kernel(%arg0: i32, %arg1: memref<9x16x256xbf16, #tpu.memory_space<vmem>>, %arg2: memref<3x256x512xbf16, #tpu.memory_space<vmem>>, %arg3: memref<1x512xf32, #tpu.memory_space<vmem>>, %arg4: memref<7x16x512xbf16, #tpu.memory_space<vmem>>) attributes {dimension_semantics = [#tpu.dimension_semantics<parallel>], iteration_bounds = array<i64: 1>, scalar_prefetch = 0 : i64, scratch_operands = 0 : i64, tpu.core_type = #tpu.core_type<tc>, window_params = [{transform_indices = @transform_0, window_bounds = array<i64: 9, 16, 256>}, {pipeline_mode = #tpu.pipeline_mode<synchronous>, transform_indices = @transform_1, window_bounds = array<i64: 3, 256, 512>}, {pipeline_mode = #tpu.pipeline_mode<synchronous>, transform_indices = @transform_2, window_bounds = array<i64: 1, 512>}, {transform_indices = @transform_3, window_bounds = array<i64: 7, 16, 512>}]} {
    %c0 = arith.constant 0 : index
    %c0_0 = arith.constant 0 : index
    %0 = vector.load %arg3[%c0, %c0_0] : memref<1x512xf32, #tpu.memory_space<vmem>>, vector<1x512xf32>
    %c0_1 = arith.constant 0 : index
    %c0_2 = arith.constant 0 : index
    %c0_3 = arith.constant 0 : index
    %1 = vector.load %arg1[%c0_1, %c0_2, %c0_3] : memref<9x16x256xbf16, #tpu.memory_space<vmem>>, vector<9x16x256xbf16>
    %2 = vector.extract_strided_slice %1 {offsets = [0, 0, 0], sizes = [7, 16, 256], strides = [1, 1, 1]} : vector<9x16x256xbf16> to vector<7x16x256xbf16>
    %3 = vector.shape_cast %2 : vector<7x16x256xbf16> to vector<112x256xbf16>
    %c0_4 = arith.constant 0 : index
    %c0_5 = arith.constant 0 : index
    %c0_6 = arith.constant 0 : index
    %4 = vector.load %arg2[%c0_4, %c0_5, %c0_6] : memref<3x256x512xbf16, #tpu.memory_space<vmem>>, vector<1x256x512xbf16>
    %5 = vector.shape_cast %4 : vector<1x256x512xbf16> to vector<256x512xbf16>
    %cst = arith.constant dense<0.000000e+00> : vector<112x512xf32>
    %6 = tpu.matmul %3, %5, %cst {dimension_numbers = #tpu.dot_dimension_numbers<[1], [0], [0], [1], [0, 0, 1, 1], [], []>} : vector<112x256xbf16>, vector<256x512xbf16>, vector<112x512xf32> -> vector<112x512xf32>
    %7 = vector.extract_strided_slice %1 {offsets = [1, 0, 0], sizes = [7, 16, 256], strides = [1, 1, 1]} : vector<9x16x256xbf16> to vector<7x16x256xbf16>
    %8 = vector.shape_cast %7 : vector<7x16x256xbf16> to vector<112x256xbf16>
    %c1 = arith.constant 1 : index
    %c0_7 = arith.constant 0 : index
    %c0_8 = arith.constant 0 : index
    %9 = vector.load %arg2[%c1, %c0_7, %c0_8] : memref<3x256x512xbf16, #tpu.memory_space<vmem>>, vector<1x256x512xbf16>
    %10 = vector.shape_cast %9 : vector<1x256x512xbf16> to vector<256x512xbf16>
    %cst_9 = arith.constant dense<0.000000e+00> : vector<112x512xf32>
    %11 = tpu.matmul %8, %10, %cst_9 {dimension_numbers = #tpu.dot_dimension_numbers<[1], [0], [0], [1], [0, 0, 1, 1], [], []>} : vector<112x256xbf16>, vector<256x512xbf16>, vector<112x512xf32> -> vector<112x512xf32>
    %12 = arith.addf %6, %11 : vector<112x512xf32>
    %13 = vector.extract_strided_slice %1 {offsets = [2, 0, 0], sizes = [7, 16, 256], strides = [1, 1, 1]} : vector<9x16x256xbf16> to vector<7x16x256xbf16>
    %14 = vector.shape_cast %13 : vector<7x16x256xbf16> to vector<112x256xbf16>
    %c2 = arith.constant 2 : index
    %c0_10 = arith.constant 0 : index
    %c0_11 = arith.constant 0 : index
    %15 = vector.load %arg2[%c2, %c0_10, %c0_11] : memref<3x256x512xbf16, #tpu.memory_space<vmem>>, vector<1x256x512xbf16>
    %16 = vector.shape_cast %15 : vector<1x256x512xbf16> to vector<256x512xbf16>
    %cst_12 = arith.constant dense<0.000000e+00> : vector<112x512xf32>
    %17 = tpu.matmul %14, %16, %cst_12 {dimension_numbers = #tpu.dot_dimension_numbers<[1], [0], [0], [1], [0, 0, 1, 1], [], []>} : vector<112x256xbf16>, vector<256x512xbf16>, vector<112x512xf32> -> vector<112x512xf32>
    %18 = arith.addf %12, %17 : vector<112x512xf32>
    %19 = vector.broadcast %0 : vector<1x512xf32> to vector<112x512xf32>
    %20 = arith.addf %18, %19 : vector<112x512xf32>
    %cst_13 = arith.constant 0.000000e+00 : f32
    %21 = vector.broadcast %cst_13 : f32 to vector<112x512xf32>
    %22 = arith.maximumf %20, %21 : vector<112x512xf32>
    %23 = vector.shape_cast %22 : vector<112x512xf32> to vector<7x16x512xf32>
    %24 = arith.truncf %23 : vector<7x16x512xf32> to vector<7x16x512xbf16>
    %c0_14 = arith.constant 0 : index
    %c0_15 = arith.constant 0 : index
    %c0_16 = arith.constant 0 : index
    %25 = vector.load %arg4[%c0_14, %c0_15, %c0_16] : memref<7x16x512xbf16, #tpu.memory_space<vmem>>, vector<7x16x512xbf16>
    tpu.vector_store %arg4[%c0_14, %c0_15, %c0_16], %24 {strides = array<i32>} : memref<7x16x512xbf16, #tpu.memory_space<vmem>>, vector<7x16x512xbf16>,
    return
  }
  func.func @transform_0(%arg0: i32) -> (i32, i32, i32) {
    %c0_i32 = arith.constant 0 : i32
    %c0_i32_0 = arith.constant 0 : i32
    %c0_i32_1 = arith.constant 0 : i32
    return %c0_i32, %arg0, %c0_i32_0 : i32, i32, i32
  }
  func.func @transform_1(%arg0: i32) -> (i32, i32, i32) {
    %c0_i32 = arith.constant 0 : i32
    %c0_i32_0 = arith.constant 0 : i32
    %c0_i32_1 = arith.constant 0 : i32
    %c0_i32_2 = arith.constant 0 : i32
    return %c0_i32, %c0_i32_0, %c0_i32_1 : i32, i32, i32
  }
  func.func @transform_2(%arg0: i32) -> (i32, i32) {
    %c0_i32 = arith.constant 0 : i32
    %c0_i32_0 = arith.constant 0 : i32
    %c0_i32_1 = arith.constant 0 : i32
    return %c0_i32, %c0_i32_0 : i32, i32
  }
  func.func @transform_3(%arg0: i32) -> (i32, i32, i32) {
    %c0_i32 = arith.constant 0 : i32
    %c0_i32_0 = arith.constant 0 : i32
    %c0_i32_1 = arith.constant 0 : i32
    return %c0_i32, %arg0, %c0_i32_0 : i32, i32, i32
  }
}

module attributes {stable_mosaic.version = 11 : i64} {
  func.func @_fc_head_kernel(%arg0: i32, %arg1: memref<7x16x512xbf16, #tpu.memory_space<vmem>>, %arg2: memref<7x512x128xbf16, #tpu.memory_space<vmem>>, %arg3: memref<1x128xf32, #tpu.memory_space<vmem>>, %arg4: memref<128x128xbf16, #tpu.memory_space<vmem>>, %arg5: memref<1x128xf32, #tpu.memory_space<vmem>>, %arg6: memref<16x128xf32, #tpu.memory_space<vmem>>) attributes {dimension_semantics = [#tpu.dimension_semantics<parallel>], iteration_bounds = array<i64: 1>, scalar_prefetch = 0 : i64, scratch_operands = 0 : i64, tpu.core_type = #tpu.core_type<tc>, window_params = [{transform_indices = @transform_0, window_bounds = array<i64: 7, 16, 512>}, {pipeline_mode = #tpu.pipeline_mode<synchronous>, transform_indices = @transform_1, window_bounds = array<i64: 7, 512, 128>}, {pipeline_mode = #tpu.pipeline_mode<synchronous>, transform_indices = @transform_2, window_bounds = array<i64: 1, 128>}, {pipeline_mode = #tpu.pipeline_mode<synchronous>, transform_indices = @transform_3, window_bounds = array<i64: 128, 128>}, {pipeline_mode = #tpu.pipeline_mode<synchronous>, transform_indices = @transform_4, window_bounds = array<i64: 1, 128>}, {transform_indices = @transform_5, window_bounds = array<i64: 16, 128>}]} {
    %c0 = arith.constant 0 : index
    %c0_0 = arith.constant 0 : index
    %c0_1 = arith.constant 0 : index
    %0 = vector.load %arg1[%c0, %c0_0, %c0_1] : memref<7x16x512xbf16, #tpu.memory_space<vmem>>, vector<1x16x512xbf16>
    %1 = vector.shape_cast %0 : vector<1x16x512xbf16> to vector<16x512xbf16>
    %c0_2 = arith.constant 0 : index
    %c0_3 = arith.constant 0 : index
    %c0_4 = arith.constant 0 : index
    %2 = vector.load %arg2[%c0_2, %c0_3, %c0_4] : memref<7x512x128xbf16, #tpu.memory_space<vmem>>, vector<1x512x128xbf16>
    %3 = vector.shape_cast %2 : vector<1x512x128xbf16> to vector<512x128xbf16>
    %cst = arith.constant dense<0.000000e+00> : vector<16x128xf32>
    %4 = tpu.matmul %1, %3, %cst {dimension_numbers = #tpu.dot_dimension_numbers<[1], [0], [0], [1], [0, 0, 1, 1], [], []>} : vector<16x512xbf16>, vector<512x128xbf16>, vector<16x128xf32> -> vector<16x128xf32>
    %c1 = arith.constant 1 : index
    %c0_5 = arith.constant 0 : index
    %c0_6 = arith.constant 0 : index
    %5 = vector.load %arg1[%c1, %c0_5, %c0_6] : memref<7x16x512xbf16, #tpu.memory_space<vmem>>, vector<1x16x512xbf16>
    %6 = vector.shape_cast %5 : vector<1x16x512xbf16> to vector<16x512xbf16>
    %c1_7 = arith.constant 1 : index
    %c0_8 = arith.constant 0 : index
    %c0_9 = arith.constant 0 : index
    %7 = vector.load %arg2[%c1_7, %c0_8, %c0_9] : memref<7x512x128xbf16, #tpu.memory_space<vmem>>, vector<1x512x128xbf16>
    %8 = vector.shape_cast %7 : vector<1x512x128xbf16> to vector<512x128xbf16>
    %cst_10 = arith.constant dense<0.000000e+00> : vector<16x128xf32>
    %9 = tpu.matmul %6, %8, %cst_10 {dimension_numbers = #tpu.dot_dimension_numbers<[1], [0], [0], [1], [0, 0, 1, 1], [], []>} : vector<16x512xbf16>, vector<512x128xbf16>, vector<16x128xf32> -> vector<16x128xf32>
    %10 = arith.addf %4, %9 : vector<16x128xf32>
    %c2 = arith.constant 2 : index
    %c0_11 = arith.constant 0 : index
    %c0_12 = arith.constant 0 : index
    %11 = vector.load %arg1[%c2, %c0_11, %c0_12] : memref<7x16x512xbf16, #tpu.memory_space<vmem>>, vector<1x16x512xbf16>
    %12 = vector.shape_cast %11 : vector<1x16x512xbf16> to vector<16x512xbf16>
    %c2_13 = arith.constant 2 : index
    %c0_14 = arith.constant 0 : index
    %c0_15 = arith.constant 0 : index
    %13 = vector.load %arg2[%c2_13, %c0_14, %c0_15] : memref<7x512x128xbf16, #tpu.memory_space<vmem>>, vector<1x512x128xbf16>
    %14 = vector.shape_cast %13 : vector<1x512x128xbf16> to vector<512x128xbf16>
    %cst_16 = arith.constant dense<0.000000e+00> : vector<16x128xf32>
    %15 = tpu.matmul %12, %14, %cst_16 {dimension_numbers = #tpu.dot_dimension_numbers<[1], [0], [0], [1], [0, 0, 1, 1], [], []>} : vector<16x512xbf16>, vector<512x128xbf16>, vector<16x128xf32> -> vector<16x128xf32>
    %16 = arith.addf %10, %15 : vector<16x128xf32>
    %c3 = arith.constant 3 : index
    %c0_17 = arith.constant 0 : index
    %c0_18 = arith.constant 0 : index
    %17 = vector.load %arg1[%c3, %c0_17, %c0_18] : memref<7x16x512xbf16, #tpu.memory_space<vmem>>, vector<1x16x512xbf16>
    %18 = vector.shape_cast %17 : vector<1x16x512xbf16> to vector<16x512xbf16>
    %c3_19 = arith.constant 3 : index
    %c0_20 = arith.constant 0 : index
    %c0_21 = arith.constant 0 : index
    %19 = vector.load %arg2[%c3_19, %c0_20, %c0_21] : memref<7x512x128xbf16, #tpu.memory_space<vmem>>, vector<1x512x128xbf16>
    %20 = vector.shape_cast %19 : vector<1x512x128xbf16> to vector<512x128xbf16>
    %cst_22 = arith.constant dense<0.000000e+00> : vector<16x128xf32>
    %21 = tpu.matmul %18, %20, %cst_22 {dimension_numbers = #tpu.dot_dimension_numbers<[1], [0], [0], [1], [0, 0, 1, 1], [], []>} : vector<16x512xbf16>, vector<512x128xbf16>, vector<16x128xf32> -> vector<16x128xf32>
    %22 = arith.addf %16, %21 : vector<16x128xf32>
    %c4 = arith.constant 4 : index
    %c0_23 = arith.constant 0 : index
    %c0_24 = arith.constant 0 : index
    %23 = vector.load %arg1[%c4, %c0_23, %c0_24] : memref<7x16x512xbf16, #tpu.memory_space<vmem>>, vector<1x16x512xbf16>
    %24 = vector.shape_cast %23 : vector<1x16x512xbf16> to vector<16x512xbf16>
    %c4_25 = arith.constant 4 : index
    %c0_26 = arith.constant 0 : index
    %c0_27 = arith.constant 0 : index
    %25 = vector.load %arg2[%c4_25, %c0_26, %c0_27] : memref<7x512x128xbf16, #tpu.memory_space<vmem>>, vector<1x512x128xbf16>
    %26 = vector.shape_cast %25 : vector<1x512x128xbf16> to vector<512x128xbf16>
    %cst_28 = arith.constant dense<0.000000e+00> : vector<16x128xf32>
    %27 = tpu.matmul %24, %26, %cst_28 {dimension_numbers = #tpu.dot_dimension_numbers<[1], [0], [0], [1], [0, 0, 1, 1], [], []>} : vector<16x512xbf16>, vector<512x128xbf16>, vector<16x128xf32> -> vector<16x128xf32>
    %28 = arith.addf %22, %27 : vector<16x128xf32>
    %c5 = arith.constant 5 : index
    %c0_29 = arith.constant 0 : index
    %c0_30 = arith.constant 0 : index
    %29 = vector.load %arg1[%c5, %c0_29, %c0_30] : memref<7x16x512xbf16, #tpu.memory_space<vmem>>, vector<1x16x512xbf16>
    %30 = vector.shape_cast %29 : vector<1x16x512xbf16> to vector<16x512xbf16>
    %c5_31 = arith.constant 5 : index
    %c0_32 = arith.constant 0 : index
    %c0_33 = arith.constant 0 : index
    %31 = vector.load %arg2[%c5_31, %c0_32, %c0_33] : memref<7x512x128xbf16, #tpu.memory_space<vmem>>, vector<1x512x128xbf16>
    %32 = vector.shape_cast %31 : vector<1x512x128xbf16> to vector<512x128xbf16>
    %cst_34 = arith.constant dense<0.000000e+00> : vector<16x128xf32>
    %33 = tpu.matmul %30, %32, %cst_34 {dimension_numbers = #tpu.dot_dimension_numbers<[1], [0], [0], [1], [0, 0, 1, 1], [], []>} : vector<16x512xbf16>, vector<512x128xbf16>, vector<16x128xf32> -> vector<16x128xf32>
    %34 = arith.addf %28, %33 : vector<16x128xf32>
    %c6 = arith.constant 6 : index
    %c0_35 = arith.constant 0 : index
    %c0_36 = arith.constant 0 : index
    %35 = vector.load %arg1[%c6, %c0_35, %c0_36] : memref<7x16x512xbf16, #tpu.memory_space<vmem>>, vector<1x16x512xbf16>
    %36 = vector.shape_cast %35 : vector<1x16x512xbf16> to vector<16x512xbf16>
    %c6_37 = arith.constant 6 : index
    %c0_38 = arith.constant 0 : index
    %c0_39 = arith.constant 0 : index
    %37 = vector.load %arg2[%c6_37, %c0_38, %c0_39] : memref<7x512x128xbf16, #tpu.memory_space<vmem>>, vector<1x512x128xbf16>
    %38 = vector.shape_cast %37 : vector<1x512x128xbf16> to vector<512x128xbf16>
    %cst_40 = arith.constant dense<0.000000e+00> : vector<16x128xf32>
    %39 = tpu.matmul %36, %38, %cst_40 {dimension_numbers = #tpu.dot_dimension_numbers<[1], [0], [0], [1], [0, 0, 1, 1], [], []>} : vector<16x512xbf16>, vector<512x128xbf16>, vector<16x128xf32> -> vector<16x128xf32>
    %40 = arith.addf %34, %39 : vector<16x128xf32>
    %c0_41 = arith.constant 0 : index
    %c0_42 = arith.constant 0 : index
    %41 = vector.load %arg3[%c0_41, %c0_42] : memref<1x128xf32, #tpu.memory_space<vmem>>, vector<1x128xf32>
    %42 = vector.broadcast %41 : vector<1x128xf32> to vector<16x128xf32>
    %43 = arith.addf %40, %42 : vector<16x128xf32>
    %cst_43 = arith.constant 0.000000e+00 : f32
    %44 = vector.broadcast %cst_43 : f32 to vector<16x128xf32>
    %45 = arith.maximumf %43, %44 : vector<16x128xf32>
    %46 = arith.truncf %45 : vector<16x128xf32> to vector<16x128xbf16>
    %c0_44 = arith.constant 0 : index
    %c0_45 = arith.constant 0 : index
    %47 = vector.load %arg4[%c0_44, %c0_45] : memref<128x128xbf16, #tpu.memory_space<vmem>>, vector<128x128xbf16>
    %cst_46 = arith.constant dense<0.000000e+00> : vector<16x128xf32>
    %48 = tpu.matmul %46, %47, %cst_46 {dimension_numbers = #tpu.dot_dimension_numbers<[1], [0], [0], [1], [0, 0, 1, 1], [], []>} : vector<16x128xbf16>, vector<128x128xbf16>, vector<16x128xf32> -> vector<16x128xf32>
    %c0_47 = arith.constant 0 : index
    %c0_48 = arith.constant 0 : index
    %49 = vector.load %arg5[%c0_47, %c0_48] : memref<1x128xf32, #tpu.memory_space<vmem>>, vector<1x128xf32>
    %50 = vector.broadcast %49 : vector<1x128xf32> to vector<16x128xf32>
    %51 = arith.addf %48, %50 : vector<16x128xf32>
    %c0_49 = arith.constant 0 : index
    %c0_50 = arith.constant 0 : index
    %52 = vector.load %arg6[%c0_49, %c0_50] : memref<16x128xf32, #tpu.memory_space<vmem>>, vector<16x128xf32>
    tpu.vector_store %arg6[%c0_49, %c0_50], %51 {strides = array<i32>} : memref<16x128xf32, #tpu.memory_space<vmem>>, vector<16x128xf32>,
    return
  }
  func.func @transform_0(%arg0: i32) -> (i32, i32, i32) {
    %c0_i32 = arith.constant 0 : i32
    %c0_i32_0 = arith.constant 0 : i32
    %c0_i32_1 = arith.constant 0 : i32
    return %c0_i32, %arg0, %c0_i32_0 : i32, i32, i32
  }
  func.func @transform_1(%arg0: i32) -> (i32, i32, i32) {
    %c0_i32 = arith.constant 0 : i32
    %c0_i32_0 = arith.constant 0 : i32
    %c0_i32_1 = arith.constant 0 : i32
    %c0_i32_2 = arith.constant 0 : i32
    return %c0_i32, %c0_i32_0, %c0_i32_1 : i32, i32, i32
  }
  func.func @transform_2(%arg0: i32) -> (i32, i32) {
    %c0_i32 = arith.constant 0 : i32
    %c0_i32_0 = arith.constant 0 : i32
    %c0_i32_1 = arith.constant 0 : i32
    return %c0_i32, %c0_i32_0 : i32, i32
  }
  func.func @transform_3(%arg0: i32) -> (i32, i32) {
    %c0_i32 = arith.constant 0 : i32
    %c0_i32_0 = arith.constant 0 : i32
    %c0_i32_1 = arith.constant 0 : i32
    return %c0_i32, %c0_i32_0 : i32, i32
  }
  func.func @transform_4(%arg0: i32) -> (i32, i32) {
    %c0_i32 = arith.constant 0 : i32
    %c0_i32_0 = arith.constant 0 : i32
    %c0_i32_1 = arith.constant 0 : i32
    return %c0_i32, %c0_i32_0 : i32, i32
  }
  func.func @transform_5(%arg0: i32) -> (i32, i32) {
    %c0_i32 = arith.constant 0 : i32
    %c0_i32_0 = arith.constant 0 : i32
    return %arg0, %c0_i32 : i32, i32
  }
}

</mosaic_0001>

<bundles_post_ra>
// kernel: net_forward.4
= control target key start
LH: loop header
LB: loop body
LE: loop exit
PB: predicated region body
PF: predicated region fallthrough
CT: control target
= control target key end

     0   :  { %9 = vsyncpa [#allocation3], 0  ;;  %s4512_s15 = smov [#allocation2]   ;;  %s5875_s0 = inlined_call_operand.vmem [shape: bf16[15,16,28], index: 0, kind: input, shape index: {}]   ;;  %s5876_s1 = inlined_call_operand.vmem [shape: bf16[15,16,28], index: 1, kind: input, shape index: {}]   ;;  %s5877_s2 = inlined_call_operand.vmem [shape: bf16[3,2,28,256], index: 2, kind: input, shape index: {}]   ;;  %s5878_s3 = inlined_call_operand.hbm [shape: f32[1,256], index: 3, kind: input, shape index: {}]   ;;  %s5879_s4 = inlined_call_operand.vmem [shape: bf16[14,16,256], index: 4, kind: output, shape index: {}]  }
   0x1   :  { %s22_s16 = sshll.u32 %s4512_s15, 4  ;;  %s4488_s19 = scalar_lea.hbm %s5878_s3, 32  ;;  %s23_s16 = int_to_ptr.vmem [resolvable:$true] %s22_s16 }
   0x2   :  { %p4489_p0 = scmp.ne.s32.totalorder %s5878_s3, %s4488_s19  ;;  %p4492_p1 = scmp.lt.u32.totalorder %s4488_s19, %s5878_s3 }
   0x4   :  { %p4494_p2 = pnand %p4492_p1, %p4489_p0 }
   0x6   :  { %4497 = shalt.err (!%p4494_p2)
}
   0x7   :  { %s4498_s24 = scalar_lea.vmem %s23_s16, 32  ;;  %p4503_p4 = scmp.lt.s32.totalorder %s23_s16, %s23_s16 }
   0x8   :  { %p4499_p3 = scmp.ne.s32.totalorder %s23_s16, %s4498_s24  ;;  %p4504_p5 = scmp.lt.s32.totalorder %s4498_s24, %s4498_s24 }
   0xa   :  { %p4505_p6 = por %p4504_p5, %p4503_p4 }
   0xc   :  { %p4506_p7 = pnand %p4505_p6, %p4499_p3 }
   0xe   :  { %4509 = shalt.err (!%p4506_p7)
}
   0xf   :  { %25 = dma.hbm_to_vmem [thread:$0]  %s5878_s3, 32, %s23_s16, [#allocation3]  }
  0x10   :  { %4510 = dma.done.wait [#allocation3], 32  }
  0x11   :  { %4511 = vsyncadd [#allocation3], 4294967264  ;;  %v5880_v0 = vmov 0   ;;  %v4394_v1 = vld [vmem:[%s5877_s2 + $0x44] ss:$8 sps:$4 sm:$0xff]   ;;  %vm231_vm0 = vcmask 1045504   ;;  %v987_v57 = vlaneseq }
  0x12   :  { %270 = vmatprep.mubr.bf16.mxu0 %v5880_v0  ;;  %1141 = vmatprep.mubr.bf16.mxu1 %v5880_v0  ;;  %v4396_v2 = vld [vmem:[%s5877_s2 + $0x40] ss:$8 sps:$4 sm:$0xff]   ;;  %v4397_v3 = vld [vmem:[%s5877_s2 + $0x54] ss:$8 sps:$4 sm:$0x3f]   ;;  %vm188_vm1 = vcmask 228352  }
  0x13   :  { %238 = vmatprep.subr.bf16.mxu0 %v4394_v1  ;;  %1109 = vmatprep.subr.bf16.mxu1 %v4394_v1  ;;  %v4399_v4 = vld [vmem:[%s5877_s2 + $0x50] ss:$8 sps:$4 sm:$0x3f]   ;;  %v4571_v6 = vld [vmem:[%s5876_s1] sm:$0xff]   ;;  %v4579_v8 = vld [vmem:[%s5875_s0 + $0x8] sm:$0xff]   ;;  %v988_v58 = vshrl.u32 %v987_v57, 7 }
  0x14   :  { %239 = vmatpush1.bf16.msra.mxu0 %v4396_v2  ;;  %1110 = vmatpush1.bf16.msra.mxu1 %v4396_v2  ;;  %v233_v5 = vsel %vm231_vm0, %v4399_v4, 0  ;;  %v4403_v7 = vld [vmem:[%s5877_s2 + $0x4] ss:$8 sps:$4 sm:$0xff]   ;;  %v4401_v9 = vld [vmem:[%s5877_s2] ss:$8 sps:$4 sm:$0xff]   ;;  %v4598_v11 = vld [vmem:[%s5875_s0 + $0x10] sm:$0xff]  }
  0x15   :  { %3656 = vmatprep.subr.msk.bf16.mxu0 %vm231_vm0, %v4397_v3  ;;  %3728 = vmatprep.subr.msk.bf16.mxu1 %vm231_vm0, %v4397_v3  ;;  %v4593_v10 = vld [vmem:[%s5876_s1 + $0x8] sm:$0xff]   ;;  %v4609_v12 = vld [vmem:[%s5876_s1 + $0x10] sm:$0xff]   ;;  %v4617_v14 = vld [vmem:[%s5875_s0 + $0x18] sm:$0xff]   ;;  %v989_v59 = vsub.s32 0, %v988_v58  ;;  %v993_v61 = vsub.s32 1, %v988_v58 }
  0x16   :  { %v4418_v13 = vld [vmem:[%s5877_s2 + $0x14] ss:$8 sps:$4 sm:$0x3f]   ;;  %v4421_v15 = vld [vmem:[%s5877_s2 + $0x10] ss:$8 sps:$4 sm:$0x3f]  }
  0x17   :  { %v542_v16 = vsel %vm231_vm0, %v4421_v15, 0  ;;  %v4634_v17 = vld [vmem:[%s5876_s1 + $0x18] sm:$0xff]   ;;  %v4639_v18 = vld [vmem:[%s5875_s0 + $0x20] sm:$0xff]   ;;  %v4658_v21 = vld [vmem:[%s5875_s0 + $0x28] sm:$0xff]  }
  0x18   :  { %241 = vmatpush1.bf16.msra.mxu0 %v233_v5  ;;  %1112 = vmatpush1.bf16.msra.mxu1 %v233_v5  ;;  %v4437_v19 = vld [vmem:[%s5877_s2 + $0x84] ss:$8 sps:$4 sm:$0xff]   ;;  %v4674_v23 = vld [vmem:[%s5875_s0 + $0x30] sm:$0xff]   ;;  %v4690_v25 = vld [vmem:[%s5875_s0 + $0x38] sm:$0xff]  }
  0x19   :  { %547 = vmatprep.subr.bf16.mxu0 %v4403_v7  ;;  %1282 = vmatprep.subr.bf16.mxu1 %v4403_v7  ;;  %v4653_v20 = vld [vmem:[%s5876_s1 + $0x20] sm:$0xff]   ;;  %v4669_v22 = vld [vmem:[%s5876_s1 + $0x28] sm:$0xff]   ;;  %v4685_v24 = vld [vmem:[%s5876_s1 + $0x30] sm:$0xff]  }
  0x1a   :  { %v4701_v26 = vld [vmem:[%s5876_s1 + $0x38] sm:$0xff]   ;;  %v4706_v27 = vld [vmem:[%s5875_s0 + $0x40] sm:$0xff]   ;;  %v4722_v29 = vld [vmem:[%s5875_s0 + $0x48] sm:$0xff]  }
  0x1b   :  { %3657 = vmatmul.mubr.msk.bf16.vlgmr.msra.gmra.mrb[0].mxu0 %vm188_vm1, %v4571_v6  ;;  %3729 = vmatmul.mubr.msk.bf16.vlgmr.msra.gmra.mrb[0].mxu1 %vm188_vm1, %v4579_v8  ;;  %v4717_v28 = vld [vmem:[%s5876_s1 + $0x40] sm:$0xff]   ;;  %v4733_v30 = vld [vmem:[%s5876_s1 + $0x48] sm:$0xff]   ;;  %v4738_v31 = vld [vmem:[%s5875_s0 + $0x50] sm:$0xff]  }
  0x1c   :  { %548 = vmatpush1.bf16.msra.mxu0 %v4401_v9  ;;  %1283 = vmatpush1.bf16.msra.mxu1 %v4401_v9  ;;  %v4749_v32 = vld [vmem:[%s5876_s1 + $0x50] sm:$0xff]   ;;  %v4754_v33 = vld [vmem:[%s5875_s0 + $0x58] sm:$0xff]   ;;  %v4770_v35 = vld [vmem:[%s5875_s0 + $0x60] sm:$0xff]  }
  0x1d   :  { %280 = vmatprep.mubr.bf16.mxu0 %v5880_v0  ;;  %1151 = vmatprep.mubr.bf16.mxu1 %v5880_v0  ;;  %v4765_v34 = vld [vmem:[%s5876_s1 + $0x58] sm:$0xff]   ;;  %v4781_v36 = vld [vmem:[%s5876_s1 + $0x60] sm:$0xff]   ;;  %v4786_v37 = vld [vmem:[%s5875_s0 + $0x68] sm:$0xff]  }
  0x1e   :  { %3689 = vmatprep.subr.msk.bf16.mxu0 %vm231_vm0, %v4418_v13  ;;  %3743 = vmatprep.subr.msk.bf16.mxu1 %vm231_vm0, %v4418_v13  ;;  %v4797_v38 = vld [vmem:[%s5876_s1 + $0x68] sm:$0xff]   ;;  %v4802_v39 = vld [vmem:[%s5875_s0 + $0x70] sm:$0xff]   ;;  %v4813_v40 = vld [vmem:[%s5875_s0] sm:$0xff]  }
  0x1f   :  { %v4435_v41 = vld [vmem:[%s5877_s2 + $0x80] ss:$8 sps:$4 sm:$0xff]   ;;  %v4440_v42 = vld [vmem:[%s5877_s2 + $0x90] ss:$8 sps:$4 sm:$0x3f]  }
  0x20   :  { %550 = vmatpush1.bf16.msra.mxu0 %v542_v16  ;;  %1285 = vmatpush1.bf16.msra.mxu1 %v542_v16  ;;  %v4438_v43 = vld [vmem:[%s5877_s2 + $0x94] ss:$8 sps:$4 sm:$0x3f]   ;;  %v752_v44 = vsel %vm231_vm0, %v4440_v42, 0  ;;  %v4443_v45 = vld [vmem:[%s5877_s2 + $0x64] ss:$8 sps:$4 sm:$0xff]  }
  0x21   :  { %757 = vmatprep.subr.bf16.mxu0 %v4437_v19  ;;  %1463 = vmatprep.subr.bf16.mxu1 %v4437_v19  ;;  %v4441_v46 = vld [vmem:[%s5877_s2 + $0x60] ss:$8 sps:$4 sm:$0xff]   ;;  %v4446_v47 = vld [vmem:[%s5877_s2 + $0x70] ss:$8 sps:$4 sm:$0x3f]  }
  0x22   :  { %v4444_v48 = vld [vmem:[%s5877_s2 + $0x74] ss:$8 sps:$4 sm:$0x3f]   ;;  %v1889_v49 = vsel %vm231_vm0, %v4446_v47, 0  ;;  %v4450_v50 = vld [vmem:[%s5877_s2 + $0x24] ss:$8 sps:$4 sm:$0xff]  }
  0x23   :  { %3658 = vmatmul.mubr.msk.bf16.gmra.mrb[4].mxu0 %vm188_vm1, %v4593_v10  ;;  %3730 = vmatmul.mubr.msk.bf16.gmra.mrb[4].mxu1 %vm188_vm1, %v4598_v11  ;;  %v4447_v51 = vld [vmem:[%s5876_s1 + $0x70] sm:$0xff]   ;;  %v4448_v52 = vld [vmem:[%s5877_s2 + $0x20] ss:$8 sps:$4 sm:$0xff]   ;;  %v4456_v56 = vld [vmem:[%s5877_s2 + $0xa4] ss:$8 sps:$4 sm:$0xff]  }
  0x24   :  { %290 = vmatprep.mubr.bf16.mxu0 %v5880_v0  ;;  %1161 = vmatprep.mubr.bf16.mxu1 %v5880_v0  ;;  %v4453_v53 = vld [vmem:[%s5877_s2 + $0x30] ss:$8 sps:$4 sm:$0x3f]   ;;  %v4451_v54 = vld [vmem:[%s5877_s2 + $0x34] ss:$8 sps:$4 sm:$0x3f]  }
  0x25   :  { %v2086_v55 = vsel %vm231_vm0, %v4453_v53, 0  ;;  %v30_v60 = vld [vmem:[#allocation2] sm:$0x3] }
  0x26   :  { %v5106_v62 = vrot.slane %v30_v60, %v989_v59  ;;  %v5108_v63 = vrot.slane %v30_v60, %v993_v61 }
  0x2b   :  { %3659 = vmatmul.mubr.msk.bf16.gmra.mrb[8].mxu0 %vm188_vm1, %v4609_v12  ;;  %3731 = vmatmul.mubr.msk.bf16.gmra.mrb[8].mxu1 %vm188_vm1, %v4617_v14 }
  0x2c   :  { %300 = vmatprep.mubr.bf16.mxu0 %v5880_v0  ;;  %1171 = vmatprep.mubr.bf16.mxu1 %v5880_v0 }
  0x33   :  { %3660 = vmatmul.mubr.msk.bf16.gmra.mrb[12].mxu0 %vm188_vm1, %v4634_v17  ;;  %3732 = vmatmul.mubr.msk.bf16.gmra.mrb[12].mxu1 %vm188_vm1, %v4639_v18 }
  0x34   :  { %310 = vmatprep.mubr.bf16.mxu0 %v5880_v0  ;;  %1181 = vmatprep.mubr.bf16.mxu1 %v5880_v0 }
  0x3b   :  { %3661 = vmatmul.mubr.msk.bf16.gmra.mrb[16].mxu0 %vm188_vm1, %v4653_v20  ;;  %3733 = vmatmul.mubr.msk.bf16.gmra.mrb[16].mxu1 %vm188_vm1, %v4658_v21 }
  0x3c   :  { %320 = vmatprep.mubr.bf16.mxu0 %v5880_v0  ;;  %1191 = vmatprep.mubr.bf16.mxu1 %v5880_v0 }
  0x43   :  { %3662 = vmatmul.mubr.msk.bf16.gmra.mrb[20].mxu0 %vm188_vm1, %v4669_v22  ;;  %3734 = vmatmul.mubr.msk.bf16.gmra.mrb[20].mxu1 %vm188_vm1, %v4674_v23 }
  0x44   :  { %330 = vmatprep.mubr.bf16.mxu0 %v5880_v0  ;;  %1201 = vmatprep.mubr.bf16.mxu1 %v5880_v0 }
  0x4b   :  { %3663 = vmatmul.mubr.msk.bf16.gmra.mrb[24].mxu0 %vm188_vm1, %v4685_v24  ;;  %3735 = vmatmul.mubr.msk.bf16.gmra.mrb[24].mxu1 %vm188_vm1, %v4690_v25 }
  0x4c   :  { %340 = vmatprep.mubr.bf16.mxu0 %v5880_v0  ;;  %1211 = vmatprep.mubr.bf16.mxu1 %v5880_v0 }
  0x53   :  { %3664 = vmatmul.mubr.msk.bf16.gmra.mrb[28].mxu0 %vm188_vm1, %v4701_v26  ;;  %3736 = vmatmul.mubr.msk.bf16.gmra.mrb[28].mxu1 %vm188_vm1, %v4706_v27 }
  0x54   :  { %350 = vmatprep.mubr.bf16.mxu0 %v5880_v0  ;;  %1221 = vmatprep.mubr.bf16.mxu1 %v5880_v0 }
  0x5b   :  { %3665 = vmatmul.mubr.msk.bf16.gmra.mrb[32].mxu0 %vm188_vm1, %v4717_v28  ;;  %3737 = vmatmul.mubr.msk.bf16.gmra.mrb[32].mxu1 %vm188_vm1, %v4722_v29 }
  0x5c   :  { %360 = vmatprep.mubr.bf16.mxu0 %v5880_v0  ;;  %1231 = vmatprep.mubr.bf16.mxu1 %v5880_v0 }
  0x63   :  { %3666 = vmatmul.mubr.msk.bf16.gmra.mrb[36].mxu0 %vm188_vm1, %v4733_v30  ;;  %3738 = vmatmul.mubr.msk.bf16.gmra.mrb[36].mxu1 %vm188_vm1, %v4738_v31 }
  0x64   :  { %370 = vmatprep.mubr.bf16.mxu0 %v5880_v0  ;;  %1241 = vmatprep.mubr.bf16.mxu1 %v5880_v0 }
  0x6b   :  { %3667 = vmatmul.mubr.msk.bf16.gmra.mrb[40].mxu0 %vm188_vm1, %v4749_v32  ;;  %3739 = vmatmul.mubr.msk.bf16.gmra.mrb[40].mxu1 %vm188_vm1, %v4754_v33 }
  0x6c   :  { %380 = vmatprep.mubr.bf16.mxu0 %v5880_v0  ;;  %1251 = vmatprep.mubr.bf16.mxu1 %v5880_v0 }
  0x73   :  { %3668 = vmatmul.mubr.msk.bf16.gmra.mrb[44].mxu0 %vm188_vm1, %v4765_v34  ;;  %3740 = vmatmul.mubr.msk.bf16.gmra.mrb[44].mxu1 %vm188_vm1, %v4770_v35 }
  0x74   :  { %390 = vmatprep.mubr.bf16.mxu0 %v5880_v0  ;;  %1261 = vmatprep.mubr.bf16.mxu1 %v5880_v0 }
  0x7b   :  { %3669 = vmatmul.mubr.msk.bf16.gmra.mrb[48].mxu0 %vm188_vm1, %v4781_v36  ;;  %3741 = vmatmul.mubr.msk.bf16.gmra.mrb[48].mxu1 %vm188_vm1, %v4786_v37 }
  0x7c   :  { %400 = vmatprep.mubr.bf16.mxu0 %v5880_v0  ;;  %1271 = vmatprep.mubr.bf16.mxu1 %v5880_v0 }
  0x83   :  { %3670 = vmatmul.mubr.msk.bf16.gmra.mrb[52].mxu0 %vm188_vm1, %v4797_v38  ;;  %3742 = vmatmul.mubr.msk.bf16.gmra.mrb[52].mxu1 %vm188_vm1, %v4802_v39 }
  0x84   :  { %579 = vmatprep.mubr.bf16.mxu0 %v5880_v0  ;;  %1314 = vmatprep.mubr.bf16.mxu1 %v5880_v0 }
  0x8b   :  { %3690 = vmatmul.mubr.msk.bf16.vlgmr.msra.gmra.mrb[0].mxu0 %vm188_vm1, %v4813_v40  ;;  %3744 = vmatmul.mubr.msk.bf16.vlgmr.msra.gmra.mrb[0].mxu1 %vm188_vm1, %v4571_v6 }
  0x8c   :  { %758 = vmatpush1.bf16.msra.mxu0 %v4435_v41  ;;  %1464 = vmatpush1.bf16.msra.mxu1 %v4435_v41 }
  0x8d   :  { %589 = vmatprep.mubr.bf16.mxu0 %v5880_v0  ;;  %1324 = vmatprep.mubr.bf16.mxu1 %v5880_v0 }
  0x8e   :  { %3713 = vmatprep.subr.msk.bf16.mxu0 %vm231_vm0, %v4438_v43  ;;  %3759 = vmatprep.subr.msk.bf16.mxu1 %vm231_vm0, %v4438_v43 }
  0x90   :  { %760 = vmatpush1.bf16.msra.mxu0 %v752_v44  ;;  %1466 = vmatpush1.bf16.msra.mxu1 %v752_v44 }
  0x91   :  { %1894 = vmatprep.subr.bf16.mxu0 %v4443_v45  ;;  %2690 = vmatprep.subr.bf16.mxu1 %v4443_v45 }
  0x93   :  { %3691 = vmatmul.mubr.msk.bf16.gmra.mrb[4].mxu0 %vm188_vm1, %v4579_v8  ;;  %3745 = vmatmul.mubr.msk.bf16.gmra.mrb[4].mxu1 %vm188_vm1, %v4593_v10 }
  0x94   :  { %599 = vmatprep.mubr.bf16.mxu0 %v5880_v0  ;;  %1334 = vmatprep.mubr.bf16.mxu1 %v5880_v0 }
  0x9b   :  { %3692 = vmatmul.mubr.msk.bf16.gmra.mrb[8].mxu0 %vm188_vm1, %v4598_v11  ;;  %3746 = vmatmul.mubr.msk.bf16.gmra.mrb[8].mxu1 %vm188_vm1, %v4609_v12 }
  0x9c   :  { %609 = vmatprep.mubr.bf16.mxu0 %v5880_v0  ;;  %1344 = vmatprep.mubr.bf16.mxu1 %v5880_v0 }
  0xa3   :  { %3693 = vmatmul.mubr.msk.bf16.gmra.mrb[12].mxu0 %vm188_vm1, %v4617_v14  ;;  %3747 = vmatmul.mubr.msk.bf16.gmra.mrb[12].mxu1 %vm188_vm1, %v4634_v17 }
  0xa4   :  { %619 = vmatprep.mubr.bf16.mxu0 %v5880_v0  ;;  %1354 = vmatprep.mubr.bf16.mxu1 %v5880_v0 }
  0xab   :  { %3694 = vmatmul.mubr.msk.bf16.gmra.mrb[16].mxu0 %vm188_vm1, %v4639_v18  ;;  %3748 = vmatmul.mubr.msk.bf16.gmra.mrb[16].mxu1 %vm188_vm1, %v4653_v20 }
  0xac   :  { %629 = vmatprep.mubr.bf16.mxu0 %v5880_v0  ;;  %1364 = vmatprep.mubr.bf16.mxu1 %v5880_v0 }
  0xb3   :  { %3695 = vmatmul.mubr.msk.bf16.gmra.mrb[20].mxu0 %vm188_vm1, %v4658_v21  ;;  %3749 = vmatmul.mubr.msk.bf16.gmra.mrb[20].mxu1 %vm188_vm1, %v4669_v22 }
  0xb4   :  { %639 = vmatprep.mubr.bf16.mxu0 %v5880_v0  ;;  %1374 = vmatprep.mubr.bf16.mxu1 %v5880_v0 }
  0xbb   :  { %3696 = vmatmul.mubr.msk.bf16.gmra.mrb[24].mxu0 %vm188_vm1, %v4674_v23  ;;  %3750 = vmatmul.mubr.msk.bf16.gmra.mrb[24].mxu1 %vm188_vm1, %v4685_v24 }
  0xbc   :  { %649 = vmatprep.mubr.bf16.mxu0 %v5880_v0  ;;  %1384 = vmatprep.mubr.bf16.mxu1 %v5880_v0 }
  0xc3   :  { %3697 = vmatmul.mubr.msk.bf16.gmra.mrb[28].mxu0 %vm188_vm1, %v4690_v25  ;;  %3751 = vmatmul.mubr.msk.bf16.gmra.mrb[28].mxu1 %vm188_vm1, %v4701_v26 }
  0xc4   :  { %659 = vmatprep.mubr.bf16.mxu0 %v5880_v0  ;;  %1394 = vmatprep.mubr.bf16.mxu1 %v5880_v0 }
  0xcb   :  { %3698 = vmatmul.mubr.msk.bf16.gmra.mrb[32].mxu0 %vm188_vm1, %v4706_v27  ;;  %3752 = vmatmul.mubr.msk.bf16.gmra.mrb[32].mxu1 %vm188_vm1, %v4717_v28 }
  0xcc   :  { %669 = vmatprep.mubr.bf16.mxu0 %v5880_v0  ;;  %1404 = vmatprep.mubr.bf16.mxu1 %v5880_v0 }
  0xd3   :  { %3699 = vmatmul.mubr.msk.bf16.gmra.mrb[36].mxu0 %vm188_vm1, %v4722_v29  ;;  %3753 = vmatmul.mubr.msk.bf16.gmra.mrb[36].mxu1 %vm188_vm1, %v4733_v30 }
  0xd4   :  { %679 = vmatprep.mubr.bf16.mxu0 %v5880_v0  ;;  %1414 = vmatprep.mubr.bf16.mxu1 %v5880_v0 }
  0xdb   :  { %3700 = vmatmul.mubr.msk.bf16.gmra.mrb[40].mxu0 %vm188_vm1, %v4738_v31  ;;  %3754 = vmatmul.mubr.msk.bf16.gmra.mrb[40].mxu1 %vm188_vm1, %v4749_v32 }
  0xdc   :  { %689 = vmatprep.mubr.bf16.mxu0 %v5880_v0  ;;  %1424 = vmatprep.mubr.bf16.mxu1 %v5880_v0 }
  0xe3   :  { %3701 = vmatmul.mubr.msk.bf16.gmra.mrb[44].mxu0 %vm188_vm1, %v4754_v33  ;;  %3755 = vmatmul.mubr.msk.bf16.gmra.mrb[44].mxu1 %vm188_vm1, %v4765_v34 }
  0xe4   :  { %699 = vmatprep.mubr.bf16.mxu0 %v5880_v0  ;;  %1434 = vmatprep.mubr.bf16.mxu1 %v5880_v0 }
  0xeb   :  { %3702 = vmatmul.mubr.msk.bf16.gmra.mrb[48].mxu0 %vm188_vm1, %v4770_v35  ;;  %3756 = vmatmul.mubr.msk.bf16.gmra.mrb[48].mxu1 %vm188_vm1, %v4781_v36 }
  0xec   :  { %709 = vmatprep.mubr.bf16.mxu0 %v5880_v0  ;;  %1444 = vmatprep.mubr.bf16.mxu1 %v5880_v0 }
  0xf3   :  { %3703 = vmatmul.mubr.msk.bf16.gmra.mrb[52].mxu0 %vm188_vm1, %v4786_v37  ;;  %3757 = vmatmul.mubr.msk.bf16.gmra.mrb[52].mxu1 %vm188_vm1, %v4797_v38 }
  0xf4   :  { %789 = vmatprep.mubr.bf16.mxu0 %v5880_v0  ;;  %1495 = vmatprep.mubr.bf16.mxu1 %v5880_v0 }
  0xfb   :  { %3714 = vmatmul.mubr.msk.bf16.vlgmr.msra.gmra.mrb[0].mxu0 %vm188_vm1, %v4579_v8  ;;  %3760 = vmatmul.mubr.msk.bf16.vlgmr.msra.gmra.mrb[0].mxu1 %vm188_vm1, %v4593_v10 }
  0xfc   :  { %1895 = vmatpush1.bf16.msra.mxu0 %v4441_v46  ;;  %2691 = vmatpush1.bf16.msra.mxu1 %v4441_v46  ;;  %v4454_v46 = vld [vmem:[%s5877_s2 + $0xa0] ss:$8 sps:$4 sm:$0xff]  }
  0xfd   :  { %799 = vmatprep.mubr.bf16.mxu0 %v5880_v0  ;;  %1505 = vmatprep.mubr.bf16.mxu1 %v5880_v0 }
  0xfe   :  { %3786 = vmatprep.subr.msk.bf16.mxu0 %vm231_vm0, %v4444_v48  ;;  %3843 = vmatprep.subr.msk.bf16.mxu1 %vm231_vm0, %v4444_v48 }
 0x100   :  { %1897 = vmatpush1.bf16.msra.mxu0 %v1889_v49  ;;  %2693 = vmatpush1.bf16.msra.mxu1 %v1889_v49 }
 0x101   :  { %2091 = vmatprep.subr.bf16.mxu0 %v4450_v50  ;;  %2863 = vmatprep.subr.bf16.mxu1 %v4450_v50 }
 0x103   :  { %3715 = vmatmul.mubr.msk.bf16.gmra.mrb[4].mxu0 %vm188_vm1, %v4598_v11  ;;  %3761 = vmatmul.mubr.msk.bf16.gmra.mrb[4].mxu1 %vm188_vm1, %v4609_v12 }
 0x104   :  { %809 = vmatprep.mubr.bf16.mxu0 %v5880_v0  ;;  %1515 = vmatprep.mubr.bf16.mxu1 %v5880_v0 }
 0x10b   :  { %3716 = vmatmul.mubr.msk.bf16.gmra.mrb[8].mxu0 %vm188_vm1, %v4617_v14  ;;  %3762 = vmatmul.mubr.msk.bf16.gmra.mrb[8].mxu1 %vm188_vm1, %v4634_v17 }
 0x10c   :  { %819 = vmatprep.mubr.bf16.mxu0 %v5880_v0  ;;  %1525 = vmatprep.mubr.bf16.mxu1 %v5880_v0 }
 0x113   :  { %3717 = vmatmul.mubr.msk.bf16.gmra.mrb[12].mxu0 %vm188_vm1, %v4639_v18  ;;  %3763 = vmatmul.mubr.msk.bf16.gmra.mrb[12].mxu1 %vm188_vm1, %v4653_v20 }
 0x114   :  { %829 = vmatprep.mubr.bf16.mxu0 %v5880_v0  ;;  %1535 = vmatprep.mubr.bf16.mxu1 %v5880_v0 }
 0x11b   :  { %3718 = vmatmul.mubr.msk.bf16.gmra.mrb[16].mxu0 %vm188_vm1, %v4658_v21  ;;  %3764 = vmatmul.mubr.msk.bf16.gmra.mrb[16].mxu1 %vm188_vm1, %v4669_v22 }
 0x11c   :  { %839 = vmatprep.mubr.bf16.mxu0 %v5880_v0  ;;  %1545 = vmatprep.mubr.bf16.mxu1 %v5880_v0 }
 0x123   :  { %3719 = vmatmul.mubr.msk.bf16.gmra.mrb[20].mxu0 %vm188_vm1, %v4674_v23  ;;  %3765 = vmatmul.mubr.msk.bf16.gmra.mrb[20].mxu1 %vm188_vm1, %v4685_v24 }
 0x124   :  { %849 = vmatprep.mubr.bf16.mxu0 %v5880_v0  ;;  %1555 = vmatprep.mubr.bf16.mxu1 %v5880_v0 }
 0x12b   :  { %3720 = vmatmul.mubr.msk.bf16.gmra.mrb[24].mxu0 %vm188_vm1, %v4690_v25  ;;  %3766 = vmatmul.mubr.msk.bf16.gmra.mrb[24].mxu1 %vm188_vm1, %v4701_v26 }
 0x12c   :  { %859 = vmatprep.mubr.bf16.mxu0 %v5880_v0  ;;  %1565 = vmatprep.mubr.bf16.mxu1 %v5880_v0 }
 0x133   :  { %3721 = vmatmul.mubr.msk.bf16.gmra.mrb[28].mxu0 %vm188_vm1, %v4706_v27  ;;  %3767 = vmatmul.mubr.msk.bf16.gmra.mrb[28].mxu1 %vm188_vm1, %v4717_v28 }
 0x134   :  { %869 = vmatprep.mubr.bf16.mxu0 %v5880_v0  ;;  %1575 = vmatprep.mubr.bf16.mxu1 %v5880_v0 }
 0x13b   :  { %3722 = vmatmul.mubr.msk.bf16.gmra.mrb[32].mxu0 %vm188_vm1, %v4722_v29  ;;  %3768 = vmatmul.mubr.msk.bf16.gmra.mrb[32].mxu1 %vm188_vm1, %v4733_v30 }
 0x13c   :  { %879 = vmatprep.mubr.bf16.mxu0 %v5880_v0  ;;  %1585 = vmatprep.mubr.bf16.mxu1 %v5880_v0 }
 0x143   :  { %3723 = vmatmul.mubr.msk.bf16.gmra.mrb[36].mxu0 %vm188_vm1, %v4738_v31  ;;  %3769 = vmatmul.mubr.msk.bf16.gmra.mrb[36].mxu1 %vm188_vm1, %v4749_v32 }
 0x144   :  { %889 = vmatprep.mubr.bf16.mxu0 %v5880_v0  ;;  %1595 = vmatprep.mubr.bf16.mxu1 %v5880_v0 }
 0x14b   :  { %3724 = vmatmul.mubr.msk.bf16.gmra.mrb[40].mxu0 %vm188_vm1, %v4754_v33  ;;  %3770 = vmatmul.mubr.msk.bf16.gmra.mrb[40].mxu1 %vm188_vm1, %v4765_v34 }
 0x14c   :  { %899 = vmatprep.mubr.bf16.mxu0 %v5880_v0  ;;  %1605 = vmatprep.mubr.bf16.mxu1 %v5880_v0 }
 0x153   :  { %3725 = vmatmul.mubr.msk.bf16.gmra.mrb[44].mxu0 %vm188_vm1, %v4770_v35  ;;  %3771 = vmatmul.mubr.msk.bf16.gmra.mrb[44].mxu1 %vm188_vm1, %v4781_v36 }
 0x154   :  { %909 = vmatprep.mubr.bf16.mxu0 %v5880_v0  ;;  %1615 = vmatprep.mubr.bf16.mxu1 %v5880_v0 }
 0x15b   :  { %3726 = vmatmul.mubr.msk.bf16.gmra.mrb[48].mxu0 %vm188_vm1, %v4786_v37  ;;  %3772 = vmatmul.mubr.msk.bf16.gmra.mrb[48].mxu1 %vm188_vm1, %v4797_v38 }
 0x15c   :  { %919 = vmatprep.mubr.bf16.mxu0 %v5880_v0  ;;  %1625 = vmatprep.mubr.bf16.mxu1 %v5880_v0 }
 0x163   :  { %3727 = vmatmul.mubr.msk.bf16.gmra.mrb[52].mxu0 %vm188_vm1, %v4802_v39  ;;  %3773 = vmatmul.mubr.msk.bf16.gmra.mrb[52].mxu1 %vm188_vm1, %v4447_v51  ;;  %v4459_v51 = vld [vmem:[%s5877_s2 + $0xb0] ss:$8 sps:$4 sm:$0x3f]  }
 0x164   :  { %1926 = vmatprep.mubr.bf16.mxu0 %v5880_v0  ;;  %2722 = vmatprep.mubr.bf16.mxu1 %v5880_v0 }
 0x16b   :  { %3787 = vmatmul.mubr.msk.bf16.vlgmr.msra.gmra.mrb[56].mxu0 %vm188_vm1, %v4571_v6  ;;  %3844 = vmatmul.mubr.msk.bf16.vlgmr.msra.gmra.mrb[56].mxu1 %vm188_vm1, %v4579_v8 }
 0x16c   :  { %2092 = vmatpush1.bf16.msra.mxu0 %v4448_v52  ;;  %2864 = vmatpush1.bf16.msra.mxu1 %v4448_v52 }
 0x16d   :  { %1936 = vmatprep.mubr.bf16.mxu0 %v5880_v0  ;;  %2732 = vmatprep.mubr.bf16.mxu1 %v5880_v0 }
 0x16e   :  { %3805 = vmatprep.subr.msk.bf16.mxu0 %vm231_vm0, %v4451_v54  ;;  %3858 = vmatprep.subr.msk.bf16.mxu1 %vm231_vm0, %v4451_v54 }
 0x170   :  { %2094 = vmatpush1.bf16.msra.mxu0 %v2086_v55  ;;  %2866 = vmatpush1.bf16.msra.mxu1 %v2086_v55 }
 0x171   :  { %2293 = vmatprep.subr.bf16.mxu0 %v4456_v56  ;;  %3036 = vmatprep.subr.bf16.mxu1 %v4456_v56 }
 0x173   :  { %3788 = vmatmul.mubr.msk.bf16.gmra.mrb[60].mxu0 %vm188_vm1, %v4593_v10  ;;  %3845 = vmatmul.mubr.msk.bf16.gmra.mrb[60].mxu1 %vm188_vm1, %v4598_v11 }
 0x174   :  { %1946 = vmatprep.mubr.bf16.mxu0 %v5880_v0  ;;  %2742 = vmatprep.mubr.bf16.mxu1 %v5880_v0 }
 0x17b   :  { %3789 = vmatmul.mubr.msk.bf16.gmra.mrb[64].mxu0 %vm188_vm1, %v4609_v12  ;;  %3846 = vmatmul.mubr.msk.bf16.gmra.mrb[64].mxu1 %vm188_vm1, %v4617_v14 }
 0x17c   :  { %1956 = vmatprep.mubr.bf16.mxu0 %v5880_v0  ;;  %2752 = vmatprep.mubr.bf16.mxu1 %v5880_v0 }
 0x183   :  { %3790 = vmatmul.mubr.msk.bf16.gmra.mrb[68].mxu0 %vm188_vm1, %v4634_v17  ;;  %3847 = vmatmul.mubr.msk.bf16.gmra.mrb[68].mxu1 %vm188_vm1, %v4639_v18 }
 0x184   :  { %1966 = vmatprep.mubr.bf16.mxu0 %v5880_v0  ;;  %2762 = vmatprep.mubr.bf16.mxu1 %v5880_v0 }
 0x18b   :  { %3791 = vmatmul.mubr.msk.bf16.gmra.mrb[72].mxu0 %vm188_vm1, %v4653_v20  ;;  %3848 = vmatmul.mubr.msk.bf16.gmra.mrb[72].mxu1 %vm188_vm1, %v4658_v21 }
 0x18c   :  { %1976 = vmatprep.mubr.bf16.mxu0 %v5880_v0  ;;  %2772 = vmatprep.mubr.bf16.mxu1 %v5880_v0 }
 0x193   :  { %3792 = vmatmul.mubr.msk.bf16.gmra.mrb[76].mxu0 %vm188_vm1, %v4669_v22  ;;  %3849 = vmatmul.mubr.msk.bf16.gmra.mrb[76].mxu1 %vm188_vm1, %v4674_v23 }
 0x194   :  { %1986 = vmatprep.mubr.bf16.mxu0 %v5880_v0  ;;  %2782 = vmatprep.mubr.bf16.mxu1 %v5880_v0 }
 0x19b   :  { %3793 = vmatmul.mubr.msk.bf16.gmra.mrb[80].mxu0 %vm188_vm1, %v4685_v24  ;;  %3850 = vmatmul.mubr.msk.bf16.gmra.mrb[80].mxu1 %vm188_vm1, %v4690_v25 }
 0x19c   :  { %1996 = vmatprep.mubr.bf16.mxu0 %v5880_v0  ;;  %2792 = vmatprep.mubr.bf16.mxu1 %v5880_v0 }
 0x1a3   :  { %3794 = vmatmul.mubr.msk.bf16.gmra.mrb[84].mxu0 %vm188_vm1, %v4701_v26  ;;  %3851 = vmatmul.mubr.msk.bf16.gmra.mrb[84].mxu1 %vm188_vm1, %v4706_v27 }
 0x1a4   :  { %2006 = vmatprep.mubr.bf16.mxu0 %v5880_v0  ;;  %2802 = vmatprep.mubr.bf16.mxu1 %v5880_v0 }
 0x1ab   :  { %3795 = vmatmul.mubr.msk.bf16.gmra.mrb[88].mxu0 %vm188_vm1, %v4717_v28  ;;  %3852 = vmatmul.mubr.msk.bf16.gmra.mrb[88].mxu1 %vm188_vm1, %v4722_v29 }
 0x1ac   :  { %2016 = vmatprep.mubr.bf16.mxu0 %v5880_v0  ;;  %2812 = vmatprep.mubr.bf16.mxu1 %v5880_v0 }
 0x1b3   :  { %3796 = vmatmul.mubr.msk.bf16.gmra.mrb[92].mxu0 %vm188_vm1, %v4733_v30  ;;  %3853 = vmatmul.mubr.msk.bf16.gmra.mrb[92].mxu1 %vm188_vm1, %v4738_v31 }
 0x1b4   :  { %2026 = vmatprep.mubr.bf16.mxu0 %v5880_v0  ;;  %2822 = vmatprep.mubr.bf16.mxu1 %v5880_v0 }
 0x1bb   :  { %3797 = vmatmul.mubr.msk.bf16.gmra.mrb[96].mxu0 %vm188_vm1, %v4749_v32  ;;  %3854 = vmatmul.mubr.msk.bf16.gmra.mrb[96].mxu1 %vm188_vm1, %v4754_v33 }
 0x1bc   :  { %2036 = vmatprep.mubr.bf16.mxu0 %v5880_v0  ;;  %2832 = vmatprep.mubr.bf16.mxu1 %v5880_v0 }
 0x1c3   :  { %3798 = vmatmul.mubr.msk.bf16.gmra.mrb[100].mxu0 %vm188_vm1, %v4765_v34  ;;  %3855 = vmatmul.mubr.msk.bf16.gmra.mrb[100].mxu1 %vm188_vm1, %v4770_v35 }
 0x1c4   :  { %2046 = vmatprep.mubr.bf16.mxu0 %v5880_v0  ;;  %2842 = vmatprep.mubr.bf16.mxu1 %v5880_v0 }
 0x1cb   :  { %3799 = vmatmul.mubr.msk.bf16.gmra.mrb[104].mxu0 %vm188_vm1, %v4781_v36  ;;  %3856 = vmatmul.mubr.msk.bf16.gmra.mrb[104].mxu1 %vm188_vm1, %v4786_v37 }
 0x1cc   :  { %2056 = vmatprep.mubr.bf16.mxu0 %v5880_v0  ;;  %2852 = vmatprep.mubr.bf16.mxu1 %v5880_v0 }
 0x1ce   :  { %v791_v1 = vpop.f32.mrb[0].mxu0  ;;  %v1497_v2 = vpop.f32.mrb[0].mxu1 }
 0x1cf   :  { %v997_v3 = vadd.f32 %v5106_v62, %v791_v1  ;;  %v1692_v4 = vadd.f32 %v1497_v2, %v5106_v62  ;;  %v793_v5 = vpop.f32.mrb[1].mxu0  ;;  %v1499_v7 = vpop.f32.mrb[1].mxu1  ;;  %v4457_v1 = vld [vmem:[%s5877_s2 + $0xb4] ss:$8 sps:$4 sm:$0x3f]  }
 0x1d0   :  { %v998_v9 = vadd.f32 %v5108_v63, %v793_v5  ;;  %v1693_v13 = vadd.f32 %v1499_v7, %v5108_v63  ;;  %v795_v15 = vpop.f32.mrb[2].mxu0  ;;  %v1501_v16 = vpop.f32.mrb[2].mxu1 }
 0x1d1   :  { %v1053_v19 = vmax.f32 %v997_v3, 0.0  ;;  %v1748_v21 = vmax.f32 %v1692_v4, 0.0  ;;  %v999_v23 = vadd.f32 %v5106_v62, %v795_v15  ;;  %v1694_v24 = vadd.f32 %v1501_v16, %v5106_v62  ;;  %v797_v25 = vpop.f32.mrb[3].mxu0  ;;  %v1503_v26 = vpop.f32.mrb[3].mxu1 }
 0x1d2   :  { %v1054_v27 = vmax.f32 %v998_v9, 0.0  ;;  %v1749_v28 = vmax.f32 %v1693_v13, 0.0  ;;  %v1000_v29 = vadd.f32 %v5108_v63, %v797_v25  ;;  %v1695_v30 = vadd.f32 %v1503_v26, %v5108_v63 }
 0x1d3   :  { %v5120_v31 = vmax.f32 %v1053_v19, %v1748_v21  ;;  %v1055_v32 = vmax.f32 %v999_v23, 0.0  ;;  %v1750_v33 = vmax.f32 %v1694_v24, 0.0  ;;  %3800 = vmatmul.mubr.msk.bf16.gmra.mrb[108].mxu0 %vm188_vm1, %v4797_v38  ;;  %3857 = vmatmul.mubr.msk.bf16.gmra.mrb[108].mxu1 %vm188_vm1, %v4802_v39  ;;  %v2288_v15 = vsel %vm231_vm0, %v4459_v51, 0 }
 0x1d4   :  { %v5126_v34 = vmax.f32 %v1054_v27, %v1749_v28  ;;  %v1056_v35 = vmax.f32 %v1000_v29, 0.0  ;;  %v1751_v36 = vmax.f32 %v1695_v30, 0.0  ;;  %2123 = vmatprep.mubr.bf16.mxu0 %v5880_v0  ;;  %2895 = vmatprep.mubr.bf16.mxu1 %v5880_v0 }
 0x1d5   :  { %v5130_v37 = vmax.f32 %v1055_v32, %v1750_v33 }
 0x1d6   :  { %v5132_v41 = vmax.f32 %v1056_v35, %v1751_v36  ;;  %v801_v42 = vpop.f32.mrb[4].mxu0  ;;  %v1507_v43 = vpop.f32.mrb[4].mxu1 }
 0x1d7   :  { %v1001_v44 = vadd.f32 %v5106_v62, %v801_v42  ;;  %v1696_v38 = vadd.f32 %v1507_v43, %v5106_v62  ;;  %v803_v45 = vpop.f32.mrb[5].mxu0  ;;  %v1509_v39 = vpop.f32.mrb[5].mxu1 }
 0x1d8   :  { %v1002_v47 = vadd.f32 %v5108_v63, %v803_v45  ;;  %v1697_v48 = vadd.f32 %v1509_v39, %v5108_v63  ;;  %v805_v49 = vpop.f32.mrb[6].mxu0  ;;  %v1511_v50 = vpop.f32.mrb[6].mxu1 }
 0x1d9   :  { %v1057_v52 = vmax.f32 %v1001_v44, 0.0  ;;  %v1752_v53 = vmax.f32 %v1696_v38, 0.0  ;;  %v1003_v54 = vadd.f32 %v5106_v62, %v805_v49  ;;  %v1698_v55 = vadd.f32 %v1511_v50, %v5106_v62  ;;  %v807_v56 = vpop.f32.mrb[7].mxu0  ;;  %v1513_v57 = vpop.f32.mrb[7].mxu1 }
 0x1da   :  { %v1058_v58 = vmax.f32 %v1002_v47, 0.0  ;;  %v1753_v59 = vmax.f32 %v1697_v48, 0.0  ;;  %v1004_v60 = vadd.f32 %v5108_v63, %v807_v56  ;;  %v1699_v61 = vadd.f32 %v1513_v57, %v5108_v63 }
 0x1db   :  { %v5151_v2 = vmax.f32 %v1057_v52, %v1752_v53  ;;  %v1059_v3 = vmax.f32 %v1003_v54, 0.0  ;;  %v1754_v4 = vmax.f32 %v1698_v55, 0.0  ;;  %3806 = vmatmul.mubr.msk.bf16.vlgmr.msra.gmra.mrb[56].mxu0 %vm188_vm1, %v4813_v40  ;;  %3859 = vmatmul.mubr.msk.bf16.vlgmr.msra.gmra.mrb[56].mxu1 %vm188_vm1, %v4571_v6 }
 0x1dc   :  { %v5157_v5 = vmax.f32 %v1058_v58, %v1753_v59  ;;  %v1060_v7 = vmax.f32 %v1004_v60, 0.0  ;;  %v1755_v9 = vmax.f32 %v1699_v61, 0.0  ;;  %2294 = vmatpush1.bf16.msra.mxu0 %v4454_v46  ;;  %3037 = vmatpush1.bf16.msra.mxu1 %v4454_v46 }
 0x1dd   :  { %v5159_v13 = vmax.f32 %v1059_v3, %v1754_v4  ;;  %2133 = vmatprep.mubr.bf16.mxu0 %v5880_v0  ;;  %2905 = vmatprep.mubr.bf16.mxu1 %v5880_v0 }
 0x1de   :  { %v5164_v16 = vmax.f32 %v1060_v7, %v1755_v9  ;;  %v811_v40 = vpop.f32.mrb[8].mxu0  ;;  %v1517_v19 = vpop.f32.mrb[8].mxu1  ;;  %3828 = vmatprep.subr.msk.bf16.mxu0 %vm231_vm0, %v4457_v1  ;;  %3873 = vmatprep.subr.msk.bf16.mxu1 %vm231_vm0, %v4457_v1 }
 0x1df   :  { %v1005_v6 = vadd.f32 %v5106_v62, %v811_v40  ;;  %v1700_v21 = vadd.f32 %v1517_v19, %v5106_v62  ;;  %v813_v23 = vpop.f32.mrb[9].mxu0  ;;  %v1519_v24 = vpop.f32.mrb[9].mxu1 }
 0x1e0   :  { %v1006_v25 = vadd.f32 %v5108_v63, %v813_v23  ;;  %v1701_v26 = vadd.f32 %v1519_v24, %v5108_v63  ;;  %v815_v27 = vpop.f32.mrb[10].mxu0  ;;  %v1521_v28 = vpop.f32.mrb[10].mxu1  ;;  %2296 = vmatpush1.bf16.msra.mxu0 %v2288_v15  ;;  %3039 = vmatpush1.bf16.msra.mxu1 %v2288_v15 }
 0x1e1   :  { %v1061_v29 = vmax.f32 %v1005_v6, 0.0  ;;  %v1756_v30 = vmax.f32 %v1700_v21, 0.0  ;;  %v1007_v32 = vadd.f32 %v5106_v62, %v815_v27  ;;  %v1702_v33 = vadd.f32 %v1521_v28, %v5106_v62  ;;  %v817_v35 = vpop.f32.mrb[11].mxu0  ;;  %v1523_v36 = vpop.f32.mrb[11].mxu1 }
 0x1e2   :  { %v1062_v42 = vmax.f32 %v1006_v25, 0.0  ;;  %v1757_v43 = vmax.f32 %v1701_v26, 0.0  ;;  %v1008_v44 = vadd.f32 %v5108_v63, %v817_v35  ;;  %v1703_v38 = vadd.f32 %v1523_v36, %v5108_v63 }
 0x1e3   :  { %v5176_v45 = vmax.f32 %v1061_v29, %v1756_v30  ;;  %v1063_v39 = vmax.f32 %v1007_v32, 0.0  ;;  %v1758_v46 = vmax.f32 %v1702_v33, 0.0  ;;  %3807 = vmatmul.mubr.msk.bf16.gmra.mrb[60].mxu0 %vm188_vm1, %v4579_v8  ;;  %3860 = vmatmul.mubr.msk.bf16.gmra.mrb[60].mxu1 %vm188_vm1, %v4593_v10 }
 0x1e4   :  { %v5182_v47 = vmax.f32 %v1062_v42, %v1757_v43  ;;  %v1064_v48 = vmax.f32 %v1008_v44, 0.0  ;;  %v1759_v49 = vmax.f32 %v1703_v38, 0.0  ;;  %2143 = vmatprep.mubr.bf16.mxu0 %v5880_v0  ;;  %2915 = vmatprep.mubr.bf16.mxu1 %v5880_v0 }
 0x1e5   :  { %v5186_v50 = vmax.f32 %v1063_v39, %v1758_v46 }
 0x1e6   :  { %v5188_v51 = vmax.f32 %v1064_v48, %v1759_v49  ;;  %v821_v52 = vpop.f32.mrb[12].mxu0  ;;  %v1527_v53 = vpop.f32.mrb[12].mxu1 }
 0x1e7   :  { %v1009_v54 = vadd.f32 %v5106_v62, %v821_v52  ;;  %v1704_v8 = vadd.f32 %v1527_v53, %v5106_v62  ;;  %v823_v55 = vpop.f32.mrb[13].mxu0  ;;  %v1529_v10 = vpop.f32.mrb[13].mxu1 }
 0x1e8   :  { %v1010_v56 = vadd.f32 %v5108_v63, %v823_v55  ;;  %v1705_v57 = vadd.f32 %v1529_v10, %v5108_v63  ;;  %v825_v58 = vpop.f32.mrb[14].mxu0  ;;  %v1531_v59 = vpop.f32.mrb[14].mxu1 }
 0x1e9   :  { %v1065_v60 = vmax.f32 %v1009_v54, 0.0  ;;  %v1760_v61 = vmax.f32 %v1704_v8, 0.0  ;;  %v1011_v1 = vadd.f32 %v5106_v62, %v825_v58  ;;  %v1706_v3 = vadd.f32 %v1531_v59, %v5106_v62  ;;  %v827_v4 = vpop.f32.mrb[15].mxu0  ;;  %v1533_v7 = vpop.f32.mrb[15].mxu1 }
 0x1ea   :  { %v1066_v9 = vmax.f32 %v1010_v56, 0.0  ;;  %v1761_v15 = vmax.f32 %v1705_v57, 0.0  ;;  %v1012_v40 = vadd.f32 %v5108_v63, %v827_v4  ;;  %v1707_v19 = vadd.f32 %v1533_v7, %v5108_v63 }
 0x1eb   :  { %v5198_v6 = vmax.f32 %v1065_v60, %v1760_v61  ;;  %v1067_v21 = vmax.f32 %v1011_v1, 0.0  ;;  %v1762_v23 = vmax.f32 %v1706_v3, 0.0  ;;  %3808 = vmatmul.mubr.msk.bf16.gmra.mrb[64].mxu0 %vm188_vm1, %v4598_v11  ;;  %3861 = vmatmul.mubr.msk.bf16.gmra.mrb[64].mxu1 %vm188_vm1, %v4609_v12 }
 0x1ec   :  { %v5204_v24 = vmax.f32 %v1066_v9, %v1761_v15  ;;  %v1068_v25 = vmax.f32 %v1012_v40, 0.0  ;;  %v1763_v26 = vmax.f32 %v1707_v19, 0.0  ;;  %2153 = vmatprep.mubr.bf16.mxu0 %v5880_v0  ;;  %2925 = vmatprep.mubr.bf16.mxu1 %v5880_v0 }
 0x1ed   :  { %v5208_v27 = vmax.f32 %v1067_v21, %v1762_v23 }
 0x1ee   :  { %v5210_v28 = vmax.f32 %v1068_v25, %v1763_v26  ;;  %v831_v29 = vpop.f32.mrb[16].mxu0  ;;  %v1537_v30 = vpop.f32.mrb[16].mxu1 }
 0x1ef   :  { %v1013_v32 = vadd.f32 %v5106_v62, %v831_v29  ;;  %v1708_v11 = vadd.f32 %v1537_v30, %v5106_v62  ;;  %v833_v33 = vpop.f32.mrb[17].mxu0  ;;  %v1539_v12 = vpop.f32.mrb[17].mxu1 }
 0x1f0   :  { %v1014_v35 = vadd.f32 %v5108_v63, %v833_v33  ;;  %v1709_v36 = vadd.f32 %v1539_v12, %v5108_v63  ;;  %v835_v42 = vpop.f32.mrb[18].mxu0  ;;  %v1541_v43 = vpop.f32.mrb[18].mxu1 }
 0x1f1   :  { %v1069_v44 = vmax.f32 %v1013_v32, 0.0  ;;  %v1764_v38 = vmax.f32 %v1708_v11, 0.0  ;;  %v1015_v39 = vadd.f32 %v5106_v62, %v835_v42  ;;  %v1710_v46 = vadd.f32 %v1541_v43, %v5106_v62  ;;  %v837_v48 = vpop.f32.mrb[19].mxu0  ;;  %v1543_v49 = vpop.f32.mrb[19].mxu1 }
 0x1f2   :  { %v1070_v52 = vmax.f32 %v1014_v35, 0.0  ;;  %v1765_v53 = vmax.f32 %v1709_v36, 0.0  ;;  %v1016_v54 = vadd.f32 %v5108_v63, %v837_v48  ;;  %v1711_v8 = vadd.f32 %v1543_v49, %v5108_v63 }
 0x1f3   :  { %v5220_v55 = vmax.f32 %v1069_v44, %v1764_v38  ;;  %v1071_v10 = vmax.f32 %v1015_v39, 0.0  ;;  %v1766_v56 = vmax.f32 %v1710_v46, 0.0  ;;  %3809 = vmatmul.mubr.msk.bf16.gmra.mrb[68].mxu0 %vm188_vm1, %v4617_v14  ;;  %3862 = vmatmul.mubr.msk.bf16.gmra.mrb[68].mxu1 %vm188_vm1, %v4634_v17 }
 0x1f4   :  { %v5226_v57 = vmax.f32 %v1070_v52, %v1765_v53  ;;  %v1072_v58 = vmax.f32 %v1016_v54, 0.0  ;;  %v1767_v59 = vmax.f32 %v1711_v8, 0.0  ;;  %2163 = vmatprep.mubr.bf16.mxu0 %v5880_v0  ;;  %2935 = vmatprep.mubr.bf16.mxu1 %v5880_v0 }
 0x1f5   :  { %v5230_v60 = vmax.f32 %v1071_v10, %v1766_v56 }
 0x1f6   :  { %v5232_v61 = vmax.f32 %v1072_v58, %v1767_v59  ;;  %v841_v1 = vpop.f32.mrb[20].mxu0  ;;  %v1547_v3 = vpop.f32.mrb[20].mxu1 }
 0x1f7   :  { %v1017_v4 = vadd.f32 %v5106_v62, %v841_v1  ;;  %v1712_v14 = vadd.f32 %v1547_v3, %v5106_v62  ;;  %v843_v7 = vpop.f32.mrb[21].mxu0  ;;  %v1549_v17 = vpop.f32.mrb[21].mxu1 }
 0x1f8   :  { %v1018_v9 = vadd.f32 %v5108_v63, %v843_v7  ;;  %v1713_v15 = vadd.f32 %v1549_v17, %v5108_v63  ;;  %v845_v40 = vpop.f32.mrb[22].mxu0  ;;  %v1551_v19 = vpop.f32.mrb[22].mxu1 }
 0x1f9   :  { %v1073_v21 = vmax.f32 %v1017_v4, 0.0  ;;  %v1768_v23 = vmax.f32 %v1712_v14, 0.0  ;;  %v1019_v25 = vadd.f32 %v5106_v62, %v845_v40  ;;  %v1714_v26 = vadd.f32 %v1551_v19, %v5106_v62  ;;  %v847_v29 = vpop.f32.mrb[23].mxu0  ;;  %v1553_v30 = vpop.f32.mrb[23].mxu1 }
 0x1fa   :  { %v1074_v32 = vmax.f32 %v1018_v9, 0.0  ;;  %v1769_v11 = vmax.f32 %v1713_v15, 0.0  ;;  %v1020_v33 = vadd.f32 %v5108_v63, %v847_v29  ;;  %v1715_v12 = vadd.f32 %v1553_v30, %v5108_v63 }
 0x1fb   :  { %v5242_v35 = vmax.f32 %v1073_v21, %v1768_v23  ;;  %v1075_v36 = vmax.f32 %v1019_v25, 0.0  ;;  %v1770_v42 = vmax.f32 %v1714_v26, 0.0  ;;  %3810 = vmatmul.mubr.msk.bf16.gmra.mrb[72].mxu0 %vm188_vm1, %v4639_v18  ;;  %3863 = vmatmul.mubr.msk.bf16.gmra.mrb[72].mxu1 %vm188_vm1, %v4653_v20  ;;  %v5269_v23 = vld [vmem:[%s5875_s0 + $0x28] sm:$0xff]  }
 0x1fc   :  { %v5248_v43 = vmax.f32 %v1074_v32, %v1769_v11  ;;  %v1076_v44 = vmax.f32 %v1020_v33, 0.0  ;;  %v1771_v38 = vmax.f32 %v1715_v12, 0.0  ;;  %2173 = vmatprep.mubr.bf16.mxu0 %v5880_v0  ;;  %2945 = vmatprep.mubr.bf16.mxu1 %v5880_v0 }
 0x1fd   :  { %v5252_v39 = vmax.f32 %v1075_v36, %v1770_v42 }
 0x1fe   :  { %v5254_v46 = vmax.f32 %v1076_v44, %v1771_v38  ;;  %v851_v48 = vpop.f32.mrb[24].mxu0  ;;  %v1557_v49 = vpop.f32.mrb[24].mxu1 }
 0x1ff   :  { %v1021_v52 = vadd.f32 %v5106_v62, %v851_v48  ;;  %v1716_v18 = vadd.f32 %v1557_v49, %v5106_v62  ;;  %v853_v53 = vpop.f32.mrb[25].mxu0  ;;  %v1559_v20 = vpop.f32.mrb[25].mxu1 }
 0x200   :  { %v1022_v54 = vadd.f32 %v5108_v63, %v853_v53  ;;  %v1717_v8 = vadd.f32 %v1559_v20, %v5108_v63  ;;  %v855_v10 = vpop.f32.mrb[26].mxu0  ;;  %v1561_v56 = vpop.f32.mrb[26].mxu1 }
 0x201   :  { %v1077_v58 = vmax.f32 %v1021_v52, 0.0  ;;  %v1772_v59 = vmax.f32 %v1716_v18, 0.0  ;;  %v1023_v1 = vadd.f32 %v5106_v62, %v855_v10  ;;  %v1718_v3 = vadd.f32 %v1561_v56, %v5106_v62  ;;  %v857_v4 = vpop.f32.mrb[27].mxu0  ;;  %v1563_v14 = vpop.f32.mrb[27].mxu1 }
 0x202   :  { %v1078_v7 = vmax.f32 %v1022_v54, 0.0  ;;  %v1773_v17 = vmax.f32 %v1717_v8, 0.0  ;;  %v1024_v9 = vadd.f32 %v5108_v63, %v857_v4  ;;  %v1719_v15 = vadd.f32 %v1563_v14, %v5108_v63  ;;  %v5296_v14 = vld [vmem:[%s5875_s0 + $0x30] sm:$0xff]  }
 0x203   :  { %v5264_v40 = vmax.f32 %v1077_v58, %v1772_v59  ;;  %v1079_v19 = vmax.f32 %v1023_v1, 0.0  ;;  %v1774_v21 = vmax.f32 %v1718_v3, 0.0  ;;  %3811 = vmatmul.mubr.msk.bf16.gmra.mrb[76].mxu0 %vm188_vm1, %v5269_v23  ;;  %3864 = vmatmul.mubr.msk.bf16.gmra.mrb[76].mxu1 %vm188_vm1, %v4669_v22 }
 0x204   :  { %v5275_v25 = vmax.f32 %v1078_v7, %v1773_v17  ;;  %v1080_v26 = vmax.f32 %v1024_v9, 0.0  ;;  %v1775_v29 = vmax.f32 %v1719_v15, 0.0  ;;  %2183 = vmatprep.mubr.bf16.mxu0 %v5880_v0  ;;  %2955 = vmatprep.mubr.bf16.mxu1 %v5880_v0  ;;  %v5303_v7 = vld [vmem:[%s5876_s1 + $0x30] sm:$0xff]  }
 0x205   :  { %v5279_v30 = vmax.f32 %v1079_v19, %v1774_v21 }
 0x206   :  { %v5281_v32 = vmax.f32 %v1080_v26, %v1775_v29  ;;  %v861_v11 = vpop.f32.mrb[28].mxu0  ;;  %v1567_v33 = vpop.f32.mrb[28].mxu1 }
 0x207   :  { %v1025_v12 = vadd.f32 %v5106_v62, %v861_v11  ;;  %v1720_v36 = vadd.f32 %v1567_v33, %v5106_v62  ;;  %v863_v42 = vpop.f32.mrb[29].mxu0  ;;  %v1569_v22 = vpop.f32.mrb[29].mxu1 }
 0x208   :  { %v1026_v44 = vadd.f32 %v5108_v63, %v863_v42  ;;  %v1721_v38 = vadd.f32 %v1569_v22, %v5108_v63  ;;  %v865_v48 = vpop.f32.mrb[30].mxu0  ;;  %v1571_v49 = vpop.f32.mrb[30].mxu1 }
 0x209   :  { %v1081_v52 = vmax.f32 %v1025_v12, 0.0  ;;  %v1776_v18 = vmax.f32 %v1720_v36, 0.0  ;;  %v1027_v53 = vadd.f32 %v5106_v62, %v865_v48  ;;  %v1722_v20 = vadd.f32 %v1571_v49, %v5106_v62  ;;  %v867_v54 = vpop.f32.mrb[31].mxu0  ;;  %v1573_v8 = vpop.f32.mrb[31].mxu1 }
 0x20a   :  { %v1082_v10 = vmax.f32 %v1026_v44, 0.0  ;;  %v1777_v56 = vmax.f32 %v1721_v38, 0.0  ;;  %v1028_v58 = vadd.f32 %v5108_v63, %v867_v54  ;;  %v1723_v59 = vadd.f32 %v1573_v8, %v5108_v63 }
 0x20b   :  { %v5291_v1 = vmax.f32 %v1081_v52, %v1776_v18  ;;  %v1083_v3 = vmax.f32 %v1027_v53, 0.0  ;;  %v1778_v4 = vmax.f32 %v1722_v20, 0.0  ;;  %3812 = vmatmul.mubr.msk.bf16.gmra.mrb[80].mxu0 %vm188_vm1, %v5296_v14  ;;  %3865 = vmatmul.mubr.msk.bf16.gmra.mrb[80].mxu1 %vm188_vm1, %v5303_v7 }
 0x20c   :  { %v5307_v17 = vmax.f32 %v1082_v10, %v1777_v56  ;;  %v1084_v9 = vmax.f32 %v1028_v58, 0.0  ;;  %v1779_v15 = vmax.f32 %v1723_v59, 0.0  ;;  %2193 = vmatprep.mubr.bf16.mxu0 %v5880_v0  ;;  %2965 = vmatprep.mubr.bf16.mxu1 %v5880_v0 }
 0x20d   :  { %v5311_v19 = vmax.f32 %v1083_v3, %v1778_v4  ;;  %v5328_v4 = vld [vmem:[%s5875_s0 + $0x38] sm:$0xff]  }
 0x20e   :  { %5882 = vst [vmem:[#allocation5_spill] sm:$0xff] %v5307_v17  ;;  %v5313_v21 = vmax.f32 %v1084_v9, %v1779_v15  ;;  %v871_v26 = vpop.f32.mrb[32].mxu0  ;;  %v1577_v29 = vpop.f32.mrb[32].mxu1  ;;  %v5335_v9 = vld [vmem:[%s5876_s1 + $0x38] sm:$0xff]  }
 0x20f   :  { %5883 = vst [vmem:[#allocation6_spill] sm:$0xff] %v5311_v19  ;;  %v1029_v11 = vadd.f32 %v5106_v62, %v871_v26  ;;  %v1724_v33 = vadd.f32 %v1577_v29, %v5106_v62  ;;  %v873_v12 = vpop.f32.mrb[33].mxu0  ;;  %v1579_v36 = vpop.f32.mrb[33].mxu1 }
 0x210   :  { %5884 = vst [vmem:[#allocation7_spill] sm:$0xff] %v5313_v21  ;;  %v1030_v42 = vadd.f32 %v5108_v63, %v873_v12  ;;  %v1725_v22 = vadd.f32 %v1579_v36, %v5108_v63  ;;  %v875_v44 = vpop.f32.mrb[34].mxu0  ;;  %v1581_v38 = vpop.f32.mrb[34].mxu1 }
 0x211   :  { %v1085_v48 = vmax.f32 %v1029_v11, 0.0  ;;  %v1780_v49 = vmax.f32 %v1724_v33, 0.0  ;;  %v1031_v52 = vadd.f32 %v5106_v62, %v875_v44  ;;  %v1726_v18 = vadd.f32 %v1581_v38, %v5106_v62  ;;  %v877_v53 = vpop.f32.mrb[35].mxu0  ;;  %v1583_v20 = vpop.f32.mrb[35].mxu1 }
 0x212   :  { %v1086_v54 = vmax.f32 %v1030_v42, 0.0  ;;  %v1781_v8 = vmax.f32 %v1725_v22, 0.0  ;;  %v1032_v10 = vadd.f32 %v5108_v63, %v877_v53  ;;  %v1727_v56 = vadd.f32 %v1583_v20, %v5108_v63 }
 0x213   :  { %v5323_v58 = vmax.f32 %v1085_v48, %v1780_v49  ;;  %v1087_v59 = vmax.f32 %v1031_v52, 0.0  ;;  %v1782_v3 = vmax.f32 %v1726_v18, 0.0  ;;  %3813 = vmatmul.mubr.msk.bf16.gmra.mrb[84].mxu0 %vm188_vm1, %v5328_v4  ;;  %3866 = vmatmul.mubr.msk.bf16.gmra.mrb[84].mxu1 %vm188_vm1, %v5335_v9 }
 0x214   :  { %v5339_v15 = vmax.f32 %v1086_v54, %v1781_v8  ;;  %v1088_v26 = vmax.f32 %v1032_v10, 0.0  ;;  %v1783_v29 = vmax.f32 %v1727_v56, 0.0  ;;  %2203 = vmatprep.mubr.bf16.mxu0 %v5880_v0  ;;  %2975 = vmatprep.mubr.bf16.mxu1 %v5880_v0 }
 0x215   :  { %5885 = vst [vmem:[#allocation8_spill] sm:$0xff] %v5323_v58  ;;  %v5343_v11 = vmax.f32 %v1087_v59, %v1782_v3 }
 0x216   :  { %5886 = vst [vmem:[#allocation9_spill] sm:$0xff] %v5339_v15  ;;  %v5345_v33 = vmax.f32 %v1088_v26, %v1783_v29  ;;  %v881_v12 = vpop.f32.mrb[36].mxu0  ;;  %v1587_v36 = vpop.f32.mrb[36].mxu1 }
 0x217   :  { %5887 = vst [vmem:[#allocation10_spill] sm:$0xff] %v5343_v11  ;;  %v1033_v42 = vadd.f32 %v5106_v62, %v881_v12  ;;  %v1728_v22 = vadd.f32 %v1587_v36, %v5106_v62  ;;  %v883_v44 = vpop.f32.mrb[37].mxu0  ;;  %v1589_v38 = vpop.f32.mrb[37].mxu1 }
 0x218   :  { %5888 = vst [vmem:[#allocation11_spill] sm:$0xff] %v5345_v33  ;;  %v1034_v48 = vadd.f32 %v5108_v63, %v883_v44  ;;  %v1729_v49 = vadd.f32 %v1589_v38, %v5108_v63  ;;  %v885_v52 = vpop.f32.mrb[38].mxu0  ;;  %v1591_v18 = vpop.f32.mrb[38].mxu1 }
 0x219   :  { %v1089_v53 = vmax.f32 %v1033_v42, 0.0  ;;  %v1784_v20 = vmax.f32 %v1728_v22, 0.0  ;;  %v1035_v54 = vadd.f32 %v5106_v62, %v885_v52  ;;  %v1730_v8 = vadd.f32 %v1591_v18, %v5106_v62  ;;  %v887_v10 = vpop.f32.mrb[39].mxu0  ;;  %v1593_v56 = vpop.f32.mrb[39].mxu1  ;;  %v5360_v42 = vld [vmem:[%s5875_s0 + $0x40] sm:$0xff]  }
 0x21a   :  { %v1090_v59 = vmax.f32 %v1034_v48, 0.0  ;;  %v1785_v3 = vmax.f32 %v1729_v49, 0.0  ;;  %v1036_v26 = vadd.f32 %v5108_v63, %v887_v10  ;;  %v1731_v29 = vadd.f32 %v1593_v56, %v5108_v63  ;;  %v5367_v22 = vld [vmem:[%s5876_s1 + $0x40] sm:$0xff]  }
 0x21b   :  { %v5355_v12 = vmax.f32 %v1089_v53, %v1784_v20  ;;  %v1091_v36 = vmax.f32 %v1035_v54, 0.0  ;;  %v1786_v44 = vmax.f32 %v1730_v8, 0.0  ;;  %3814 = vmatmul.mubr.msk.bf16.gmra.mrb[88].mxu0 %vm188_vm1, %v5360_v42  ;;  %3867 = vmatmul.mubr.msk.bf16.gmra.mrb[88].mxu1 %vm188_vm1, %v5367_v22 }
 0x21c   :  { %v5371_v38 = vmax.f32 %v1090_v59, %v1785_v3  ;;  %v1092_v48 = vmax.f32 %v1036_v26, 0.0  ;;  %v1787_v49 = vmax.f32 %v1731_v29, 0.0  ;;  %2213 = vmatprep.mubr.bf16.mxu0 %v5880_v0  ;;  %2985 = vmatprep.mubr.bf16.mxu1 %v5880_v0 }
 0x21d   :  { %5889 = vst [vmem:[#allocation12_spill] sm:$0xff] %v5355_v12  ;;  %v5375_v52 = vmax.f32 %v1091_v36, %v1786_v44 }
 0x21e   :  { %5890 = vst [vmem:[#allocation13_spill] sm:$0xff] %v5371_v38  ;;  %v5377_v18 = vmax.f32 %v1092_v48, %v1787_v49  ;;  %v891_v53 = vpop.f32.mrb[40].mxu0  ;;  %v1597_v20 = vpop.f32.mrb[40].mxu1 }
 0x21f   :  { %5891 = vst [vmem:[#allocation14_spill] sm:$0xff] %v5375_v52  ;;  %v1037_v54 = vadd.f32 %v5106_v62, %v891_v53  ;;  %v1732_v8 = vadd.f32 %v1597_v20, %v5106_v62  ;;  %v893_v10 = vpop.f32.mrb[41].mxu0  ;;  %v1599_v56 = vpop.f32.mrb[41].mxu1 }
 0x220   :  { %5892 = vst [vmem:[#allocation15_spill] sm:$0xff] %v5377_v18  ;;  %v1038_v59 = vadd.f32 %v5108_v63, %v893_v10  ;;  %v1733_v3 = vadd.f32 %v1599_v56, %v5108_v63  ;;  %v895_v26 = vpop.f32.mrb[42].mxu0  ;;  %v1601_v29 = vpop.f32.mrb[42].mxu1 }
 0x221   :  { %v1093_v38 = vmax.f32 %v1037_v54, 0.0  ;;  %v1788_v0 = vmax.f32 %v1732_v8, 0.0  ;;  %v1039_v36 = vadd.f32 %v5106_v62, %v895_v26  ;;  %v1734_v44 = vadd.f32 %v1601_v29, %v5106_v62  ;;  %v897_v48 = vpop.f32.mrb[43].mxu0  ;;  %v1603_v49 = vpop.f32.mrb[43].mxu1  ;;  %v5392_v54 = vld [vmem:[%s5875_s0 + $0x48] sm:$0xff]  }
 0x222   :  { %v1094_v18 = vmax.f32 %v1038_v59, 0.0  ;;  %v1789_v53 = vmax.f32 %v1733_v3, 0.0  ;;  %v1040_v20 = vadd.f32 %v5108_v63, %v897_v48  ;;  %v1735_v52 = vadd.f32 %v1603_v49, %v5108_v63  ;;  %v5399_v8 = vld [vmem:[%s5876_s1 + $0x48] sm:$0xff]  }
 0x223   :  { %v5387_v12 = vmax.f32 %v1093_v38, %v1788_v0  ;;  %v1095_v10 = vmax.f32 %v1039_v36, 0.0  ;;  %v1790_v56 = vmax.f32 %v1734_v44, 0.0  ;;  %3815 = vmatmul.mubr.msk.bf16.gmra.mrb[92].mxu0 %vm188_vm1, %v5392_v54  ;;  %3868 = vmatmul.mubr.msk.bf16.gmra.mrb[92].mxu1 %vm188_vm1, %v5399_v8  ;;  %v5895_v3 = vmov 0  }
 0x224   :  { %v5403_v0 = vmax.f32 %v1094_v18, %v1789_v53  ;;  %v1096_v38 = vmax.f32 %v1040_v20, 0.0  ;;  %v1791_v59 = vmax.f32 %v1735_v52, 0.0  ;;  %2223 = vmatprep.mubr.bf16.mxu0 %v5895_v3  ;;  %2995 = vmatprep.mubr.bf16.mxu1 %v5895_v3 }
 0x225   :  { %5893 = vst [vmem:[#allocation16_spill] sm:$0xff] %v5387_v12  ;;  %v5407_v26 = vmax.f32 %v1095_v10, %v1790_v56 }
 0x226   :  { %5894 = vst [vmem:[#allocation17_spill] sm:$0xff] %v5403_v0  ;;  %v5409_v29 = vmax.f32 %v1096_v38, %v1791_v59  ;;  %v901_v36 = vpop.f32.mrb[44].mxu0  ;;  %v1607_v44 = vpop.f32.mrb[44].mxu1 }
 0x227   :  { %5896 = vst [vmem:[#allocation18_spill] sm:$0xff] %v5407_v26  ;;  %v1041_v48 = vadd.f32 %v5106_v62, %v901_v36  ;;  %v1736_v49 = vadd.f32 %v1607_v44, %v5106_v62  ;;  %v903_v12 = vpop.f32.mrb[45].mxu0  ;;  %v1609_v33 = vpop.f32.mrb[45].mxu1 }
 0x228   :  { %5897 = vst [vmem:[#allocation19_spill] sm:$0xff] %v5409_v29  ;;  %v1042_v18 = vadd.f32 %v5108_v63, %v903_v12  ;;  %v1737_v52 = vadd.f32 %v1609_v33, %v5108_v63  ;;  %v905_v53 = vpop.f32.mrb[46].mxu0  ;;  %v1611_v20 = vpop.f32.mrb[46].mxu1 }
 0x229   :  { %v1097_v0 = vmax.f32 %v1041_v48, 0.0  ;;  %v1792_v11 = vmax.f32 %v1736_v49, 0.0  ;;  %v1043_v10 = vadd.f32 %v5106_v62, %v905_v53  ;;  %v1738_v56 = vadd.f32 %v1611_v20, %v5106_v62  ;;  %v907_v38 = vpop.f32.mrb[47].mxu0  ;;  %v1613_v59 = vpop.f32.mrb[47].mxu1  ;;  %v5424_v48 = vld [vmem:[%s5875_s0 + $0x50] sm:$0xff]  }
 0x22a   :  { %v1098_v29 = vmax.f32 %v1042_v18, 0.0  ;;  %v1793_v36 = vmax.f32 %v1737_v52, 0.0  ;;  %v1044_v44 = vadd.f32 %v5108_v63, %v907_v38  ;;  %v1739_v26 = vadd.f32 %v1613_v59, %v5108_v63  ;;  %v5431_v49 = vld [vmem:[%s5876_s1 + $0x50] sm:$0xff]  }
 0x22b   :  { %v5419_v15 = vmax.f32 %v1097_v0, %v1792_v11  ;;  %v1099_v12 = vmax.f32 %v1043_v10, 0.0  ;;  %v1794_v33 = vmax.f32 %v1738_v56, 0.0  ;;  %3816 = vmatmul.mubr.msk.bf16.gmra.mrb[96].mxu0 %vm188_vm1, %v5424_v48  ;;  %3869 = vmatmul.mubr.msk.bf16.gmra.mrb[96].mxu1 %vm188_vm1, %v5431_v49 }
 0x22c   :  { %v5435_v11 = vmax.f32 %v1098_v29, %v1793_v36  ;;  %v1100_v0 = vmax.f32 %v1044_v44, 0.0  ;;  %v1795_v18 = vmax.f32 %v1739_v26, 0.0  ;;  %2233 = vmatprep.mubr.bf16.mxu0 %v5895_v3  ;;  %3005 = vmatprep.mubr.bf16.mxu1 %v5895_v3 }
 0x22d   :  { %5898 = vst [vmem:[#allocation20_spill] sm:$0xff] %v5419_v15  ;;  %v5439_v52 = vmax.f32 %v1099_v12, %v1794_v33 }
 0x22e   :  { %5899 = vst [vmem:[#allocation21_spill] sm:$0xff] %v5435_v11  ;;  %v5441_v53 = vmax.f32 %v1100_v0, %v1795_v18  ;;  %v911_v20 = vpop.f32.mrb[48].mxu0  ;;  %v1617_v10 = vpop.f32.mrb[48].mxu1 }
 0x22f   :  { %5900 = vst [vmem:[#allocation22_spill] sm:$0xff] %v5439_v52  ;;  %v1045_v56 = vadd.f32 %v5106_v62, %v911_v20  ;;  %v1740_v38 = vadd.f32 %v1617_v10, %v5106_v62  ;;  %v913_v59 = vpop.f32.mrb[49].mxu0  ;;  %v1619_v15 = vpop.f32.mrb[49].mxu1 }
 0x230   :  { %5901 = vst [vmem:[#allocation23_spill] sm:$0xff] %v5441_v53  ;;  %v1046_v29 = vadd.f32 %v5108_v63, %v913_v59  ;;  %v1741_v26 = vadd.f32 %v1619_v15, %v5108_v63  ;;  %v915_v36 = vpop.f32.mrb[50].mxu0  ;;  %v1621_v44 = vpop.f32.mrb[50].mxu1 }
 0x231   :  { %v1101_v11 = vmax.f32 %v1045_v56, 0.0  ;;  %v1796_v58 = vmax.f32 %v1740_v38, 0.0  ;;  %v1047_v12 = vadd.f32 %v5106_v62, %v915_v36  ;;  %v1742_v33 = vadd.f32 %v1621_v44, %v5106_v62  ;;  %v917_v0 = vpop.f32.mrb[51].mxu0  ;;  %v1623_v18 = vpop.f32.mrb[51].mxu1  ;;  %v5456_v56 = vld [vmem:[%s5875_s0 + $0x58] sm:$0xff]  }
 0x232   :  { %v1102_v53 = vmax.f32 %v1046_v29, 0.0  ;;  %v1797_v20 = vmax.f32 %v1741_v26, 0.0  ;;  %v1048_v10 = vadd.f32 %v5108_v63, %v917_v0  ;;  %v1743_v52 = vadd.f32 %v1623_v18, %v5108_v63  ;;  %v5463_v38 = vld [vmem:[%s5876_s1 + $0x58] sm:$0xff]  }
 0x233   :  { %v5451_v21 = vmax.f32 %v1101_v11, %v1796_v58  ;;  %v1103_v59 = vmax.f32 %v1047_v12, 0.0  ;;  %v1798_v15 = vmax.f32 %v1742_v33, 0.0  ;;  %3817 = vmatmul.mubr.msk.bf16.gmra.mrb[100].mxu0 %vm188_vm1, %v5456_v56  ;;  %3870 = vmatmul.mubr.msk.bf16.gmra.mrb[100].mxu1 %vm188_vm1, %v5463_v38 }
 0x234   :  { %v5467_v58 = vmax.f32 %v1102_v53, %v1797_v20  ;;  %v1104_v11 = vmax.f32 %v1048_v10, 0.0  ;;  %v1799_v29 = vmax.f32 %v1743_v52, 0.0  ;;  %2243 = vmatprep.mubr.bf16.mxu0 %v5895_v3  ;;  %3015 = vmatprep.mubr.bf16.mxu1 %v5895_v3 }
 0x235   :  { %5902 = vst [vmem:[#allocation24_spill] sm:$0xff] %v5451_v21  ;;  %v5471_v26 = vmax.f32 %v1103_v59, %v1798_v15 }
 0x236   :  { %5903 = vst [vmem:[#allocation25_spill] sm:$0xff] %v5467_v58  ;;  %v5473_v36 = vmax.f32 %v1104_v11, %v1799_v29  ;;  %v921_v44 = vpop.f32.mrb[52].mxu0  ;;  %v1627_v12 = vpop.f32.mrb[52].mxu1 }
 0x237   :  { %5904 = vst [vmem:[#allocation26_spill] sm:$0xff] %v5471_v26  ;;  %v1049_v33 = vadd.f32 %v5106_v62, %v921_v44  ;;  %v1744_v0 = vadd.f32 %v1627_v12, %v5106_v62  ;;  %v923_v18 = vpop.f32.mrb[53].mxu0  ;;  %v1629_v21 = vpop.f32.mrb[53].mxu1 }
 0x238   :  { %5905 = vst [vmem:[#allocation27_spill] sm:$0xff] %v5473_v36  ;;  %v1050_v53 = vadd.f32 %v5108_v63, %v923_v18  ;;  %v1745_v52 = vadd.f32 %v1629_v21, %v5108_v63  ;;  %v925_v20 = vpop.f32.mrb[54].mxu0  ;;  %v1631_v10 = vpop.f32.mrb[54].mxu1 }
 0x239   :  { %v1105_v58 = vmax.f32 %v1049_v33, 0.0  ;;  %v1800_v19 = vmax.f32 %v1744_v0, 0.0  ;;  %v1051_v59 = vadd.f32 %v5106_v62, %v925_v20  ;;  %v1746_v15 = vadd.f32 %v1631_v10, %v5106_v62  ;;  %v927_v11 = vpop.f32.mrb[55].mxu0  ;;  %v1633_v29 = vpop.f32.mrb[55].mxu1  ;;  %v5488_v33 = vld [vmem:[%s5875_s0 + $0x60] sm:$0xff]   ;;  %v5510_v10 = vld [vmem:[%s5875_s0 + $0x68] sm:$0xff]  }
 0x23a   :  { %v1106_v36 = vmax.f32 %v1050_v53, 0.0  ;;  %v1801_v44 = vmax.f32 %v1745_v52, 0.0  ;;  %v1052_v12 = vadd.f32 %v5108_v63, %v927_v11  ;;  %v1747_v26 = vadd.f32 %v1633_v29, %v5108_v63  ;;  %v5495_v0 = vld [vmem:[%s5876_s1 + $0x60] sm:$0xff]   ;;  %v4480_v11 = vld [vmem:[%s5876_s1 + $0x10] sm:$0xff]   ;;  %v4481_v29 = vld [vmem:[%s5875_s0 + $0x18] sm:$0xff]  }
 0x23b   :  { %v5483_v17 = vmax.f32 %v1105_v58, %v1800_v19  ;;  %v1107_v18 = vmax.f32 %v1051_v59, 0.0  ;;  %v1802_v21 = vmax.f32 %v1746_v15, 0.0  ;;  %3818 = vmatmul.mubr.msk.bf16.gmra.mrb[104].mxu0 %vm188_vm1, %v5488_v33  ;;  %3871 = vmatmul.mubr.msk.bf16.gmra.mrb[104].mxu1 %vm188_vm1, %v5495_v0  ;;  %v4478_v59 = vld [vmem:[%s5876_s1 + $0x8] sm:$0xff]   ;;  %v4479_v15 = vld [vmem:[%s5875_s0 + $0x10] sm:$0xff]  }
 0x23c   :  { %v5499_v19 = vmax.f32 %v1106_v36, %v1801_v44  ;;  %v1108_v58 = vmax.f32 %v1052_v12, 0.0  ;;  %v1803_v53 = vmax.f32 %v1747_v26, 0.0  ;;  %2253 = vmatprep.mubr.bf16.mxu0 %v5895_v3  ;;  %3025 = vmatprep.mubr.bf16.mxu1 %v5895_v3  ;;  %v4476_v26 = vld [vmem:[%s5876_s1 + $0x68] sm:$0xff]   ;;  %v4482_v44 = vld [vmem:[%s5876_s1 + $0x18] sm:$0xff]   ;;  %v4483_v12 = vld [vmem:[%s5875_s0 + $0x20] sm:$0xff]  }
 0x23d   :  { %v5503_v52 = vmax.f32 %v1107_v18, %v1802_v21  ;;  %v4477_v36 = vld [vmem:[%s5875_s0 + $0x8] sm:$0xff]   ;;  %v4484_v18 = vld [vmem:[%s5876_s1 + $0x20] sm:$0xff]  }
 0x23e   :  { %v5505_v20 = vmax.f32 %v1108_v58, %v1803_v53  ;;  %v4485_v21 = vld [vmem:[%s5876_s1 + $0x28] sm:$0xff]  }
 0x243   :  { %3819 = vmatmul.mubr.msk.bf16.gmra.mrb[108].mxu0 %vm188_vm1, %v5510_v10  ;;  %3872 = vmatmul.mubr.msk.bf16.gmra.mrb[108].mxu1 %vm188_vm1, %v4476_v26 }
 0x244   :  { %2325 = vmatprep.mubr.bf16.mxu0 %v5895_v3  ;;  %3068 = vmatprep.mubr.bf16.mxu1 %v5895_v3 }
 0x24b   :  { %3829 = vmatmul.mubr.msk.bf16.vlgmr.msra.gmra.mrb[56].mxu0 %vm188_vm1, %v4477_v36  ;;  %3874 = vmatmul.mubr.msk.bf16.vlgmr.msra.gmra.mrb[56].mxu1 %vm188_vm1, %v4478_v59 }
 0x24c   :  { %2335 = vmatprep.mubr.bf16.mxu0 %v5895_v3  ;;  %3078 = vmatprep.mubr.bf16.mxu1 %v5895_v3 }
 0x253   :  { %3830 = vmatmul.mubr.msk.bf16.gmra.mrb[60].mxu0 %vm188_vm1, %v4479_v15  ;;  %3875 = vmatmul.mubr.msk.bf16.gmra.mrb[60].mxu1 %vm188_vm1, %v4480_v11 }
 0x254   :  { %2345 = vmatprep.mubr.bf16.mxu0 %v5895_v3  ;;  %3088 = vmatprep.mubr.bf16.mxu1 %v5895_v3 }
 0x25b   :  { %3831 = vmatmul.mubr.msk.bf16.gmra.mrb[64].mxu0 %vm188_vm1, %v4481_v29  ;;  %3876 = vmatmul.mubr.msk.bf16.gmra.mrb[64].mxu1 %vm188_vm1, %v4482_v44 }
 0x25c   :  { %2355 = vmatprep.mubr.bf16.mxu0 %v5895_v3  ;;  %3098 = vmatprep.mubr.bf16.mxu1 %v5895_v3 }
 0x263   :  { %3832 = vmatmul.mubr.msk.bf16.gmra.mrb[68].mxu0 %vm188_vm1, %v4483_v12  ;;  %3877 = vmatmul.mubr.msk.bf16.gmra.mrb[68].mxu1 %vm188_vm1, %v4484_v18 }
 0x264   :  { %2365 = vmatprep.mubr.bf16.mxu0 %v5895_v3  ;;  %3108 = vmatprep.mubr.bf16.mxu1 %v5895_v3 }
 0x26b   :  { %3833 = vmatmul.mubr.msk.bf16.gmra.mrb[72].mxu0 %vm188_vm1, %v5269_v23  ;;  %3878 = vmatmul.mubr.msk.bf16.gmra.mrb[72].mxu1 %vm188_vm1, %v4485_v21  ;;  %v4486_v23 = vld [vmem:[%s5875_s0 + $0x70] sm:$0xff]  }
 0x26c   :  { %2375 = vmatprep.mubr.bf16.mxu0 %v5895_v3  ;;  %3118 = vmatprep.mubr.bf16.mxu1 %v5895_v3 }
 0x273   :  { %3834 = vmatmul.mubr.msk.bf16.gmra.mrb[76].mxu0 %vm188_vm1, %v5296_v14  ;;  %3879 = vmatmul.mubr.msk.bf16.gmra.mrb[76].mxu1 %vm188_vm1, %v5303_v7  ;;  %v4487_v14 = vld [vmem:[%s5876_s1 + $0x70] sm:$0xff]  }
 0x274   :  { %2385 = vmatprep.mubr.bf16.mxu0 %v5895_v3  ;;  %3128 = vmatprep.mubr.bf16.mxu1 %v5895_v3 }
 0x27b   :  { %3835 = vmatmul.mubr.msk.bf16.gmra.mrb[80].mxu0 %vm188_vm1, %v5328_v4  ;;  %3880 = vmatmul.mubr.msk.bf16.gmra.mrb[80].mxu1 %vm188_vm1, %v5335_v9 }
 0x27c   :  { %2395 = vmatprep.mubr.bf16.mxu0 %v5895_v3  ;;  %3138 = vmatprep.mubr.bf16.mxu1 %v5895_v3 }
 0x283   :  { %3836 = vmatmul.mubr.msk.bf16.gmra.mrb[84].mxu0 %vm188_vm1, %v5360_v42  ;;  %3881 = vmatmul.mubr.msk.bf16.gmra.mrb[84].mxu1 %vm188_vm1, %v5367_v22 }
 0x284   :  { %2405 = vmatprep.mubr.bf16.mxu0 %v5895_v3  ;;  %3148 = vmatprep.mubr.bf16.mxu1 %v5895_v3 }
 0x28b   :  { %3837 = vmatmul.mubr.msk.bf16.gmra.mrb[88].mxu0 %vm188_vm1, %v5392_v54  ;;  %3882 = vmatmul.mubr.msk.bf16.gmra.mrb[88].mxu1 %vm188_vm1, %v5399_v8 }
 0x28c   :  { %2415 = vmatprep.mubr.bf16.mxu0 %v5895_v3  ;;  %3158 = vmatprep.mubr.bf16.mxu1 %v5895_v3 }
 0x293   :  { %3838 = vmatmul.mubr.msk.bf16.gmra.mrb[92].mxu0 %vm188_vm1, %v5424_v48  ;;  %3883 = vmatmul.mubr.msk.bf16.gmra.mrb[92].mxu1 %vm188_vm1, %v5431_v49 }
 0x294   :  { %2425 = vmatprep.mubr.bf16.mxu0 %v5895_v3  ;;  %3168 = vmatprep.mubr.bf16.mxu1 %v5895_v3 }
 0x29b   :  { %3839 = vmatmul.mubr.msk.bf16.gmra.mrb[96].mxu0 %vm188_vm1, %v5456_v56  ;;  %3884 = vmatmul.mubr.msk.bf16.gmra.mrb[96].mxu1 %vm188_vm1, %v5463_v38 }
 0x29c   :  { %2435 = vmatprep.mubr.bf16.mxu0 %v5895_v3  ;;  %3178 = vmatprep.mubr.bf16.mxu1 %v5895_v3 }
 0x2a3   :  { %3840 = vmatmul.mubr.msk.bf16.gmra.mrb[100].mxu0 %vm188_vm1, %v5488_v33  ;;  %3885 = vmatmul.mubr.msk.bf16.gmra.mrb[100].mxu1 %vm188_vm1, %v5495_v0 }
 0x2a4   :  { %2445 = vmatprep.mubr.bf16.mxu0 %v5895_v3  ;;  %3188 = vmatprep.mubr.bf16.mxu1 %v5895_v3 }
 0x2ab   :  { %3841 = vmatmul.mubr.msk.bf16.gmra.mrb[104].mxu0 %vm188_vm1, %v5510_v10  ;;  %3886 = vmatmul.mubr.msk.bf16.gmra.mrb[104].mxu1 %vm188_vm1, %v4476_v26 }
 0x2ac   :  { %2455 = vmatprep.mubr.bf16.mxu0 %v5895_v3  ;;  %3198 = vmatprep.mubr.bf16.mxu1 %v5895_v3 }
 0x2b3   :  { %3842 = vmatmul.mubr.msk.bf16.gmra.mrb[108].mxu0 %vm188_vm1, %v4486_v23  ;;  %3887 = vmatmul.mubr.msk.bf16.gmra.mrb[108].mxu1 %vm188_vm1, %v4487_v14 }
 0x31e   :  { %v2327_v7 = vpop.f32.mrb[56].mxu0  ;;  %v3070_v4 = vpop.f32.mrb[56].mxu1 }
 0x31f   :  { %v2522_v9 = vadd.f32 %v2327_v7, %v5106_v62  ;;  %v3265_v42 = vadd.f32 %v3070_v4, %v5106_v62  ;;  %v2329_v22 = vpop.f32.mrb[57].mxu0  ;;  %v3072_v54 = vpop.f32.mrb[57].mxu1 }
 0x320   :  { %v2523_v8 = vadd.f32 %v2329_v22, %v5108_v63  ;;  %v3266_v3 = vadd.f32 %v3072_v54, %v5108_v63  ;;  %v2331_v48 = vpop.f32.mrb[58].mxu0  ;;  %v3074_v49 = vpop.f32.mrb[58].mxu1 }
 0x321   :  { %v2578_v56 = vmax.f32 %v2522_v9, 0.0  ;;  %v2524_v38 = vadd.f32 %v2331_v48, %v5106_v62  ;;  %v3267_v33 = vadd.f32 %v3074_v49, %v5106_v62  ;;  %v2333_v0 = vpop.f32.mrb[59].mxu0  ;;  %v3076_v58 = vpop.f32.mrb[59].mxu1  ;;  %v3321_v59 = vmax.f32 %v3265_v42, 0.0 }
 0x322   :  { %v2579_v53 = vmax.f32 %v2523_v8, 0.0  ;;  %v2525_v10 = vadd.f32 %v2333_v0, %v5108_v63  ;;  %v3268_v26 = vadd.f32 %v3076_v58, %v5108_v63  ;;  %v3322_v29 = vmax.f32 %v3266_v3, 0.0 }
 0x323   :  { %v2634_v36 = vmax.f32 %v5120_v31, %v2578_v56  ;;  %v2580_v15 = vmax.f32 %v2524_v38, 0.0  ;;  %v3323_v21 = vmax.f32 %v3267_v33, 0.0 }
 0x324   :  { %v2635_v11 = vmax.f32 %v5126_v34, %v2579_v53  ;;  %v2581_v44 = vmax.f32 %v2525_v10, 0.0  ;;  %v3324_v7 = vmax.f32 %v3268_v26, 0.0 }
 0x325   :  { %v3377_v12 = vmax.f32 %v2634_v36, %v3321_v59  ;;  %v2636_v18 = vmax.f32 %v5130_v37, %v2580_v15 }
 0x326   :  { %v3378_v23 = vmax.f32 %v2635_v11, %v3322_v29  ;;  %v2637_v14 = vmax.f32 %v5132_v41, %v2581_v44  ;;  %v2337_v4 = vpop.f32.mrb[60].mxu0  ;;  %v3080_v9 = vpop.f32.mrb[60].mxu1 }
 0x327   :  { %v3379_v22 = vmax.f32 %v2636_v18, %v3323_v21  ;;  %v2526_v54 = vadd.f32 %v2337_v4, %v5106_v62  ;;  %v3269_v31 = vadd.f32 %v3080_v9, %v5106_v62  ;;  %v2339_v42 = vpop.f32.mrb[61].mxu0  ;;  %v3082_v8 = vpop.f32.mrb[61].mxu1 }
 0x328   :  { %v3916_v34 = vpack.c.bf16 %v3378_v23, %v3377_v12  ;;  %v3380_v3 = vmax.f32 %v2637_v14, %v3324_v7  ;;  %v2527_v48 = vadd.f32 %v2339_v42, %v5108_v63  ;;  %v3270_v37 = vadd.f32 %v3082_v8, %v5108_v63  ;;  %v2341_v49 = vpop.f32.mrb[62].mxu0  ;;  %v3084_v56 = vpop.f32.mrb[62].mxu1 }
 0x329   :  { %v2582_v38 = vmax.f32 %v2526_v54, 0.0  ;;  %v2528_v41 = vadd.f32 %v2341_v49, %v5106_v62  ;;  %v3271_v33 = vadd.f32 %v3084_v56, %v5106_v62  ;;  %v2343_v0 = vpop.f32.mrb[63].mxu0  ;;  %v3086_v58 = vpop.f32.mrb[63].mxu1  ;;  %v3325_v59 = vmax.f32 %v3269_v31, 0.0 }
 0x32a   :  { %3601 = vst [vmem:[%s5879_s4] sm:$0xff] %v3916_v34  ;;  %v3917_v53 = vpack.c.bf16 %v3380_v3, %v3379_v22  ;;  %v2583_v10 = vmax.f32 %v2527_v48, 0.0  ;;  %v2529_v26 = vadd.f32 %v2343_v0, %v5108_v63  ;;  %v3272_v11 = vadd.f32 %v3086_v58, %v5108_v63 }
 0x32b   :  { %v2638_v36 = vmax.f32 %v5151_v2, %v2582_v38  ;;  %v2584_v15 = vmax.f32 %v2528_v41, 0.0  ;;  %v3326_v44 = vmax.f32 %v3270_v37, 0.0  ;;  %v3327_v23 = vmax.f32 %v3271_v33, 0.0 }
 0x32c   :  { %3602 = vst [vmem:[%s5879_s4 + $0x8] sm:$0xff] %v3917_v53  ;;  %v2639_v29 = vmax.f32 %v5157_v5, %v2583_v10  ;;  %v2585_v12 = vmax.f32 %v2529_v26, 0.0  ;;  %v3328_v2 = vmax.f32 %v3272_v11, 0.0 }
 0x32d   :  { %v3381_v18 = vmax.f32 %v2638_v36, %v3325_v59  ;;  %v2640_v21 = vmax.f32 %v5159_v13, %v2584_v15 }
 0x32e   :  { %v3382_v14 = vmax.f32 %v2639_v29, %v3326_v44  ;;  %v2641_v7 = vmax.f32 %v5164_v16, %v2585_v12  ;;  %v2347_v4 = vpop.f32.mrb[64].mxu0  ;;  %v3090_v9 = vpop.f32.mrb[64].mxu1 }
 0x32f   :  { %v3383_v22 = vmax.f32 %v2640_v21, %v3327_v23  ;;  %v2530_v54 = vadd.f32 %v2347_v4, %v5106_v62  ;;  %v3273_v31 = vadd.f32 %v3090_v9, %v5106_v62  ;;  %v2349_v42 = vpop.f32.mrb[65].mxu0  ;;  %v3092_v8 = vpop.f32.mrb[65].mxu1 }
 0x330   :  { %v3918_v5 = vpack.c.bf16 %v3382_v14, %v3381_v18  ;;  %v3384_v34 = vmax.f32 %v2641_v7, %v3328_v2  ;;  %v2531_v3 = vadd.f32 %v2349_v42, %v5108_v63  ;;  %v3274_v13 = vadd.f32 %v3092_v8, %v5108_v63  ;;  %v2351_v48 = vpop.f32.mrb[66].mxu0  ;;  %v3094_v37 = vpop.f32.mrb[66].mxu1 }
 0x331   :  { %v2586_v49 = vmax.f32 %v2530_v54, 0.0  ;;  %v2532_v16 = vadd.f32 %v2351_v48, %v5106_v62  ;;  %v3275_v56 = vadd.f32 %v3094_v37, %v5106_v62  ;;  %v2353_v38 = vpop.f32.mrb[67].mxu0  ;;  %v3096_v41 = vpop.f32.mrb[67].mxu1  ;;  %v3329_v10 = vmax.f32 %v3273_v31, 0.0 }
 0x332   :  { %3603 = vst [vmem:[%s5879_s4 + $0x10] sm:$0xff] %v3918_v5  ;;  %v3919_v33 = vpack.c.bf16 %v3384_v34, %v3383_v22  ;;  %v2587_v0 = vmax.f32 %v2531_v3, 0.0  ;;  %v2533_v58 = vadd.f32 %v2353_v38, %v5108_v63  ;;  %v3276_v36 = vadd.f32 %v3096_v41, %v5108_v63 }
 0x333   :  { %v2642_v53 = vmax.f32 %v5176_v45, %v2586_v49  ;;  %v2588_v26 = vmax.f32 %v2532_v16, 0.0  ;;  %v3330_v15 = vmax.f32 %v3274_v13, 0.0  ;;  %v3331_v12 = vmax.f32 %v3275_v56, 0.0 }
 0x334   :  { %3604 = vst [vmem:[%s5879_s4 + $0x18] sm:$0xff] %v3919_v33  ;;  %v2643_v59 = vmax.f32 %v5182_v47, %v2587_v0  ;;  %v2589_v11 = vmax.f32 %v2533_v58, 0.0  ;;  %v3332_v45 = vmax.f32 %v3276_v36, 0.0 }
 0x335   :  { %v3385_v29 = vmax.f32 %v2642_v53, %v3329_v10  ;;  %v2644_v44 = vmax.f32 %v5186_v50, %v2588_v26 }
 0x336   :  { %v3386_v18 = vmax.f32 %v2643_v59, %v3330_v15  ;;  %v2645_v21 = vmax.f32 %v5188_v51, %v2589_v11  ;;  %v2357_v23 = vpop.f32.mrb[68].mxu0  ;;  %v3100_v14 = vpop.f32.mrb[68].mxu1 }
 0x337   :  { %v3387_v7 = vmax.f32 %v2644_v44, %v3331_v12  ;;  %v2534_v2 = vadd.f32 %v2357_v23, %v5106_v62  ;;  %v3277_v4 = vadd.f32 %v3100_v14, %v5106_v62  ;;  %v2359_v9 = vpop.f32.mrb[69].mxu0  ;;  %v3102_v22 = vpop.f32.mrb[69].mxu1 }
 0x338   :  { %v3920_v47 = vpack.c.bf16 %v3386_v18, %v3385_v29  ;;  %v3388_v54 = vmax.f32 %v2645_v21, %v3332_v45  ;;  %v2535_v31 = vadd.f32 %v2359_v9, %v5108_v63  ;;  %v3278_v50 = vadd.f32 %v3102_v22, %v5108_v63  ;;  %v2361_v42 = vpop.f32.mrb[70].mxu0  ;;  %v3104_v8 = vpop.f32.mrb[70].mxu1 }
 0x339   :  { %v2590_v5 = vmax.f32 %v2534_v2, 0.0  ;;  %v2536_v51 = vadd.f32 %v2361_v42, %v5106_v62  ;;  %v3279_v34 = vadd.f32 %v3104_v8, %v5106_v62  ;;  %v2363_v3 = vpop.f32.mrb[71].mxu0  ;;  %v3106_v13 = vpop.f32.mrb[71].mxu1  ;;  %v3333_v56 = vmax.f32 %v3277_v4, 0.0 }
 0x33a   :  { %3605 = vst [vmem:[%s5879_s4 + $0x20] sm:$0xff] %v3920_v47  ;;  %v3921_v48 = vpack.c.bf16 %v3388_v54, %v3387_v7  ;;  %v2591_v37 = vmax.f32 %v2535_v31, 0.0  ;;  %v2537_v49 = vadd.f32 %v2363_v3, %v5108_v63  ;;  %v3280_v41 = vadd.f32 %v3106_v13, %v5108_v63 }
 0x33b   :  { %v2646_v16 = vmax.f32 %v5198_v6, %v2590_v5  ;;  %v2592_v38 = vmax.f32 %v2536_v51, 0.0  ;;  %v3334_v0 = vmax.f32 %v3278_v50, 0.0  ;;  %v3335_v26 = vmax.f32 %v3279_v34, 0.0 }
 0x33c   :  { %3606 = vst [vmem:[%s5879_s4 + $0x28] sm:$0xff] %v3921_v48  ;;  %v2647_v33 = vmax.f32 %v5204_v24, %v2591_v37  ;;  %v2593_v58 = vmax.f32 %v2537_v49, 0.0  ;;  %v3336_v6 = vmax.f32 %v3280_v41, 0.0 }
 0x33d   :  { %v3389_v53 = vmax.f32 %v2646_v16, %v3333_v56  ;;  %v2648_v10 = vmax.f32 %v5208_v27, %v2592_v38 }
 0x33e   :  { %v3390_v36 = vmax.f32 %v2647_v33, %v3334_v0  ;;  %v2649_v59 = vmax.f32 %v5210_v28, %v2593_v58  ;;  %v2367_v15 = vpop.f32.mrb[72].mxu0  ;;  %v3110_v11 = vpop.f32.mrb[72].mxu1 }
 0x33f   :  { %v3391_v29 = vmax.f32 %v2648_v10, %v3335_v26  ;;  %v2538_v44 = vadd.f32 %v2367_v15, %v5106_v62  ;;  %v3281_v12 = vadd.f32 %v3110_v11, %v5106_v62  ;;  %v2369_v18 = vpop.f32.mrb[73].mxu0  ;;  %v3112_v21 = vpop.f32.mrb[73].mxu1 }
 0x340   :  { %v3922_v24 = vpack.c.bf16 %v3390_v36, %v3389_v53  ;;  %v3392_v45 = vmax.f32 %v2649_v59, %v3336_v6  ;;  %v2539_v23 = vadd.f32 %v2369_v18, %v5108_v63  ;;  %v3282_v27 = vadd.f32 %v3112_v21, %v5108_v63  ;;  %v2371_v14 = vpop.f32.mrb[74].mxu0  ;;  %v3114_v7 = vpop.f32.mrb[74].mxu1 }
 0x341   :  { %v2594_v2 = vmax.f32 %v2538_v44, 0.0  ;;  %v2540_v28 = vadd.f32 %v2371_v14, %v5106_v62  ;;  %v3283_v4 = vadd.f32 %v3114_v7, %v5106_v62  ;;  %v2373_v9 = vpop.f32.mrb[75].mxu0  ;;  %v3116_v22 = vpop.f32.mrb[75].mxu1  ;;  %v3337_v42 = vmax.f32 %v3281_v12, 0.0 }
 0x342   :  { %3607 = vst [vmem:[%s5879_s4 + $0x30] sm:$0xff] %v3922_v24  ;;  %v3923_v47 = vpack.c.bf16 %v3392_v45, %v3391_v29  ;;  %v2595_v54 = vmax.f32 %v2539_v23, 0.0  ;;  %v2541_v31 = vadd.f32 %v2373_v9, %v5108_v63  ;;  %v3284_v5 = vadd.f32 %v3116_v22, %v5108_v63 }
 0x343   :  { %v2650_v50 = vmax.f32 %v5220_v55, %v2594_v2  ;;  %v2596_v8 = vmax.f32 %v2540_v28, 0.0  ;;  %v3338_v34 = vmax.f32 %v3282_v27, 0.0  ;;  %v3339_v37 = vmax.f32 %v3283_v4, 0.0 }
 0x344   :  { %3608 = vst [vmem:[%s5879_s4 + $0x38] sm:$0xff] %v3923_v47  ;;  %v2651_v51 = vmax.f32 %v5226_v57, %v2595_v54  ;;  %v2597_v3 = vmax.f32 %v2541_v31, 0.0  ;;  %v3340_v55 = vmax.f32 %v3284_v5, 0.0 }
 0x345   :  { %v3393_v13 = vmax.f32 %v2650_v50, %v3337_v42  ;;  %v2652_v48 = vmax.f32 %v5230_v60, %v2596_v8 }
 0x346   :  { %v3394_v49 = vmax.f32 %v2651_v51, %v3338_v34  ;;  %v2653_v16 = vmax.f32 %v5232_v61, %v2597_v3  ;;  %v2377_v56 = vpop.f32.mrb[76].mxu0  ;;  %v3120_v38 = vpop.f32.mrb[76].mxu1 }
 0x347   :  { %v3395_v41 = vmax.f32 %v2652_v48, %v3339_v37  ;;  %v2542_v33 = vadd.f32 %v2377_v56, %v5106_v62  ;;  %v3285_v0 = vadd.f32 %v3120_v38, %v5106_v62  ;;  %v2379_v58 = vpop.f32.mrb[77].mxu0  ;;  %v3122_v53 = vpop.f32.mrb[77].mxu1 }
 0x348   :  { %v3924_v57 = vpack.c.bf16 %v3394_v49, %v3393_v13  ;;  %v3396_v10 = vmax.f32 %v2653_v16, %v3340_v55  ;;  %v2543_v26 = vadd.f32 %v2379_v58, %v5108_v63  ;;  %v3286_v60 = vadd.f32 %v3122_v53, %v5108_v63  ;;  %v2381_v36 = vpop.f32.mrb[78].mxu0  ;;  %v3124_v59 = vpop.f32.mrb[78].mxu1 }
 0x349   :  { %v2598_v6 = vmax.f32 %v2542_v33, 0.0  ;;  %v2544_v61 = vadd.f32 %v2381_v36, %v5106_v62  ;;  %v3287_v15 = vadd.f32 %v3124_v59, %v5106_v62  ;;  %v2383_v11 = vpop.f32.mrb[79].mxu0  ;;  %v3126_v29 = vpop.f32.mrb[79].mxu1  ;;  %v3341_v24 = vmax.f32 %v3285_v0, 0.0 }
 0x34a   :  { %3609 = vst [vmem:[%s5879_s4 + $0x40] sm:$0xff] %v3924_v57  ;;  %v3925_v44 = vpack.c.bf16 %v3396_v10, %v3395_v41  ;;  %v2599_v12 = vmax.f32 %v2543_v26, 0.0  ;;  %v2545_v18 = vadd.f32 %v2383_v11, %v5108_v63  ;;  %v3288_v23 = vadd.f32 %v3126_v29, %v5108_v63 }
 0x34b   :  { %v2654_v21 = vmax.f32 %v5242_v35, %v2598_v6  ;;  %v2600_v45 = vmax.f32 %v2544_v61, 0.0  ;;  %v3342_v14 = vmax.f32 %v3286_v60, 0.0  ;;  %v3343_v4 = vmax.f32 %v3287_v15, 0.0 }
 0x34c   :  { %3610 = vst [vmem:[%s5879_s4 + $0x48] sm:$0xff] %v3925_v44  ;;  %v2655_v27 = vmax.f32 %v5248_v43, %v2599_v12  ;;  %v2601_v7 = vmax.f32 %v2545_v18, 0.0  ;;  %v3344_v35 = vmax.f32 %v3288_v23, 0.0 }
 0x34d   :  { %v3397_v2 = vmax.f32 %v2654_v21, %v3341_v24  ;;  %v2656_v28 = vmax.f32 %v5252_v39, %v2600_v45 }
 0x34e   :  { %v3398_v9 = vmax.f32 %v2655_v27, %v3342_v14  ;;  %v2657_v22 = vmax.f32 %v5254_v46, %v2601_v7  ;;  %v2387_v47 = vpop.f32.mrb[80].mxu0  ;;  %v3130_v54 = vpop.f32.mrb[80].mxu1 }
 0x34f   :  { %v3399_v31 = vmax.f32 %v2656_v28, %v3343_v4  ;;  %v2546_v50 = vadd.f32 %v2387_v47, %v5106_v62  ;;  %v3289_v42 = vadd.f32 %v3130_v54, %v5106_v62  ;;  %v2389_v8 = vpop.f32.mrb[81].mxu0  ;;  %v3132_v5 = vpop.f32.mrb[81].mxu1 }
 0x350   :  { %v3926_v43 = vpack.c.bf16 %v3398_v9, %v3397_v2  ;;  %v3400_v51 = vmax.f32 %v2657_v22, %v3344_v35  ;;  %v2547_v34 = vadd.f32 %v2389_v8, %v5108_v63  ;;  %v3290_v39 = vadd.f32 %v3132_v5, %v5108_v63  ;;  %v2391_v3 = vpop.f32.mrb[82].mxu0  ;;  %v3134_v13 = vpop.f32.mrb[82].mxu1 }
 0x351   :  { %v2602_v48 = vmax.f32 %v2546_v50, 0.0  ;;  %v2548_v46 = vadd.f32 %v2391_v3, %v5106_v62  ;;  %v3291_v37 = vadd.f32 %v3134_v13, %v5106_v62  ;;  %v2393_v49 = vpop.f32.mrb[83].mxu0  ;;  %v3136_v16 = vpop.f32.mrb[83].mxu1  ;;  %v3345_v33 = vmax.f32 %v3289_v42, 0.0  ;;  %v5908_v3 = vld [vmem:[#allocation7_spill] sm:$0xff] }
 0x352   :  { %3611 = vst [vmem:[%s5879_s4 + $0x50] sm:$0xff] %v3926_v43  ;;  %v3927_v55 = vpack.c.bf16 %v3400_v51, %v3399_v31  ;;  %v2603_v56 = vmax.f32 %v2547_v34, 0.0  ;;  %v2549_v38 = vadd.f32 %v2393_v49, %v5108_v63  ;;  %v3292_v58 = vadd.f32 %v3136_v16, %v5108_v63  ;;  %v5906_v31 = vld [vmem:[#allocation5_spill] sm:$0xff]  ;;  %v5907_v43 = vld [vmem:[#allocation6_spill] sm:$0xff] }
 0x353   :  { %v2658_v41 = vmax.f32 %v5264_v40, %v2602_v48  ;;  %v2604_v0 = vmax.f32 %v2548_v46, 0.0  ;;  %v3346_v57 = vmax.f32 %v3290_v39, 0.0  ;;  %v3347_v36 = vmax.f32 %v3291_v37, 0.0 }
 0x354   :  { %3612 = vst [vmem:[%s5879_s4 + $0x58] sm:$0xff] %v3927_v55  ;;  %v2659_v53 = vmax.f32 %v5275_v25, %v2603_v56  ;;  %v2605_v10 = vmax.f32 %v2549_v38, 0.0  ;;  %v3348_v40 = vmax.f32 %v3292_v58, 0.0 }
 0x355   :  { %v3401_v26 = vmax.f32 %v2658_v41, %v3345_v33  ;;  %v2660_v60 = vmax.f32 %v5279_v30, %v2604_v0 }
 0x356   :  { %v3402_v59 = vmax.f32 %v2659_v53, %v3346_v57  ;;  %v2661_v6 = vmax.f32 %v5281_v32, %v2605_v10  ;;  %v2397_v61 = vpop.f32.mrb[84].mxu0  ;;  %v3140_v15 = vpop.f32.mrb[84].mxu1 }
 0x357   :  { %v3403_v11 = vmax.f32 %v2660_v60, %v3347_v36  ;;  %v2550_v29 = vadd.f32 %v2397_v61, %v5106_v62  ;;  %v3293_v44 = vadd.f32 %v3140_v15, %v5106_v62  ;;  %v2399_v12 = vpop.f32.mrb[85].mxu0  ;;  %v3142_v18 = vpop.f32.mrb[85].mxu1  ;;  %v5909_v61 = vld [vmem:[#allocation8_spill] sm:$0xff] }
 0x358   :  { %v3928_v25 = vpack.c.bf16 %v3402_v59, %v3401_v26  ;;  %v3404_v21 = vmax.f32 %v2661_v6, %v3348_v40  ;;  %v2551_v24 = vadd.f32 %v2399_v12, %v5108_v63  ;;  %v3294_v30 = vadd.f32 %v3142_v18, %v5108_v63  ;;  %v2401_v45 = vpop.f32.mrb[86].mxu0  ;;  %v3144_v23 = vpop.f32.mrb[86].mxu1  ;;  %v5910_v12 = vld [vmem:[#allocation9_spill] sm:$0xff] }
 0x359   :  { %v2606_v27 = vmax.f32 %v2550_v29, 0.0  ;;  %v2552_v32 = vadd.f32 %v2401_v45, %v5106_v62  ;;  %v3295_v14 = vadd.f32 %v3144_v23, %v5106_v62  ;;  %v2403_v7 = vpop.f32.mrb[87].mxu0  ;;  %v3146_v2 = vpop.f32.mrb[87].mxu1  ;;  %v3349_v35 = vmax.f32 %v3293_v44, 0.0 }
 0x35a   :  { %3613 = vst [vmem:[%s5879_s4 + $0x60] sm:$0xff] %v3928_v25  ;;  %v3929_v28 = vpack.c.bf16 %v3404_v21, %v3403_v11  ;;  %v2607_v4 = vmax.f32 %v2551_v24, 0.0  ;;  %v2553_v9 = vadd.f32 %v2403_v7, %v5108_v63  ;;  %v3296_v54 = vadd.f32 %v3146_v2, %v5108_v63 }
 0x35b   :  { %v2662_v22 = vmax.f32 %v5291_v1, %v2606_v27  ;;  %v2608_v47 = vmax.f32 %v2552_v32, 0.0  ;;  %v3350_v42 = vmax.f32 %v3294_v30, 0.0  ;;  %v3351_v34 = vmax.f32 %v3295_v14, 0.0  ;;  %v5911_v30 = vld [vmem:[#allocation10_spill] sm:$0xff]  ;;  %v5912_v32 = vld [vmem:[#allocation11_spill] sm:$0xff] }
 0x35c   :  { %3614 = vst [vmem:[%s5879_s4 + $0x68] sm:$0xff] %v3929_v28  ;;  %v2663_v50 = vmax.f32 %v5906_v31, %v2607_v4  ;;  %v2609_v8 = vmax.f32 %v2553_v9, 0.0  ;;  %v3352_v1 = vmax.f32 %v3296_v54, 0.0 }
 0x35d   :  { %v3405_v5 = vmax.f32 %v2662_v22, %v3349_v35  ;;  %v2664_v51 = vmax.f32 %v5907_v43, %v2608_v47 }
 0x35e   :  { %v3406_v39 = vmax.f32 %v2663_v50, %v3350_v42  ;;  %v2665_v13 = vmax.f32 %v5908_v3, %v2609_v8  ;;  %v2407_v48 = vpop.f32.mrb[88].mxu0  ;;  %v3150_v46 = vpop.f32.mrb[88].mxu1 }
 0x35f   :  { %v3407_v37 = vmax.f32 %v2664_v51, %v3351_v34  ;;  %v2554_v49 = vadd.f32 %v2407_v48, %v5106_v62  ;;  %v3297_v16 = vadd.f32 %v3150_v46, %v5106_v62  ;;  %v2409_v55 = vpop.f32.mrb[89].mxu0  ;;  %v3152_v56 = vpop.f32.mrb[89].mxu1  ;;  %v5913_v46 = vld [vmem:[#allocation12_spill] sm:$0xff] }
 0x360   :  { %v3930_v38 = vpack.c.bf16 %v3406_v39, %v3405_v5  ;;  %v3408_v41 = vmax.f32 %v2665_v13, %v3352_v1  ;;  %v2555_v33 = vadd.f32 %v2409_v55, %v5108_v63  ;;  %v3298_v0 = vadd.f32 %v3152_v56, %v5108_v63  ;;  %v2411_v58 = vpop.f32.mrb[90].mxu0  ;;  %v3154_v53 = vpop.f32.mrb[90].mxu1  ;;  %v5914_v56 = vld [vmem:[#allocation13_spill] sm:$0xff] }
 0x361   :  { %v2610_v57 = vmax.f32 %v2554_v49, 0.0  ;;  %v2556_v10 = vadd.f32 %v2411_v58, %v5106_v62  ;;  %v3299_v26 = vadd.f32 %v3154_v53, %v5106_v62  ;;  %v2413_v60 = vpop.f32.mrb[91].mxu0  ;;  %v3156_v36 = vpop.f32.mrb[91].mxu1  ;;  %v3353_v11 = vmax.f32 %v3297_v16, 0.0  ;;  %v5915_v58 = vld [vmem:[#allocation14_spill] sm:$0xff] }
 0x362   :  { %3615 = vst [vmem:[%s5879_s4 + $0x70] sm:$0xff] %v3930_v38  ;;  %v3931_v59 = vpack.c.bf16 %v3408_v41, %v3407_v37  ;;  %v2611_v6 = vmax.f32 %v2555_v33, 0.0  ;;  %v2557_v40 = vadd.f32 %v2413_v60, %v5108_v63  ;;  %v3300_v44 = vadd.f32 %v3156_v36, %v5108_v63 }
 0x363   :  { %v2666_v15 = vmax.f32 %v5909_v61, %v2610_v57  ;;  %v2612_v29 = vmax.f32 %v2556_v10, 0.0  ;;  %v3354_v25 = vmax.f32 %v3298_v0, 0.0  ;;  %v3355_v23 = vmax.f32 %v3299_v26, 0.0  ;;  %v5916_v26 = vld [vmem:[#allocation15_spill] sm:$0xff] }
 0x364   :  { %3616 = vst [vmem:[%s5879_s4 + $0x78] sm:$0xff] %v3931_v59  ;;  %v2667_v18 = vmax.f32 %v5910_v12, %v2611_v6  ;;  %v2613_v21 = vmax.f32 %v2557_v40, 0.0  ;;  %v3356_v7 = vmax.f32 %v3300_v44, 0.0 }
 0x365   :  { %v3409_v24 = vmax.f32 %v2666_v15, %v3353_v11  ;;  %v2668_v45 = vmax.f32 %v5911_v30, %v2612_v29 }
 0x366   :  { %v3410_v27 = vmax.f32 %v2667_v18, %v3354_v25  ;;  %v2669_v14 = vmax.f32 %v5912_v32, %v2613_v21  ;;  %v2417_v2 = vpop.f32.mrb[92].mxu0  ;;  %v3160_v28 = vpop.f32.mrb[92].mxu1 }
 0x367   :  { %v3411_v4 = vmax.f32 %v2668_v45, %v3355_v23  ;;  %v2558_v9 = vadd.f32 %v2417_v2, %v5106_v62  ;;  %v3301_v22 = vadd.f32 %v3160_v28, %v5106_v62  ;;  %v2419_v35 = vpop.f32.mrb[93].mxu0  ;;  %v3162_v47 = vpop.f32.mrb[93].mxu1  ;;  %v5917_v28 = vld [vmem:[#allocation16_spill] sm:$0xff] }
 0x368   :  { %v3932_v54 = vpack.c.bf16 %v3410_v27, %v3409_v24  ;;  %v3412_v31 = vmax.f32 %v2669_v14, %v3356_v7  ;;  %v2559_v50 = vadd.f32 %v2419_v35, %v5108_v63  ;;  %v3302_v42 = vadd.f32 %v3162_v47, %v5108_v63  ;;  %v2421_v8 = vpop.f32.mrb[94].mxu0  ;;  %v3164_v5 = vpop.f32.mrb[94].mxu1  ;;  %v5918_v47 = vld [vmem:[#allocation17_spill] sm:$0xff] }
 0x369   :  { %v2614_v43 = vmax.f32 %v2558_v9, 0.0  ;;  %v2560_v51 = vadd.f32 %v2421_v8, %v5106_v62  ;;  %v3303_v34 = vadd.f32 %v3164_v5, %v5106_v62  ;;  %v2423_v39 = vpop.f32.mrb[95].mxu0  ;;  %v3166_v3 = vpop.f32.mrb[95].mxu1  ;;  %v3357_v49 = vmax.f32 %v3301_v22, 0.0  ;;  %v5919_v8 = vld [vmem:[#allocation18_spill] sm:$0xff] }
 0x36a   :  { %3617 = vst [vmem:[%s5879_s4 + $0x80] sm:$0xff] %v3932_v54  ;;  %v3933_v13 = vpack.c.bf16 %v3412_v31, %v3411_v4  ;;  %v2615_v1 = vmax.f32 %v2559_v50, 0.0  ;;  %v2561_v48 = vadd.f32 %v2423_v39, %v5108_v63  ;;  %v3304_v55 = vadd.f32 %v3166_v3, %v5108_v63 }
 0x36b   :  { %v2670_v37 = vmax.f32 %v5913_v46, %v2614_v43  ;;  %v2616_v16 = vmax.f32 %v2560_v51, 0.0  ;;  %v3358_v41 = vmax.f32 %v3302_v42, 0.0  ;;  %v3359_v57 = vmax.f32 %v3303_v34, 0.0  ;;  %v5920_v34 = vld [vmem:[#allocation19_spill] sm:$0xff] }
 0x36c   :  { %3618 = vst [vmem:[%s5879_s4 + $0x88] sm:$0xff] %v3933_v13  ;;  %v2671_v38 = vmax.f32 %v5914_v56, %v2615_v1  ;;  %v2617_v33 = vmax.f32 %v2561_v48, 0.0  ;;  %v3360_v36 = vmax.f32 %v3304_v55, 0.0 }
 0x36d   :  { %v3413_v0 = vmax.f32 %v2670_v37, %v3357_v49  ;;  %v2672_v53 = vmax.f32 %v5915_v58, %v2616_v16 }
 0x36e   :  { %v3414_v10 = vmax.f32 %v2671_v38, %v3358_v41  ;;  %v2673_v60 = vmax.f32 %v5916_v26, %v2617_v33  ;;  %v2427_v59 = vpop.f32.mrb[96].mxu0  ;;  %v3170_v6 = vpop.f32.mrb[96].mxu1 }
 0x36f   :  { %v3415_v40 = vmax.f32 %v2672_v53, %v3359_v57  ;;  %v2562_v61 = vadd.f32 %v2427_v59, %v5106_v62  ;;  %v3305_v15 = vadd.f32 %v3170_v6, %v5106_v62  ;;  %v2429_v11 = vpop.f32.mrb[97].mxu0  ;;  %v3172_v29 = vpop.f32.mrb[97].mxu1  ;;  %v5921_v6 = vld [vmem:[#allocation20_spill] sm:$0xff] }
 0x370   :  { %v3934_v44 = vpack.c.bf16 %v3414_v10, %v3413_v0  ;;  %v3416_v12 = vmax.f32 %v2673_v60, %v3360_v36  ;;  %v2563_v18 = vadd.f32 %v2429_v11, %v5108_v63  ;;  %v3306_v25 = vadd.f32 %v3172_v29, %v5108_v63  ;;  %v2431_v21 = vpop.f32.mrb[98].mxu0  ;;  %v3174_v24 = vpop.f32.mrb[98].mxu1  ;;  %v5922_v29 = vld [vmem:[#allocation21_spill] sm:$0xff] }
 0x371   :  { %v2618_v30 = vmax.f32 %v2562_v61, 0.0  ;;  %v2564_v45 = vadd.f32 %v2431_v21, %v5106_v62  ;;  %v3307_v23 = vadd.f32 %v3174_v24, %v5106_v62  ;;  %v2433_v27 = vpop.f32.mrb[99].mxu0  ;;  %v3176_v32 = vpop.f32.mrb[99].mxu1  ;;  %v3361_v9 = vmax.f32 %v3305_v15, 0.0  ;;  %v5923_v21 = vld [vmem:[#allocation22_spill] sm:$0xff] }
 0x372   :  { %3619 = vst [vmem:[%s5879_s4 + $0x90] sm:$0xff] %v3934_v44  ;;  %v3935_v14 = vpack.c.bf16 %v3416_v12, %v3415_v40  ;;  %v2619_v7 = vmax.f32 %v2563_v18, 0.0  ;;  %v2565_v2 = vadd.f32 %v2433_v27, %v5108_v63  ;;  %v3308_v35 = vadd.f32 %v3176_v32, %v5108_v63 }
 0x373   :  { %v2674_v4 = vmax.f32 %v5917_v28, %v2618_v30  ;;  %v2620_v22 = vmax.f32 %v2564_v45, 0.0  ;;  %v3362_v31 = vmax.f32 %v3306_v25, 0.0  ;;  %v3363_v43 = vmax.f32 %v3307_v23, 0.0  ;;  %v5924_v23 = vld [vmem:[#allocation23_spill] sm:$0xff] }
 0x374   :  { %3620 = vst [vmem:[%s5879_s4 + $0x98] sm:$0xff] %v3935_v14  ;;  %v2675_v54 = vmax.f32 %v5918_v47, %v2619_v7  ;;  %v2621_v50 = vmax.f32 %v2565_v2, 0.0  ;;  %v3364_v3 = vmax.f32 %v3308_v35, 0.0 }
 0x375   :  { %v3417_v42 = vmax.f32 %v2674_v4, %v3361_v9  ;;  %v2676_v5 = vmax.f32 %v5919_v8, %v2620_v22 }
 0x376   :  { %v3418_v51 = vmax.f32 %v2675_v54, %v3362_v31  ;;  %v2677_v39 = vmax.f32 %v5920_v34, %v2621_v50  ;;  %v2437_v13 = vpop.f32.mrb[100].mxu0  ;;  %v3180_v1 = vpop.f32.mrb[100].mxu1 }
 0x377   :  { %v3419_v48 = vmax.f32 %v2676_v5, %v3363_v43  ;;  %v2566_v46 = vadd.f32 %v2437_v13, %v5106_v62  ;;  %v3309_v37 = vadd.f32 %v3180_v1, %v5106_v62  ;;  %v2439_v49 = vpop.f32.mrb[101].mxu0  ;;  %v3182_v16 = vpop.f32.mrb[101].mxu1  ;;  %v5925_v1 = vld [vmem:[#allocation24_spill] sm:$0xff] }
 0x378   :  { %v3936_v55 = vpack.c.bf16 %v3418_v51, %v3417_v42  ;;  %v3420_v56 = vmax.f32 %v2677_v39, %v3364_v3  ;;  %v2567_v38 = vadd.f32 %v2439_v49, %v5108_v63  ;;  %v3310_v41 = vadd.f32 %v3182_v16, %v5108_v63  ;;  %v2441_v33 = vpop.f32.mrb[102].mxu0  ;;  %v3184_v0 = vpop.f32.mrb[102].mxu1  ;;  %v5926_v16 = vld [vmem:[#allocation25_spill] sm:$0xff] }
 0x379   :  { %v2622_v58 = vmax.f32 %v2566_v46, 0.0  ;;  %v2568_v53 = vadd.f32 %v2441_v33, %v5106_v62  ;;  %v3311_v57 = vadd.f32 %v3184_v0, %v5106_v62  ;;  %v2443_v10 = vpop.f32.mrb[103].mxu0  ;;  %v3186_v26 = vpop.f32.mrb[103].mxu1  ;;  %v3365_v61 = vmax.f32 %v3309_v37, 0.0  ;;  %v5927_v33 = vld [vmem:[#allocation26_spill] sm:$0xff] }
 0x37a   :  { %3621 = vst [vmem:[%s5879_s4 + $0xa0] sm:$0xff] %v3936_v55  ;;  %v3937_v60 = vpack.c.bf16 %v3420_v56, %v3419_v48  ;;  %v2623_v36 = vmax.f32 %v2567_v38, 0.0  ;;  %v2569_v59 = vadd.f32 %v2443_v10, %v5108_v63  ;;  %v3312_v11 = vadd.f32 %v3186_v26, %v5108_v63 }
 0x37b   :  { %v2678_v40 = vmax.f32 %v5921_v6, %v2622_v58  ;;  %v2624_v15 = vmax.f32 %v2568_v53, 0.0  ;;  %v3366_v12 = vmax.f32 %v3310_v41, 0.0  ;;  %v3367_v30 = vmax.f32 %v3311_v57, 0.0  ;;  %v5928_v57 = vld [vmem:[#allocation27_spill] sm:$0xff] }
 0x37c   :  { %3622 = vst [vmem:[%s5879_s4 + $0xa8] sm:$0xff] %v3937_v60  ;;  %v2679_v44 = vmax.f32 %v5922_v29, %v2623_v36  ;;  %v2625_v18 = vmax.f32 %v2569_v59, 0.0  ;;  %v3368_v32 = vmax.f32 %v3312_v11, 0.0 }
 0x37d   :  { %v3421_v25 = vmax.f32 %v2678_v40, %v3365_v61  ;;  %v2680_v24 = vmax.f32 %v5923_v21, %v2624_v15 }
 0x37e   :  { %v3422_v45 = vmax.f32 %v2679_v44, %v3366_v12  ;;  %v2681_v27 = vmax.f32 %v5924_v23, %v2625_v18  ;;  %v2447_v14 = vpop.f32.mrb[104].mxu0  ;;  %v3190_v7 = vpop.f32.mrb[104].mxu1 }
 0x37f   :  { %v3423_v2 = vmax.f32 %v2680_v24, %v3367_v30  ;;  %v2570_v28 = vadd.f32 %v2447_v14, %v5106_v62  ;;  %v3313_v4 = vadd.f32 %v3190_v7, %v5106_v62  ;;  %v2449_v9 = vpop.f32.mrb[105].mxu0  ;;  %v3192_v22 = vpop.f32.mrb[105].mxu1 }
 0x380   :  { %v3938_v35 = vpack.c.bf16 %v3422_v45, %v3421_v25  ;;  %v3424_v47 = vmax.f32 %v2681_v27, %v3368_v32  ;;  %v2571_v54 = vadd.f32 %v2449_v9, %v5108_v63  ;;  %v3314_v31 = vadd.f32 %v3192_v22, %v5108_v63  ;;  %v2451_v50 = vpop.f32.mrb[106].mxu0  ;;  %v3194_v42 = vpop.f32.mrb[106].mxu1 }
 0x381   :  { %v2626_v8 = vmax.f32 %v2570_v28, 0.0  ;;  %v2572_v5 = vadd.f32 %v2451_v50, %v5106_v62  ;;  %v3315_v43 = vadd.f32 %v3194_v42, %v5106_v62  ;;  %v2453_v51 = vpop.f32.mrb[107].mxu0  ;;  %v3196_v34 = vpop.f32.mrb[107].mxu1  ;;  %v3369_v46 = vmax.f32 %v3313_v4, 0.0 }
 0x382   :  { %3623 = vst [vmem:[%s5879_s4 + $0xb0] sm:$0xff] %v3938_v35  ;;  %v3939_v39 = vpack.c.bf16 %v3424_v47, %v3423_v2  ;;  %v2627_v3 = vmax.f32 %v2571_v54, 0.0  ;;  %v2573_v13 = vadd.f32 %v2453_v51, %v5108_v63  ;;  %v3316_v49 = vadd.f32 %v3196_v34, %v5108_v63 }
 0x383   :  { %v2682_v48 = vmax.f32 %v5925_v1, %v2626_v8  ;;  %v2628_v37 = vmax.f32 %v2572_v5, 0.0  ;;  %v3370_v56 = vmax.f32 %v3314_v31, 0.0  ;;  %v3371_v58 = vmax.f32 %v3315_v43, 0.0 }
 0x384   :  { %3624 = vst [vmem:[%s5879_s4 + $0xb8] sm:$0xff] %v3939_v39  ;;  %v2683_v55 = vmax.f32 %v5926_v16, %v2627_v3  ;;  %v2629_v38 = vmax.f32 %v2573_v13, 0.0  ;;  %v3372_v26 = vmax.f32 %v3316_v49, 0.0 }
 0x385   :  { %v3425_v41 = vmax.f32 %v2682_v48, %v3369_v46  ;;  %v2684_v0 = vmax.f32 %v5927_v33, %v2628_v37 }
 0x386   :  { %v3426_v53 = vmax.f32 %v2683_v55, %v3370_v56  ;;  %v2685_v10 = vmax.f32 %v5928_v57, %v2629_v38  ;;  %v2457_v60 = vpop.f32.mrb[108].mxu0  ;;  %v3200_v36 = vpop.f32.mrb[108].mxu1 }
 0x387   :  { %v3427_v59 = vmax.f32 %v2684_v0, %v3371_v58  ;;  %v2574_v6 = vadd.f32 %v2457_v60, %v5106_v62  ;;  %v3317_v40 = vadd.f32 %v3200_v36, %v5106_v62  ;;  %v2459_v61 = vpop.f32.mrb[109].mxu0  ;;  %v3202_v15 = vpop.f32.mrb[109].mxu1 }
 0x388   :  { %v3940_v11 = vpack.c.bf16 %v3426_v53, %v3425_v41  ;;  %v3428_v29 = vmax.f32 %v2685_v10, %v3372_v26  ;;  %v2575_v44 = vadd.f32 %v2459_v61, %v5108_v63  ;;  %v3318_v12 = vadd.f32 %v3202_v15, %v5108_v63  ;;  %v2461_v18 = vpop.f32.mrb[110].mxu0  ;;  %v3204_v25 = vpop.f32.mrb[110].mxu1 }
 0x389   :  { %v2630_v21 = vmax.f32 %v2574_v6, 0.0  ;;  %v2576_v24 = vadd.f32 %v2461_v18, %v5106_v62  ;;  %v3319_v30 = vadd.f32 %v3204_v25, %v5106_v62  ;;  %v2463_v45 = vpop.f32.mrb[111].mxu0  ;;  %v3206_v23 = vpop.f32.mrb[111].mxu1  ;;  %v3373_v2 = vmax.f32 %v3317_v40, 0.0 }
 0x38a   :  { %3625 = vst [vmem:[%s5879_s4 + $0xc0] sm:$0xff] %v3940_v11  ;;  %v3941_v27 = vpack.c.bf16 %v3428_v29, %v3427_v59  ;;  %v2631_v32 = vmax.f32 %v2575_v44, 0.0  ;;  %v2577_v14 = vadd.f32 %v2463_v45, %v5108_v63  ;;  %v3320_v4 = vadd.f32 %v3206_v23, %v5108_v63 }
 0x38b   :  { %v2686_v7 = vmax.f32 %v5483_v17, %v2630_v21  ;;  %v2632_v28 = vmax.f32 %v2576_v24, 0.0  ;;  %v3374_v9 = vmax.f32 %v3318_v12, 0.0  ;;  %v3375_v54 = vmax.f32 %v3319_v30, 0.0 }
 0x38c   :  { %3626 = vst [vmem:[%s5879_s4 + $0xc8] sm:$0xff] %v3941_v27  ;;  %v2687_v62 = vmax.f32 %v5499_v19, %v2631_v32  ;;  %v2633_v22 = vmax.f32 %v2577_v14, 0.0  ;;  %v3376_v17 = vmax.f32 %v3320_v4, 0.0 }
 0x38d   :  { %v3429_v35 = vmax.f32 %v2686_v7, %v3373_v2  ;;  %v2688_v47 = vmax.f32 %v5503_v52, %v2632_v28 }
 0x38e   :  { %v3430_v31 = vmax.f32 %v2687_v62, %v3374_v9  ;;  %v2689_v50 = vmax.f32 %v5505_v20, %v2633_v22 }
 0x38f   :  { %v3431_v42 = vmax.f32 %v2688_v47, %v3375_v54 }
 0x390   :  { %v3942_v8 = vpack.c.bf16 %v3430_v31, %v3429_v35  ;;  %v3432_v5 = vmax.f32 %v2689_v50, %v3376_v17 }
 0x392   :  { %3627 = vst [vmem:[%s5879_s4 + $0xd0] sm:$0xff] %v3942_v8  ;;  %v3943_v63 = vpack.c.bf16 %v3432_v5, %v3431_v42 }
 0x394   :  { %3628 = vst [vmem:[%s5879_s4 + $0xd8] sm:$0xff] %v3943_v63 }
 0x395   :  { %3633 = vsyncpa [#allocation3], 1 }

// kernel: net_forward.6
= control target key start
LH: loop header
LB: loop body
LE: loop exit
PB: predicated region body
PF: predicated region fallthrough
CT: control target
= control target key end

     0   :  { %s4010_s1 = inlined_call_operand.vmem [shape: bf16[3,256,512], index: 1, kind: input, shape index: {}]   ;;  %s4011_s0 = inlined_call_operand.vmem [shape: bf16[9,16,256], index: 0, kind: input, shape index: {}]   ;;  %s4012_s2 = inlined_call_operand.vmem [shape: f32[1,512], index: 2, kind: input, shape index: {}]   ;;  %s4013_s3 = inlined_call_operand.vmem [shape: bf16[7,16,512], index: 3, kind: output, shape index: {}]  }
   0x1   :  { %v2790_v0 = vld [vmem:[%s4010_s1 + $0x204] ss:$16 sps:$4 sm:$0xff]   ;;  %v2792_v1 = vld [vmem:[%s4010_s1 + $0x20c] ss:$16 sps:$4 sm:$0xff]   ;;  %v2794_v2 = vld [vmem:[%s4010_s1 + $0x200] ss:$16 sps:$4 sm:$0xff]  }
   0x2   :  { %552 = vmatprep.subr.bf16.mxu0 %v2790_v0  ;;  %v2795_v3 = vld [vmem:[%s4010_s1 + $0x208] ss:$16 sps:$4 sm:$0xff]   ;;  %655 = vmatprep.subr.bf16.mxu1 %v2792_v1  ;;  %v2796_v4 = vld [vmem:[%s4010_s1 + $0x224] ss:$16 sps:$4 sm:$0xff]   ;;  %v2798_v5 = vld [vmem:[%s4010_s1 + $0x22c] ss:$16 sps:$4 sm:$0xff]  }
   0x3   :  { %553 = vmatpush1.bf16.msra.mxu0 %v2794_v2  ;;  %656 = vmatpush1.bf16.msra.mxu1 %v2795_v3  ;;  %v2800_v6 = vld [vmem:[%s4010_s1 + $0x220] ss:$16 sps:$4 sm:$0xff]   ;;  %v2801_v7 = vld [vmem:[%s4010_s1 + $0x228] ss:$16 sps:$4 sm:$0xff]   ;;  %v2802_v8 = vld [vmem:[%s4010_s1 + $0x244] ss:$16 sps:$4 sm:$0xff]  }
   0x4   :  { %554 = vmatprep.subr.bf16.mxu0 %v2796_v4  ;;  %657 = vmatprep.subr.bf16.mxu1 %v2798_v5  ;;  %v2804_v9 = vld [vmem:[%s4010_s1 + $0x24c] ss:$16 sps:$4 sm:$0xff]   ;;  %v2806_v10 = vld [vmem:[%s4010_s1 + $0x240] ss:$16 sps:$4 sm:$0xff]   ;;  %v2807_v11 = vld [vmem:[%s4010_s1 + $0x248] ss:$16 sps:$4 sm:$0xff]  }
   0x5   :  { %v2808_v12 = vld [vmem:[%s4010_s1 + $0x264] ss:$16 sps:$4 sm:$0xff]   ;;  %v2810_v13 = vld [vmem:[%s4010_s1 + $0x26c] ss:$16 sps:$4 sm:$0xff]   ;;  %v2812_v14 = vld [vmem:[%s4010_s1 + $0x260] ss:$16 sps:$4 sm:$0xff]  }
   0x6   :  { %v2813_v15 = vld [vmem:[%s4010_s1 + $0x268] ss:$16 sps:$4 sm:$0xff]   ;;  %v2814_v16 = vld [vmem:[%s4010_s1 + $0x284] ss:$16 sps:$4 sm:$0xff]   ;;  %v2816_v17 = vld [vmem:[%s4010_s1 + $0x28c] ss:$16 sps:$4 sm:$0xff]  }
   0x7   :  { %555 = vmatpush1.bf16.msra.mxu0 %v2800_v6  ;;  %658 = vmatpush1.bf16.msra.mxu1 %v2801_v7  ;;  %v2818_v18 = vld [vmem:[%s4010_s1 + $0x280] ss:$16 sps:$4 sm:$0xff]   ;;  %v2819_v19 = vld [vmem:[%s4010_s1 + $0x288] ss:$16 sps:$4 sm:$0xff]   ;;  %v2820_v20 = vld [vmem:[%s4010_s1 + $0x2a4] ss:$16 sps:$4 sm:$0xff]  }
   0x8   :  { %556 = vmatprep.subr.bf16.mxu0 %v2802_v8  ;;  %659 = vmatprep.subr.bf16.mxu1 %v2804_v9  ;;  %v2822_v21 = vld [vmem:[%s4010_s1 + $0x2ac] ss:$16 sps:$4 sm:$0xff]   ;;  %v2824_v22 = vld [vmem:[%s4010_s1 + $0x2a0] ss:$16 sps:$4 sm:$0xff]   ;;  %v2825_v23 = vld [vmem:[%s4010_s1 + $0x2a8] ss:$16 sps:$4 sm:$0xff]  }
   0x9   :  { %v2826_v24 = vld [vmem:[%s4010_s1 + $0x2c4] ss:$16 sps:$4 sm:$0xff]   ;;  %v2828_v25 = vld [vmem:[%s4010_s1 + $0x2cc] ss:$16 sps:$4 sm:$0xff]   ;;  %v2830_v26 = vld [vmem:[%s4010_s1 + $0x2c0] ss:$16 sps:$4 sm:$0xff]  }
   0xa   :  { %v2831_v27 = vld [vmem:[%s4010_s1 + $0x2c8] ss:$16 sps:$4 sm:$0xff]   ;;  %v2832_v28 = vld [vmem:[%s4010_s1 + $0x2e4] ss:$16 sps:$4 sm:$0xff]   ;;  %v2834_v29 = vld [vmem:[%s4010_s1 + $0x2ec] ss:$16 sps:$4 sm:$0xff]  }
   0xb   :  { %557 = vmatpush1.bf16.msra.mxu0 %v2806_v10  ;;  %660 = vmatpush1.bf16.msra.mxu1 %v2807_v11  ;;  %v2836_v30 = vld [vmem:[%s4010_s1 + $0x2e0] ss:$16 sps:$4 sm:$0xff]   ;;  %v2837_v31 = vld [vmem:[%s4010_s1 + $0x2e8] ss:$16 sps:$4 sm:$0xff]   ;;  %v2838_v32 = vld [vmem:[%s4010_s1 + $0x304] ss:$16 sps:$4 sm:$0xff]  }
   0xc   :  { %558 = vmatprep.subr.bf16.mxu0 %v2808_v12  ;;  %661 = vmatprep.subr.bf16.mxu1 %v2810_v13  ;;  %v2840_v33 = vld [vmem:[%s4010_s1 + $0x30c] ss:$16 sps:$4 sm:$0xff]   ;;  %v2842_v34 = vld [vmem:[%s4010_s1 + $0x300] ss:$16 sps:$4 sm:$0xff]   ;;  %v2843_v35 = vld [vmem:[%s4010_s1 + $0x308] ss:$16 sps:$4 sm:$0xff]  }
   0xd   :  { %v2844_v36 = vld [vmem:[%s4010_s1 + $0x324] ss:$16 sps:$4 sm:$0xff]   ;;  %v2846_v37 = vld [vmem:[%s4010_s1 + $0x32c] ss:$16 sps:$4 sm:$0xff]   ;;  %v2848_v38 = vld [vmem:[%s4010_s1 + $0x320] ss:$16 sps:$4 sm:$0xff]  }
   0xe   :  { %v2849_v39 = vld [vmem:[%s4010_s1 + $0x328] ss:$16 sps:$4 sm:$0xff]   ;;  %v2850_v40 = vld [vmem:[%s4010_s1 + $0x344] ss:$16 sps:$4 sm:$0xff]   ;;  %v2852_v41 = vld [vmem:[%s4010_s1 + $0x34c] ss:$16 sps:$4 sm:$0xff]  }
   0xf   :  { %559 = vmatpush1.bf16.msra.mxu0 %v2812_v14  ;;  %662 = vmatpush1.bf16.msra.mxu1 %v2813_v15  ;;  %v2854_v42 = vld [vmem:[%s4010_s1 + $0x340] ss:$16 sps:$4 sm:$0xff]   ;;  %v2855_v43 = vld [vmem:[%s4010_s1 + $0x348] ss:$16 sps:$4 sm:$0xff]   ;;  %v2856_v44 = vld [vmem:[%s4010_s1 + $0x364] ss:$16 sps:$4 sm:$0xff]  }
  0x10   :  { %560 = vmatprep.subr.bf16.mxu0 %v2814_v16  ;;  %663 = vmatprep.subr.bf16.mxu1 %v2816_v17  ;;  %v2858_v45 = vld [vmem:[%s4010_s1 + $0x36c] ss:$16 sps:$4 sm:$0xff]   ;;  %v2860_v46 = vld [vmem:[%s4010_s1 + $0x360] ss:$16 sps:$4 sm:$0xff]   ;;  %v2861_v48 = vld [vmem:[%s4010_s1 + $0x368] ss:$16 sps:$4 sm:$0xff]  }
  0x11   :  { %v3269_v47 = vld [vmem:[%s4011_s0 + $0x14] ss:$8 sps:$4 sm:$0xff]   ;;  %v2866_v51 = vld [vmem:[%s4010_s1 + $0x380] ss:$16 sps:$4 sm:$0xff]   ;;  %v2867_v52 = vld [vmem:[%s4010_s1 + $0x388] ss:$16 sps:$4 sm:$0xff]  }
  0x12   :  { %v2862_v49 = vld [vmem:[%s4010_s1 + $0x384] ss:$16 sps:$4 sm:$0xff]   ;;  %v2864_v50 = vld [vmem:[%s4010_s1 + $0x38c] ss:$16 sps:$4 sm:$0xff]   ;;  %584 = vmatprep.mubr.bf16.mxu0 %v3269_v47  ;;  %687 = vmatprep.mubr.bf16.mxu1 %v3269_v47  ;;  %v2872_v55 = vld [vmem:[%s4010_s1 + $0x3a0] ss:$16 sps:$4 sm:$0xff]  }
  0x13   :  { %561 = vmatpush1.bf16.msra.mxu0 %v2818_v18  ;;  %664 = vmatpush1.bf16.msra.mxu1 %v2819_v19  ;;  %v2868_v53 = vld [vmem:[%s4010_s1 + $0x3a4] ss:$16 sps:$4 sm:$0xff]   ;;  %v2870_v54 = vld [vmem:[%s4010_s1 + $0x3ac] ss:$16 sps:$4 sm:$0xff]   ;;  %v2873_v56 = vld [vmem:[%s4010_s1 + $0x3a8] ss:$16 sps:$4 sm:$0xff]  }
  0x14   :  { %562 = vmatprep.subr.bf16.mxu0 %v2820_v20  ;;  %665 = vmatprep.subr.bf16.mxu1 %v2822_v21  ;;  %v2874_v57 = vld [vmem:[%s4010_s1 + $0x3c4] ss:$16 sps:$4 sm:$0xff]   ;;  %v2876_v58 = vld [vmem:[%s4010_s1 + $0x3cc] ss:$16 sps:$4 sm:$0xff]   ;;  %v2878_v59 = vld [vmem:[%s4010_s1 + $0x3c0] ss:$16 sps:$4 sm:$0xff]  }
  0x15   :  { %v2879_v60 = vld [vmem:[%s4010_s1 + $0x3c8] ss:$16 sps:$4 sm:$0xff]   ;;  %v2880_v61 = vld [vmem:[%s4010_s1 + $0x3e4] ss:$16 sps:$4 sm:$0xff]   ;;  %v2882_v62 = vld [vmem:[%s4010_s1 + $0x3ec] ss:$16 sps:$4 sm:$0xff]  }
  0x16   :  { %v2884_v63 = vld [vmem:[%s4010_s1 + $0x3e0] ss:$16 sps:$4 sm:$0xff]   ;;  %v2885_v0 = vld [vmem:[%s4010_s1 + $0x3e8] ss:$16 sps:$4 sm:$0xff]   ;;  %v2890_v1 = vld [vmem:[%s4010_s1 + $0x4] ss:$16 sps:$4 sm:$0xff]  }
  0x17   :  { %563 = vmatpush1.bf16.msra.mxu0 %v2824_v22  ;;  %666 = vmatpush1.bf16.msra.mxu1 %v2825_v23  ;;  %v2893_v2 = vld [vmem:[%s4010_s1 + $0xc] ss:$16 sps:$4 sm:$0xff]   ;;  %v2888_v3 = vld [vmem:[%s4010_s1] ss:$16 sps:$4 sm:$0xff]   ;;  %v2891_v5 = vld [vmem:[%s4010_s1 + $0x8] ss:$16 sps:$4 sm:$0xff]  }
  0x18   :  { %564 = vmatprep.subr.bf16.mxu0 %v2826_v24  ;;  %667 = vmatprep.subr.bf16.mxu1 %v2828_v25  ;;  %v3336_v4 = vld [vmem:[%s4011_s0 + $0x10] ss:$8 sps:$4 sm:$0xff]   ;;  %v2897_v6 = vld [vmem:[%s4010_s1 + $0x24] ss:$16 sps:$4 sm:$0xff]   ;;  %v2900_v7 = vld [vmem:[%s4010_s1 + $0x2c] ss:$16 sps:$4 sm:$0xff]  }
  0x19   :  { %v3350_v8 = vld [vmem:[%s4011_s0 + $0x24] ss:$8 sps:$4 sm:$0xff]   ;;  %v2895_v9 = vld [vmem:[%s4010_s1 + $0x20] ss:$16 sps:$4 sm:$0xff]   ;;  %v2898_v10 = vld [vmem:[%s4010_s1 + $0x28] ss:$16 sps:$4 sm:$0xff]  }
  0x1a   :  { %v2903_v11 = vld [vmem:[%s4010_s1 + $0x44] ss:$16 sps:$4 sm:$0xff]   ;;  %v2906_v12 = vld [vmem:[%s4010_s1 + $0x4c] ss:$16 sps:$4 sm:$0xff]   ;;  %v2901_v13 = vld [vmem:[%s4010_s1 + $0x40] ss:$16 sps:$4 sm:$0xff]  }
  0x1b   :  { %565 = vmatpush1.bf16.msra.mxu0 %v2830_v26  ;;  %668 = vmatpush1.bf16.msra.mxu1 %v2831_v27  ;;  %v2904_v14 = vld [vmem:[%s4010_s1 + $0x48] ss:$16 sps:$4 sm:$0xff]   ;;  %v2909_v16 = vld [vmem:[%s4010_s1 + $0x64] ss:$16 sps:$4 sm:$0xff]   ;;  %v2912_v17 = vld [vmem:[%s4010_s1 + $0x6c] ss:$16 sps:$4 sm:$0xff]  }
  0x1c   :  { %566 = vmatprep.subr.bf16.mxu0 %v2832_v28  ;;  %669 = vmatprep.subr.bf16.mxu1 %v2834_v29  ;;  %v3377_v15 = vld [vmem:[%s4011_s0 + $0x20] ss:$8 sps:$4 sm:$0xff]   ;;  %v3388_v18 = vld [vmem:[%s4011_s0 + $0x34] ss:$8 sps:$4 sm:$0xff]   ;;  %v3415_v25 = vld [vmem:[%s4011_s0 + $0x30] ss:$8 sps:$4 sm:$0xff]  }
  0x1d   :  { %v2907_v19 = vld [vmem:[%s4010_s1 + $0x60] ss:$16 sps:$4 sm:$0xff]   ;;  %v2910_v20 = vld [vmem:[%s4010_s1 + $0x68] ss:$16 sps:$4 sm:$0xff]   ;;  %v2917_v21 = vld [vmem:[%s4010_s1 + $0x84] ss:$16 sps:$4 sm:$0xff]  }
  0x1e   :  { %v2920_v22 = vld [vmem:[%s4010_s1 + $0x8c] ss:$16 sps:$4 sm:$0xff]   ;;  %v2915_v23 = vld [vmem:[%s4010_s1 + $0x80] ss:$16 sps:$4 sm:$0xff]   ;;  %v2918_v24 = vld [vmem:[%s4010_s1 + $0x88] ss:$16 sps:$4 sm:$0xff]  }
  0x1f   :  { %567 = vmatpush1.bf16.msra.mxu0 %v2836_v30  ;;  %670 = vmatpush1.bf16.msra.mxu1 %v2837_v31  ;;  %v2924_v26 = vld [vmem:[%s4010_s1 + $0xa4] ss:$16 sps:$4 sm:$0xff]   ;;  %v2927_v27 = vld [vmem:[%s4010_s1 + $0xac] ss:$16 sps:$4 sm:$0xff]   ;;  %v2922_v29 = vld [vmem:[%s4010_s1 + $0xa0] ss:$16 sps:$4 sm:$0xff]  }
  0x20   :  { %568 = vmatprep.subr.bf16.mxu0 %v2838_v32  ;;  %671 = vmatprep.subr.bf16.mxu1 %v2840_v33  ;;  %v3426_v28 = vld [vmem:[%s4011_s0 + $0x44] ss:$8 sps:$4 sm:$0xff]   ;;  %v2925_v30 = vld [vmem:[%s4010_s1 + $0xa8] ss:$16 sps:$4 sm:$0xff]   ;;  %v2930_v33 = vld [vmem:[%s4010_s1 + $0xc0] ss:$16 sps:$4 sm:$0xff]  }
  0x21   :  { %v2932_v31 = vld [vmem:[%s4010_s1 + $0xc4] ss:$16 sps:$4 sm:$0xff]   ;;  %v2935_v32 = vld [vmem:[%s4010_s1 + $0xcc] ss:$16 sps:$4 sm:$0xff]  }
  0x23   :  { %569 = vmatpush1.bf16.msra.mxu0 %v2842_v34  ;;  %672 = vmatpush1.bf16.msra.mxu1 %v2843_v35  ;;  %v2933_v34 = vld [vmem:[%s4010_s1 + $0xc8] ss:$16 sps:$4 sm:$0xff]  }
  0x24   :  { %570 = vmatprep.subr.bf16.mxu0 %v2844_v36  ;;  %673 = vmatprep.subr.bf16.mxu1 %v2846_v37  ;;  %v3453_v35 = vld [vmem:[%s4011_s0 + $0x40] ss:$8 sps:$4 sm:$0xff]   ;;  %v2939_v36 = vld [vmem:[%s4010_s1 + $0xe4] ss:$16 sps:$4 sm:$0xff]   ;;  %v2942_v37 = vld [vmem:[%s4010_s1 + $0xec] ss:$16 sps:$4 sm:$0xff]  }
  0x27   :  { %571 = vmatpush1.bf16.msra.mxu0 %v2848_v38  ;;  %674 = vmatpush1.bf16.msra.mxu1 %v2849_v39  ;;  %v3464_v38 = vld [vmem:[%s4011_s0 + $0x54] ss:$8 sps:$4 sm:$0xff]   ;;  %v2937_v39 = vld [vmem:[%s4010_s1 + $0xe0] ss:$16 sps:$4 sm:$0xff]  }
  0x28   :  { %572 = vmatprep.subr.bf16.mxu0 %v2850_v40  ;;  %675 = vmatprep.subr.bf16.mxu1 %v2852_v41  ;;  %v2940_v40 = vld [vmem:[%s4010_s1 + $0xe8] ss:$16 sps:$4 sm:$0xff]   ;;  %v2947_v41 = vld [vmem:[%s4010_s1 + $0x104] ss:$16 sps:$4 sm:$0xff]  }
  0x2b   :  { %573 = vmatpush1.bf16.msra.mxu0 %v2854_v42  ;;  %676 = vmatpush1.bf16.msra.mxu1 %v2855_v43  ;;  %v2950_v42 = vld [vmem:[%s4010_s1 + $0x10c] ss:$16 sps:$4 sm:$0xff]   ;;  %v2945_v43 = vld [vmem:[%s4010_s1 + $0x100] ss:$16 sps:$4 sm:$0xff]  }
  0x2c   :  { %574 = vmatprep.subr.bf16.mxu0 %v2856_v44  ;;  %677 = vmatprep.subr.bf16.mxu1 %v2858_v45  ;;  %v2948_v44 = vld [vmem:[%s4010_s1 + $0x108] ss:$16 sps:$4 sm:$0xff]  }
  0x2d   :  { %v3491_v45 = vld [vmem:[%s4011_s0 + $0x50] ss:$8 sps:$4 sm:$0xff]  }
  0x2f   :  { %575 = vmatpush1.bf16.msra.mxu0 %v2860_v46  ;;  %678 = vmatpush1.bf16.msra.mxu1 %v2861_v48  ;;  %v2954_v46 = vld [vmem:[%s4010_s1 + $0x124] ss:$16 sps:$4 sm:$0xff]   ;;  %v2957_v48 = vld [vmem:[%s4010_s1 + $0x12c] ss:$16 sps:$4 sm:$0xff]  }
  0x30   :  { %576 = vmatprep.subr.bf16.mxu0 %v2862_v49  ;;  %679 = vmatprep.subr.bf16.mxu1 %v2864_v50  ;;  %v3502_v49 = vld [vmem:[%s4011_s0 + $0x64] ss:$8 sps:$4 sm:$0xff]   ;;  %v2952_v50 = vld [vmem:[%s4010_s1 + $0x120] ss:$16 sps:$4 sm:$0xff]  }
  0x33   :  { %577 = vmatpush1.bf16.msra.mxu0 %v2866_v51  ;;  %680 = vmatpush1.bf16.msra.mxu1 %v2867_v52  ;;  %v2955_v51 = vld [vmem:[%s4010_s1 + $0x128] ss:$16 sps:$4 sm:$0xff]   ;;  %v2962_v52 = vld [vmem:[%s4010_s1 + $0x144] ss:$16 sps:$4 sm:$0xff]  }
  0x34   :  { %578 = vmatprep.subr.bf16.mxu0 %v2868_v53  ;;  %681 = vmatprep.subr.bf16.mxu1 %v2870_v54  ;;  %v2965_v53 = vld [vmem:[%s4010_s1 + $0x14c] ss:$16 sps:$4 sm:$0xff]   ;;  %v2960_v54 = vld [vmem:[%s4010_s1 + $0x140] ss:$16 sps:$4 sm:$0xff]  }
  0x37   :  { %579 = vmatpush1.bf16.msra.mxu0 %v2872_v55  ;;  %682 = vmatpush1.bf16.msra.mxu1 %v2873_v56  ;;  %v2963_v55 = vld [vmem:[%s4010_s1 + $0x148] ss:$16 sps:$4 sm:$0xff]  }
  0x38   :  { %580 = vmatprep.subr.bf16.mxu0 %v2874_v57  ;;  %683 = vmatprep.subr.bf16.mxu1 %v2876_v58  ;;  %v3529_v56 = vld [vmem:[%s4011_s0 + $0x60] ss:$8 sps:$4 sm:$0xff]   ;;  %v2969_v57 = vld [vmem:[%s4010_s1 + $0x164] ss:$16 sps:$4 sm:$0xff]   ;;  %v2972_v58 = vld [vmem:[%s4010_s1 + $0x16c] ss:$16 sps:$4 sm:$0xff]  }
  0x3b   :  { %581 = vmatpush1.bf16.msra.mxu0 %v2878_v59  ;;  %684 = vmatpush1.bf16.msra.mxu1 %v2879_v60  ;;  %v3540_v59 = vld [vmem:[%s4011_s0 + $0x74] ss:$8 sps:$4 sm:$0xff]   ;;  %v2967_v60 = vld [vmem:[%s4010_s1 + $0x160] ss:$16 sps:$4 sm:$0xff]  }
  0x3c   :  { %582 = vmatprep.subr.bf16.mxu0 %v2880_v61  ;;  %685 = vmatprep.subr.bf16.mxu1 %v2882_v62  ;;  %v2970_v61 = vld [vmem:[%s4010_s1 + $0x168] ss:$16 sps:$4 sm:$0xff]   ;;  %v2977_v62 = vld [vmem:[%s4010_s1 + $0x184] ss:$16 sps:$4 sm:$0xff]  }
  0x3f   :  { %583 = vmatpush1.bf16.msra.mxu0 %v2884_v63  ;;  %686 = vmatpush1.bf16.msra.mxu1 %v2885_v0  ;;  %v2980_v63 = vld [vmem:[%s4010_s1 + $0x18c] ss:$16 sps:$4 sm:$0xff]   ;;  %v2975_v0 = vld [vmem:[%s4010_s1 + $0x180] ss:$16 sps:$4 sm:$0xff]  }
  0x40   :  { %1088 = vmatprep.subr.bf16.mxu0 %v2890_v1  ;;  %1191 = vmatprep.subr.bf16.mxu1 %v2893_v2  ;;  %v2978_v1 = vld [vmem:[%s4010_s1 + $0x188] ss:$16 sps:$4 sm:$0xff]  }
  0x41   :  { %v3567_v2 = vld [vmem:[%s4011_s0 + $0x70] ss:$8 sps:$4 sm:$0xff]  }
  0x42   :  { %585 = vmatmul.mubr.bf16.vlgmr.msra.gmra.mrb[0].mxu0 %v3336_v4  ;;  %688 = vmatmul.mubr.bf16.vlgmr.msra.gmra.mrb[0].mxu1 %v3336_v4 }
  0x43   :  { %1089 = vmatpush1.bf16.msra.mxu0 %v2888_v3  ;;  %1192 = vmatpush1.bf16.msra.mxu1 %v2891_v5  ;;  %v2984_v3 = vld [vmem:[%s4010_s1 + $0x1a4] ss:$16 sps:$4 sm:$0xff]   ;;  %v2987_v5 = vld [vmem:[%s4010_s1 + $0x1ac] ss:$16 sps:$4 sm:$0xff]  }
  0x44   :  { %1090 = vmatprep.subr.bf16.mxu0 %v2897_v6  ;;  %1193 = vmatprep.subr.bf16.mxu1 %v2900_v7  ;;  %v3005_v6 = vld [vmem:[%s4011_s0 + $0x4] ss:$8 sps:$4 sm:$0xff]   ;;  %v2982_v7 = vld [vmem:[%s4010_s1 + $0x1a0] ss:$16 sps:$4 sm:$0xff]  }
  0x45   :  { %594 = vmatprep.mubr.bf16.mxu0 %v3350_v8  ;;  %697 = vmatprep.mubr.bf16.mxu1 %v3350_v8 }
  0x47   :  { %1091 = vmatpush1.bf16.msra.mxu0 %v2895_v9  ;;  %1194 = vmatpush1.bf16.msra.mxu1 %v2898_v10  ;;  %v2985_v9 = vld [vmem:[%s4010_s1 + $0x1a8] ss:$16 sps:$4 sm:$0xff]   ;;  %v2992_v10 = vld [vmem:[%s4010_s1 + $0x1c4] ss:$16 sps:$4 sm:$0xff]  }
  0x48   :  { %1092 = vmatprep.subr.bf16.mxu0 %v2903_v11  ;;  %1195 = vmatprep.subr.bf16.mxu1 %v2906_v12  ;;  %v2995_v11 = vld [vmem:[%s4010_s1 + $0x1cc] ss:$16 sps:$4 sm:$0xff]   ;;  %v2990_v12 = vld [vmem:[%s4010_s1 + $0x1c0] ss:$16 sps:$4 sm:$0xff]  }
  0x4a   :  { %595 = vmatmul.mubr.bf16.gmra.mrb[4].mxu0 %v3377_v15  ;;  %698 = vmatmul.mubr.bf16.gmra.mrb[4].mxu1 %v3377_v15 }
  0x4b   :  { %1093 = vmatpush1.bf16.msra.mxu0 %v2901_v13  ;;  %1196 = vmatpush1.bf16.msra.mxu1 %v2904_v14  ;;  %v2993_v13 = vld [vmem:[%s4010_s1 + $0x1c8] ss:$16 sps:$4 sm:$0xff]   ;;  %v2999_v14 = vld [vmem:[%s4010_s1 + $0x1e4] ss:$16 sps:$4 sm:$0xff]  }
  0x4c   :  { %1094 = vmatprep.subr.bf16.mxu0 %v2909_v16  ;;  %1197 = vmatprep.subr.bf16.mxu1 %v2912_v17  ;;  %v3002_v16 = vld [vmem:[%s4010_s1 + $0x1ec] ss:$16 sps:$4 sm:$0xff]   ;;  %v2997_v17 = vld [vmem:[%s4010_s1 + $0x1e0] ss:$16 sps:$4 sm:$0xff]  }
  0x4d   :  { %604 = vmatprep.mubr.bf16.mxu0 %v3388_v18  ;;  %707 = vmatprep.mubr.bf16.mxu1 %v3388_v18 }
  0x4f   :  { %1095 = vmatpush1.bf16.msra.mxu0 %v2907_v19  ;;  %1198 = vmatpush1.bf16.msra.mxu1 %v2910_v20  ;;  %v3000_v19 = vld [vmem:[%s4010_s1 + $0x1e8] ss:$16 sps:$4 sm:$0xff]   ;;  %v3008_v20 = vld [vmem:[%s4010_s1 + $0x404] ss:$16 sps:$4 sm:$0xff]  }
  0x50   :  { %1096 = vmatprep.subr.bf16.mxu0 %v2917_v21  ;;  %1199 = vmatprep.subr.bf16.mxu1 %v2920_v22  ;;  %v3011_v21 = vld [vmem:[%s4010_s1 + $0x40c] ss:$16 sps:$4 sm:$0xff]   ;;  %v3003_v22 = vld [vmem:[%s4011_s0] ss:$8 sps:$4 sm:$0xff]  }
  0x52   :  { %605 = vmatmul.mubr.bf16.gmra.mrb[8].mxu0 %v3415_v25  ;;  %708 = vmatmul.mubr.bf16.gmra.mrb[8].mxu1 %v3415_v25 }
  0x53   :  { %1097 = vmatpush1.bf16.msra.mxu0 %v2915_v23  ;;  %1200 = vmatpush1.bf16.msra.mxu1 %v2918_v24  ;;  %v3006_v23 = vld [vmem:[%s4010_s1 + $0x400] ss:$16 sps:$4 sm:$0xff]   ;;  %v3009_v24 = vld [vmem:[%s4010_s1 + $0x408] ss:$16 sps:$4 sm:$0xff]  }
  0x54   :  { %1098 = vmatprep.subr.bf16.mxu0 %v2924_v26  ;;  %1201 = vmatprep.subr.bf16.mxu1 %v2927_v27  ;;  %v3014_v26 = vld [vmem:[%s4010_s1 + $0x424] ss:$16 sps:$4 sm:$0xff]   ;;  %v3017_v27 = vld [vmem:[%s4010_s1 + $0x42c] ss:$16 sps:$4 sm:$0xff]  }
  0x55   :  { %614 = vmatprep.mubr.bf16.mxu0 %v3426_v28  ;;  %717 = vmatprep.mubr.bf16.mxu1 %v3426_v28 }
  0x57   :  { %1099 = vmatpush1.bf16.msra.mxu0 %v2922_v29  ;;  %1202 = vmatpush1.bf16.msra.mxu1 %v2925_v30  ;;  %v3012_v29 = vld [vmem:[%s4010_s1 + $0x420] ss:$16 sps:$4 sm:$0xff]   ;;  %v3015_v30 = vld [vmem:[%s4010_s1 + $0x428] ss:$16 sps:$4 sm:$0xff]  }
  0x58   :  { %1100 = vmatprep.subr.bf16.mxu0 %v2932_v31  ;;  %1203 = vmatprep.subr.bf16.mxu1 %v2935_v32  ;;  %v3020_v31 = vld [vmem:[%s4010_s1 + $0x444] ss:$16 sps:$4 sm:$0xff]   ;;  %v3023_v32 = vld [vmem:[%s4010_s1 + $0x44c] ss:$16 sps:$4 sm:$0xff]  }
  0x5a   :  { %615 = vmatmul.mubr.bf16.gmra.mrb[12].mxu0 %v3453_v35  ;;  %718 = vmatmul.mubr.bf16.gmra.mrb[12].mxu1 %v3453_v35 }
  0x5b   :  { %1101 = vmatpush1.bf16.msra.mxu0 %v2930_v33  ;;  %1204 = vmatpush1.bf16.msra.mxu1 %v2933_v34  ;;  %v3018_v33 = vld [vmem:[%s4010_s1 + $0x440] ss:$16 sps:$4 sm:$0xff]   ;;  %v3021_v34 = vld [vmem:[%s4010_s1 + $0x448] ss:$16 sps:$4 sm:$0xff]  }
  0x5c   :  { %1102 = vmatprep.subr.bf16.mxu0 %v2939_v36  ;;  %1205 = vmatprep.subr.bf16.mxu1 %v2942_v37  ;;  %v3026_v36 = vld [vmem:[%s4010_s1 + $0x464] ss:$16 sps:$4 sm:$0xff]   ;;  %v3024_v37 = vld [vmem:[%s4010_s1 + $0x460] ss:$16 sps:$4 sm:$0xff]  }
  0x5d   :  { %624 = vmatprep.mubr.bf16.mxu0 %v3464_v38  ;;  %727 = vmatprep.mubr.bf16.mxu1 %v3464_v38 }
  0x5f   :  { %1103 = vmatpush1.bf16.msra.mxu0 %v2937_v39  ;;  %1206 = vmatpush1.bf16.msra.mxu1 %v2940_v40  ;;  %v3027_v39 = vld [vmem:[%s4010_s1 + $0x468] ss:$16 sps:$4 sm:$0xff]   ;;  %v3032_v40 = vld [vmem:[%s4010_s1 + $0x484] ss:$16 sps:$4 sm:$0xff]  }
  0x60   :  { %1104 = vmatprep.subr.bf16.mxu0 %v2947_v41  ;;  %1207 = vmatprep.subr.bf16.mxu1 %v2950_v42  ;;  %v3030_v41 = vld [vmem:[%s4010_s1 + $0x480] ss:$16 sps:$4 sm:$0xff]   ;;  %v3033_v42 = vld [vmem:[%s4010_s1 + $0x488] ss:$16 sps:$4 sm:$0xff]  }
  0x62   :  { %625 = vmatmul.mubr.bf16.gmra.mrb[16].mxu0 %v3491_v45  ;;  %728 = vmatmul.mubr.bf16.gmra.mrb[16].mxu1 %v3491_v45 }
  0x63   :  { %1105 = vmatpush1.bf16.msra.mxu0 %v2945_v43  ;;  %1208 = vmatpush1.bf16.msra.mxu1 %v2948_v44  ;;  %v3038_v43 = vld [vmem:[%s4010_s1 + $0x4a4] ss:$16 sps:$4 sm:$0xff]   ;;  %v3041_v44 = vld [vmem:[%s4010_s1 + $0x4ac] ss:$16 sps:$4 sm:$0xff]  }
  0x64   :  { %1106 = vmatprep.subr.bf16.mxu0 %v2954_v46  ;;  %1209 = vmatprep.subr.bf16.mxu1 %v2957_v48  ;;  %v3036_v46 = vld [vmem:[%s4010_s1 + $0x4a0] ss:$16 sps:$4 sm:$0xff]   ;;  %v3039_v48 = vld [vmem:[%s4010_s1 + $0x4a8] ss:$16 sps:$4 sm:$0xff]  }
  0x65   :  { %634 = vmatprep.mubr.bf16.mxu0 %v3502_v49  ;;  %737 = vmatprep.mubr.bf16.mxu1 %v3502_v49 }
  0x67   :  { %1107 = vmatpush1.bf16.msra.mxu0 %v2952_v50  ;;  %1210 = vmatpush1.bf16.msra.mxu1 %v2955_v51  ;;  %v3044_v50 = vld [vmem:[%s4010_s1 + $0x4c4] ss:$16 sps:$4 sm:$0xff]   ;;  %v3047_v51 = vld [vmem:[%s4010_s1 + $0x4cc] ss:$16 sps:$4 sm:$0xff]  }
  0x68   :  { %1108 = vmatprep.subr.bf16.mxu0 %v2962_v52  ;;  %1211 = vmatprep.subr.bf16.mxu1 %v2965_v53  ;;  %v3042_v52 = vld [vmem:[%s4010_s1 + $0x4c0] ss:$16 sps:$4 sm:$0xff]   ;;  %v3045_v53 = vld [vmem:[%s4010_s1 + $0x4c8] ss:$16 sps:$4 sm:$0xff]  }
  0x6a   :  { %635 = vmatmul.mubr.bf16.gmra.mrb[20].mxu0 %v3529_v56  ;;  %738 = vmatmul.mubr.bf16.gmra.mrb[20].mxu1 %v3529_v56 }
  0x6b   :  { %1109 = vmatpush1.bf16.msra.mxu0 %v2960_v54  ;;  %1212 = vmatpush1.bf16.msra.mxu1 %v2963_v55  ;;  %v3050_v54 = vld [vmem:[%s4010_s1 + $0x4e4] ss:$16 sps:$4 sm:$0xff]   ;;  %v3053_v55 = vld [vmem:[%s4010_s1 + $0x4ec] ss:$16 sps:$4 sm:$0xff]  }
  0x6c   :  { %1110 = vmatprep.subr.bf16.mxu0 %v2969_v57  ;;  %1213 = vmatprep.subr.bf16.mxu1 %v2972_v58  ;;  %v3048_v57 = vld [vmem:[%s4010_s1 + $0x4e0] ss:$16 sps:$4 sm:$0xff]   ;;  %v3051_v58 = vld [vmem:[%s4010_s1 + $0x4e8] ss:$16 sps:$4 sm:$0xff]  }
  0x6d   :  { %644 = vmatprep.mubr.bf16.mxu0 %v3540_v59  ;;  %747 = vmatprep.mubr.bf16.mxu1 %v3540_v59 }
  0x6f   :  { %1111 = vmatpush1.bf16.msra.mxu0 %v2967_v60  ;;  %1214 = vmatpush1.bf16.msra.mxu1 %v2970_v61  ;;  %v3056_v60 = vld [vmem:[%s4010_s1 + $0x504] ss:$16 sps:$4 sm:$0xff]   ;;  %v3059_v61 = vld [vmem:[%s4010_s1 + $0x50c] ss:$16 sps:$4 sm:$0xff]  }
  0x70   :  { %1112 = vmatprep.subr.bf16.mxu0 %v2977_v62  ;;  %1215 = vmatprep.subr.bf16.mxu1 %v2980_v63  ;;  %v3054_v62 = vld [vmem:[%s4010_s1 + $0x500] ss:$16 sps:$4 sm:$0xff]   ;;  %v3057_v63 = vld [vmem:[%s4010_s1 + $0x508] ss:$16 sps:$4 sm:$0xff]  }
  0x72   :  { %645 = vmatmul.mubr.bf16.gmra.mrb[24].mxu0 %v3567_v2  ;;  %748 = vmatmul.mubr.bf16.gmra.mrb[24].mxu1 %v3567_v2 }
  0x73   :  { %1113 = vmatpush1.bf16.msra.mxu0 %v2975_v0  ;;  %1216 = vmatpush1.bf16.msra.mxu1 %v2978_v1  ;;  %v3062_v0 = vld [vmem:[%s4010_s1 + $0x524] ss:$16 sps:$4 sm:$0xff]   ;;  %v3065_v1 = vld [vmem:[%s4010_s1 + $0x52c] ss:$16 sps:$4 sm:$0xff]  }
  0x74   :  { %1114 = vmatprep.subr.bf16.mxu0 %v2984_v3  ;;  %1217 = vmatprep.subr.bf16.mxu1 %v2987_v5  ;;  %v3060_v3 = vld [vmem:[%s4010_s1 + $0x520] ss:$16 sps:$4 sm:$0xff]   ;;  %v3063_v5 = vld [vmem:[%s4010_s1 + $0x528] ss:$16 sps:$4 sm:$0xff]  }
  0x75   :  { %1120 = vmatprep.mubr.bf16.mxu0 %v3005_v6  ;;  %1223 = vmatprep.mubr.bf16.mxu1 %v3005_v6  ;;  %v3068_v6 = vld [vmem:[%s4010_s1 + $0x544] ss:$16 sps:$4 sm:$0xff]  }
  0x77   :  { %1115 = vmatpush1.bf16.msra.mxu0 %v2982_v7  ;;  %1218 = vmatpush1.bf16.msra.mxu1 %v2985_v9  ;;  %v3071_v7 = vld [vmem:[%s4010_s1 + $0x54c] ss:$16 sps:$4 sm:$0xff]   ;;  %v3066_v9 = vld [vmem:[%s4010_s1 + $0x540] ss:$16 sps:$4 sm:$0xff]  }
  0x78   :  { %1116 = vmatprep.subr.bf16.mxu0 %v2992_v10  ;;  %1219 = vmatprep.subr.bf16.mxu1 %v2995_v11  ;;  %v3069_v10 = vld [vmem:[%s4010_s1 + $0x548] ss:$16 sps:$4 sm:$0xff]   ;;  %v3074_v11 = vld [vmem:[%s4010_s1 + $0x564] ss:$16 sps:$4 sm:$0xff]  }
  0x7b   :  { %1117 = vmatpush1.bf16.msra.mxu0 %v2990_v12  ;;  %1220 = vmatpush1.bf16.msra.mxu1 %v2993_v13  ;;  %v3077_v12 = vld [vmem:[%s4010_s1 + $0x56c] ss:$16 sps:$4 sm:$0xff]   ;;  %v3072_v13 = vld [vmem:[%s4010_s1 + $0x560] ss:$16 sps:$4 sm:$0xff]  }
  0x7c   :  { %1118 = vmatprep.subr.bf16.mxu0 %v2999_v14  ;;  %1221 = vmatprep.subr.bf16.mxu1 %v3002_v16  ;;  %v3075_v14 = vld [vmem:[%s4010_s1 + $0x568] ss:$16 sps:$4 sm:$0xff]   ;;  %v3080_v16 = vld [vmem:[%s4010_s1 + $0x584] ss:$16 sps:$4 sm:$0xff]  }
  0x7f   :  { %1119 = vmatpush1.bf16.msra.mxu0 %v2997_v17  ;;  %1222 = vmatpush1.bf16.msra.mxu1 %v3000_v19  ;;  %v3083_v17 = vld [vmem:[%s4010_s1 + $0x58c] ss:$16 sps:$4 sm:$0xff]   ;;  %v3078_v19 = vld [vmem:[%s4010_s1 + $0x580] ss:$16 sps:$4 sm:$0xff]  }
  0x80   :  { %1689 = vmatprep.subr.bf16.mxu0 %v3008_v20  ;;  %1792 = vmatprep.subr.bf16.mxu1 %v3011_v21  ;;  %v3081_v20 = vld [vmem:[%s4010_s1 + $0x588] ss:$16 sps:$4 sm:$0xff]   ;;  %v3086_v21 = vld [vmem:[%s4010_s1 + $0x5a4] ss:$16 sps:$4 sm:$0xff]  }
  0x82   :  { %1121 = vmatmul.mubr.bf16.vlgmr.msra.gmra.mrb[0].mxu0 %v3003_v22  ;;  %1224 = vmatmul.mubr.bf16.vlgmr.msra.gmra.mrb[0].mxu1 %v3003_v22  ;;  %v3089_v22 = vld [vmem:[%s4010_s1 + $0x5ac] ss:$16 sps:$4 sm:$0xff]  }
  0x83   :  { %1690 = vmatpush1.bf16.msra.mxu0 %v3006_v23  ;;  %1793 = vmatpush1.bf16.msra.mxu1 %v3009_v24  ;;  %v3084_v23 = vld [vmem:[%s4010_s1 + $0x5a0] ss:$16 sps:$4 sm:$0xff]   ;;  %v3087_v24 = vld [vmem:[%s4010_s1 + $0x5a8] ss:$16 sps:$4 sm:$0xff]  }
  0x84   :  { %1691 = vmatprep.subr.bf16.mxu0 %v3014_v26  ;;  %1794 = vmatprep.subr.bf16.mxu1 %v3017_v27  ;;  %v3092_v26 = vld [vmem:[%s4010_s1 + $0x5c4] ss:$16 sps:$4 sm:$0xff]   ;;  %v3095_v27 = vld [vmem:[%s4010_s1 + $0x5cc] ss:$16 sps:$4 sm:$0xff]  }
  0x85   :  { %1130 = vmatprep.mubr.bf16.mxu0 %v3269_v47  ;;  %1233 = vmatprep.mubr.bf16.mxu1 %v3269_v47  ;;  %v3029_v47 = vld [vmem:[%s4010_s1 + $0x46c] ss:$16 sps:$4 sm:$0xff]  }
  0x87   :  { %1692 = vmatpush1.bf16.msra.mxu0 %v3012_v29  ;;  %1795 = vmatpush1.bf16.msra.mxu1 %v3015_v30  ;;  %v3090_v29 = vld [vmem:[%s4010_s1 + $0x5c0] ss:$16 sps:$4 sm:$0xff]   ;;  %v3093_v30 = vld [vmem:[%s4010_s1 + $0x5c8] ss:$16 sps:$4 sm:$0xff]  }
  0x88   :  { %1693 = vmatprep.subr.bf16.mxu0 %v3020_v31  ;;  %1796 = vmatprep.subr.bf16.mxu1 %v3023_v32  ;;  %v3098_v31 = vld [vmem:[%s4010_s1 + $0x5e4] ss:$16 sps:$4 sm:$0xff]   ;;  %v3096_v32 = vld [vmem:[%s4010_s1 + $0x5e0] ss:$16 sps:$4 sm:$0xff]  }
  0x8a   :  { %1131 = vmatmul.mubr.bf16.gmra.mrb[4].mxu0 %v3336_v4  ;;  %1234 = vmatmul.mubr.bf16.gmra.mrb[4].mxu1 %v3336_v4  ;;  %v3035_v4 = vld [vmem:[%s4010_s1 + $0x48c] ss:$16 sps:$4 sm:$0xff]  }
  0x8b   :  { %1694 = vmatpush1.bf16.msra.mxu0 %v3018_v33  ;;  %1797 = vmatpush1.bf16.msra.mxu1 %v3021_v34  ;;  %v3099_v33 = vld [vmem:[%s4010_s1 + $0x5e8] ss:$16 sps:$4 sm:$0xff]  }
  0x8c   :  { %1695 = vmatprep.subr.bf16.mxu0 %v3026_v36  ;;  %1798 = vmatprep.subr.bf16.mxu1 %v3029_v47 }
  0x8d   :  { %1140 = vmatprep.mubr.bf16.mxu0 %v3350_v8  ;;  %1243 = vmatprep.mubr.bf16.mxu1 %v3350_v8 }
  0x8f   :  { %1696 = vmatpush1.bf16.msra.mxu0 %v3024_v37  ;;  %1799 = vmatpush1.bf16.msra.mxu1 %v3027_v39 }
  0x90   :  { %1697 = vmatprep.subr.bf16.mxu0 %v3032_v40  ;;  %1800 = vmatprep.subr.bf16.mxu1 %v3035_v4 }
  0x92   :  { %1141 = vmatmul.mubr.bf16.gmra.mrb[8].mxu0 %v3377_v15  ;;  %1244 = vmatmul.mubr.bf16.gmra.mrb[8].mxu1 %v3377_v15 }
  0x93   :  { %1698 = vmatpush1.bf16.msra.mxu0 %v3030_v41  ;;  %1801 = vmatpush1.bf16.msra.mxu1 %v3033_v42 }
  0x94   :  { %1699 = vmatprep.subr.bf16.mxu0 %v3038_v43  ;;  %1802 = vmatprep.subr.bf16.mxu1 %v3041_v44 }
  0x95   :  { %1150 = vmatprep.mubr.bf16.mxu0 %v3388_v18  ;;  %1253 = vmatprep.mubr.bf16.mxu1 %v3388_v18 }
  0x97   :  { %1700 = vmatpush1.bf16.msra.mxu0 %v3036_v46  ;;  %1803 = vmatpush1.bf16.msra.mxu1 %v3039_v48 }
  0x98   :  { %1701 = vmatprep.subr.bf16.mxu0 %v3044_v50  ;;  %1804 = vmatprep.subr.bf16.mxu1 %v3047_v51 }
  0x9a   :  { %1151 = vmatmul.mubr.bf16.gmra.mrb[12].mxu0 %v3415_v25  ;;  %1254 = vmatmul.mubr.bf16.gmra.mrb[12].mxu1 %v3415_v25 }
  0x9b   :  { %1702 = vmatpush1.bf16.msra.mxu0 %v3042_v52  ;;  %1805 = vmatpush1.bf16.msra.mxu1 %v3045_v53 }
  0x9c   :  { %1703 = vmatprep.subr.bf16.mxu0 %v3050_v54  ;;  %1806 = vmatprep.subr.bf16.mxu1 %v3053_v55 }
  0x9d   :  { %1160 = vmatprep.mubr.bf16.mxu0 %v3426_v28  ;;  %1263 = vmatprep.mubr.bf16.mxu1 %v3426_v28 }
  0x9f   :  { %1704 = vmatpush1.bf16.msra.mxu0 %v3048_v57  ;;  %1807 = vmatpush1.bf16.msra.mxu1 %v3051_v58 }
  0xa0   :  { %1705 = vmatprep.subr.bf16.mxu0 %v3056_v60  ;;  %1808 = vmatprep.subr.bf16.mxu1 %v3059_v61 }
  0xa2   :  { %1161 = vmatmul.mubr.bf16.gmra.mrb[16].mxu0 %v3453_v35  ;;  %1264 = vmatmul.mubr.bf16.gmra.mrb[16].mxu1 %v3453_v35 }
  0xa3   :  { %1706 = vmatpush1.bf16.msra.mxu0 %v3054_v62  ;;  %1809 = vmatpush1.bf16.msra.mxu1 %v3057_v63 }
  0xa4   :  { %1707 = vmatprep.subr.bf16.mxu0 %v3062_v0  ;;  %1810 = vmatprep.subr.bf16.mxu1 %v3065_v1 }
  0xa5   :  { %1170 = vmatprep.mubr.bf16.mxu0 %v3464_v38  ;;  %1273 = vmatprep.mubr.bf16.mxu1 %v3464_v38 }
  0xa7   :  { %1708 = vmatpush1.bf16.msra.mxu0 %v3060_v3  ;;  %1811 = vmatpush1.bf16.msra.mxu1 %v3063_v5 }
  0xa8   :  { %1709 = vmatprep.subr.bf16.mxu0 %v3068_v6  ;;  %1812 = vmatprep.subr.bf16.mxu1 %v3071_v7 }
  0xaa   :  { %1171 = vmatmul.mubr.bf16.gmra.mrb[20].mxu0 %v3491_v45  ;;  %1274 = vmatmul.mubr.bf16.gmra.mrb[20].mxu1 %v3491_v45 }
  0xab   :  { %1710 = vmatpush1.bf16.msra.mxu0 %v3066_v9  ;;  %1813 = vmatpush1.bf16.msra.mxu1 %v3069_v10 }
  0xac   :  { %1711 = vmatprep.subr.bf16.mxu0 %v3074_v11  ;;  %1814 = vmatprep.subr.bf16.mxu1 %v3077_v12 }
  0xad   :  { %1180 = vmatprep.mubr.bf16.mxu0 %v3502_v49  ;;  %1283 = vmatprep.mubr.bf16.mxu1 %v3502_v49 }
  0xaf   :  { %1712 = vmatpush1.bf16.msra.mxu0 %v3072_v13  ;;  %1815 = vmatpush1.bf16.msra.mxu1 %v3075_v14 }
  0xb0   :  { %1713 = vmatprep.subr.bf16.mxu0 %v3080_v16  ;;  %1816 = vmatprep.subr.bf16.mxu1 %v3083_v17 }
  0xb2   :  { %1181 = vmatmul.mubr.bf16.gmra.mrb[24].mxu0 %v3529_v56  ;;  %1284 = vmatmul.mubr.bf16.gmra.mrb[24].mxu1 %v3529_v56 }
  0xb3   :  { %1714 = vmatpush1.bf16.msra.mxu0 %v3078_v19  ;;  %1817 = vmatpush1.bf16.msra.mxu1 %v3081_v20 }
  0xb4   :  { %1715 = vmatprep.subr.bf16.mxu0 %v3086_v21  ;;  %1818 = vmatprep.subr.bf16.mxu1 %v3089_v22 }
  0xb5   :  { %1721 = vmatprep.mubr.bf16.mxu0 %v3350_v8  ;;  %1824 = vmatprep.mubr.bf16.mxu1 %v3350_v8  ;;  %v3101_v8 = vld [vmem:[%s4010_s1 + $0x5ec] ss:$16 sps:$4 sm:$0xff]  }
  0xb7   :  { %1716 = vmatpush1.bf16.msra.mxu0 %v3084_v23  ;;  %1819 = vmatpush1.bf16.msra.mxu1 %v3087_v24 }
  0xb8   :  { %1717 = vmatprep.subr.bf16.mxu0 %v3092_v26  ;;  %1820 = vmatprep.subr.bf16.mxu1 %v3095_v27 }
  0xbb   :  { %1718 = vmatpush1.bf16.msra.mxu0 %v3090_v29  ;;  %1821 = vmatpush1.bf16.msra.mxu1 %v3093_v30 }
  0xbc   :  { %1719 = vmatprep.subr.bf16.mxu0 %v3098_v31  ;;  %1822 = vmatprep.subr.bf16.mxu1 %v3101_v8 }
  0xbf   :  { %1720 = vmatpush1.bf16.msra.mxu0 %v3096_v32  ;;  %1823 = vmatpush1.bf16.msra.mxu1 %v3099_v33 }
  0xc2   :  { %1722 = vmatmul.mubr.bf16.vlgmr.msra.gmra.mrb[0].mxu0 %v3377_v15  ;;  %1825 = vmatmul.mubr.bf16.vlgmr.msra.gmra.mrb[0].mxu1 %v3377_v15  ;;  %v3102_v15 = vld [vmem:[%s4011_s0 + $0x84] ss:$8 sps:$4 sm:$0xff]  }
  0xc3   :  { %1731 = vmatprep.mubr.bf16.mxu0 %v3388_v18  ;;  %1834 = vmatprep.mubr.bf16.mxu1 %v3388_v18  ;;  %v3104_v18 = vld [vmem:[%s4011_s0 + $0x80] ss:$8 sps:$4 sm:$0xff]  }
  0xca   :  { %1732 = vmatmul.mubr.bf16.gmra.mrb[4].mxu0 %v3415_v25  ;;  %1835 = vmatmul.mubr.bf16.gmra.mrb[4].mxu1 %v3415_v25  ;;  %v1952_v25 = vlaneseq }
  0xcb   :  { %1741 = vmatprep.mubr.bf16.mxu0 %v3426_v28  ;;  %1844 = vmatprep.mubr.bf16.mxu1 %v3426_v28 }
  0xcc   :  { %v1953_v28 = vshrl.u32 %v1952_v25, 7 }
  0xd2   :  { %1742 = vmatmul.mubr.bf16.gmra.mrb[8].mxu0 %v3453_v35  ;;  %1845 = vmatmul.mubr.bf16.gmra.mrb[8].mxu1 %v3453_v35  ;;  %v1954_v35 = vsub.s32 0, %v1953_v28 }
  0xd3   :  { %1751 = vmatprep.mubr.bf16.mxu0 %v3464_v38  ;;  %1854 = vmatprep.mubr.bf16.mxu1 %v3464_v38  ;;  %v1962_v38 = vsub.s32 2, %v1953_v28 }
  0xda   :  { %1752 = vmatmul.mubr.bf16.gmra.mrb[12].mxu0 %v3491_v45  ;;  %1855 = vmatmul.mubr.bf16.gmra.mrb[12].mxu1 %v3491_v45  ;;  %v14_v45 = vld [vmem:[%s4012_s2] sm:$0xf] }
  0xdb   :  { %1761 = vmatprep.mubr.bf16.mxu0 %v3502_v49  ;;  %1864 = vmatprep.mubr.bf16.mxu1 %v3502_v49  ;;  %v1958_v49 = vsub.s32 1, %v1953_v28 }
  0xdd   :  { %v3866_v34 = vrot.slane %v14_v45, %v1958_v49 }
  0xe2   :  { %1762 = vmatmul.mubr.bf16.gmra.mrb[16].mxu0 %v3529_v56  ;;  %1865 = vmatmul.mubr.bf16.gmra.mrb[16].mxu1 %v3529_v56  ;;  %v1966_v56 = vsub.s32 3, %v1953_v28 }
  0xe3   :  { %1771 = vmatprep.mubr.bf16.mxu0 %v3540_v59  ;;  %1874 = vmatprep.mubr.bf16.mxu1 %v3540_v59  ;;  %v3862_v59 = vrot.slane %v14_v45, %v1954_v35 }
  0xe4   :  { %v3868_v36 = vrot.slane %v14_v45, %v1966_v56 }
  0xea   :  { %1772 = vmatmul.mubr.bf16.gmra.mrb[20].mxu0 %v3567_v2  ;;  %1875 = vmatmul.mubr.bf16.gmra.mrb[20].mxu1 %v3567_v2  ;;  %v3864_v2 = vrot.slane %v14_v45, %v1962_v38 }
  0xeb   :  { %1781 = vmatprep.mubr.bf16.mxu0 %v3102_v15  ;;  %1884 = vmatprep.mubr.bf16.mxu1 %v3102_v15 }
  0xf2   :  { %1782 = vmatmul.mubr.bf16.gmra.mrb[24].mxu0 %v3104_v18  ;;  %1885 = vmatmul.mubr.bf16.gmra.mrb[24].mxu1 %v3104_v18 }
 0x195   :  { %v1723_v47 = vpop.f32.mrb[0].mxu0  ;;  %v1826_v37 = vpop.f32.mrb[0].mxu1 }
 0x196   :  { %v1972_v39 = vadd.f32 %v3862_v59, %v1723_v47  ;;  %v1974_v40 = vadd.f32 %v3864_v2, %v1826_v37  ;;  %v1725_v4 = vpop.f32.mrb[1].mxu0  ;;  %v1828_v41 = vpop.f32.mrb[1].mxu1 }
 0x197   :  { %v1973_v42 = vadd.f32 %v3866_v34, %v1725_v4  ;;  %v1975_v43 = vadd.f32 %v3868_v36, %v1828_v41  ;;  %v1727_v44 = vpop.f32.mrb[2].mxu0  ;;  %v1830_v46 = vpop.f32.mrb[2].mxu1 }
 0x198   :  { %v2028_v48 = vmax.f32 %v1972_v39, 0.0  ;;  %v2030_v50 = vmax.f32 %v1974_v40, 0.0  ;;  %v1976_v51 = vadd.f32 %v3862_v59, %v1727_v44  ;;  %v1978_v52 = vadd.f32 %v3864_v2, %v1830_v46  ;;  %v1729_v53 = vpop.f32.mrb[3].mxu0  ;;  %v1832_v54 = vpop.f32.mrb[3].mxu1 }
 0x199   :  { %v2029_v55 = vmax.f32 %v1973_v42, 0.0  ;;  %v2031_v57 = vmax.f32 %v1975_v43, 0.0  ;;  %v1977_v58 = vadd.f32 %v3866_v34, %v1729_v53  ;;  %v1979_v60 = vadd.f32 %v3868_v36, %v1832_v54 }
 0x19a   :  { %v2032_v61 = vmax.f32 %v1976_v51, 0.0  ;;  %v2034_v62 = vmax.f32 %v1978_v52, 0.0 }
 0x19b   :  { %v2650_v63 = vpack.c.bf16 %v2029_v55, %v2028_v48  ;;  %v2651_v0 = vpack.c.bf16 %v2031_v57, %v2030_v50  ;;  %v2033_v1 = vmax.f32 %v1977_v58, 0.0  ;;  %v2035_v3 = vmax.f32 %v1979_v60, 0.0 }
 0x19d   :  { %2252 = vst [vmem:[%s4013_s3] sm:$0xff] %v2650_v63  ;;  %2253 = vst [vmem:[%s4013_s3 + $0x8] sm:$0xff] %v2651_v0  ;;  %v2652_v5 = vpack.c.bf16 %v2033_v1, %v2032_v61  ;;  %v2653_v6 = vpack.c.bf16 %v2035_v3, %v2034_v62  ;;  %v1733_v7 = vpop.f32.mrb[4].mxu0  ;;  %v1836_v9 = vpop.f32.mrb[4].mxu1 }
 0x19e   :  { %v1980_v10 = vadd.f32 %v3862_v59, %v1733_v7  ;;  %v1982_v11 = vadd.f32 %v3864_v2, %v1836_v9  ;;  %v1735_v12 = vpop.f32.mrb[5].mxu0  ;;  %v1838_v13 = vpop.f32.mrb[5].mxu1 }
 0x19f   :  { %2254 = vst [vmem:[%s4013_s3 + $0x10] sm:$0xff] %v2652_v5  ;;  %2255 = vst [vmem:[%s4013_s3 + $0x18] sm:$0xff] %v2653_v6  ;;  %v1981_v14 = vadd.f32 %v3866_v34, %v1735_v12  ;;  %v1983_v16 = vadd.f32 %v3868_v36, %v1838_v13  ;;  %v1737_v17 = vpop.f32.mrb[6].mxu0  ;;  %v1840_v19 = vpop.f32.mrb[6].mxu1 }
 0x1a0   :  { %v2036_v20 = vmax.f32 %v1980_v10, 0.0  ;;  %v2038_v21 = vmax.f32 %v1982_v11, 0.0  ;;  %v1984_v22 = vadd.f32 %v3862_v59, %v1737_v17  ;;  %v1986_v23 = vadd.f32 %v3864_v2, %v1840_v19  ;;  %v1739_v24 = vpop.f32.mrb[7].mxu0  ;;  %v1842_v26 = vpop.f32.mrb[7].mxu1 }
 0x1a1   :  { %v2037_v27 = vmax.f32 %v1981_v14, 0.0  ;;  %v2039_v29 = vmax.f32 %v1983_v16, 0.0  ;;  %v1985_v30 = vadd.f32 %v3866_v34, %v1739_v24  ;;  %v1987_v31 = vadd.f32 %v3868_v36, %v1842_v26 }
 0x1a2   :  { %v2040_v8 = vmax.f32 %v1984_v22, 0.0  ;;  %v2042_v32 = vmax.f32 %v1986_v23, 0.0 }
 0x1a3   :  { %v2654_v33 = vpack.c.bf16 %v2037_v27, %v2036_v20  ;;  %v2655_v15 = vpack.c.bf16 %v2039_v29, %v2038_v21  ;;  %v2041_v18 = vmax.f32 %v1985_v30, 0.0  ;;  %v2043_v25 = vmax.f32 %v1987_v31, 0.0 }
 0x1a5   :  { %2256 = vst [vmem:[%s4013_s3 + $0x20] sm:$0xff] %v2654_v33  ;;  %2257 = vst [vmem:[%s4013_s3 + $0x28] sm:$0xff] %v2655_v15  ;;  %v2656_v28 = vpack.c.bf16 %v2041_v18, %v2040_v8  ;;  %v2657_v35 = vpack.c.bf16 %v2043_v25, %v2042_v32  ;;  %v1743_v38 = vpop.f32.mrb[8].mxu0  ;;  %v1846_v45 = vpop.f32.mrb[8].mxu1 }
 0x1a6   :  { %v1988_v49 = vadd.f32 %v3862_v59, %v1743_v38  ;;  %v1990_v56 = vadd.f32 %v3864_v2, %v1846_v45  ;;  %v1745_v47 = vpop.f32.mrb[9].mxu0  ;;  %v1848_v37 = vpop.f32.mrb[9].mxu1 }
 0x1a7   :  { %2258 = vst [vmem:[%s4013_s3 + $0x30] sm:$0xff] %v2656_v28  ;;  %2259 = vst [vmem:[%s4013_s3 + $0x38] sm:$0xff] %v2657_v35  ;;  %v1989_v39 = vadd.f32 %v3866_v34, %v1745_v47  ;;  %v1991_v40 = vadd.f32 %v3868_v36, %v1848_v37  ;;  %v1747_v4 = vpop.f32.mrb[10].mxu0  ;;  %v1850_v41 = vpop.f32.mrb[10].mxu1 }
 0x1a8   :  { %v2044_v42 = vmax.f32 %v1988_v49, 0.0  ;;  %v2046_v43 = vmax.f32 %v1990_v56, 0.0  ;;  %v1992_v44 = vadd.f32 %v3862_v59, %v1747_v4  ;;  %v1994_v46 = vadd.f32 %v3864_v2, %v1850_v41  ;;  %v1749_v48 = vpop.f32.mrb[11].mxu0  ;;  %v1852_v50 = vpop.f32.mrb[11].mxu1 }
 0x1a9   :  { %v2045_v51 = vmax.f32 %v1989_v39, 0.0  ;;  %v2047_v52 = vmax.f32 %v1991_v40, 0.0  ;;  %v1993_v53 = vadd.f32 %v3866_v34, %v1749_v48  ;;  %v1995_v54 = vadd.f32 %v3868_v36, %v1852_v50 }
 0x1aa   :  { %v2048_v55 = vmax.f32 %v1992_v44, 0.0  ;;  %v2050_v57 = vmax.f32 %v1994_v46, 0.0 }
 0x1ab   :  { %v2658_v58 = vpack.c.bf16 %v2045_v51, %v2044_v42  ;;  %v2659_v60 = vpack.c.bf16 %v2047_v52, %v2046_v43  ;;  %v2049_v61 = vmax.f32 %v1993_v53, 0.0  ;;  %v2051_v62 = vmax.f32 %v1995_v54, 0.0 }
 0x1ad   :  { %2260 = vst [vmem:[%s4013_s3 + $0x40] sm:$0xff] %v2658_v58  ;;  %2261 = vst [vmem:[%s4013_s3 + $0x48] sm:$0xff] %v2659_v60  ;;  %v2660_v63 = vpack.c.bf16 %v2049_v61, %v2048_v55  ;;  %v2661_v0 = vpack.c.bf16 %v2051_v62, %v2050_v57  ;;  %v1753_v1 = vpop.f32.mrb[12].mxu0  ;;  %v1856_v3 = vpop.f32.mrb[12].mxu1 }
 0x1ae   :  { %v1996_v5 = vadd.f32 %v3862_v59, %v1753_v1  ;;  %v1998_v6 = vadd.f32 %v3864_v2, %v1856_v3  ;;  %v1755_v7 = vpop.f32.mrb[13].mxu0  ;;  %v1858_v9 = vpop.f32.mrb[13].mxu1 }
 0x1af   :  { %2262 = vst [vmem:[%s4013_s3 + $0x50] sm:$0xff] %v2660_v63  ;;  %2263 = vst [vmem:[%s4013_s3 + $0x58] sm:$0xff] %v2661_v0  ;;  %v1997_v10 = vadd.f32 %v3866_v34, %v1755_v7  ;;  %v1999_v11 = vadd.f32 %v3868_v36, %v1858_v9  ;;  %v1757_v12 = vpop.f32.mrb[14].mxu0  ;;  %v1860_v13 = vpop.f32.mrb[14].mxu1 }
 0x1b0   :  { %v2052_v14 = vmax.f32 %v1996_v5, 0.0  ;;  %v2054_v16 = vmax.f32 %v1998_v6, 0.0  ;;  %v2000_v17 = vadd.f32 %v3862_v59, %v1757_v12  ;;  %v2002_v19 = vadd.f32 %v3864_v2, %v1860_v13  ;;  %v1759_v20 = vpop.f32.mrb[15].mxu0  ;;  %v1862_v21 = vpop.f32.mrb[15].mxu1 }
 0x1b1   :  { %v2053_v22 = vmax.f32 %v1997_v10, 0.0  ;;  %v2055_v23 = vmax.f32 %v1999_v11, 0.0  ;;  %v2001_v24 = vadd.f32 %v3866_v34, %v1759_v20  ;;  %v2003_v26 = vadd.f32 %v3868_v36, %v1862_v21 }
 0x1b2   :  { %v2056_v27 = vmax.f32 %v2000_v17, 0.0  ;;  %v2058_v29 = vmax.f32 %v2002_v19, 0.0 }
 0x1b3   :  { %v2662_v30 = vpack.c.bf16 %v2053_v22, %v2052_v14  ;;  %v2663_v31 = vpack.c.bf16 %v2055_v23, %v2054_v16  ;;  %v2057_v8 = vmax.f32 %v2001_v24, 0.0  ;;  %v2059_v32 = vmax.f32 %v2003_v26, 0.0 }
 0x1b5   :  { %2264 = vst [vmem:[%s4013_s3 + $0x60] sm:$0xff] %v2662_v30  ;;  %2265 = vst [vmem:[%s4013_s3 + $0x68] sm:$0xff] %v2663_v31  ;;  %v2664_v33 = vpack.c.bf16 %v2057_v8, %v2056_v27  ;;  %v2665_v15 = vpack.c.bf16 %v2059_v32, %v2058_v29  ;;  %v1763_v18 = vpop.f32.mrb[16].mxu0  ;;  %v1866_v25 = vpop.f32.mrb[16].mxu1 }
 0x1b6   :  { %v2004_v28 = vadd.f32 %v3862_v59, %v1763_v18  ;;  %v2006_v35 = vadd.f32 %v3864_v2, %v1866_v25  ;;  %v1765_v38 = vpop.f32.mrb[17].mxu0  ;;  %v1868_v45 = vpop.f32.mrb[17].mxu1 }
 0x1b7   :  { %2266 = vst [vmem:[%s4013_s3 + $0x70] sm:$0xff] %v2664_v33  ;;  %2267 = vst [vmem:[%s4013_s3 + $0x78] sm:$0xff] %v2665_v15  ;;  %v2005_v49 = vadd.f32 %v3866_v34, %v1765_v38  ;;  %v2007_v56 = vadd.f32 %v3868_v36, %v1868_v45  ;;  %v1767_v47 = vpop.f32.mrb[18].mxu0  ;;  %v1870_v37 = vpop.f32.mrb[18].mxu1 }
 0x1b8   :  { %v2060_v39 = vmax.f32 %v2004_v28, 0.0  ;;  %v2062_v40 = vmax.f32 %v2006_v35, 0.0  ;;  %v2008_v4 = vadd.f32 %v3862_v59, %v1767_v47  ;;  %v2010_v41 = vadd.f32 %v3864_v2, %v1870_v37  ;;  %v1769_v42 = vpop.f32.mrb[19].mxu0  ;;  %v1872_v43 = vpop.f32.mrb[19].mxu1 }
 0x1b9   :  { %v2061_v44 = vmax.f32 %v2005_v49, 0.0  ;;  %v2063_v46 = vmax.f32 %v2007_v56, 0.0  ;;  %v2009_v48 = vadd.f32 %v3866_v34, %v1769_v42  ;;  %v2011_v50 = vadd.f32 %v3868_v36, %v1872_v43 }
 0x1ba   :  { %v2064_v51 = vmax.f32 %v2008_v4, 0.0  ;;  %v2066_v52 = vmax.f32 %v2010_v41, 0.0 }
 0x1bb   :  { %v2666_v53 = vpack.c.bf16 %v2061_v44, %v2060_v39  ;;  %v2667_v54 = vpack.c.bf16 %v2063_v46, %v2062_v40  ;;  %v2065_v55 = vmax.f32 %v2009_v48, 0.0  ;;  %v2067_v57 = vmax.f32 %v2011_v50, 0.0 }
 0x1bd   :  { %2268 = vst [vmem:[%s4013_s3 + $0x80] sm:$0xff] %v2666_v53  ;;  %2269 = vst [vmem:[%s4013_s3 + $0x88] sm:$0xff] %v2667_v54  ;;  %v2668_v58 = vpack.c.bf16 %v2065_v55, %v2064_v51  ;;  %v2669_v60 = vpack.c.bf16 %v2067_v57, %v2066_v52  ;;  %v1773_v61 = vpop.f32.mrb[20].mxu0  ;;  %v1876_v62 = vpop.f32.mrb[20].mxu1 }
 0x1be   :  { %v2012_v63 = vadd.f32 %v3862_v59, %v1773_v61  ;;  %v2014_v0 = vadd.f32 %v3864_v2, %v1876_v62  ;;  %v1775_v1 = vpop.f32.mrb[21].mxu0  ;;  %v1878_v3 = vpop.f32.mrb[21].mxu1 }
 0x1bf   :  { %2270 = vst [vmem:[%s4013_s3 + $0x90] sm:$0xff] %v2668_v58  ;;  %2271 = vst [vmem:[%s4013_s3 + $0x98] sm:$0xff] %v2669_v60  ;;  %v2013_v5 = vadd.f32 %v3866_v34, %v1775_v1  ;;  %v2015_v6 = vadd.f32 %v3868_v36, %v1878_v3  ;;  %v1777_v7 = vpop.f32.mrb[22].mxu0  ;;  %v1880_v9 = vpop.f32.mrb[22].mxu1 }
 0x1c0   :  { %v2068_v10 = vmax.f32 %v2012_v63, 0.0  ;;  %v2070_v11 = vmax.f32 %v2014_v0, 0.0  ;;  %v2016_v12 = vadd.f32 %v3862_v59, %v1777_v7  ;;  %v2018_v13 = vadd.f32 %v3864_v2, %v1880_v9  ;;  %v1779_v14 = vpop.f32.mrb[23].mxu0  ;;  %v1882_v16 = vpop.f32.mrb[23].mxu1 }
 0x1c1   :  { %v2069_v17 = vmax.f32 %v2013_v5, 0.0  ;;  %v2071_v19 = vmax.f32 %v2015_v6, 0.0  ;;  %v2017_v20 = vadd.f32 %v3866_v34, %v1779_v14  ;;  %v2019_v21 = vadd.f32 %v3868_v36, %v1882_v16 }
 0x1c2   :  { %v2072_v22 = vmax.f32 %v2016_v12, 0.0  ;;  %v2074_v23 = vmax.f32 %v2018_v13, 0.0 }
 0x1c3   :  { %v2670_v24 = vpack.c.bf16 %v2069_v17, %v2068_v10  ;;  %v2671_v26 = vpack.c.bf16 %v2071_v19, %v2070_v11  ;;  %v2073_v27 = vmax.f32 %v2017_v20, 0.0  ;;  %v2075_v29 = vmax.f32 %v2019_v21, 0.0 }
 0x1c5   :  { %2272 = vst [vmem:[%s4013_s3 + $0xa0] sm:$0xff] %v2670_v24  ;;  %2273 = vst [vmem:[%s4013_s3 + $0xa8] sm:$0xff] %v2671_v26  ;;  %v2672_v30 = vpack.c.bf16 %v2073_v27, %v2072_v22  ;;  %v2673_v31 = vpack.c.bf16 %v2075_v29, %v2074_v23  ;;  %v1783_v8 = vpop.f32.mrb[24].mxu0  ;;  %v1886_v32 = vpop.f32.mrb[24].mxu1 }
 0x1c6   :  { %v2020_v33 = vadd.f32 %v3862_v59, %v1783_v8  ;;  %v2022_v15 = vadd.f32 %v3864_v2, %v1886_v32  ;;  %v1785_v18 = vpop.f32.mrb[25].mxu0  ;;  %v1888_v25 = vpop.f32.mrb[25].mxu1 }
 0x1c7   :  { %2274 = vst [vmem:[%s4013_s3 + $0xb0] sm:$0xff] %v2672_v30  ;;  %2275 = vst [vmem:[%s4013_s3 + $0xb8] sm:$0xff] %v2673_v31  ;;  %v2021_v28 = vadd.f32 %v3866_v34, %v1785_v18  ;;  %v2023_v35 = vadd.f32 %v3868_v36, %v1888_v25  ;;  %v1787_v38 = vpop.f32.mrb[26].mxu0  ;;  %v1890_v45 = vpop.f32.mrb[26].mxu1 }
 0x1c8   :  { %v2076_v49 = vmax.f32 %v2020_v33, 0.0  ;;  %v2078_v56 = vmax.f32 %v2022_v15, 0.0  ;;  %v2024_v47 = vadd.f32 %v3862_v59, %v1787_v38  ;;  %v2026_v37 = vadd.f32 %v3864_v2, %v1890_v45  ;;  %v1789_v39 = vpop.f32.mrb[27].mxu0  ;;  %v1892_v40 = vpop.f32.mrb[27].mxu1 }
 0x1c9   :  { %v2077_v4 = vmax.f32 %v2021_v28, 0.0  ;;  %v2079_v41 = vmax.f32 %v2023_v35, 0.0  ;;  %v2025_v42 = vadd.f32 %v3866_v34, %v1789_v39  ;;  %v2027_v43 = vadd.f32 %v3868_v36, %v1892_v40 }
 0x1ca   :  { %v2080_v44 = vmax.f32 %v2024_v47, 0.0  ;;  %v2082_v46 = vmax.f32 %v2026_v37, 0.0 }
 0x1cb   :  { %v2674_v48 = vpack.c.bf16 %v2077_v4, %v2076_v49  ;;  %v2675_v50 = vpack.c.bf16 %v2079_v41, %v2078_v56  ;;  %v2081_v51 = vmax.f32 %v2025_v42, 0.0  ;;  %v2083_v52 = vmax.f32 %v2027_v43, 0.0 }
 0x1cd   :  { %2276 = vst [vmem:[%s4013_s3 + $0xc0] sm:$0xff] %v2674_v48  ;;  %2277 = vst [vmem:[%s4013_s3 + $0xc8] sm:$0xff] %v2675_v50  ;;  %v2676_v59 = vpack.c.bf16 %v2081_v51, %v2080_v44  ;;  %v2677_v2 = vpack.c.bf16 %v2083_v52, %v2082_v46 }
 0x1cf   :  { %2278 = vst [vmem:[%s4013_s3 + $0xd0] sm:$0xff] %v2676_v59  ;;  %2279 = vst [vmem:[%s4013_s3 + $0xd8] sm:$0xff] %v2677_v2 }

// kernel: net_forward.5
= control target key start
LH: loop header
LB: loop body
LE: loop exit
PB: predicated region body
PF: predicated region fallthrough
CT: control target
= control target key end

     0   :  { %s5444_s2 = inlined_call_operand.vmem [shape: bf16[3,2,256,256], index: 2, kind: input, shape index: {}]   ;;  %s5445_s1 = inlined_call_operand.vmem [shape: bf16[8,16,256], index: 1, kind: input, shape index: {}]   ;;  %s5446_s0 = inlined_call_operand.vmem [shape: bf16[8,16,256], index: 0, kind: input, shape index: {}]   ;;  %s5447_s3 = inlined_call_operand.vmem [shape: f32[1,256], index: 3, kind: input, shape index: {}]   ;;  %s5448_s4 = inlined_call_operand.vmem [shape: bf16[7,16,256], index: 4, kind: output, shape index: {}]  }
   0x1   :  { %v3772_v0 = vld [vmem:[%s5444_s2 + $0x204] ss:$8 sps:$4 sm:$0xff]   ;;  %v3774_v1 = vld [vmem:[%s5444_s2 + $0x200] ss:$8 sps:$4 sm:$0xff]   ;;  %v3775_v2 = vld [vmem:[%s5444_s2 + $0x214] ss:$8 sps:$4 sm:$0xff]  }
   0x2   :  { %345 = vmatprep.subr.bf16.mxu0 %v3772_v0  ;;  %1182 = vmatprep.subr.bf16.mxu1 %v3772_v0  ;;  %v3777_v3 = vld [vmem:[%s5444_s2 + $0x210] ss:$8 sps:$4 sm:$0xff]   ;;  %v3778_v4 = vld [vmem:[%s5444_s2 + $0x224] ss:$8 sps:$4 sm:$0xff]   ;;  %v3780_v5 = vld [vmem:[%s5444_s2 + $0x220] ss:$8 sps:$4 sm:$0xff]  }
   0x3   :  { %346 = vmatpush1.bf16.msra.mxu0 %v3774_v1  ;;  %1183 = vmatpush1.bf16.msra.mxu1 %v3774_v1  ;;  %v3781_v6 = vld [vmem:[%s5444_s2 + $0x234] ss:$8 sps:$4 sm:$0xff]   ;;  %v3783_v7 = vld [vmem:[%s5444_s2 + $0x230] ss:$8 sps:$4 sm:$0xff]   ;;  %v3784_v8 = vld [vmem:[%s5444_s2 + $0x244] ss:$8 sps:$4 sm:$0xff]  }
   0x4   :  { %347 = vmatprep.subr.bf16.mxu0 %v3775_v2  ;;  %1184 = vmatprep.subr.bf16.mxu1 %v3775_v2  ;;  %v3786_v9 = vld [vmem:[%s5444_s2 + $0x240] ss:$8 sps:$4 sm:$0xff]   ;;  %v3787_v10 = vld [vmem:[%s5444_s2 + $0x254] ss:$8 sps:$4 sm:$0xff]   ;;  %v3789_v11 = vld [vmem:[%s5444_s2 + $0x250] ss:$8 sps:$4 sm:$0xff]  }
   0x5   :  { %v3790_v12 = vld [vmem:[%s5444_s2 + $0x264] ss:$8 sps:$4 sm:$0xff]   ;;  %v3792_v14 = vld [vmem:[%s5444_s2 + $0x260] ss:$8 sps:$4 sm:$0xff]   ;;  %v3793_v15 = vld [vmem:[%s5444_s2 + $0x274] ss:$8 sps:$4 sm:$0xff]  }
   0x6   :  { %v4203_v13 = vld [vmem:[%s5445_s1 + $0x4] ss:$8 sps:$4 sm:$0xff]   ;;  %v4214_v16 = vld [vmem:[%s5446_s0 + $0x14] ss:$8 sps:$4 sm:$0xff]   ;;  %v3795_v17 = vld [vmem:[%s5444_s2 + $0x270] ss:$8 sps:$4 sm:$0xff]  }
   0x7   :  { %348 = vmatpush1.bf16.msra.mxu0 %v3777_v3  ;;  %1185 = vmatpush1.bf16.msra.mxu1 %v3777_v3  ;;  %v3796_v18 = vld [vmem:[%s5444_s2 + $0x284] ss:$8 sps:$4 sm:$0xff]   ;;  %v3798_v19 = vld [vmem:[%s5444_s2 + $0x280] ss:$8 sps:$4 sm:$0xff]   ;;  %v3799_v20 = vld [vmem:[%s5444_s2 + $0x294] ss:$8 sps:$4 sm:$0xff]  }
   0x8   :  { %349 = vmatprep.subr.bf16.mxu0 %v3778_v4  ;;  %1186 = vmatprep.subr.bf16.mxu1 %v3778_v4  ;;  %v3801_v21 = vld [vmem:[%s5444_s2 + $0x290] ss:$8 sps:$4 sm:$0xff]   ;;  %v3802_v22 = vld [vmem:[%s5444_s2 + $0x2a4] ss:$8 sps:$4 sm:$0xff]   ;;  %v3804_v23 = vld [vmem:[%s5444_s2 + $0x2a0] ss:$8 sps:$4 sm:$0xff]  }
   0x9   :  { %377 = vmatprep.mubr.bf16.mxu0 %v4203_v13  ;;  %1214 = vmatprep.mubr.bf16.mxu1 %v4214_v16  ;;  %v3805_v24 = vld [vmem:[%s5444_s2 + $0x2b4] ss:$8 sps:$4 sm:$0xff]   ;;  %v3807_v25 = vld [vmem:[%s5444_s2 + $0x2b0] ss:$8 sps:$4 sm:$0xff]   ;;  %v3808_v26 = vld [vmem:[%s5444_s2 + $0x2c4] ss:$8 sps:$4 sm:$0xff]  }
   0xa   :  { %v3810_v27 = vld [vmem:[%s5444_s2 + $0x2c0] ss:$8 sps:$4 sm:$0xff]   ;;  %v3811_v28 = vld [vmem:[%s5444_s2 + $0x2d4] ss:$8 sps:$4 sm:$0xff]   ;;  %v3813_v29 = vld [vmem:[%s5444_s2 + $0x2d0] ss:$8 sps:$4 sm:$0xff]  }
   0xb   :  { %350 = vmatpush1.bf16.msra.mxu0 %v3780_v5  ;;  %1187 = vmatpush1.bf16.msra.mxu1 %v3780_v5  ;;  %v3814_v30 = vld [vmem:[%s5444_s2 + $0x2e4] ss:$8 sps:$4 sm:$0xff]   ;;  %v3816_v31 = vld [vmem:[%s5444_s2 + $0x2e0] ss:$8 sps:$4 sm:$0xff]   ;;  %v3817_v32 = vld [vmem:[%s5444_s2 + $0x2f4] ss:$8 sps:$4 sm:$0xff]  }
   0xc   :  { %351 = vmatprep.subr.bf16.mxu0 %v3781_v6  ;;  %1188 = vmatprep.subr.bf16.mxu1 %v3781_v6  ;;  %v3819_v33 = vld [vmem:[%s5444_s2 + $0x2f0] ss:$8 sps:$4 sm:$0xff]   ;;  %v3824_v34 = vld [vmem:[%s5444_s2 + $0x4] ss:$8 sps:$4 sm:$0xff]   ;;  %v4275_v35 = vld [vmem:[%s5445_s1] ss:$8 sps:$4 sm:$0xff]  }
   0xd   :  { %v4280_v36 = vld [vmem:[%s5446_s0 + $0x10] ss:$8 sps:$4 sm:$0xff]   ;;  %v3822_v37 = vld [vmem:[%s5444_s2] ss:$8 sps:$4 sm:$0xff]   ;;  %v3831_v38 = vld [vmem:[%s5444_s2 + $0x14] ss:$8 sps:$4 sm:$0xff]  }
   0xe   :  { %v4291_v39 = vld [vmem:[%s5445_s1 + $0x14] ss:$8 sps:$4 sm:$0xff]   ;;  %v4296_v40 = vld [vmem:[%s5446_s0 + $0x24] ss:$8 sps:$4 sm:$0xff]   ;;  %v3829_v41 = vld [vmem:[%s5444_s2 + $0x10] ss:$8 sps:$4 sm:$0xff]  }
   0xf   :  { %352 = vmatpush1.bf16.msra.mxu0 %v3783_v7  ;;  %1189 = vmatpush1.bf16.msra.mxu1 %v3783_v7  ;;  %v3834_v42 = vld [vmem:[%s5444_s2 + $0x24] ss:$8 sps:$4 sm:$0xff]   ;;  %v4311_v43 = vld [vmem:[%s5445_s1 + $0x10] ss:$8 sps:$4 sm:$0xff]   ;;  %v4316_v44 = vld [vmem:[%s5446_s0 + $0x20] ss:$8 sps:$4 sm:$0xff]  }
  0x10   :  { %353 = vmatprep.subr.bf16.mxu0 %v3784_v8  ;;  %1190 = vmatprep.subr.bf16.mxu1 %v3784_v8  ;;  %v3832_v45 = vld [vmem:[%s5444_s2 + $0x20] ss:$8 sps:$4 sm:$0xff]   ;;  %v3837_v46 = vld [vmem:[%s5444_s2 + $0x34] ss:$8 sps:$4 sm:$0xff]   ;;  %v4327_v47 = vld [vmem:[%s5445_s1 + $0x24] ss:$8 sps:$4 sm:$0xff]  }
  0x11   :  { %v4332_v48 = vld [vmem:[%s5446_s0 + $0x34] ss:$8 sps:$4 sm:$0xff]   ;;  %v3835_v49 = vld [vmem:[%s5444_s2 + $0x30] ss:$8 sps:$4 sm:$0xff]   ;;  %v3842_v50 = vld [vmem:[%s5444_s2 + $0x44] ss:$8 sps:$4 sm:$0xff]  }
  0x12   :  { %v4347_v51 = vld [vmem:[%s5445_s1 + $0x20] ss:$8 sps:$4 sm:$0xff]   ;;  %v4352_v52 = vld [vmem:[%s5446_s0 + $0x30] ss:$8 sps:$4 sm:$0xff]   ;;  %v3849_v54 = vld [vmem:[%s5444_s2 + $0x54] ss:$8 sps:$4 sm:$0xff]  }
  0x13   :  { %354 = vmatpush1.bf16.msra.mxu0 %v3786_v9  ;;  %1191 = vmatpush1.bf16.msra.mxu1 %v3786_v9  ;;  %v3840_v53 = vld [vmem:[%s5444_s2 + $0x40] ss:$8 sps:$4 sm:$0xff]   ;;  %v4363_v55 = vld [vmem:[%s5445_s1 + $0x34] ss:$8 sps:$4 sm:$0xff]   ;;  %v4368_v56 = vld [vmem:[%s5446_s0 + $0x44] ss:$8 sps:$4 sm:$0xff]  }
  0x14   :  { %355 = vmatprep.subr.bf16.mxu0 %v3787_v10  ;;  %1192 = vmatprep.subr.bf16.mxu1 %v3787_v10  ;;  %v3847_v57 = vld [vmem:[%s5444_s2 + $0x50] ss:$8 sps:$4 sm:$0xff]   ;;  %v3854_v58 = vld [vmem:[%s5444_s2 + $0x64] ss:$8 sps:$4 sm:$0xff]   ;;  %v4388_v60 = vld [vmem:[%s5446_s0 + $0x40] ss:$8 sps:$4 sm:$0xff]  }
  0x15   :  { %v4383_v59 = vld [vmem:[%s5445_s1 + $0x30] ss:$8 sps:$4 sm:$0xff]   ;;  %v3852_v61 = vld [vmem:[%s5444_s2 + $0x60] ss:$8 sps:$4 sm:$0xff]   ;;  %v3861_v62 = vld [vmem:[%s5444_s2 + $0x74] ss:$8 sps:$4 sm:$0xff]  }
  0x16   :  { %v4399_v63 = vld [vmem:[%s5445_s1 + $0x44] ss:$8 sps:$4 sm:$0xff]   ;;  %v4404_v0 = vld [vmem:[%s5446_s0 + $0x54] ss:$8 sps:$4 sm:$0xff]   ;;  %v3859_v1 = vld [vmem:[%s5444_s2 + $0x70] ss:$8 sps:$4 sm:$0xff]  }
  0x17   :  { %356 = vmatpush1.bf16.msra.mxu0 %v3789_v11  ;;  %1193 = vmatpush1.bf16.msra.mxu1 %v3789_v11  ;;  %v3866_v2 = vld [vmem:[%s5444_s2 + $0x84] ss:$8 sps:$4 sm:$0xff]   ;;  %v3864_v3 = vld [vmem:[%s5444_s2 + $0x80] ss:$8 sps:$4 sm:$0xff]   ;;  %v3873_v4 = vld [vmem:[%s5444_s2 + $0x94] ss:$8 sps:$4 sm:$0xff]  }
  0x18   :  { %357 = vmatprep.subr.bf16.mxu0 %v3790_v12  ;;  %1194 = vmatprep.subr.bf16.mxu1 %v3790_v12  ;;  %v4425_v5 = vld [vmem:[%s5445_s1 + $0x40] ss:$8 sps:$4 sm:$0xff]   ;;  %v4430_v6 = vld [vmem:[%s5446_s0 + $0x50] ss:$8 sps:$4 sm:$0xff]   ;;  %v4435_v7 = vld [vmem:[%s5445_s1 + $0x54] ss:$8 sps:$4 sm:$0xff]  }
  0x19   :  { %v4440_v8 = vld [vmem:[%s5446_s0 + $0x64] ss:$8 sps:$4 sm:$0xff]   ;;  %v3871_v9 = vld [vmem:[%s5444_s2 + $0x90] ss:$8 sps:$4 sm:$0xff]   ;;  %v4458_v12 = vld [vmem:[%s5446_s0 + $0x60] ss:$8 sps:$4 sm:$0xff]  }
  0x1a   :  { %v3878_v10 = vld [vmem:[%s5444_s2 + $0xa4] ss:$8 sps:$4 sm:$0xff]   ;;  %v4453_v11 = vld [vmem:[%s5445_s1 + $0x50] ss:$8 sps:$4 sm:$0xff]  }
  0x1b   :  { %358 = vmatpush1.bf16.msra.mxu0 %v3792_v14  ;;  %1195 = vmatpush1.bf16.msra.mxu1 %v3792_v14  ;;  %v3876_v14 = vld [vmem:[%s5444_s2 + $0xa0] ss:$8 sps:$4 sm:$0xff]  }
  0x1c   :  { %359 = vmatprep.subr.bf16.mxu0 %v3793_v15  ;;  %1196 = vmatprep.subr.bf16.mxu1 %v3793_v15  ;;  %v3885_v15 = vld [vmem:[%s5444_s2 + $0xb4] ss:$8 sps:$4 sm:$0xff]  }
  0x1f   :  { %360 = vmatpush1.bf16.msra.mxu0 %v3795_v17  ;;  %1197 = vmatpush1.bf16.msra.mxu1 %v3795_v17  ;;  %v4471_v17 = vld [vmem:[%s5445_s1 + $0x64] ss:$8 sps:$4 sm:$0xff]  }
  0x20   :  { %361 = vmatprep.subr.bf16.mxu0 %v3796_v18  ;;  %1198 = vmatprep.subr.bf16.mxu1 %v3796_v18  ;;  %v4476_v18 = vld [vmem:[%s5446_s0 + $0x74] ss:$8 sps:$4 sm:$0xff]  }
  0x23   :  { %362 = vmatpush1.bf16.msra.mxu0 %v3798_v19  ;;  %1199 = vmatpush1.bf16.msra.mxu1 %v3798_v19  ;;  %v3883_v19 = vld [vmem:[%s5444_s2 + $0xb0] ss:$8 sps:$4 sm:$0xff]  }
  0x24   :  { %363 = vmatprep.subr.bf16.mxu0 %v3799_v20  ;;  %1200 = vmatprep.subr.bf16.mxu1 %v3799_v20  ;;  %v3890_v20 = vld [vmem:[%s5444_s2 + $0xc4] ss:$8 sps:$4 sm:$0xff]  }
  0x27   :  { %364 = vmatpush1.bf16.msra.mxu0 %v3801_v21  ;;  %1201 = vmatpush1.bf16.msra.mxu1 %v3801_v21  ;;  %v4489_v21 = vld [vmem:[%s5445_s1 + $0x60] ss:$8 sps:$4 sm:$0xff]  }
  0x28   :  { %365 = vmatprep.subr.bf16.mxu0 %v3802_v22  ;;  %1202 = vmatprep.subr.bf16.mxu1 %v3802_v22  ;;  %v4494_v22 = vld [vmem:[%s5446_s0 + $0x70] ss:$8 sps:$4 sm:$0xff]  }
  0x2b   :  { %366 = vmatpush1.bf16.msra.mxu0 %v3804_v23  ;;  %1203 = vmatpush1.bf16.msra.mxu1 %v3804_v23  ;;  %v3888_v23 = vld [vmem:[%s5444_s2 + $0xc0] ss:$8 sps:$4 sm:$0xff]  }
  0x2c   :  { %367 = vmatprep.subr.bf16.mxu0 %v3805_v24  ;;  %1204 = vmatprep.subr.bf16.mxu1 %v3805_v24  ;;  %v3897_v24 = vld [vmem:[%s5444_s2 + $0xd4] ss:$8 sps:$4 sm:$0xff]  }
  0x2f   :  { %368 = vmatpush1.bf16.msra.mxu0 %v3807_v25  ;;  %1205 = vmatpush1.bf16.msra.mxu1 %v3807_v25  ;;  %v4507_v25 = vld [vmem:[%s5446_s0 + $0x4] ss:$8 sps:$4 sm:$0xff]  }
  0x30   :  { %369 = vmatprep.subr.bf16.mxu0 %v3808_v26  ;;  %1206 = vmatprep.subr.bf16.mxu1 %v3808_v26  ;;  %v3895_v26 = vld [vmem:[%s5444_s2 + $0xd0] ss:$8 sps:$4 sm:$0xff]  }
  0x33   :  { %370 = vmatpush1.bf16.msra.mxu0 %v3810_v27  ;;  %1207 = vmatpush1.bf16.msra.mxu1 %v3810_v27  ;;  %v3902_v27 = vld [vmem:[%s5444_s2 + $0xe4] ss:$8 sps:$4 sm:$0xff]  }
  0x34   :  { %371 = vmatprep.subr.bf16.mxu0 %v3811_v28  ;;  %1208 = vmatprep.subr.bf16.mxu1 %v3811_v28  ;;  %v3900_v28 = vld [vmem:[%s5444_s2 + $0xe0] ss:$8 sps:$4 sm:$0xff]  }
  0x37   :  { %372 = vmatpush1.bf16.msra.mxu0 %v3813_v29  ;;  %1209 = vmatpush1.bf16.msra.mxu1 %v3813_v29  ;;  %v3909_v29 = vld [vmem:[%s5444_s2 + $0xf4] ss:$8 sps:$4 sm:$0xff]  }
  0x38   :  { %373 = vmatprep.subr.bf16.mxu0 %v3814_v30  ;;  %1210 = vmatprep.subr.bf16.mxu1 %v3814_v30  ;;  %v3907_v30 = vld [vmem:[%s5444_s2 + $0xf0] ss:$8 sps:$4 sm:$0xff]  }
  0x3b   :  { %374 = vmatpush1.bf16.msra.mxu0 %v3816_v31  ;;  %1211 = vmatpush1.bf16.msra.mxu1 %v3816_v31  ;;  %v4534_v31 = vld [vmem:[%s5446_s0] ss:$8 sps:$4 sm:$0xff]  }
  0x3c   :  { %375 = vmatprep.subr.bf16.mxu0 %v3817_v32  ;;  %1212 = vmatprep.subr.bf16.mxu1 %v3817_v32  ;;  %v3913_v32 = vld [vmem:[%s5444_s2 + $0x400] ss:$8 sps:$4 sm:$0xff]  }
  0x3f   :  { %376 = vmatpush1.bf16.msra.mxu0 %v3819_v33  ;;  %1213 = vmatpush1.bf16.msra.mxu1 %v3819_v33  ;;  %v3918_v33 = vld [vmem:[%s5444_s2 + $0x414] ss:$8 sps:$4 sm:$0xff]  }
  0x40   :  { %678 = vmatprep.subr.bf16.mxu0 %v3824_v34  ;;  %1285 = vmatprep.subr.bf16.mxu1 %v3824_v34  ;;  %v3916_v34 = vld [vmem:[%s5444_s2 + $0x410] ss:$8 sps:$4 sm:$0xff]  }
  0x42   :  { %378 = vmatmul.mubr.bf16.vlgmr.msra.gmra.mrb[0].mxu0 %v4275_v35  ;;  %1215 = vmatmul.mubr.bf16.vlgmr.msra.gmra.mrb[0].mxu1 %v4280_v36 }
  0x43   :  { %679 = vmatpush1.bf16.msra.mxu0 %v3822_v37  ;;  %1286 = vmatpush1.bf16.msra.mxu1 %v3822_v37  ;;  %v3921_v37 = vld [vmem:[%s5444_s2 + $0x424] ss:$8 sps:$4 sm:$0xff]  }
  0x44   :  { %680 = vmatprep.subr.bf16.mxu0 %v3831_v38  ;;  %1287 = vmatprep.subr.bf16.mxu1 %v3831_v38  ;;  %v3924_v38 = vld [vmem:[%s5444_s2 + $0x434] ss:$8 sps:$4 sm:$0xff]  }
  0x45   :  { %387 = vmatprep.mubr.bf16.mxu0 %v4291_v39  ;;  %1224 = vmatprep.mubr.bf16.mxu1 %v4296_v40 }
  0x47   :  { %681 = vmatpush1.bf16.msra.mxu0 %v3829_v41  ;;  %1288 = vmatpush1.bf16.msra.mxu1 %v3829_v41  ;;  %v3922_v41 = vld [vmem:[%s5444_s2 + $0x430] ss:$8 sps:$4 sm:$0xff]  }
  0x48   :  { %682 = vmatprep.subr.bf16.mxu0 %v3834_v42  ;;  %1289 = vmatprep.subr.bf16.mxu1 %v3834_v42  ;;  %v3927_v42 = vld [vmem:[%s5444_s2 + $0x444] ss:$8 sps:$4 sm:$0xff]  }
  0x4a   :  { %388 = vmatmul.mubr.bf16.gmra.mrb[4].mxu0 %v4311_v43  ;;  %1225 = vmatmul.mubr.bf16.gmra.mrb[4].mxu1 %v4316_v44 }
  0x4b   :  { %683 = vmatpush1.bf16.msra.mxu0 %v3832_v45  ;;  %1290 = vmatpush1.bf16.msra.mxu1 %v3832_v45  ;;  %v3925_v45 = vld [vmem:[%s5444_s2 + $0x440] ss:$8 sps:$4 sm:$0xff]  }
  0x4c   :  { %684 = vmatprep.subr.bf16.mxu0 %v3837_v46  ;;  %1291 = vmatprep.subr.bf16.mxu1 %v3837_v46  ;;  %v3930_v46 = vld [vmem:[%s5444_s2 + $0x454] ss:$8 sps:$4 sm:$0xff]  }
  0x4d   :  { %397 = vmatprep.mubr.bf16.mxu0 %v4327_v47  ;;  %1234 = vmatprep.mubr.bf16.mxu1 %v4332_v48 }
  0x4f   :  { %685 = vmatpush1.bf16.msra.mxu0 %v3835_v49  ;;  %1292 = vmatpush1.bf16.msra.mxu1 %v3835_v49  ;;  %v3928_v49 = vld [vmem:[%s5444_s2 + $0x450] ss:$8 sps:$4 sm:$0xff]  }
  0x50   :  { %686 = vmatprep.subr.bf16.mxu0 %v3842_v50  ;;  %1293 = vmatprep.subr.bf16.mxu1 %v3842_v50  ;;  %v3933_v50 = vld [vmem:[%s5444_s2 + $0x464] ss:$8 sps:$4 sm:$0xff]  }
  0x52   :  { %398 = vmatmul.mubr.bf16.gmra.mrb[8].mxu0 %v4347_v51  ;;  %1235 = vmatmul.mubr.bf16.gmra.mrb[8].mxu1 %v4352_v52 }
  0x53   :  { %687 = vmatpush1.bf16.msra.mxu0 %v3840_v53  ;;  %1294 = vmatpush1.bf16.msra.mxu1 %v3840_v53  ;;  %v3931_v53 = vld [vmem:[%s5444_s2 + $0x460] ss:$8 sps:$4 sm:$0xff]  }
  0x54   :  { %688 = vmatprep.subr.bf16.mxu0 %v3849_v54  ;;  %1295 = vmatprep.subr.bf16.mxu1 %v3849_v54  ;;  %v3936_v54 = vld [vmem:[%s5444_s2 + $0x474] ss:$8 sps:$4 sm:$0xff]  }
  0x55   :  { %407 = vmatprep.mubr.bf16.mxu0 %v4363_v55  ;;  %1244 = vmatprep.mubr.bf16.mxu1 %v4368_v56 }
  0x57   :  { %689 = vmatpush1.bf16.msra.mxu0 %v3847_v57  ;;  %1296 = vmatpush1.bf16.msra.mxu1 %v3847_v57  ;;  %v3934_v57 = vld [vmem:[%s5444_s2 + $0x470] ss:$8 sps:$4 sm:$0xff]  }
  0x58   :  { %690 = vmatprep.subr.bf16.mxu0 %v3854_v58  ;;  %1297 = vmatprep.subr.bf16.mxu1 %v3854_v58  ;;  %v3939_v58 = vld [vmem:[%s5444_s2 + $0x484] ss:$8 sps:$4 sm:$0xff]  }
  0x5a   :  { %408 = vmatmul.mubr.bf16.gmra.mrb[12].mxu0 %v4383_v59  ;;  %1245 = vmatmul.mubr.bf16.gmra.mrb[12].mxu1 %v4388_v60 }
  0x5b   :  { %691 = vmatpush1.bf16.msra.mxu0 %v3852_v61  ;;  %1298 = vmatpush1.bf16.msra.mxu1 %v3852_v61  ;;  %v3937_v61 = vld [vmem:[%s5444_s2 + $0x480] ss:$8 sps:$4 sm:$0xff]  }
  0x5c   :  { %692 = vmatprep.subr.bf16.mxu0 %v3861_v62  ;;  %1299 = vmatprep.subr.bf16.mxu1 %v3861_v62  ;;  %v3942_v62 = vld [vmem:[%s5444_s2 + $0x494] ss:$8 sps:$4 sm:$0xff]  }
  0x5d   :  { %417 = vmatprep.mubr.bf16.mxu0 %v4399_v63  ;;  %1254 = vmatprep.mubr.bf16.mxu1 %v4404_v0 }
  0x5f   :  { %693 = vmatpush1.bf16.msra.mxu0 %v3859_v1  ;;  %1300 = vmatpush1.bf16.msra.mxu1 %v3859_v1  ;;  %v3940_v1 = vld [vmem:[%s5444_s2 + $0x490] ss:$8 sps:$4 sm:$0xff]  }
  0x60   :  { %694 = vmatprep.subr.bf16.mxu0 %v3866_v2  ;;  %1301 = vmatprep.subr.bf16.mxu1 %v3866_v2  ;;  %v3945_v2 = vld [vmem:[%s5444_s2 + $0x4a4] ss:$8 sps:$4 sm:$0xff]  }
  0x62   :  { %418 = vmatmul.mubr.bf16.gmra.mrb[16].mxu0 %v4425_v5  ;;  %1255 = vmatmul.mubr.bf16.gmra.mrb[16].mxu1 %v4430_v6 }
  0x63   :  { %695 = vmatpush1.bf16.msra.mxu0 %v3864_v3  ;;  %1302 = vmatpush1.bf16.msra.mxu1 %v3864_v3  ;;  %v3943_v3 = vld [vmem:[%s5444_s2 + $0x4a0] ss:$8 sps:$4 sm:$0xff]  }
  0x64   :  { %696 = vmatprep.subr.bf16.mxu0 %v3873_v4  ;;  %1303 = vmatprep.subr.bf16.mxu1 %v3873_v4  ;;  %v3948_v4 = vld [vmem:[%s5444_s2 + $0x4b4] ss:$8 sps:$4 sm:$0xff]  }
  0x65   :  { %427 = vmatprep.mubr.bf16.mxu0 %v4435_v7  ;;  %1264 = vmatprep.mubr.bf16.mxu1 %v4440_v8 }
  0x67   :  { %697 = vmatpush1.bf16.msra.mxu0 %v3871_v9  ;;  %1304 = vmatpush1.bf16.msra.mxu1 %v3871_v9  ;;  %v3946_v9 = vld [vmem:[%s5444_s2 + $0x4b0] ss:$8 sps:$4 sm:$0xff]  }
  0x68   :  { %698 = vmatprep.subr.bf16.mxu0 %v3878_v10  ;;  %1305 = vmatprep.subr.bf16.mxu1 %v3878_v10  ;;  %v3951_v10 = vld [vmem:[%s5444_s2 + $0x4c4] ss:$8 sps:$4 sm:$0xff]  }
  0x6a   :  { %428 = vmatmul.mubr.bf16.gmra.mrb[20].mxu0 %v4453_v11  ;;  %1265 = vmatmul.mubr.bf16.gmra.mrb[20].mxu1 %v4458_v12 }
  0x6b   :  { %699 = vmatpush1.bf16.msra.mxu0 %v3876_v14  ;;  %1306 = vmatpush1.bf16.msra.mxu1 %v3876_v14  ;;  %v3949_v14 = vld [vmem:[%s5444_s2 + $0x4c0] ss:$8 sps:$4 sm:$0xff]  }
  0x6c   :  { %700 = vmatprep.subr.bf16.mxu0 %v3885_v15  ;;  %1307 = vmatprep.subr.bf16.mxu1 %v3885_v15  ;;  %v3954_v15 = vld [vmem:[%s5444_s2 + $0x4d4] ss:$8 sps:$4 sm:$0xff]  }
  0x6d   :  { %437 = vmatprep.mubr.bf16.mxu0 %v4471_v17  ;;  %1274 = vmatprep.mubr.bf16.mxu1 %v4476_v18 }
  0x6f   :  { %701 = vmatpush1.bf16.msra.mxu0 %v3883_v19  ;;  %1308 = vmatpush1.bf16.msra.mxu1 %v3883_v19  ;;  %v3952_v19 = vld [vmem:[%s5444_s2 + $0x4d0] ss:$8 sps:$4 sm:$0xff]  }
  0x70   :  { %702 = vmatprep.subr.bf16.mxu0 %v3890_v20  ;;  %1309 = vmatprep.subr.bf16.mxu1 %v3890_v20  ;;  %v3957_v20 = vld [vmem:[%s5444_s2 + $0x4e4] ss:$8 sps:$4 sm:$0xff]  }
  0x72   :  { %438 = vmatmul.mubr.bf16.gmra.mrb[24].mxu0 %v4489_v21  ;;  %1275 = vmatmul.mubr.bf16.gmra.mrb[24].mxu1 %v4494_v22 }
  0x73   :  { %703 = vmatpush1.bf16.msra.mxu0 %v3888_v23  ;;  %1310 = vmatpush1.bf16.msra.mxu1 %v3888_v23  ;;  %v3955_v23 = vld [vmem:[%s5444_s2 + $0x4e0] ss:$8 sps:$4 sm:$0xff]  }
  0x74   :  { %704 = vmatprep.subr.bf16.mxu0 %v3897_v24  ;;  %1311 = vmatprep.subr.bf16.mxu1 %v3897_v24  ;;  %v3960_v24 = vld [vmem:[%s5444_s2 + $0x4f4] ss:$8 sps:$4 sm:$0xff]  }
  0x75   :  { %710 = vmatprep.mubr.bf16.mxu0 %v4507_v25  ;;  %1317 = vmatprep.mubr.bf16.mxu1 %v4203_v13  ;;  %v3915_v13 = vld [vmem:[%s5444_s2 + $0x404] ss:$8 sps:$4 sm:$0xff]  }
  0x77   :  { %705 = vmatpush1.bf16.msra.mxu0 %v3895_v26  ;;  %1312 = vmatpush1.bf16.msra.mxu1 %v3895_v26  ;;  %v3961_v26 = vld [vmem:[%s5444_s2 + $0x300] ss:$8 sps:$4 sm:$0xff]  }
  0x78   :  { %706 = vmatprep.subr.bf16.mxu0 %v3902_v27  ;;  %1313 = vmatprep.subr.bf16.mxu1 %v3902_v27  ;;  %v3966_v27 = vld [vmem:[%s5444_s2 + $0x314] ss:$8 sps:$4 sm:$0xff]  }
  0x7b   :  { %707 = vmatpush1.bf16.msra.mxu0 %v3900_v28  ;;  %1314 = vmatpush1.bf16.msra.mxu1 %v3900_v28  ;;  %v3964_v28 = vld [vmem:[%s5444_s2 + $0x310] ss:$8 sps:$4 sm:$0xff]  }
  0x7c   :  { %708 = vmatprep.subr.bf16.mxu0 %v3909_v29  ;;  %1315 = vmatprep.subr.bf16.mxu1 %v3909_v29  ;;  %v3969_v29 = vld [vmem:[%s5444_s2 + $0x324] ss:$8 sps:$4 sm:$0xff]  }
  0x7f   :  { %709 = vmatpush1.bf16.msra.mxu0 %v3907_v30  ;;  %1316 = vmatpush1.bf16.msra.mxu1 %v3907_v30  ;;  %v3978_v30 = vld [vmem:[%s5444_s2 + $0x354] ss:$8 sps:$4 sm:$0xff]  }
  0x80   :  { %984 = vmatprep.subr.bf16.mxu0 %v3915_v13  ;;  %1398 = vmatprep.subr.bf16.mxu1 %v3915_v13  ;;  %v3981_v13 = vld [vmem:[%s5444_s2 + $0x364] ss:$8 sps:$4 sm:$0xff]  }
  0x82   :  { %711 = vmatmul.mubr.bf16.vlgmr.msra.gmra.mrb[0].mxu0 %v4534_v31  ;;  %1318 = vmatmul.mubr.bf16.vlgmr.msra.gmra.mrb[0].mxu1 %v4275_v35  ;;  %v3919_v35 = vld [vmem:[%s5444_s2 + $0x420] ss:$8 sps:$4 sm:$0xff]  }
  0x83   :  { %985 = vmatpush1.bf16.msra.mxu0 %v3913_v32  ;;  %1399 = vmatpush1.bf16.msra.mxu1 %v3913_v32  ;;  %v3979_v32 = vld [vmem:[%s5444_s2 + $0x360] ss:$8 sps:$4 sm:$0xff]  }
  0x84   :  { %986 = vmatprep.subr.bf16.mxu0 %v3918_v33  ;;  %1400 = vmatprep.subr.bf16.mxu1 %v3918_v33  ;;  %v3984_v33 = vld [vmem:[%s5444_s2 + $0x374] ss:$8 sps:$4 sm:$0xff]  }
  0x85   :  { %720 = vmatprep.mubr.bf16.mxu0 %v4214_v16  ;;  %1327 = vmatprep.mubr.bf16.mxu1 %v4291_v39 }
  0x87   :  { %987 = vmatpush1.bf16.msra.mxu0 %v3916_v34  ;;  %1401 = vmatpush1.bf16.msra.mxu1 %v3916_v34  ;;  %v3982_v34 = vld [vmem:[%s5444_s2 + $0x370] ss:$8 sps:$4 sm:$0xff]  }
  0x88   :  { %988 = vmatprep.subr.bf16.mxu0 %v3921_v37  ;;  %1402 = vmatprep.subr.bf16.mxu1 %v3921_v37  ;;  %v3987_v37 = vld [vmem:[%s5444_s2 + $0x384] ss:$8 sps:$4 sm:$0xff]  }
  0x8a   :  { %721 = vmatmul.mubr.bf16.gmra.mrb[4].mxu0 %v4280_v36  ;;  %1328 = vmatmul.mubr.bf16.gmra.mrb[4].mxu1 %v4311_v43 }
  0x8b   :  { %989 = vmatpush1.bf16.msra.mxu0 %v3919_v35  ;;  %1403 = vmatpush1.bf16.msra.mxu1 %v3919_v35  ;;  %v3985_v35 = vld [vmem:[%s5444_s2 + $0x380] ss:$8 sps:$4 sm:$0xff]  }
  0x8c   :  { %990 = vmatprep.subr.bf16.mxu0 %v3924_v38  ;;  %1404 = vmatprep.subr.bf16.mxu1 %v3924_v38  ;;  %v3990_v38 = vld [vmem:[%s5444_s2 + $0x394] ss:$8 sps:$4 sm:$0xff]  }
  0x8d   :  { %730 = vmatprep.mubr.bf16.mxu0 %v4296_v40  ;;  %1337 = vmatprep.mubr.bf16.mxu1 %v4327_v47 }
  0x8f   :  { %991 = vmatpush1.bf16.msra.mxu0 %v3922_v41  ;;  %1405 = vmatpush1.bf16.msra.mxu1 %v3922_v41  ;;  %v3988_v41 = vld [vmem:[%s5444_s2 + $0x390] ss:$8 sps:$4 sm:$0xff]  }
  0x90   :  { %992 = vmatprep.subr.bf16.mxu0 %v3927_v42  ;;  %1406 = vmatprep.subr.bf16.mxu1 %v3927_v42  ;;  %v3993_v42 = vld [vmem:[%s5444_s2 + $0x3a4] ss:$8 sps:$4 sm:$0xff]  }
  0x92   :  { %731 = vmatmul.mubr.bf16.gmra.mrb[8].mxu0 %v4316_v44  ;;  %1338 = vmatmul.mubr.bf16.gmra.mrb[8].mxu1 %v4347_v51 }
  0x93   :  { %993 = vmatpush1.bf16.msra.mxu0 %v3925_v45  ;;  %1407 = vmatpush1.bf16.msra.mxu1 %v3925_v45  ;;  %v3991_v45 = vld [vmem:[%s5444_s2 + $0x3a0] ss:$8 sps:$4 sm:$0xff]  }
  0x94   :  { %994 = vmatprep.subr.bf16.mxu0 %v3930_v46  ;;  %1408 = vmatprep.subr.bf16.mxu1 %v3930_v46  ;;  %v3996_v46 = vld [vmem:[%s5444_s2 + $0x3b4] ss:$8 sps:$4 sm:$0xff]  }
  0x95   :  { %740 = vmatprep.mubr.bf16.mxu0 %v4332_v48  ;;  %1347 = vmatprep.mubr.bf16.mxu1 %v4363_v55 }
  0x97   :  { %995 = vmatpush1.bf16.msra.mxu0 %v3928_v49  ;;  %1409 = vmatpush1.bf16.msra.mxu1 %v3928_v49  ;;  %v4749_v49 = vld [vmem:[%s5445_s1 + $0x74] ss:$8 sps:$4 sm:$0xff]  }
  0x98   :  { %996 = vmatprep.subr.bf16.mxu0 %v3933_v50  ;;  %1410 = vmatprep.subr.bf16.mxu1 %v3933_v50  ;;  %v3994_v50 = vld [vmem:[%s5444_s2 + $0x3b0] ss:$8 sps:$4 sm:$0xff]  }
  0x9a   :  { %741 = vmatmul.mubr.bf16.gmra.mrb[12].mxu0 %v4352_v52  ;;  %1348 = vmatmul.mubr.bf16.gmra.mrb[12].mxu1 %v4383_v59 }
  0x9b   :  { %997 = vmatpush1.bf16.msra.mxu0 %v3931_v53  ;;  %1411 = vmatpush1.bf16.msra.mxu1 %v3931_v53  ;;  %v4002_v53 = vld [vmem:[%s5444_s2 + $0x3c4] ss:$8 sps:$4 sm:$0xff]  }
  0x9c   :  { %998 = vmatprep.subr.bf16.mxu0 %v3936_v54  ;;  %1412 = vmatprep.subr.bf16.mxu1 %v3936_v54  ;;  %v4764_v54 = vld [vmem:[%s5445_s1 + $0x70] ss:$8 sps:$4 sm:$0xff]  }
  0x9d   :  { %750 = vmatprep.mubr.bf16.mxu0 %v4368_v56  ;;  %1357 = vmatprep.mubr.bf16.mxu1 %v4399_v63 }
  0x9f   :  { %999 = vmatpush1.bf16.msra.mxu0 %v3934_v57  ;;  %1413 = vmatpush1.bf16.msra.mxu1 %v3934_v57  ;;  %v4000_v57 = vld [vmem:[%s5444_s2 + $0x3c0] ss:$8 sps:$4 sm:$0xff]  }
  0xa0   :  { %1000 = vmatprep.subr.bf16.mxu0 %v3939_v58  ;;  %1414 = vmatprep.subr.bf16.mxu1 %v3939_v58  ;;  %v4005_v58 = vld [vmem:[%s5444_s2 + $0x3d4] ss:$8 sps:$4 sm:$0xff]  }
  0xa2   :  { %751 = vmatmul.mubr.bf16.gmra.mrb[16].mxu0 %v4388_v60  ;;  %1358 = vmatmul.mubr.bf16.gmra.mrb[16].mxu1 %v4425_v5 }
  0xa3   :  { %1001 = vmatpush1.bf16.msra.mxu0 %v3937_v61  ;;  %1415 = vmatpush1.bf16.msra.mxu1 %v3937_v61  ;;  %v4003_v61 = vld [vmem:[%s5444_s2 + $0x3d0] ss:$8 sps:$4 sm:$0xff]  }
  0xa4   :  { %1002 = vmatprep.subr.bf16.mxu0 %v3942_v62  ;;  %1416 = vmatprep.subr.bf16.mxu1 %v3942_v62  ;;  %v4008_v62 = vld [vmem:[%s5444_s2 + $0x3e4] ss:$8 sps:$4 sm:$0xff]  }
  0xa5   :  { %760 = vmatprep.mubr.bf16.mxu0 %v4404_v0  ;;  %1367 = vmatprep.mubr.bf16.mxu1 %v4435_v7 }
  0xa7   :  { %1003 = vmatpush1.bf16.msra.mxu0 %v3940_v1  ;;  %1417 = vmatpush1.bf16.msra.mxu1 %v3940_v1  ;;  %v4783_v1 = vld [vmem:[%s5445_s1 + $0x4] ss:$8 sps:$4 sm:$0xff]  }
  0xa8   :  { %1004 = vmatprep.subr.bf16.mxu0 %v3945_v2  ;;  %1418 = vmatprep.subr.bf16.mxu1 %v3945_v2  ;;  %v4789_v2 = vld [vmem:[%s5446_s0 + $0x14] ss:$8 sps:$4 sm:$0xff]  }
  0xaa   :  { %761 = vmatmul.mubr.bf16.gmra.mrb[20].mxu0 %v4430_v6  ;;  %1368 = vmatmul.mubr.bf16.gmra.mrb[20].mxu1 %v4453_v11 }
  0xab   :  { %1005 = vmatpush1.bf16.msra.mxu0 %v3943_v3  ;;  %1419 = vmatpush1.bf16.msra.mxu1 %v3943_v3  ;;  %v4006_v3 = vld [vmem:[%s5444_s2 + $0x3e0] ss:$8 sps:$4 sm:$0xff]  }
  0xac   :  { %1006 = vmatprep.subr.bf16.mxu0 %v3948_v4  ;;  %1420 = vmatprep.subr.bf16.mxu1 %v3948_v4  ;;  %v4011_v4 = vld [vmem:[%s5444_s2 + $0x3f4] ss:$8 sps:$4 sm:$0xff]  }
  0xad   :  { %770 = vmatprep.mubr.bf16.mxu0 %v4440_v8  ;;  %1377 = vmatprep.mubr.bf16.mxu1 %v4471_v17 }
  0xaf   :  { %1007 = vmatpush1.bf16.msra.mxu0 %v3946_v9  ;;  %1421 = vmatpush1.bf16.msra.mxu1 %v3946_v9  ;;  %v4009_v9 = vld [vmem:[%s5444_s2 + $0x3f0] ss:$8 sps:$4 sm:$0xff]  }
  0xb0   :  { %1008 = vmatprep.subr.bf16.mxu0 %v3951_v10  ;;  %1422 = vmatprep.subr.bf16.mxu1 %v3951_v10  ;;  %v4014_v10 = vld [vmem:[%s5444_s2 + $0x104] ss:$8 sps:$4 sm:$0xff]  }
  0xb2   :  { %771 = vmatmul.mubr.bf16.gmra.mrb[24].mxu0 %v4458_v12  ;;  %1378 = vmatmul.mubr.bf16.gmra.mrb[24].mxu1 %v4489_v21 }
  0xb3   :  { %1009 = vmatpush1.bf16.msra.mxu0 %v3949_v14  ;;  %1423 = vmatpush1.bf16.msra.mxu1 %v3949_v14  ;;  %v4012_v14 = vld [vmem:[%s5444_s2 + $0x100] ss:$8 sps:$4 sm:$0xff]  }
  0xb4   :  { %1010 = vmatprep.subr.bf16.mxu0 %v3954_v15  ;;  %1424 = vmatprep.subr.bf16.mxu1 %v3954_v15  ;;  %v4017_v15 = vld [vmem:[%s5444_s2 + $0x114] ss:$8 sps:$4 sm:$0xff]  }
  0xb5   :  { %1016 = vmatprep.mubr.bf16.mxu0 %v4214_v16  ;;  %1430 = vmatprep.mubr.bf16.mxu1 %v4291_v39  ;;  %v3958_v16 = vld [vmem:[%s5444_s2 + $0x4f0] ss:$8 sps:$4 sm:$0xff]   ;;  %v3963_v39 = vld [vmem:[%s5444_s2 + $0x304] ss:$8 sps:$4 sm:$0xff]  }
  0xb7   :  { %1011 = vmatpush1.bf16.msra.mxu0 %v3952_v19  ;;  %1425 = vmatpush1.bf16.msra.mxu1 %v3952_v19  ;;  %v4813_v19 = vld [vmem:[%s5445_s1] ss:$8 sps:$4 sm:$0xff]  }
  0xb8   :  { %1012 = vmatprep.subr.bf16.mxu0 %v3957_v20  ;;  %1426 = vmatprep.subr.bf16.mxu1 %v3957_v20  ;;  %v4819_v20 = vld [vmem:[%s5446_s0 + $0x10] ss:$8 sps:$4 sm:$0xff]  }
  0xbb   :  { %1013 = vmatpush1.bf16.msra.mxu0 %v3955_v23  ;;  %1427 = vmatpush1.bf16.msra.mxu1 %v3955_v23  ;;  %v4015_v23 = vld [vmem:[%s5444_s2 + $0x110] ss:$8 sps:$4 sm:$0xff]  }
  0xbc   :  { %1014 = vmatprep.subr.bf16.mxu0 %v3960_v24  ;;  %1428 = vmatprep.subr.bf16.mxu1 %v3960_v24  ;;  %v4020_v24 = vld [vmem:[%s5444_s2 + $0x124] ss:$8 sps:$4 sm:$0xff]  }
  0xbf   :  { %1015 = vmatpush1.bf16.msra.mxu0 %v3958_v16  ;;  %1429 = vmatpush1.bf16.msra.mxu1 %v3958_v16  ;;  %v4831_v16 = vld [vmem:[%s5445_s1 + $0x14] ss:$8 sps:$4 sm:$0xff]  }
  0xc0   :  { %1839 = vmatprep.subr.bf16.mxu0 %v3963_v39  ;;  %2613 = vmatprep.subr.bf16.mxu1 %v3963_v39  ;;  %v4837_v39 = vld [vmem:[%s5446_s0 + $0x24] ss:$8 sps:$4 sm:$0xff]  }
  0xc2   :  { %1017 = vmatmul.mubr.bf16.vlgmr.msra.gmra.mrb[0].mxu0 %v4280_v36  ;;  %1431 = vmatmul.mubr.bf16.vlgmr.msra.gmra.mrb[0].mxu1 %v4311_v43  ;;  %v3967_v36 = vld [vmem:[%s5444_s2 + $0x320] ss:$8 sps:$4 sm:$0xff]   ;;  %v3972_v43 = vld [vmem:[%s5444_s2 + $0x334] ss:$8 sps:$4 sm:$0xff]  }
  0xc3   :  { %1840 = vmatpush1.bf16.msra.mxu0 %v3961_v26  ;;  %2614 = vmatpush1.bf16.msra.mxu1 %v3961_v26  ;;  %v4018_v26 = vld [vmem:[%s5444_s2 + $0x120] ss:$8 sps:$4 sm:$0xff]  }
  0xc4   :  { %1841 = vmatprep.subr.bf16.mxu0 %v3966_v27  ;;  %2615 = vmatprep.subr.bf16.mxu1 %v3966_v27  ;;  %v4023_v27 = vld [vmem:[%s5444_s2 + $0x134] ss:$8 sps:$4 sm:$0xff]  }
  0xc5   :  { %1026 = vmatprep.mubr.bf16.mxu0 %v4296_v40  ;;  %1440 = vmatprep.mubr.bf16.mxu1 %v4327_v47  ;;  %v3970_v40 = vld [vmem:[%s5444_s2 + $0x330] ss:$8 sps:$4 sm:$0xff]   ;;  %v3975_v47 = vld [vmem:[%s5444_s2 + $0x344] ss:$8 sps:$4 sm:$0xff]  }
  0xc7   :  { %1842 = vmatpush1.bf16.msra.mxu0 %v3964_v28  ;;  %2616 = vmatpush1.bf16.msra.mxu1 %v3964_v28  ;;  %v4849_v28 = vld [vmem:[%s5445_s1 + $0x10] ss:$8 sps:$4 sm:$0xff]  }
  0xc8   :  { %1843 = vmatprep.subr.bf16.mxu0 %v3969_v29  ;;  %2617 = vmatprep.subr.bf16.mxu1 %v3969_v29  ;;  %v4855_v29 = vld [vmem:[%s5446_s0 + $0x20] ss:$8 sps:$4 sm:$0xff]  }
  0xca   :  { %1027 = vmatmul.mubr.bf16.gmra.mrb[4].mxu0 %v4316_v44  ;;  %1441 = vmatmul.mubr.bf16.gmra.mrb[4].mxu1 %v4347_v51  ;;  %v3973_v44 = vld [vmem:[%s5444_s2 + $0x340] ss:$8 sps:$4 sm:$0xff]  }
  0xcb   :  { %1844 = vmatpush1.bf16.msra.mxu0 %v3967_v36  ;;  %2618 = vmatpush1.bf16.msra.mxu1 %v3967_v36  ;;  %v4021_v36 = vld [vmem:[%s5444_s2 + $0x130] ss:$8 sps:$4 sm:$0xff]  }
  0xcc   :  { %1845 = vmatprep.subr.bf16.mxu0 %v3972_v43  ;;  %2619 = vmatprep.subr.bf16.mxu1 %v3972_v43  ;;  %v4026_v43 = vld [vmem:[%s5444_s2 + $0x144] ss:$8 sps:$4 sm:$0xff]  }
  0xcd   :  { %1036 = vmatprep.mubr.bf16.mxu0 %v4332_v48  ;;  %1450 = vmatprep.mubr.bf16.mxu1 %v4363_v55  ;;  %v3976_v48 = vld [vmem:[%s5444_s2 + $0x350] ss:$8 sps:$4 sm:$0xff]  }
  0xcf   :  { %1846 = vmatpush1.bf16.msra.mxu0 %v3970_v40  ;;  %2620 = vmatpush1.bf16.msra.mxu1 %v3970_v40  ;;  %v4867_v40 = vld [vmem:[%s5445_s1 + $0x24] ss:$8 sps:$4 sm:$0xff]  }
  0xd0   :  { %1847 = vmatprep.subr.bf16.mxu0 %v3975_v47  ;;  %2621 = vmatprep.subr.bf16.mxu1 %v3975_v47  ;;  %v4873_v47 = vld [vmem:[%s5446_s0 + $0x34] ss:$8 sps:$4 sm:$0xff]  }
  0xd2   :  { %1037 = vmatmul.mubr.bf16.gmra.mrb[8].mxu0 %v4352_v52  ;;  %1451 = vmatmul.mubr.bf16.gmra.mrb[8].mxu1 %v4383_v59 }
  0xd3   :  { %1848 = vmatpush1.bf16.msra.mxu0 %v3973_v44  ;;  %2622 = vmatpush1.bf16.msra.mxu1 %v3973_v44  ;;  %v4024_v44 = vld [vmem:[%s5444_s2 + $0x140] ss:$8 sps:$4 sm:$0xff]  }
  0xd4   :  { %1849 = vmatprep.subr.bf16.mxu0 %v3978_v30  ;;  %2623 = vmatprep.subr.bf16.mxu1 %v3978_v30  ;;  %v4029_v30 = vld [vmem:[%s5444_s2 + $0x154] ss:$8 sps:$4 sm:$0xff]  }
  0xd5   :  { %1046 = vmatprep.mubr.bf16.mxu0 %v4368_v56  ;;  %1460 = vmatprep.mubr.bf16.mxu1 %v4399_v63 }
  0xd7   :  { %1850 = vmatpush1.bf16.msra.mxu0 %v3976_v48  ;;  %2624 = vmatpush1.bf16.msra.mxu1 %v3976_v48  ;;  %v4027_v48 = vld [vmem:[%s5444_s2 + $0x150] ss:$8 sps:$4 sm:$0xff]  }
  0xd8   :  { %1851 = vmatprep.subr.bf16.mxu0 %v3981_v13  ;;  %2625 = vmatprep.subr.bf16.mxu1 %v3981_v13  ;;  %v4032_v13 = vld [vmem:[%s5444_s2 + $0x164] ss:$8 sps:$4 sm:$0xff]  }
  0xda   :  { %1047 = vmatmul.mubr.bf16.gmra.mrb[12].mxu0 %v4388_v60  ;;  %1461 = vmatmul.mubr.bf16.gmra.mrb[12].mxu1 %v4425_v5 }
  0xdb   :  { %1852 = vmatpush1.bf16.msra.mxu0 %v3979_v32  ;;  %2626 = vmatpush1.bf16.msra.mxu1 %v3979_v32  ;;  %v4062_v32 = vld [vmem:[%s5444_s2 + $0x504] ss:$8 sps:$4 sm:$0xff]  }
  0xdc   :  { %1853 = vmatprep.subr.bf16.mxu0 %v3984_v33  ;;  %2627 = vmatprep.subr.bf16.mxu1 %v3984_v33  ;;  %v4060_v33 = vld [vmem:[%s5444_s2 + $0x500] ss:$8 sps:$4 sm:$0xff]  }
  0xdd   :  { %1056 = vmatprep.mubr.bf16.mxu0 %v4404_v0  ;;  %1470 = vmatprep.mubr.bf16.mxu1 %v4435_v7 }
  0xdf   :  { %1854 = vmatpush1.bf16.msra.mxu0 %v3982_v34  ;;  %2628 = vmatpush1.bf16.msra.mxu1 %v3982_v34  ;;  %v4065_v34 = vld [vmem:[%s5444_s2 + $0x514] ss:$8 sps:$4 sm:$0xff]  }
  0xe0   :  { %1855 = vmatprep.subr.bf16.mxu0 %v3987_v37  ;;  %2629 = vmatprep.subr.bf16.mxu1 %v3987_v37  ;;  %v4063_v37 = vld [vmem:[%s5444_s2 + $0x510] ss:$8 sps:$4 sm:$0xff]  }
  0xe2   :  { %1057 = vmatmul.mubr.bf16.gmra.mrb[16].mxu0 %v4430_v6  ;;  %1471 = vmatmul.mubr.bf16.gmra.mrb[16].mxu1 %v4453_v11 }
  0xe3   :  { %1856 = vmatpush1.bf16.msra.mxu0 %v3985_v35  ;;  %2630 = vmatpush1.bf16.msra.mxu1 %v3985_v35  ;;  %v4068_v35 = vld [vmem:[%s5444_s2 + $0x524] ss:$8 sps:$4 sm:$0xff]  }
  0xe4   :  { %1857 = vmatprep.subr.bf16.mxu0 %v3990_v38  ;;  %2631 = vmatprep.subr.bf16.mxu1 %v3990_v38  ;;  %v4071_v38 = vld [vmem:[%s5444_s2 + $0x534] ss:$8 sps:$4 sm:$0xff]  }
  0xe5   :  { %1066 = vmatprep.mubr.bf16.mxu0 %v4440_v8  ;;  %1480 = vmatprep.mubr.bf16.mxu1 %v4471_v17 }
  0xe7   :  { %1858 = vmatpush1.bf16.msra.mxu0 %v3988_v41  ;;  %2632 = vmatpush1.bf16.msra.mxu1 %v3988_v41  ;;  %v4069_v41 = vld [vmem:[%s5444_s2 + $0x530] ss:$8 sps:$4 sm:$0xff]  }
  0xe8   :  { %1859 = vmatprep.subr.bf16.mxu0 %v3993_v42  ;;  %2633 = vmatprep.subr.bf16.mxu1 %v3993_v42  ;;  %v4074_v42 = vld [vmem:[%s5444_s2 + $0x544] ss:$8 sps:$4 sm:$0xff]  }
  0xea   :  { %1067 = vmatmul.mubr.bf16.gmra.mrb[20].mxu0 %v4458_v12  ;;  %1481 = vmatmul.mubr.bf16.gmra.mrb[20].mxu1 %v4489_v21 }
  0xeb   :  { %1860 = vmatpush1.bf16.msra.mxu0 %v3991_v45  ;;  %2634 = vmatpush1.bf16.msra.mxu1 %v3991_v45  ;;  %v4072_v45 = vld [vmem:[%s5444_s2 + $0x540] ss:$8 sps:$4 sm:$0xff]  }
  0xec   :  { %1861 = vmatprep.subr.bf16.mxu0 %v3996_v46  ;;  %2635 = vmatprep.subr.bf16.mxu1 %v3996_v46  ;;  %v4077_v46 = vld [vmem:[%s5444_s2 + $0x554] ss:$8 sps:$4 sm:$0xff]  }
  0xed   :  { %1076 = vmatprep.mubr.bf16.mxu0 %v4476_v18  ;;  %1490 = vmatprep.mubr.bf16.mxu1 %v4749_v49 }
  0xef   :  { %1862 = vmatpush1.bf16.msra.mxu0 %v3994_v50  ;;  %2636 = vmatpush1.bf16.msra.mxu1 %v3994_v50  ;;  %v5010_v50 = vld [vmem:[%s5445_s1 + $0x20] ss:$8 sps:$4 sm:$0xff]  }
  0xf0   :  { %1863 = vmatprep.subr.bf16.mxu0 %v4002_v53  ;;  %2637 = vmatprep.subr.bf16.mxu1 %v4002_v53  ;;  %v4075_v53 = vld [vmem:[%s5444_s2 + $0x550] ss:$8 sps:$4 sm:$0xff]  }
  0xf2   :  { %1077 = vmatmul.mubr.bf16.gmra.mrb[24].mxu0 %v4494_v22  ;;  %1491 = vmatmul.mubr.bf16.gmra.mrb[24].mxu1 %v4764_v54 }
  0xf3   :  { %1864 = vmatpush1.bf16.msra.mxu0 %v4000_v57  ;;  %2638 = vmatpush1.bf16.msra.mxu1 %v4000_v57  ;;  %v4080_v57 = vld [vmem:[%s5444_s2 + $0x564] ss:$8 sps:$4 sm:$0xff]  }
  0xf4   :  { %1865 = vmatprep.subr.bf16.mxu0 %v4005_v58  ;;  %2639 = vmatprep.subr.bf16.mxu1 %v4005_v58  ;;  %v5023_v58 = vld [vmem:[%s5445_s1 + $0x34] ss:$8 sps:$4 sm:$0xff]  }
  0xf5   :  { %1871 = vmatprep.mubr.bf16.mxu0 %v4783_v1  ;;  %2645 = vmatprep.mubr.bf16.mxu1 %v4789_v2 }
  0xf7   :  { %1866 = vmatpush1.bf16.msra.mxu0 %v4003_v61  ;;  %2640 = vmatpush1.bf16.msra.mxu1 %v4003_v61  ;;  %v4078_v61 = vld [vmem:[%s5444_s2 + $0x560] ss:$8 sps:$4 sm:$0xff]  }
  0xf8   :  { %1867 = vmatprep.subr.bf16.mxu0 %v4008_v62  ;;  %2641 = vmatprep.subr.bf16.mxu1 %v4008_v62  ;;  %v4083_v62 = vld [vmem:[%s5444_s2 + $0x574] ss:$8 sps:$4 sm:$0xff]  }
  0xfb   :  { %1868 = vmatpush1.bf16.msra.mxu0 %v4006_v3  ;;  %2642 = vmatpush1.bf16.msra.mxu1 %v4006_v3  ;;  %v5041_v3 = vld [vmem:[%s5445_s1 + $0x30] ss:$8 sps:$4 sm:$0xff]  }
  0xfc   :  { %1869 = vmatprep.subr.bf16.mxu0 %v4011_v4  ;;  %2643 = vmatprep.subr.bf16.mxu1 %v4011_v4  ;;  %v4081_v4 = vld [vmem:[%s5444_s2 + $0x570] ss:$8 sps:$4 sm:$0xff]  }
  0xff   :  { %1870 = vmatpush1.bf16.msra.mxu0 %v4009_v9  ;;  %2644 = vmatpush1.bf16.msra.mxu1 %v4009_v9  ;;  %v4086_v9 = vld [vmem:[%s5444_s2 + $0x584] ss:$8 sps:$4 sm:$0xff]  }
 0x100   :  { %2102 = vmatprep.subr.bf16.mxu0 %v4014_v10  ;;  %2716 = vmatprep.subr.bf16.mxu1 %v4014_v10  ;;  %v5053_v10 = vld [vmem:[%s5446_s0 + $0x44] ss:$8 sps:$4 sm:$0xff]  }
 0x102   :  { %1872 = vmatmul.mubr.bf16.vlgmr.msra.gmra.mrb[28].mxu0 %v4813_v19  ;;  %2646 = vmatmul.mubr.bf16.vlgmr.msra.gmra.mrb[28].mxu1 %v4819_v20 }
 0x103   :  { %2103 = vmatpush1.bf16.msra.mxu0 %v4012_v14  ;;  %2717 = vmatpush1.bf16.msra.mxu1 %v4012_v14  ;;  %v5059_v14 = vld [vmem:[%s5445_s1 + $0x44] ss:$8 sps:$4 sm:$0xff]  }
 0x104   :  { %2104 = vmatprep.subr.bf16.mxu0 %v4017_v15  ;;  %2718 = vmatprep.subr.bf16.mxu1 %v4017_v15  ;;  %v4084_v15 = vld [vmem:[%s5444_s2 + $0x580] ss:$8 sps:$4 sm:$0xff]  }
 0x105   :  { %1881 = vmatprep.mubr.bf16.mxu0 %v4831_v16  ;;  %2655 = vmatprep.mubr.bf16.mxu1 %v4837_v39 }
 0x107   :  { %2105 = vmatpush1.bf16.msra.mxu0 %v4015_v23  ;;  %2719 = vmatpush1.bf16.msra.mxu1 %v4015_v23  ;;  %v5071_v23 = vld [vmem:[%s5446_s0 + $0x40] ss:$8 sps:$4 sm:$0xff]  }
 0x108   :  { %2106 = vmatprep.subr.bf16.mxu0 %v4020_v24  ;;  %2720 = vmatprep.subr.bf16.mxu1 %v4020_v24  ;;  %v5077_v24 = vld [vmem:[%s5445_s1 + $0x40] ss:$8 sps:$4 sm:$0xff]  }
 0x10a   :  { %1882 = vmatmul.mubr.bf16.gmra.mrb[32].mxu0 %v4849_v28  ;;  %2656 = vmatmul.mubr.bf16.gmra.mrb[32].mxu1 %v4855_v29 }
 0x10b   :  { %2107 = vmatpush1.bf16.msra.mxu0 %v4018_v26  ;;  %2721 = vmatpush1.bf16.msra.mxu1 %v4018_v26  ;;  %v4087_v26 = vld [vmem:[%s5444_s2 + $0x590] ss:$8 sps:$4 sm:$0xff]  }
 0x10c   :  { %2108 = vmatprep.subr.bf16.mxu0 %v4023_v27  ;;  %2722 = vmatprep.subr.bf16.mxu1 %v4023_v27  ;;  %v4092_v27 = vld [vmem:[%s5444_s2 + $0x5a4] ss:$8 sps:$4 sm:$0xff]  }
 0x10d   :  { %1891 = vmatprep.mubr.bf16.mxu0 %v4867_v40  ;;  %2665 = vmatprep.mubr.bf16.mxu1 %v4873_v47 }
 0x10f   :  { %2109 = vmatpush1.bf16.msra.mxu0 %v4021_v36  ;;  %2723 = vmatpush1.bf16.msra.mxu1 %v4021_v36  ;;  %v5089_v36 = vld [vmem:[%s5446_s0 + $0x54] ss:$8 sps:$4 sm:$0xff]  }
 0x110   :  { %2110 = vmatprep.subr.bf16.mxu0 %v4026_v43  ;;  %2724 = vmatprep.subr.bf16.mxu1 %v4026_v43  ;;  %v5095_v43 = vld [vmem:[%s5445_s1 + $0x54] ss:$8 sps:$4 sm:$0xff]  }
 0x112   :  { %1892 = vmatmul.mubr.bf16.gmra.mrb[36].mxu0 %v4347_v51  ;;  %2666 = vmatmul.mubr.bf16.gmra.mrb[36].mxu1 %v4352_v52  ;;  %v4030_v51 = vld [vmem:[%s5444_s2 + $0x160] ss:$8 sps:$4 sm:$0xff]   ;;  %v4035_v52 = vld [vmem:[%s5444_s2 + $0x174] ss:$8 sps:$4 sm:$0xff]  }
 0x113   :  { %2111 = vmatpush1.bf16.msra.mxu0 %v4024_v44  ;;  %2725 = vmatpush1.bf16.msra.mxu1 %v4024_v44  ;;  %v4090_v44 = vld [vmem:[%s5444_s2 + $0x5a0] ss:$8 sps:$4 sm:$0xff]  }
 0x114   :  { %2112 = vmatprep.subr.bf16.mxu0 %v4029_v30  ;;  %2726 = vmatprep.subr.bf16.mxu1 %v4029_v30  ;;  %v4095_v30 = vld [vmem:[%s5444_s2 + $0x5b4] ss:$8 sps:$4 sm:$0xff]  }
 0x115   :  { %1901 = vmatprep.mubr.bf16.mxu0 %v4363_v55  ;;  %2675 = vmatprep.mubr.bf16.mxu1 %v4368_v56  ;;  %v4033_v55 = vld [vmem:[%s5444_s2 + $0x170] ss:$8 sps:$4 sm:$0xff]   ;;  %v4038_v56 = vld [vmem:[%s5444_s2 + $0x184] ss:$8 sps:$4 sm:$0xff]  }
 0x117   :  { %2113 = vmatpush1.bf16.msra.mxu0 %v4027_v48  ;;  %2727 = vmatpush1.bf16.msra.mxu1 %v4027_v48  ;;  %v5107_v48 = vld [vmem:[%s5446_s0 + $0x50] ss:$8 sps:$4 sm:$0xff]  }
 0x118   :  { %2114 = vmatprep.subr.bf16.mxu0 %v4032_v13  ;;  %2728 = vmatprep.subr.bf16.mxu1 %v4032_v13  ;;  %v5113_v13 = vld [vmem:[%s5445_s1 + $0x50] ss:$8 sps:$4 sm:$0xff]  }
 0x11a   :  { %1902 = vmatmul.mubr.bf16.gmra.mrb[40].mxu0 %v4383_v59  ;;  %2676 = vmatmul.mubr.bf16.gmra.mrb[40].mxu1 %v4388_v60  ;;  %v4036_v59 = vld [vmem:[%s5444_s2 + $0x180] ss:$8 sps:$4 sm:$0xff]   ;;  %v4041_v60 = vld [vmem:[%s5444_s2 + $0x194] ss:$8 sps:$4 sm:$0xff]  }
 0x11b   :  { %2115 = vmatpush1.bf16.msra.mxu0 %v4030_v51  ;;  %2729 = vmatpush1.bf16.msra.mxu1 %v4030_v51  ;;  %v4093_v51 = vld [vmem:[%s5444_s2 + $0x5b0] ss:$8 sps:$4 sm:$0xff]  }
 0x11c   :  { %2116 = vmatprep.subr.bf16.mxu0 %v4035_v52  ;;  %2730 = vmatprep.subr.bf16.mxu1 %v4035_v52  ;;  %v4098_v52 = vld [vmem:[%s5444_s2 + $0x5c4] ss:$8 sps:$4 sm:$0xff]  }
 0x11d   :  { %1911 = vmatprep.mubr.bf16.mxu0 %v4399_v63  ;;  %2685 = vmatprep.mubr.bf16.mxu1 %v4404_v0  ;;  %v4039_v63 = vld [vmem:[%s5444_s2 + $0x190] ss:$8 sps:$4 sm:$0xff]   ;;  %v4044_v0 = vld [vmem:[%s5444_s2 + $0x1a4] ss:$8 sps:$4 sm:$0xff]  }
 0x11f   :  { %2117 = vmatpush1.bf16.msra.mxu0 %v4033_v55  ;;  %2731 = vmatpush1.bf16.msra.mxu1 %v4033_v55  ;;  %v5125_v55 = vld [vmem:[%s5446_s0 + $0x64] ss:$8 sps:$4 sm:$0xff]  }
 0x120   :  { %2118 = vmatprep.subr.bf16.mxu0 %v4038_v56  ;;  %2732 = vmatprep.subr.bf16.mxu1 %v4038_v56  ;;  %v5131_v56 = vld [vmem:[%s5445_s1 + $0x64] ss:$8 sps:$4 sm:$0xff]  }
 0x122   :  { %1912 = vmatmul.mubr.bf16.gmra.mrb[44].mxu0 %v4425_v5  ;;  %2686 = vmatmul.mubr.bf16.gmra.mrb[44].mxu1 %v4430_v6  ;;  %v4042_v5 = vld [vmem:[%s5444_s2 + $0x1a0] ss:$8 sps:$4 sm:$0xff]   ;;  %v4047_v6 = vld [vmem:[%s5444_s2 + $0x1b4] ss:$8 sps:$4 sm:$0xff]  }
 0x123   :  { %2119 = vmatpush1.bf16.msra.mxu0 %v4036_v59  ;;  %2733 = vmatpush1.bf16.msra.mxu1 %v4036_v59  ;;  %v4096_v59 = vld [vmem:[%s5444_s2 + $0x5c0] ss:$8 sps:$4 sm:$0xff]  }
 0x124   :  { %2120 = vmatprep.subr.bf16.mxu0 %v4041_v60  ;;  %2734 = vmatprep.subr.bf16.mxu1 %v4041_v60  ;;  %v4101_v60 = vld [vmem:[%s5444_s2 + $0x5d4] ss:$8 sps:$4 sm:$0xff]  }
 0x125   :  { %1921 = vmatprep.mubr.bf16.mxu0 %v4435_v7  ;;  %2695 = vmatprep.mubr.bf16.mxu1 %v4440_v8  ;;  %v4045_v7 = vld [vmem:[%s5444_s2 + $0x1b0] ss:$8 sps:$4 sm:$0xff]   ;;  %v4050_v8 = vld [vmem:[%s5444_s2 + $0x1c4] ss:$8 sps:$4 sm:$0xff]  }
 0x127   :  { %2121 = vmatpush1.bf16.msra.mxu0 %v4039_v63  ;;  %2735 = vmatpush1.bf16.msra.mxu1 %v4039_v63  ;;  %v5143_v63 = vld [vmem:[%s5446_s0 + $0x60] ss:$8 sps:$4 sm:$0xff]  }
 0x128   :  { %2122 = vmatprep.subr.bf16.mxu0 %v4044_v0  ;;  %2736 = vmatprep.subr.bf16.mxu1 %v4044_v0  ;;  %v5149_v0 = vld [vmem:[%s5445_s1 + $0x60] ss:$8 sps:$4 sm:$0xff]  }
 0x12a   :  { %1922 = vmatmul.mubr.bf16.gmra.mrb[48].mxu0 %v4453_v11  ;;  %2696 = vmatmul.mubr.bf16.gmra.mrb[48].mxu1 %v4458_v12  ;;  %v4048_v11 = vld [vmem:[%s5444_s2 + $0x1c0] ss:$8 sps:$4 sm:$0xff]   ;;  %v4053_v12 = vld [vmem:[%s5444_s2 + $0x1d4] ss:$8 sps:$4 sm:$0xff]  }
 0x12b   :  { %2123 = vmatpush1.bf16.msra.mxu0 %v4042_v5  ;;  %2737 = vmatpush1.bf16.msra.mxu1 %v4042_v5  ;;  %v4099_v5 = vld [vmem:[%s5444_s2 + $0x5d0] ss:$8 sps:$4 sm:$0xff]  }
 0x12c   :  { %2124 = vmatprep.subr.bf16.mxu0 %v4047_v6  ;;  %2738 = vmatprep.subr.bf16.mxu1 %v4047_v6  ;;  %v4104_v6 = vld [vmem:[%s5444_s2 + $0x5e4] ss:$8 sps:$4 sm:$0xff]  }
 0x12d   :  { %1931 = vmatprep.mubr.bf16.mxu0 %v4471_v17  ;;  %2705 = vmatprep.mubr.bf16.mxu1 %v4476_v18  ;;  %v4051_v17 = vld [vmem:[%s5444_s2 + $0x1d0] ss:$8 sps:$4 sm:$0xff]   ;;  %v4056_v18 = vld [vmem:[%s5444_s2 + $0x1e4] ss:$8 sps:$4 sm:$0xff]  }
 0x12f   :  { %2125 = vmatpush1.bf16.msra.mxu0 %v4045_v7  ;;  %2739 = vmatpush1.bf16.msra.mxu1 %v4045_v7  ;;  %v4102_v7 = vld [vmem:[%s5444_s2 + $0x5e0] ss:$8 sps:$4 sm:$0xff]  }
 0x130   :  { %2126 = vmatprep.subr.bf16.mxu0 %v4050_v8  ;;  %2740 = vmatprep.subr.bf16.mxu1 %v4050_v8  ;;  %v4107_v8 = vld [vmem:[%s5444_s2 + $0x5f4] ss:$8 sps:$4 sm:$0xff]  }
 0x132   :  { %1932 = vmatmul.mubr.bf16.gmra.mrb[52].mxu0 %v4489_v21  ;;  %2706 = vmatmul.mubr.bf16.gmra.mrb[52].mxu1 %v4494_v22  ;;  %v4054_v21 = vld [vmem:[%s5444_s2 + $0x1e0] ss:$8 sps:$4 sm:$0xff]   ;;  %v4059_v22 = vld [vmem:[%s5444_s2 + $0x1f4] ss:$8 sps:$4 sm:$0xff]  }
 0x133   :  { %2127 = vmatpush1.bf16.msra.mxu0 %v4048_v11  ;;  %2741 = vmatpush1.bf16.msra.mxu1 %v4048_v11 }
 0x134   :  { %2128 = vmatprep.subr.bf16.mxu0 %v4053_v12  ;;  %2742 = vmatprep.subr.bf16.mxu1 %v4053_v12 }
 0x135   :  { %2134 = vmatprep.mubr.bf16.mxu0 %v4507_v25  ;;  %2748 = vmatprep.mubr.bf16.mxu1 %v4783_v1  ;;  %v4057_v25 = vld [vmem:[%s5444_s2 + $0x1f0] ss:$8 sps:$4 sm:$0xff]  }
 0x136   :  { %v5035_v1 = vld [vmem:[%s5446_s0 + $0x30] ss:$8 sps:$4 sm:$0xff]  }
 0x137   :  { %2129 = vmatpush1.bf16.msra.mxu0 %v4051_v17  ;;  %2743 = vmatpush1.bf16.msra.mxu1 %v4051_v17 }
 0x138   :  { %2130 = vmatprep.subr.bf16.mxu0 %v4056_v18  ;;  %2744 = vmatprep.subr.bf16.mxu1 %v4056_v18 }
 0x13b   :  { %2131 = vmatpush1.bf16.msra.mxu0 %v4054_v21  ;;  %2745 = vmatpush1.bf16.msra.mxu1 %v4054_v21 }
 0x13c   :  { %2132 = vmatprep.subr.bf16.mxu0 %v4059_v22  ;;  %2746 = vmatprep.subr.bf16.mxu1 %v4059_v22 }
 0x13f   :  { %2133 = vmatpush1.bf16.msra.mxu0 %v4057_v25  ;;  %2747 = vmatpush1.bf16.msra.mxu1 %v4057_v25 }
 0x140   :  { %2398 = vmatprep.subr.bf16.mxu0 %v4062_v32  ;;  %2819 = vmatprep.subr.bf16.mxu1 %v4062_v32 }
 0x142   :  { %2135 = vmatmul.mubr.bf16.vlgmr.msra.gmra.mrb[28].mxu0 %v4534_v31  ;;  %2749 = vmatmul.mubr.bf16.vlgmr.msra.gmra.mrb[28].mxu1 %v4813_v19  ;;  %v4066_v31 = vld [vmem:[%s5444_s2 + $0x520] ss:$8 sps:$4 sm:$0xff]   ;;  %v4089_v19 = vld [vmem:[%s5444_s2 + $0x594] ss:$8 sps:$4 sm:$0xff]  }
 0x143   :  { %2399 = vmatpush1.bf16.msra.mxu0 %v4060_v33  ;;  %2820 = vmatpush1.bf16.msra.mxu1 %v4060_v33 }
 0x144   :  { %2400 = vmatprep.subr.bf16.mxu0 %v4065_v34  ;;  %2821 = vmatprep.subr.bf16.mxu1 %v4065_v34 }
 0x145   :  { %2144 = vmatprep.mubr.bf16.mxu0 %v4789_v2  ;;  %2758 = vmatprep.mubr.bf16.mxu1 %v4831_v16 }
 0x147   :  { %2401 = vmatpush1.bf16.msra.mxu0 %v4063_v37  ;;  %2822 = vmatpush1.bf16.msra.mxu1 %v4063_v37 }
 0x148   :  { %2402 = vmatprep.subr.bf16.mxu0 %v4068_v35  ;;  %2823 = vmatprep.subr.bf16.mxu1 %v4068_v35 }
 0x14a   :  { %2145 = vmatmul.mubr.bf16.gmra.mrb[32].mxu0 %v4819_v20  ;;  %2759 = vmatmul.mubr.bf16.gmra.mrb[32].mxu1 %v4849_v28 }
 0x14b   :  { %2403 = vmatpush1.bf16.msra.mxu0 %v4066_v31  ;;  %2824 = vmatpush1.bf16.msra.mxu1 %v4066_v31 }
 0x14c   :  { %2404 = vmatprep.subr.bf16.mxu0 %v4071_v38  ;;  %2825 = vmatprep.subr.bf16.mxu1 %v4071_v38 }
 0x14d   :  { %2154 = vmatprep.mubr.bf16.mxu0 %v4837_v39  ;;  %2768 = vmatprep.mubr.bf16.mxu1 %v4867_v40 }
 0x14f   :  { %2405 = vmatpush1.bf16.msra.mxu0 %v4069_v41  ;;  %2826 = vmatpush1.bf16.msra.mxu1 %v4069_v41 }
 0x150   :  { %2406 = vmatprep.subr.bf16.mxu0 %v4074_v42  ;;  %2827 = vmatprep.subr.bf16.mxu1 %v4074_v42 }
 0x152   :  { %2155 = vmatmul.mubr.bf16.gmra.mrb[36].mxu0 %v4855_v29  ;;  %2769 = vmatmul.mubr.bf16.gmra.mrb[36].mxu1 %v5010_v50 }
 0x153   :  { %2407 = vmatpush1.bf16.msra.mxu0 %v4072_v45  ;;  %2828 = vmatpush1.bf16.msra.mxu1 %v4072_v45 }
 0x154   :  { %2408 = vmatprep.subr.bf16.mxu0 %v4077_v46  ;;  %2829 = vmatprep.subr.bf16.mxu1 %v4077_v46 }
 0x155   :  { %2164 = vmatprep.mubr.bf16.mxu0 %v4873_v47  ;;  %2778 = vmatprep.mubr.bf16.mxu1 %v5023_v58 }
 0x157   :  { %2409 = vmatpush1.bf16.msra.mxu0 %v4075_v53  ;;  %2830 = vmatpush1.bf16.msra.mxu1 %v4075_v53 }
 0x158   :  { %2410 = vmatprep.subr.bf16.mxu0 %v4080_v57  ;;  %2831 = vmatprep.subr.bf16.mxu1 %v4080_v57 }
 0x15a   :  { %2165 = vmatmul.mubr.bf16.gmra.mrb[40].mxu0 %v5035_v1  ;;  %2779 = vmatmul.mubr.bf16.gmra.mrb[40].mxu1 %v5041_v3 }
 0x15b   :  { %2411 = vmatpush1.bf16.msra.mxu0 %v4078_v61  ;;  %2832 = vmatpush1.bf16.msra.mxu1 %v4078_v61 }
 0x15c   :  { %2412 = vmatprep.subr.bf16.mxu0 %v4083_v62  ;;  %2833 = vmatprep.subr.bf16.mxu1 %v4083_v62 }
 0x15d   :  { %2174 = vmatprep.mubr.bf16.mxu0 %v5053_v10  ;;  %2788 = vmatprep.mubr.bf16.mxu1 %v5059_v14 }
 0x15f   :  { %2413 = vmatpush1.bf16.msra.mxu0 %v4081_v4  ;;  %2834 = vmatpush1.bf16.msra.mxu1 %v4081_v4 }
 0x160   :  { %2414 = vmatprep.subr.bf16.mxu0 %v4086_v9  ;;  %2835 = vmatprep.subr.bf16.mxu1 %v4086_v9 }
 0x162   :  { %2175 = vmatmul.mubr.bf16.gmra.mrb[44].mxu0 %v5071_v23  ;;  %2789 = vmatmul.mubr.bf16.gmra.mrb[44].mxu1 %v5077_v24 }
 0x163   :  { %2415 = vmatpush1.bf16.msra.mxu0 %v4084_v15  ;;  %2836 = vmatpush1.bf16.msra.mxu1 %v4084_v15 }
 0x164   :  { %2416 = vmatprep.subr.bf16.mxu0 %v4089_v19  ;;  %2837 = vmatprep.subr.bf16.mxu1 %v4089_v19 }
 0x165   :  { %2184 = vmatprep.mubr.bf16.mxu0 %v5089_v36  ;;  %2798 = vmatprep.mubr.bf16.mxu1 %v5095_v43 }
 0x167   :  { %2417 = vmatpush1.bf16.msra.mxu0 %v4087_v26  ;;  %2838 = vmatpush1.bf16.msra.mxu1 %v4087_v26 }
 0x168   :  { %2418 = vmatprep.subr.bf16.mxu0 %v4092_v27  ;;  %2839 = vmatprep.subr.bf16.mxu1 %v4092_v27 }
 0x16a   :  { %2185 = vmatmul.mubr.bf16.gmra.mrb[48].mxu0 %v5107_v48  ;;  %2799 = vmatmul.mubr.bf16.gmra.mrb[48].mxu1 %v5113_v13 }
 0x16b   :  { %2419 = vmatpush1.bf16.msra.mxu0 %v4090_v44  ;;  %2840 = vmatpush1.bf16.msra.mxu1 %v4090_v44 }
 0x16c   :  { %2420 = vmatprep.subr.bf16.mxu0 %v4095_v30  ;;  %2841 = vmatprep.subr.bf16.mxu1 %v4095_v30 }
 0x16d   :  { %2194 = vmatprep.mubr.bf16.mxu0 %v5125_v55  ;;  %2808 = vmatprep.mubr.bf16.mxu1 %v5131_v56 }
 0x16f   :  { %2421 = vmatpush1.bf16.msra.mxu0 %v4093_v51  ;;  %2842 = vmatpush1.bf16.msra.mxu1 %v4093_v51 }
 0x170   :  { %2422 = vmatprep.subr.bf16.mxu0 %v4098_v52  ;;  %2843 = vmatprep.subr.bf16.mxu1 %v4098_v52 }
 0x172   :  { %2195 = vmatmul.mubr.bf16.gmra.mrb[52].mxu0 %v5143_v63  ;;  %2809 = vmatmul.mubr.bf16.gmra.mrb[52].mxu1 %v5149_v0 }
 0x173   :  { %2423 = vmatpush1.bf16.msra.mxu0 %v4096_v59  ;;  %2844 = vmatpush1.bf16.msra.mxu1 %v4096_v59 }
 0x174   :  { %2424 = vmatprep.subr.bf16.mxu0 %v4101_v60  ;;  %2845 = vmatprep.subr.bf16.mxu1 %v4101_v60 }
 0x175   :  { %2430 = vmatprep.mubr.bf16.mxu0 %v4789_v2  ;;  %2851 = vmatprep.mubr.bf16.mxu1 %v4831_v16  ;;  %v4105_v2 = vld [vmem:[%s5444_s2 + $0x5f0] ss:$8 sps:$4 sm:$0xff]   ;;  %v1116_v16 = vlaneseq }
 0x177   :  { %2425 = vmatpush1.bf16.msra.mxu0 %v4099_v5  ;;  %2846 = vmatpush1.bf16.msra.mxu1 %v4099_v5  ;;  %v1117_v11 = vshrl.u32 %v1116_v16, 7 }
 0x178   :  { %2426 = vmatprep.subr.bf16.mxu0 %v4104_v6  ;;  %2847 = vmatprep.subr.bf16.mxu1 %v4104_v6 }
 0x179   :  { %v1118_v12 = vsub.s32 0, %v1117_v11 }
 0x17b   :  { %2427 = vmatpush1.bf16.msra.mxu0 %v4102_v7  ;;  %2848 = vmatpush1.bf16.msra.mxu1 %v4102_v7 }
 0x17c   :  { %2428 = vmatprep.subr.bf16.mxu0 %v4107_v8  ;;  %2849 = vmatprep.subr.bf16.mxu1 %v4107_v8 }
 0x17f   :  { %2429 = vmatpush1.bf16.msra.mxu0 %v4105_v2  ;;  %2850 = vmatpush1.bf16.msra.mxu1 %v4105_v2 }
 0x182   :  { %2431 = vmatmul.mubr.bf16.vlgmr.msra.gmra.mrb[28].mxu0 %v4819_v20  ;;  %2852 = vmatmul.mubr.bf16.vlgmr.msra.gmra.mrb[28].mxu1 %v4849_v28  ;;  %v17_v20 = vld [vmem:[%s5447_s3] sm:$0x3]  ;;  %v1122_v28 = vsub.s32 1, %v1117_v11 }
 0x183   :  { %2440 = vmatprep.mubr.bf16.mxu0 %v4837_v39  ;;  %2861 = vmatprep.mubr.bf16.mxu1 %v4867_v40  ;;  %v5182_v39 = vrot.slane %v17_v20, %v1118_v12 }
 0x18a   :  { %2441 = vmatmul.mubr.bf16.gmra.mrb[32].mxu0 %v4855_v29  ;;  %2862 = vmatmul.mubr.bf16.gmra.mrb[32].mxu1 %v5010_v50  ;;  %v5184_v29 = vrot.slane %v17_v20, %v1122_v28 }
 0x18b   :  { %2450 = vmatprep.mubr.bf16.mxu0 %v4873_v47  ;;  %2871 = vmatprep.mubr.bf16.mxu1 %v5023_v58 }
 0x192   :  { %2451 = vmatmul.mubr.bf16.gmra.mrb[36].mxu0 %v5035_v1  ;;  %2872 = vmatmul.mubr.bf16.gmra.mrb[36].mxu1 %v5041_v3 }
 0x193   :  { %2460 = vmatprep.mubr.bf16.mxu0 %v5053_v10  ;;  %2881 = vmatprep.mubr.bf16.mxu1 %v5059_v14 }
 0x195   :  { %v1018_v40 = vpop.f32.mrb[0].mxu0  ;;  %v1432_v47 = vpop.f32.mrb[0].mxu1 }
 0x196   :  { %v1126_v17 = vadd.f32 %v5182_v39, %v1018_v40  ;;  %v1529_v18 = vadd.f32 %v1432_v47, %v5182_v39  ;;  %v1020_v21 = vpop.f32.mrb[1].mxu0  ;;  %v1434_v22 = vpop.f32.mrb[1].mxu1 }
 0x197   :  { %v1127_v25 = vadd.f32 %v5184_v29, %v1020_v21  ;;  %v1530_v32 = vadd.f32 %v1434_v22, %v5184_v29  ;;  %v1022_v33 = vpop.f32.mrb[2].mxu0  ;;  %v1436_v34 = vpop.f32.mrb[2].mxu1 }
 0x198   :  { %v1154_v37 = vmax.f32 %v1126_v17, 0.0  ;;  %v1557_v35 = vmax.f32 %v1529_v18, 0.0  ;;  %v1128_v31 = vadd.f32 %v5182_v39, %v1022_v33  ;;  %v1531_v38 = vadd.f32 %v1436_v34, %v5182_v39  ;;  %v1024_v41 = vpop.f32.mrb[3].mxu0  ;;  %v1438_v42 = vpop.f32.mrb[3].mxu1 }
 0x199   :  { %v1155_v45 = vmax.f32 %v1127_v25, 0.0  ;;  %v1558_v46 = vmax.f32 %v1530_v32, 0.0  ;;  %v1129_v50 = vadd.f32 %v5184_v29, %v1024_v41  ;;  %v1532_v53 = vadd.f32 %v1438_v42, %v5184_v29 }
 0x19a   :  { %v5196_v57 = vmax.f32 %v1154_v37, %v1557_v35  ;;  %v1156_v58 = vmax.f32 %v1128_v31, 0.0  ;;  %v1559_v61 = vmax.f32 %v1531_v38, 0.0  ;;  %2461 = vmatmul.mubr.bf16.gmra.mrb[40].mxu0 %v5071_v23  ;;  %2882 = vmatmul.mubr.bf16.gmra.mrb[40].mxu1 %v5077_v24 }
 0x19b   :  { %v5200_v62 = vmax.f32 %v1155_v45, %v1558_v46  ;;  %v1157_v1 = vmax.f32 %v1129_v50, 0.0  ;;  %v1560_v3 = vmax.f32 %v1532_v53, 0.0  ;;  %2470 = vmatprep.mubr.bf16.mxu0 %v5089_v36  ;;  %2891 = vmatprep.mubr.bf16.mxu1 %v5095_v43 }
 0x19c   :  { %v5204_v4 = vmax.f32 %v1156_v58, %v1559_v61 }
 0x19d   :  { %v5206_v9 = vmax.f32 %v1157_v1, %v1560_v3  ;;  %v1028_v10 = vpop.f32.mrb[4].mxu0  ;;  %v1442_v14 = vpop.f32.mrb[4].mxu1 }
 0x19e   :  { %v1130_v15 = vadd.f32 %v5182_v39, %v1028_v10  ;;  %v1533_v19 = vadd.f32 %v1442_v14, %v5182_v39  ;;  %v1030_v23 = vpop.f32.mrb[5].mxu0  ;;  %v1444_v24 = vpop.f32.mrb[5].mxu1  ;;  %v4134_v10 = vld [vmem:[%s5446_s0 + $0x74] ss:$8 sps:$4 sm:$0xff]  }
 0x19f   :  { %v1131_v26 = vadd.f32 %v5184_v29, %v1030_v23  ;;  %v1534_v27 = vadd.f32 %v1444_v24, %v5184_v29  ;;  %v1032_v44 = vpop.f32.mrb[6].mxu0  ;;  %v1446_v36 = vpop.f32.mrb[6].mxu1 }
 0x1a0   :  { %v1158_v30 = vmax.f32 %v1130_v15, 0.0  ;;  %v1561_v43 = vmax.f32 %v1533_v19, 0.0  ;;  %v1132_v51 = vadd.f32 %v5182_v39, %v1032_v44  ;;  %v1535_v52 = vadd.f32 %v1446_v36, %v5182_v39  ;;  %v1034_v59 = vpop.f32.mrb[7].mxu0  ;;  %v1448_v60 = vpop.f32.mrb[7].mxu1 }
 0x1a1   :  { %v1159_v5 = vmax.f32 %v1131_v26, 0.0  ;;  %v1562_v6 = vmax.f32 %v1534_v27, 0.0  ;;  %v1133_v7 = vadd.f32 %v5184_v29, %v1034_v59  ;;  %v1536_v8 = vadd.f32 %v1448_v60, %v5184_v29 }
 0x1a2   :  { %v5216_v2 = vmax.f32 %v1158_v30, %v1561_v43  ;;  %v1160_v16 = vmax.f32 %v1132_v51, 0.0  ;;  %v1563_v11 = vmax.f32 %v1535_v52, 0.0  ;;  %2471 = vmatmul.mubr.bf16.gmra.mrb[44].mxu0 %v5107_v48  ;;  %2892 = vmatmul.mubr.bf16.gmra.mrb[44].mxu1 %v5113_v13 }
 0x1a3   :  { %v5220_v12 = vmax.f32 %v1159_v5, %v1562_v6  ;;  %v1161_v20 = vmax.f32 %v1133_v7, 0.0  ;;  %v1564_v28 = vmax.f32 %v1536_v8, 0.0  ;;  %2480 = vmatprep.mubr.bf16.mxu0 %v5125_v55  ;;  %2901 = vmatprep.mubr.bf16.mxu1 %v5131_v56 }
 0x1a4   :  { %v5224_v40 = vmax.f32 %v1160_v16, %v1563_v11 }
 0x1a5   :  { %v5226_v47 = vmax.f32 %v1161_v20, %v1564_v28  ;;  %v1038_v17 = vpop.f32.mrb[8].mxu0  ;;  %v1452_v18 = vpop.f32.mrb[8].mxu1  ;;  %v4135_v28 = vld [vmem:[%s5446_s0 + $0x70] ss:$8 sps:$4 sm:$0xff]  }
 0x1a6   :  { %v1134_v21 = vadd.f32 %v5182_v39, %v1038_v17  ;;  %v1537_v48 = vadd.f32 %v1452_v18, %v5182_v39  ;;  %v1040_v22 = vpop.f32.mrb[9].mxu0  ;;  %v1454_v13 = vpop.f32.mrb[9].mxu1 }
 0x1a7   :  { %v1135_v25 = vadd.f32 %v5184_v29, %v1040_v22  ;;  %v1538_v32 = vadd.f32 %v1454_v13, %v5184_v29  ;;  %v1042_v33 = vpop.f32.mrb[10].mxu0  ;;  %v1456_v55 = vpop.f32.mrb[10].mxu1 }
 0x1a8   :  { %v1162_v34 = vmax.f32 %v1134_v21, 0.0  ;;  %v1565_v56 = vmax.f32 %v1537_v48, 0.0  ;;  %v1136_v37 = vadd.f32 %v5182_v39, %v1042_v33  ;;  %v1539_v35 = vadd.f32 %v1456_v55, %v5182_v39  ;;  %v1044_v31 = vpop.f32.mrb[11].mxu0  ;;  %v1458_v38 = vpop.f32.mrb[11].mxu1 }
 0x1a9   :  { %v1163_v41 = vmax.f32 %v1135_v25, 0.0  ;;  %v1566_v42 = vmax.f32 %v1538_v32, 0.0  ;;  %v1137_v45 = vadd.f32 %v5184_v29, %v1044_v31  ;;  %v1540_v46 = vadd.f32 %v1458_v38, %v5184_v29 }
 0x1aa   :  { %v5236_v50 = vmax.f32 %v1162_v34, %v1565_v56  ;;  %v1164_v53 = vmax.f32 %v1136_v37, 0.0  ;;  %v1567_v58 = vmax.f32 %v1539_v35, 0.0  ;;  %2481 = vmatmul.mubr.bf16.gmra.mrb[48].mxu0 %v5143_v63  ;;  %2902 = vmatmul.mubr.bf16.gmra.mrb[48].mxu1 %v5149_v0 }
 0x1ab   :  { %v5240_v61 = vmax.f32 %v1163_v41, %v1566_v42  ;;  %v1165_v1 = vmax.f32 %v1137_v45, 0.0  ;;  %v1568_v3 = vmax.f32 %v1540_v46, 0.0  ;;  %2490 = vmatprep.mubr.bf16.mxu0 %v4134_v10  ;;  %2911 = vmatprep.mubr.bf16.mxu1 %v4749_v49 }
 0x1ac   :  { %v5246_v14 = vmax.f32 %v1164_v53, %v1567_v58 }
 0x1ad   :  { %v5248_v15 = vmax.f32 %v1165_v1, %v1568_v3  ;;  %v1048_v19 = vpop.f32.mrb[12].mxu0  ;;  %v1462_v23 = vpop.f32.mrb[12].mxu1 }
 0x1ae   :  { %v1138_v63 = vadd.f32 %v5182_v39, %v1048_v19  ;;  %v1541_v0 = vadd.f32 %v1462_v23, %v5182_v39  ;;  %v1050_v24 = vpop.f32.mrb[13].mxu0  ;;  %v1464_v26 = vpop.f32.mrb[13].mxu1 }
 0x1af   :  { %v1139_v27 = vadd.f32 %v5184_v29, %v1050_v24  ;;  %v1542_v44 = vadd.f32 %v1464_v26, %v5184_v29  ;;  %v1052_v36 = vpop.f32.mrb[14].mxu0  ;;  %v1466_v30 = vpop.f32.mrb[14].mxu1 }
 0x1b0   :  { %v1166_v43 = vmax.f32 %v1138_v63, 0.0  ;;  %v1569_v49 = vmax.f32 %v1541_v0, 0.0  ;;  %v1140_v51 = vadd.f32 %v5182_v39, %v1052_v36  ;;  %v1543_v52 = vadd.f32 %v1466_v30, %v5182_v39  ;;  %v1054_v59 = vpop.f32.mrb[15].mxu0  ;;  %v1468_v60 = vpop.f32.mrb[15].mxu1 }
 0x1b1   :  { %v1167_v5 = vmax.f32 %v1139_v27, 0.0  ;;  %v1570_v6 = vmax.f32 %v1542_v44, 0.0  ;;  %v1141_v7 = vadd.f32 %v5184_v29, %v1054_v59  ;;  %v1544_v8 = vadd.f32 %v1468_v60, %v5184_v29 }
 0x1b2   :  { %v5258_v16 = vmax.f32 %v1166_v43, %v1569_v49  ;;  %v1168_v11 = vmax.f32 %v1140_v51, 0.0  ;;  %v1571_v20 = vmax.f32 %v1543_v52, 0.0  ;;  %2491 = vmatmul.mubr.bf16.gmra.mrb[52].mxu0 %v4135_v28  ;;  %2912 = vmatmul.mubr.bf16.gmra.mrb[52].mxu1 %v4764_v54 }
 0x1b3   :  { %v5264_v17 = vmax.f32 %v1167_v5, %v1570_v6  ;;  %v1169_v18 = vmax.f32 %v1141_v7, 0.0  ;;  %v1572_v21 = vmax.f32 %v1544_v8, 0.0 }
 0x1b4   :  { %v5266_v48 = vmax.f32 %v1168_v11, %v1571_v20 }
 0x1b5   :  { %v5268_v22 = vmax.f32 %v1169_v18, %v1572_v21  ;;  %v1058_v13 = vpop.f32.mrb[16].mxu0  ;;  %v1472_v25 = vpop.f32.mrb[16].mxu1 }
 0x1b6   :  { %v1142_v32 = vadd.f32 %v5182_v39, %v1058_v13  ;;  %v1545_v33 = vadd.f32 %v1472_v25, %v5182_v39  ;;  %v1060_v55 = vpop.f32.mrb[17].mxu0  ;;  %v1474_v34 = vpop.f32.mrb[17].mxu1 }
 0x1b7   :  { %v1143_v56 = vadd.f32 %v5184_v29, %v1060_v55  ;;  %v1546_v54 = vadd.f32 %v1474_v34, %v5184_v29  ;;  %v1062_v37 = vpop.f32.mrb[18].mxu0  ;;  %v1476_v35 = vpop.f32.mrb[18].mxu1 }
 0x1b8   :  { %v1170_v31 = vmax.f32 %v1142_v32, 0.0  ;;  %v1573_v38 = vmax.f32 %v1545_v33, 0.0  ;;  %v1144_v41 = vadd.f32 %v5182_v39, %v1062_v37  ;;  %v1547_v42 = vadd.f32 %v1476_v35, %v5182_v39  ;;  %v1064_v45 = vpop.f32.mrb[19].mxu0  ;;  %v1478_v46 = vpop.f32.mrb[19].mxu1 }
 0x1b9   :  { %v1171_v53 = vmax.f32 %v1143_v56, 0.0  ;;  %v1574_v58 = vmax.f32 %v1546_v54, 0.0  ;;  %v1145_v1 = vadd.f32 %v5184_v29, %v1064_v45  ;;  %v1548_v3 = vadd.f32 %v1478_v46, %v5184_v29 }
 0x1ba   :  { %v5278_v10 = vmax.f32 %v1170_v31, %v1573_v38  ;;  %v1172_v19 = vmax.f32 %v1144_v41, 0.0  ;;  %v1575_v23 = vmax.f32 %v1547_v42, 0.0 }
 0x1bb   :  { %v5280_v63 = vmax.f32 %v1171_v53, %v1574_v58  ;;  %v1173_v0 = vmax.f32 %v1145_v1, 0.0  ;;  %v1576_v24 = vmax.f32 %v1548_v3, 0.0 }
 0x1bc   :  { %v5282_v26 = vmax.f32 %v1172_v19, %v1575_v23 }
 0x1bd   :  { %v5284_v27 = vmax.f32 %v1173_v0, %v1576_v24  ;;  %v1068_v44 = vpop.f32.mrb[20].mxu0  ;;  %v1482_v36 = vpop.f32.mrb[20].mxu1 }
 0x1be   :  { %v1146_v30 = vadd.f32 %v5182_v39, %v1068_v44  ;;  %v1549_v43 = vadd.f32 %v1482_v36, %v5182_v39  ;;  %v1070_v49 = vpop.f32.mrb[21].mxu0  ;;  %v1484_v51 = vpop.f32.mrb[21].mxu1 }
 0x1bf   :  { %v1147_v52 = vadd.f32 %v5184_v29, %v1070_v49  ;;  %v1550_v59 = vadd.f32 %v1484_v51, %v5184_v29  ;;  %v1072_v60 = vpop.f32.mrb[22].mxu0  ;;  %v1486_v5 = vpop.f32.mrb[22].mxu1 }
 0x1c0   :  { %v1174_v6 = vmax.f32 %v1146_v30, 0.0  ;;  %v1577_v7 = vmax.f32 %v1549_v43, 0.0  ;;  %v1148_v8 = vadd.f32 %v5182_v39, %v1072_v60  ;;  %v1551_v11 = vadd.f32 %v1486_v5, %v5182_v39  ;;  %v1074_v20 = vpop.f32.mrb[23].mxu0  ;;  %v1488_v28 = vpop.f32.mrb[23].mxu1 }
 0x1c1   :  { %v1175_v18 = vmax.f32 %v1147_v52, 0.0  ;;  %v1578_v21 = vmax.f32 %v1550_v59, 0.0  ;;  %v1149_v13 = vadd.f32 %v5184_v29, %v1074_v20  ;;  %v1552_v25 = vadd.f32 %v1488_v28, %v5184_v29 }
 0x1c2   :  { %v5294_v32 = vmax.f32 %v1174_v6, %v1577_v7  ;;  %v1176_v33 = vmax.f32 %v1148_v8, 0.0  ;;  %v1579_v55 = vmax.f32 %v1551_v11, 0.0 }
 0x1c3   :  { %v5296_v34 = vmax.f32 %v1175_v18, %v1578_v21  ;;  %v1177_v56 = vmax.f32 %v1149_v13, 0.0  ;;  %v1580_v54 = vmax.f32 %v1552_v25, 0.0 }
 0x1c4   :  { %v5298_v37 = vmax.f32 %v1176_v33, %v1579_v55 }
 0x1c5   :  { %v5300_v35 = vmax.f32 %v1177_v56, %v1580_v54  ;;  %v1078_v31 = vpop.f32.mrb[24].mxu0  ;;  %v1492_v38 = vpop.f32.mrb[24].mxu1 }
 0x1c6   :  { %v1150_v41 = vadd.f32 %v5182_v39, %v1078_v31  ;;  %v1553_v42 = vadd.f32 %v1492_v38, %v5182_v39  ;;  %v1080_v45 = vpop.f32.mrb[25].mxu0  ;;  %v1494_v46 = vpop.f32.mrb[25].mxu1 }
 0x1c7   :  { %v1151_v53 = vadd.f32 %v5184_v29, %v1080_v45  ;;  %v1554_v58 = vadd.f32 %v1494_v46, %v5184_v29  ;;  %v1082_v1 = vpop.f32.mrb[26].mxu0  ;;  %v1496_v3 = vpop.f32.mrb[26].mxu1 }
 0x1c8   :  { %v1178_v19 = vmax.f32 %v1150_v41, 0.0  ;;  %v1581_v23 = vmax.f32 %v1553_v42, 0.0  ;;  %v1152_v0 = vadd.f32 %v5182_v39, %v1082_v1  ;;  %v1555_v24 = vadd.f32 %v1496_v3, %v5182_v39  ;;  %v1084_v44 = vpop.f32.mrb[27].mxu0  ;;  %v1498_v36 = vpop.f32.mrb[27].mxu1 }
 0x1c9   :  { %v1179_v30 = vmax.f32 %v1151_v53, 0.0  ;;  %v1582_v43 = vmax.f32 %v1554_v58, 0.0  ;;  %v1153_v49 = vadd.f32 %v5184_v29, %v1084_v44  ;;  %v1556_v51 = vadd.f32 %v1498_v36, %v5184_v29 }
 0x1ca   :  { %v5310_v52 = vmax.f32 %v1178_v19, %v1581_v23  ;;  %v1180_v59 = vmax.f32 %v1152_v0, 0.0  ;;  %v1583_v60 = vmax.f32 %v1555_v24, 0.0 }
 0x1cb   :  { %v5312_v5 = vmax.f32 %v1179_v30, %v1582_v43  ;;  %v1181_v6 = vmax.f32 %v1153_v49, 0.0  ;;  %v1584_v7 = vmax.f32 %v1556_v51, 0.0 }
 0x1cc   :  { %v5314_v8 = vmax.f32 %v1180_v59, %v1583_v60 }
 0x1cd   :  { %v5316_v11 = vmax.f32 %v1181_v6, %v1584_v7 }
 0x255   :  { %v2432_v20 = vpop.f32.mrb[28].mxu0  ;;  %v2853_v28 = vpop.f32.mrb[28].mxu1 }
 0x256   :  { %v2529_v18 = vadd.f32 %v2432_v20, %v5182_v39  ;;  %v2950_v21 = vadd.f32 %v2853_v28, %v5182_v39  ;;  %v2434_v13 = vpop.f32.mrb[29].mxu0  ;;  %v2855_v25 = vpop.f32.mrb[29].mxu1 }
 0x257   :  { %v2530_v33 = vadd.f32 %v2434_v13, %v5184_v29  ;;  %v2951_v55 = vadd.f32 %v2855_v25, %v5184_v29  ;;  %v2436_v56 = vpop.f32.mrb[30].mxu0  ;;  %v2857_v54 = vpop.f32.mrb[30].mxu1 }
 0x258   :  { %v2557_v31 = vmax.f32 %v2529_v18, 0.0  ;;  %v2531_v38 = vadd.f32 %v2436_v56, %v5182_v39  ;;  %v2952_v41 = vadd.f32 %v2857_v54, %v5182_v39  ;;  %v2438_v42 = vpop.f32.mrb[31].mxu0  ;;  %v2859_v45 = vpop.f32.mrb[31].mxu1  ;;  %v2978_v3 = vmax.f32 %v2950_v21, 0.0 }
 0x259   :  { %v2558_v46 = vmax.f32 %v2530_v33, 0.0  ;;  %v2532_v53 = vadd.f32 %v2438_v42, %v5184_v29  ;;  %v2953_v58 = vadd.f32 %v2859_v45, %v5184_v29  ;;  %v2979_v0 = vmax.f32 %v2951_v55, 0.0 }
 0x25a   :  { %v2585_v1 = vmax.f32 %v5196_v57, %v2557_v31  ;;  %v2559_v19 = vmax.f32 %v2531_v38, 0.0  ;;  %v2980_v30 = vmax.f32 %v2952_v41, 0.0 }
 0x25b   :  { %v2586_v23 = vmax.f32 %v5200_v62, %v2558_v46  ;;  %v2560_v24 = vmax.f32 %v2532_v53, 0.0  ;;  %v2981_v51 = vmax.f32 %v2953_v58, 0.0 }
 0x25c   :  { %v3006_v44 = vmax.f32 %v2585_v1, %v2978_v3  ;;  %v2587_v36 = vmax.f32 %v5204_v4, %v2559_v19 }
 0x25d   :  { %v3007_v43 = vmax.f32 %v2586_v23, %v2979_v0  ;;  %v2588_v49 = vmax.f32 %v5206_v9, %v2560_v24  ;;  %v2442_v59 = vpop.f32.mrb[32].mxu0  ;;  %v2863_v60 = vpop.f32.mrb[32].mxu1 }
 0x25e   :  { %v3008_v6 = vmax.f32 %v2587_v36, %v2980_v30  ;;  %v2533_v7 = vadd.f32 %v2442_v59, %v5182_v39  ;;  %v2954_v57 = vadd.f32 %v2863_v60, %v5182_v39  ;;  %v2444_v20 = vpop.f32.mrb[33].mxu0  ;;  %v2865_v28 = vpop.f32.mrb[33].mxu1 }
 0x25f   :  { %v3534_v62 = vpack.c.bf16 %v3007_v43, %v3006_v44  ;;  %v3009_v18 = vmax.f32 %v2588_v49, %v2981_v51  ;;  %v2534_v21 = vadd.f32 %v2444_v20, %v5184_v29  ;;  %v2955_v4 = vadd.f32 %v2865_v28, %v5184_v29  ;;  %v2446_v13 = vpop.f32.mrb[34].mxu0  ;;  %v2867_v25 = vpop.f32.mrb[34].mxu1 }
 0x260   :  { %v2561_v33 = vmax.f32 %v2533_v7, 0.0  ;;  %v2535_v9 = vadd.f32 %v2446_v13, %v5182_v39  ;;  %v2956_v55 = vadd.f32 %v2867_v25, %v5182_v39  ;;  %v2448_v56 = vpop.f32.mrb[35].mxu0  ;;  %v2869_v54 = vpop.f32.mrb[35].mxu1  ;;  %v2982_v45 = vmax.f32 %v2954_v57, 0.0 }
 0x261   :  { %3118 = vst [vmem:[%s5448_s4] sm:$0xff] %v3534_v62  ;;  %v3535_v31 = vpack.c.bf16 %v3009_v18, %v3008_v6  ;;  %v2562_v38 = vmax.f32 %v2534_v21, 0.0  ;;  %v2536_v41 = vadd.f32 %v2448_v56, %v5184_v29  ;;  %v2957_v53 = vadd.f32 %v2869_v54, %v5184_v29 }
 0x262   :  { %v2589_v42 = vmax.f32 %v5216_v2, %v2561_v33  ;;  %v2563_v46 = vmax.f32 %v2535_v9, 0.0  ;;  %v2983_v1 = vmax.f32 %v2955_v4, 0.0  ;;  %v2984_v0 = vmax.f32 %v2956_v55, 0.0 }
 0x263   :  { %3119 = vst [vmem:[%s5448_s4 + $0x8] sm:$0xff] %v3535_v31  ;;  %v2590_v58 = vmax.f32 %v5220_v12, %v2562_v38  ;;  %v2564_v3 = vmax.f32 %v2536_v41, 0.0  ;;  %v2985_v2 = vmax.f32 %v2957_v53, 0.0 }
 0x264   :  { %v3010_v19 = vmax.f32 %v2589_v42, %v2982_v45  ;;  %v2591_v23 = vmax.f32 %v5224_v40, %v2563_v46 }
 0x265   :  { %v3011_v24 = vmax.f32 %v2590_v58, %v2983_v1  ;;  %v2592_v44 = vmax.f32 %v5226_v47, %v2564_v3  ;;  %v2452_v36 = vpop.f32.mrb[36].mxu0  ;;  %v2873_v30 = vpop.f32.mrb[36].mxu1 }
 0x266   :  { %v3012_v43 = vmax.f32 %v2591_v23, %v2984_v0  ;;  %v2537_v49 = vadd.f32 %v2452_v36, %v5182_v39  ;;  %v2958_v51 = vadd.f32 %v2873_v30, %v5182_v39  ;;  %v2454_v59 = vpop.f32.mrb[37].mxu0  ;;  %v2875_v60 = vpop.f32.mrb[37].mxu1 }
 0x267   :  { %v3536_v12 = vpack.c.bf16 %v3011_v24, %v3010_v19  ;;  %v3013_v6 = vmax.f32 %v2592_v44, %v2985_v2  ;;  %v2538_v7 = vadd.f32 %v2454_v59, %v5184_v29  ;;  %v2959_v40 = vadd.f32 %v2875_v60, %v5184_v29  ;;  %v2456_v57 = vpop.f32.mrb[38].mxu0  ;;  %v2877_v20 = vpop.f32.mrb[38].mxu1 }
 0x268   :  { %v2565_v28 = vmax.f32 %v2537_v49, 0.0  ;;  %v2539_v47 = vadd.f32 %v2456_v57, %v5182_v39  ;;  %v2960_v62 = vadd.f32 %v2877_v20, %v5182_v39  ;;  %v2458_v18 = vpop.f32.mrb[39].mxu0  ;;  %v2879_v21 = vpop.f32.mrb[39].mxu1  ;;  %v2986_v9 = vmax.f32 %v2958_v51, 0.0 }
 0x269   :  { %3120 = vst [vmem:[%s5448_s4 + $0x10] sm:$0xff] %v3536_v12  ;;  %v3537_v4 = vpack.c.bf16 %v3013_v6, %v3012_v43  ;;  %v2566_v13 = vmax.f32 %v2538_v7, 0.0  ;;  %v2540_v25 = vadd.f32 %v2458_v18, %v5184_v29  ;;  %v2961_v56 = vadd.f32 %v2879_v21, %v5184_v29 }
 0x26a   :  { %v2593_v33 = vmax.f32 %v5236_v50, %v2565_v28  ;;  %v2567_v55 = vmax.f32 %v2539_v47, 0.0  ;;  %v2987_v31 = vmax.f32 %v2959_v40, 0.0  ;;  %v2988_v45 = vmax.f32 %v2960_v62, 0.0 }
 0x26b   :  { %3121 = vst [vmem:[%s5448_s4 + $0x18] sm:$0xff] %v3537_v4  ;;  %v2594_v54 = vmax.f32 %v5240_v61, %v2566_v13  ;;  %v2568_v38 = vmax.f32 %v2540_v25, 0.0  ;;  %v2989_v50 = vmax.f32 %v2961_v56, 0.0 }
 0x26c   :  { %v3014_v41 = vmax.f32 %v2593_v33, %v2986_v9  ;;  %v2595_v42 = vmax.f32 %v5246_v14, %v2567_v55 }
 0x26d   :  { %v3015_v46 = vmax.f32 %v2594_v54, %v2987_v31  ;;  %v2596_v53 = vmax.f32 %v5248_v15, %v2568_v38  ;;  %v2462_v58 = vpop.f32.mrb[40].mxu0  ;;  %v2883_v1 = vpop.f32.mrb[40].mxu1 }
 0x26e   :  { %v3016_v3 = vmax.f32 %v2595_v42, %v2988_v45  ;;  %v2541_v19 = vadd.f32 %v2462_v58, %v5182_v39  ;;  %v2962_v23 = vadd.f32 %v2883_v1, %v5182_v39  ;;  %v2464_v0 = vpop.f32.mrb[41].mxu0  ;;  %v2885_v24 = vpop.f32.mrb[41].mxu1 }
 0x26f   :  { %v3538_v61 = vpack.c.bf16 %v3015_v46, %v3014_v41  ;;  %v3017_v44 = vmax.f32 %v2596_v53, %v2989_v50  ;;  %v2542_v2 = vadd.f32 %v2464_v0, %v5184_v29  ;;  %v2963_v14 = vadd.f32 %v2885_v24, %v5184_v29  ;;  %v2466_v36 = vpop.f32.mrb[42].mxu0  ;;  %v2887_v30 = vpop.f32.mrb[42].mxu1 }
 0x270   :  { %v2569_v43 = vmax.f32 %v2541_v19, 0.0  ;;  %v2543_v15 = vadd.f32 %v2466_v36, %v5182_v39  ;;  %v2964_v49 = vadd.f32 %v2887_v30, %v5182_v39  ;;  %v2468_v51 = vpop.f32.mrb[43].mxu0  ;;  %v2889_v59 = vpop.f32.mrb[43].mxu1  ;;  %v2990_v40 = vmax.f32 %v2962_v23, 0.0 }
 0x271   :  { %3122 = vst [vmem:[%s5448_s4 + $0x20] sm:$0xff] %v3538_v61  ;;  %v3539_v60 = vpack.c.bf16 %v3017_v44, %v3016_v3  ;;  %v2570_v12 = vmax.f32 %v2542_v2, 0.0  ;;  %v2544_v6 = vadd.f32 %v2468_v51, %v5184_v29  ;;  %v2965_v20 = vadd.f32 %v2889_v59, %v5184_v29 }
 0x272   :  { %v2597_v7 = vmax.f32 %v5258_v16, %v2569_v43  ;;  %v2571_v57 = vmax.f32 %v2543_v15, 0.0  ;;  %v2991_v47 = vmax.f32 %v2963_v14, 0.0  ;;  %v2992_v4 = vmax.f32 %v2964_v49, 0.0 }
 0x273   :  { %3123 = vst [vmem:[%s5448_s4 + $0x28] sm:$0xff] %v3539_v60  ;;  %v2598_v28 = vmax.f32 %v5264_v17, %v2570_v12  ;;  %v2572_v62 = vmax.f32 %v2544_v6, 0.0  ;;  %v2993_v16 = vmax.f32 %v2965_v20, 0.0 }
 0x274   :  { %v3018_v18 = vmax.f32 %v2597_v7, %v2990_v40  ;;  %v2599_v21 = vmax.f32 %v5266_v48, %v2571_v57 }
 0x275   :  { %v3019_v13 = vmax.f32 %v2598_v28, %v2991_v47  ;;  %v2600_v25 = vmax.f32 %v5268_v22, %v2572_v62  ;;  %v2472_v33 = vpop.f32.mrb[44].mxu0  ;;  %v2893_v9 = vpop.f32.mrb[44].mxu1 }
 0x276   :  { %v3020_v55 = vmax.f32 %v2599_v21, %v2992_v4  ;;  %v2545_v56 = vadd.f32 %v2472_v33, %v5182_v39  ;;  %v2966_v54 = vadd.f32 %v2893_v9, %v5182_v39  ;;  %v2474_v31 = vpop.f32.mrb[45].mxu0  ;;  %v2895_v38 = vpop.f32.mrb[45].mxu1 }
 0x277   :  { %v3540_v17 = vpack.c.bf16 %v3019_v13, %v3018_v18  ;;  %v3021_v41 = vmax.f32 %v2600_v25, %v2993_v16  ;;  %v2546_v42 = vadd.f32 %v2474_v31, %v5184_v29  ;;  %v2967_v48 = vadd.f32 %v2895_v38, %v5184_v29  ;;  %v2476_v45 = vpop.f32.mrb[46].mxu0  ;;  %v2897_v46 = vpop.f32.mrb[46].mxu1 }
 0x278   :  { %v2573_v53 = vmax.f32 %v2545_v56, 0.0  ;;  %v2547_v22 = vadd.f32 %v2476_v45, %v5182_v39  ;;  %v2968_v50 = vadd.f32 %v2897_v46, %v5182_v39  ;;  %v2478_v58 = vpop.f32.mrb[47].mxu0  ;;  %v2899_v1 = vpop.f32.mrb[47].mxu1  ;;  %v2994_v24 = vmax.f32 %v2966_v54, 0.0 }
 0x279   :  { %3124 = vst [vmem:[%s5448_s4 + $0x30] sm:$0xff] %v3540_v17  ;;  %v3541_v3 = vpack.c.bf16 %v3021_v41, %v3020_v55  ;;  %v2574_v19 = vmax.f32 %v2546_v42, 0.0  ;;  %v2548_v23 = vadd.f32 %v2478_v58, %v5184_v29  ;;  %v2969_v44 = vadd.f32 %v2899_v1, %v5184_v29 }
 0x27a   :  { %v2601_v0 = vmax.f32 %v5278_v10, %v2573_v53  ;;  %v2575_v61 = vmax.f32 %v2547_v22, 0.0  ;;  %v2995_v14 = vmax.f32 %v2967_v48, 0.0  ;;  %v2996_v15 = vmax.f32 %v2968_v50, 0.0 }
 0x27b   :  { %3125 = vst [vmem:[%s5448_s4 + $0x38] sm:$0xff] %v3541_v3  ;;  %v2602_v2 = vmax.f32 %v5280_v63, %v2574_v19  ;;  %v2576_v36 = vmax.f32 %v2548_v23, 0.0  ;;  %v2997_v10 = vmax.f32 %v2969_v44, 0.0 }
 0x27c   :  { %v3022_v30 = vmax.f32 %v2601_v0, %v2994_v24  ;;  %v2603_v43 = vmax.f32 %v5282_v26, %v2575_v61 }
 0x27d   :  { %v3023_v49 = vmax.f32 %v2602_v2, %v2995_v14  ;;  %v2604_v51 = vmax.f32 %v5284_v27, %v2576_v36  ;;  %v2482_v59 = vpop.f32.mrb[48].mxu0  ;;  %v2903_v60 = vpop.f32.mrb[48].mxu1 }
 0x27e   :  { %v3024_v12 = vmax.f32 %v2603_v43, %v2996_v15  ;;  %v2549_v6 = vadd.f32 %v2482_v59, %v5182_v39  ;;  %v2970_v7 = vadd.f32 %v2903_v60, %v5182_v39  ;;  %v2484_v40 = vpop.f32.mrb[49].mxu0  ;;  %v2905_v57 = vpop.f32.mrb[49].mxu1 }
 0x27f   :  { %v3542_v63 = vpack.c.bf16 %v3023_v49, %v3022_v30  ;;  %v3025_v20 = vmax.f32 %v2604_v51, %v2997_v10  ;;  %v2550_v28 = vadd.f32 %v2484_v40, %v5184_v29  ;;  %v2971_v26 = vadd.f32 %v2905_v57, %v5184_v29  ;;  %v2486_v47 = vpop.f32.mrb[50].mxu0  ;;  %v2907_v62 = vpop.f32.mrb[50].mxu1 }
 0x280   :  { %v2577_v18 = vmax.f32 %v2549_v6, 0.0  ;;  %v2551_v27 = vadd.f32 %v2486_v47, %v5182_v39  ;;  %v2972_v21 = vadd.f32 %v2907_v62, %v5182_v39  ;;  %v2488_v4 = vpop.f32.mrb[51].mxu0  ;;  %v2909_v13 = vpop.f32.mrb[51].mxu1  ;;  %v2998_v55 = vmax.f32 %v2970_v7, 0.0 }
 0x281   :  { %3126 = vst [vmem:[%s5448_s4 + $0x40] sm:$0xff] %v3542_v63  ;;  %v3543_v25 = vpack.c.bf16 %v3025_v20, %v3024_v12  ;;  %v2578_v16 = vmax.f32 %v2550_v28, 0.0  ;;  %v2552_v33 = vadd.f32 %v2488_v4, %v5184_v29  ;;  %v2973_v54 = vadd.f32 %v2909_v13, %v5184_v29 }
 0x282   :  { %v2605_v9 = vmax.f32 %v5294_v32, %v2577_v18  ;;  %v2579_v56 = vmax.f32 %v2551_v27, 0.0  ;;  %v2999_v38 = vmax.f32 %v2971_v26, 0.0  ;;  %v3000_v48 = vmax.f32 %v2972_v21, 0.0 }
 0x283   :  { %3127 = vst [vmem:[%s5448_s4 + $0x48] sm:$0xff] %v3543_v25  ;;  %v2606_v31 = vmax.f32 %v5296_v34, %v2578_v16  ;;  %v2580_v17 = vmax.f32 %v2552_v33, 0.0  ;;  %v3001_v32 = vmax.f32 %v2973_v54, 0.0 }
 0x284   :  { %v3026_v41 = vmax.f32 %v2605_v9, %v2998_v55  ;;  %v2607_v42 = vmax.f32 %v5298_v37, %v2579_v56 }
 0x285   :  { %v3027_v45 = vmax.f32 %v2606_v31, %v2999_v38  ;;  %v2608_v46 = vmax.f32 %v5300_v35, %v2580_v17  ;;  %v2492_v53 = vpop.f32.mrb[52].mxu0  ;;  %v2913_v22 = vpop.f32.mrb[52].mxu1 }
 0x286   :  { %v3028_v50 = vmax.f32 %v2607_v42, %v3000_v48  ;;  %v2553_v58 = vadd.f32 %v2492_v53, %v5182_v39  ;;  %v2974_v1 = vadd.f32 %v2913_v22, %v5182_v39  ;;  %v2494_v3 = vpop.f32.mrb[53].mxu0  ;;  %v2915_v19 = vpop.f32.mrb[53].mxu1 }
 0x287   :  { %v3544_v34 = vpack.c.bf16 %v3027_v45, %v3026_v41  ;;  %v3029_v23 = vmax.f32 %v2608_v46, %v3001_v32  ;;  %v2554_v0 = vadd.f32 %v2494_v3, %v5184_v29  ;;  %v2975_v37 = vadd.f32 %v2915_v19, %v5184_v29  ;;  %v2496_v24 = vpop.f32.mrb[54].mxu0  ;;  %v2917_v61 = vpop.f32.mrb[54].mxu1 }
 0x288   :  { %v2581_v44 = vmax.f32 %v2553_v58, 0.0  ;;  %v2555_v35 = vadd.f32 %v2496_v24, %v5182_v39  ;;  %v2976_v2 = vadd.f32 %v2917_v61, %v5182_v39  ;;  %v2498_v14 = vpop.f32.mrb[55].mxu0  ;;  %v2919_v36 = vpop.f32.mrb[55].mxu1  ;;  %v3002_v51 = vmax.f32 %v2974_v1, 0.0 }
 0x289   :  { %3128 = vst [vmem:[%s5448_s4 + $0x50] sm:$0xff] %v3544_v34  ;;  %v3545_v30 = vpack.c.bf16 %v3029_v23, %v3028_v50  ;;  %v2582_v43 = vmax.f32 %v2554_v0, 0.0  ;;  %v2556_v15 = vadd.f32 %v2498_v14, %v5184_v29  ;;  %v2977_v59 = vadd.f32 %v2919_v36, %v5184_v29 }
 0x28a   :  { %v2609_v49 = vmax.f32 %v5310_v52, %v2581_v44  ;;  %v2583_v10 = vmax.f32 %v2555_v35, 0.0  ;;  %v3003_v60 = vmax.f32 %v2975_v37, 0.0  ;;  %v3004_v40 = vmax.f32 %v2976_v2, 0.0 }
 0x28b   :  { %3129 = vst [vmem:[%s5448_s4 + $0x58] sm:$0xff] %v3545_v30  ;;  %v2610_v39 = vmax.f32 %v5312_v5, %v2582_v43  ;;  %v2584_v12 = vmax.f32 %v2556_v15, 0.0  ;;  %v3005_v52 = vmax.f32 %v2977_v59, 0.0 }
 0x28c   :  { %v3030_v6 = vmax.f32 %v2609_v49, %v3002_v51  ;;  %v2611_v7 = vmax.f32 %v5314_v8, %v2583_v10 }
 0x28d   :  { %v3031_v57 = vmax.f32 %v2610_v39, %v3003_v60  ;;  %v2612_v63 = vmax.f32 %v5316_v11, %v2584_v12 }
 0x28e   :  { %v3032_v20 = vmax.f32 %v2611_v7, %v3004_v40 }
 0x28f   :  { %v3546_v28 = vpack.c.bf16 %v3031_v57, %v3030_v6  ;;  %v3033_v26 = vmax.f32 %v2612_v63, %v3005_v52 }
 0x291   :  { %3130 = vst [vmem:[%s5448_s4 + $0x60] sm:$0xff] %v3546_v28  ;;  %v3547_v29 = vpack.c.bf16 %v3033_v26, %v3032_v20 }
 0x293   :  { %3131 = vst [vmem:[%s5448_s4 + $0x68] sm:$0xff] %v3547_v29 }

// kernel: net_forward.7
= control target key start
LH: loop header
LB: loop body
LE: loop exit
PB: predicated region body
PF: predicated region fallthrough
CT: control target
= control target key end

     0   :  { %vm3991_vm0 = vmmov 0   ;;  %s4814_s1 = inlined_call_operand.vmem [shape: bf16[7,512,128], index: 1, kind: input, shape index: {}]   ;;  %s4815_s0 = inlined_call_operand.vmem [shape: bf16[7,16,512], index: 0, kind: input, shape index: {}]   ;;  %s4816_s3 = inlined_call_operand.vmem [shape: bf16[128,128], index: 3, kind: input, shape index: {}]   ;;  %s4817_s2 = inlined_call_operand.vmem [shape: f32[1,128], index: 2, kind: input, shape index: {}]   ;;  %s4818_s4 = inlined_call_operand.vmem [shape: f32[1,128], index: 4, kind: input, shape index: {}]   ;;  %s4819_s5 = inlined_call_operand.vmem [shape: f32[16,128], index: 5, kind: output, shape index: {}]  }
   0x1   :  { %v3716_v0 = vld [vmem:[%s4814_s1 + $0x140] sm:$0xff]   ;;  %v3720_v4 = vld [vmem:[%s4814_s1 + $0x148] sm:$0xff]   ;;  %v3724_v8 = vld [vmem:[%s4814_s1 + $0x150] sm:$0xff]  }
   0x2   :  { %v3717_v1 = vld [vmem:[%s4814_s1 + $0x1c0] sm:$0xff]   ;;  %3377 = vmatprep.subr.bf16.mxu0 %v3716_v0  ;;  %v3721_v5 = vld [vmem:[%s4814_s1 + $0x1c8] sm:$0xff]   ;;  %v3725_v9 = vld [vmem:[%s4814_s1 + $0x1d0] sm:$0xff]  }
   0x3   :  { %v3718_v2 = vld [vmem:[%s4814_s1 + $0x100] sm:$0xff]   ;;  %3399 = vmatprep.subr.bf16.mxu1 %v3717_v1  ;;  %v3722_v6 = vld [vmem:[%s4814_s1 + $0x108] sm:$0xff]   ;;  %v3726_v10 = vld [vmem:[%s4814_s1 + $0x110] sm:$0xff]  }
   0x4   :  { %v3719_v3 = vld [vmem:[%s4814_s1 + $0x180] sm:$0xff]   ;;  %3378 = vmatpush3.bf16.msra.mxu0 %v3718_v2  ;;  %v3723_v7 = vld [vmem:[%s4814_s1 + $0x188] sm:$0xff]   ;;  %v3727_v11 = vld [vmem:[%s4814_s1 + $0x190] sm:$0xff]  }
   0x5   :  { %3400 = vmatpush3.bf16.msra.mxu1 %v3719_v3  ;;  %3379 = vmatprep.subr.bf16.mxu0 %v3720_v4  ;;  %v3728_v12 = vld [vmem:[%s4814_s1 + $0x158] sm:$0xff]   ;;  %v3732_v16 = vld [vmem:[%s4814_s1 + $0x160] sm:$0xff]   ;;  %v3736_v20 = vld [vmem:[%s4814_s1 + $0x168] sm:$0xff]  }
   0x6   :  { %3401 = vmatprep.subr.bf16.mxu1 %v3721_v5  ;;  %v3729_v13 = vld [vmem:[%s4814_s1 + $0x1d8] sm:$0xff]   ;;  %v3733_v17 = vld [vmem:[%s4814_s1 + $0x1e0] sm:$0xff]   ;;  %v3737_v21 = vld [vmem:[%s4814_s1 + $0x1e8] sm:$0xff]  }
   0x7   :  { %v3730_v14 = vld [vmem:[%s4814_s1 + $0x118] sm:$0xff]   ;;  %v3734_v18 = vld [vmem:[%s4814_s1 + $0x120] sm:$0xff]   ;;  %v3738_v22 = vld [vmem:[%s4814_s1 + $0x128] sm:$0xff]  }
   0x8   :  { %3380 = vmatpush3.bf16.msra.mxu0 %v3722_v6  ;;  %v3731_v15 = vld [vmem:[%s4814_s1 + $0x198] sm:$0xff]   ;;  %v3735_v19 = vld [vmem:[%s4814_s1 + $0x1a0] sm:$0xff]   ;;  %v3739_v23 = vld [vmem:[%s4814_s1 + $0x1a8] sm:$0xff]  }
   0x9   :  { %3402 = vmatpush3.bf16.msra.mxu1 %v3723_v7  ;;  %3381 = vmatprep.subr.bf16.mxu0 %v3724_v8  ;;  %v3740_v24 = vld [vmem:[%s4814_s1 + $0x170] sm:$0xff]   ;;  %v3744_v28 = vld [vmem:[%s4814_s1 + $0x178] sm:$0xff]   ;;  %v3754_v36 = vld [vmem:[%s4814_s1 + $0x40] sm:$0xff]  }
   0xa   :  { %3403 = vmatprep.subr.bf16.mxu1 %v3725_v9  ;;  %v3741_v25 = vld [vmem:[%s4814_s1 + $0x1f0] sm:$0xff]   ;;  %v3745_v29 = vld [vmem:[%s4814_s1 + $0x1f8] sm:$0xff]   ;;  %v3755_v37 = vld [vmem:[%s4814_s1 + $0xc0] sm:$0xff]  }
   0xb   :  { %v3742_v26 = vld [vmem:[%s4814_s1 + $0x130] sm:$0xff]   ;;  %v3746_v30 = vld [vmem:[%s4814_s1 + $0x138] sm:$0xff]   ;;  %v3756_v38 = vld [vmem:[%s4814_s1] sm:$0xff]  }
   0xc   :  { %3382 = vmatpush3.bf16.msra.mxu0 %v3726_v10  ;;  %v3743_v27 = vld [vmem:[%s4814_s1 + $0x1b0] sm:$0xff]   ;;  %v3747_v31 = vld [vmem:[%s4814_s1 + $0x1b8] sm:$0xff]   ;;  %v3757_v39 = vld [vmem:[%s4814_s1 + $0x80] sm:$0xff]  }
   0xd   :  { %3404 = vmatpush3.bf16.msra.mxu1 %v3727_v11  ;;  %3383 = vmatprep.subr.bf16.mxu0 %v3728_v12  ;;  %v3748_v32 = vld [vmem:[%s4815_s0 + $0x20] ss:$16 sps:$4 sm:$0xff]   ;;  %v3750_v33 = vld [vmem:[%s4815_s0 + $0x24] ss:$16 sps:$4 sm:$0xff]   ;;  %v3751_v34 = vld [vmem:[%s4815_s0 + $0x28] ss:$16 sps:$4 sm:$0xff]  }
   0xe   :  { %3405 = vmatprep.subr.bf16.mxu1 %v3729_v13  ;;  %v3753_v35 = vld [vmem:[%s4815_s0 + $0x2c] ss:$16 sps:$4 sm:$0xff]   ;;  %403 = vmatprep.mubr.bf16.mxu0 %v3750_v33  ;;  %v3762_v44 = vld [vmem:[%s4814_s1 + $0x50] sm:$0xff]   ;;  %v3770_v52 = vld [vmem:[%s4814_s1 + $0x60] sm:$0xff]  }
   0xf   :  { %444 = vmatprep.mubr.bf16.mxu1 %v3753_v35  ;;  %v3758_v40 = vld [vmem:[%s4814_s1 + $0x48] sm:$0xff]   ;;  %v3763_v45 = vld [vmem:[%s4814_s1 + $0xd0] sm:$0xff]   ;;  %v3766_v48 = vld [vmem:[%s4814_s1 + $0x58] sm:$0xff]  }
  0x10   :  { %3384 = vmatpush3.bf16.msra.mxu0 %v3730_v14  ;;  %v3759_v41 = vld [vmem:[%s4814_s1 + $0xc8] sm:$0xff]   ;;  %v3764_v46 = vld [vmem:[%s4814_s1 + $0x10] sm:$0xff]   ;;  %v3767_v49 = vld [vmem:[%s4814_s1 + $0xd8] sm:$0xff]  }
  0x11   :  { %3406 = vmatpush3.bf16.msra.mxu1 %v3731_v15  ;;  %3385 = vmatprep.subr.bf16.mxu0 %v3732_v16  ;;  %v3760_v42 = vld [vmem:[%s4814_s1 + $0x8] sm:$0xff]   ;;  %v3765_v47 = vld [vmem:[%s4814_s1 + $0x90] sm:$0xff]   ;;  %v3768_v50 = vld [vmem:[%s4814_s1 + $0x18] sm:$0xff]  }
  0x12   :  { %3407 = vmatprep.subr.bf16.mxu1 %v3733_v17  ;;  %v3761_v43 = vld [vmem:[%s4814_s1 + $0x88] sm:$0xff]   ;;  %v3769_v51 = vld [vmem:[%s4814_s1 + $0x98] sm:$0xff]   ;;  %v3771_v53 = vld [vmem:[%s4814_s1 + $0xe0] sm:$0xff]  }
  0x13   :  { %v3772_v54 = vld [vmem:[%s4814_s1 + $0x20] sm:$0xff]   ;;  %v3774_v56 = vld [vmem:[%s4814_s1 + $0x68] sm:$0xff]   ;;  %v3778_v60 = vld [vmem:[%s4814_s1 + $0x70] sm:$0xff]  }
  0x14   :  { %3386 = vmatpush3.bf16.msra.mxu0 %v3734_v18  ;;  %v3773_v55 = vld [vmem:[%s4814_s1 + $0xa0] sm:$0xff]   ;;  %v3775_v57 = vld [vmem:[%s4814_s1 + $0xe8] sm:$0xff]   ;;  %v3779_v61 = vld [vmem:[%s4814_s1 + $0xf0] sm:$0xff]  }
  0x15   :  { %3408 = vmatpush3.bf16.msra.mxu1 %v3735_v19  ;;  %3387 = vmatprep.subr.bf16.mxu0 %v3736_v20  ;;  %v3776_v58 = vld [vmem:[%s4814_s1 + $0x28] sm:$0xff]   ;;  %v3780_v62 = vld [vmem:[%s4814_s1 + $0x30] sm:$0xff]   ;;  %v3782_v0 = vld [vmem:[%s4814_s1 + $0x78] sm:$0xff]  }
  0x16   :  { %3409 = vmatprep.subr.bf16.mxu1 %v3737_v21  ;;  %v3777_v59 = vld [vmem:[%s4814_s1 + $0xa8] sm:$0xff]   ;;  %v3781_v63 = vld [vmem:[%s4814_s1 + $0xb0] sm:$0xff]   ;;  %v3783_v1 = vld [vmem:[%s4814_s1 + $0xf8] sm:$0xff]  }
  0x17   :  { %v3784_v2 = vld [vmem:[%s4814_s1 + $0x38] sm:$0xff]   ;;  %v3786_v4 = vld [vmem:[%s4815_s0] ss:$16 sps:$4 sm:$0xff]   ;;  %v3788_v5 = vld [vmem:[%s4815_s0 + $0x4] ss:$16 sps:$4 sm:$0xff]  }
  0x18   :  { %3388 = vmatpush3.bf16.msra.mxu0 %v3738_v22  ;;  %v3785_v3 = vld [vmem:[%s4814_s1 + $0xb8] sm:$0xff]   ;;  %v3792_v8 = vld [vmem:[%s4814_s1 + $0x240] sm:$0xff]   ;;  %v3796_v12 = vld [vmem:[%s4814_s1 + $0x248] sm:$0xff]  }
  0x19   :  { %3410 = vmatpush3.bf16.msra.mxu1 %v3739_v23  ;;  %3389 = vmatprep.subr.bf16.mxu0 %v3740_v24  ;;  %v3789_v6 = vld [vmem:[%s4815_s0 + $0x8] ss:$16 sps:$4 sm:$0xff]   ;;  %v3791_v7 = vld [vmem:[%s4815_s0 + $0xc] ss:$16 sps:$4 sm:$0xff]   ;;  %v3793_v9 = vld [vmem:[%s4814_s1 + $0x2c0] sm:$0xff]  }
  0x1a   :  { %3411 = vmatprep.subr.bf16.mxu1 %v3741_v25  ;;  %v3794_v10 = vld [vmem:[%s4814_s1 + $0x200] sm:$0xff]   ;;  %v3797_v13 = vld [vmem:[%s4814_s1 + $0x2c8] sm:$0xff]   ;;  %v3800_v16 = vld [vmem:[%s4814_s1 + $0x250] sm:$0xff]  }
  0x1b   :  { %v3795_v11 = vld [vmem:[%s4814_s1 + $0x280] sm:$0xff]   ;;  %v3798_v14 = vld [vmem:[%s4814_s1 + $0x208] sm:$0xff]   ;;  %v3801_v17 = vld [vmem:[%s4814_s1 + $0x2d0] sm:$0xff]  }
  0x1c   :  { %3390 = vmatpush3.bf16.msra.mxu0 %v3742_v26  ;;  %v3799_v15 = vld [vmem:[%s4814_s1 + $0x288] sm:$0xff]   ;;  %v3802_v18 = vld [vmem:[%s4814_s1 + $0x210] sm:$0xff]   ;;  %v3804_v20 = vld [vmem:[%s4814_s1 + $0x258] sm:$0xff]  }
  0x1d   :  { %3412 = vmatpush3.bf16.msra.mxu1 %v3743_v27  ;;  %3391 = vmatprep.subr.bf16.mxu0 %v3744_v28  ;;  %v3803_v19 = vld [vmem:[%s4814_s1 + $0x290] sm:$0xff]   ;;  %v3805_v21 = vld [vmem:[%s4814_s1 + $0x2d8] sm:$0xff]   ;;  %v3808_v24 = vld [vmem:[%s4814_s1 + $0x260] sm:$0xff]  }
  0x1e   :  { %3413 = vmatprep.subr.bf16.mxu1 %v3745_v29  ;;  %v3806_v22 = vld [vmem:[%s4814_s1 + $0x218] sm:$0xff]   ;;  %v3809_v25 = vld [vmem:[%s4814_s1 + $0x2e0] sm:$0xff]   ;;  %v3812_v28 = vld [vmem:[%s4814_s1 + $0x268] sm:$0xff]  }
  0x1f   :  { %v3807_v23 = vld [vmem:[%s4814_s1 + $0x298] sm:$0xff]   ;;  %v3810_v26 = vld [vmem:[%s4814_s1 + $0x220] sm:$0xff]   ;;  %v3813_v29 = vld [vmem:[%s4814_s1 + $0x2e8] sm:$0xff]  }
  0x20   :  { %3392 = vmatpush3.bf16.msra.mxu0 %v3746_v30  ;;  %v3811_v27 = vld [vmem:[%s4814_s1 + $0x2a0] sm:$0xff]   ;;  %v3814_v30 = vld [vmem:[%s4814_s1 + $0x228] sm:$0xff]   ;;  %v3817_v33 = vld [vmem:[%s4814_s1 + $0x2f0] sm:$0xff]  }
  0x21   :  { %3414 = vmatpush3.bf16.msra.mxu1 %v3747_v31  ;;  %3421 = vmatprep.subr.bf16.mxu0 %v3754_v36  ;;  %v3815_v31 = vld [vmem:[%s4814_s1 + $0x2a8] sm:$0xff]   ;;  %v3819_v35 = vld [vmem:[%s4814_s1 + $0x2b0] sm:$0xff]   ;;  %v3820_v36 = vld [vmem:[%s4814_s1 + $0x278] sm:$0xff]  }
  0x22   :  { %3443 = vmatprep.subr.bf16.mxu1 %v3755_v37  ;;  %v3821_v37 = vld [vmem:[%s4814_s1 + $0x2f8] sm:$0xff]  }
  0x23   :  { %404 = vmatmul.mubr.bf16.vlgmr.msra.gmra.mrb[0].mxu0 %v3748_v32  ;;  %v3816_v32 = vld [vmem:[%s4814_s1 + $0x270] sm:$0xff]  }
  0x24   :  { %445 = vmatmul.mubr.bf16.vlgmr.msra.gmra.mrb[0].mxu1 %v3751_v34  ;;  %3422 = vmatpush3.bf16.msra.mxu0 %v3756_v38  ;;  %v3818_v34 = vld [vmem:[%s4814_s1 + $0x230] sm:$0xff]   ;;  %v3822_v38 = vld [vmem:[%s4814_s1 + $0x238] sm:$0xff]  }
  0x25   :  { %3444 = vmatpush3.bf16.msra.mxu1 %v3757_v39  ;;  %3423 = vmatprep.subr.bf16.mxu0 %v3758_v40  ;;  %v3823_v39 = vld [vmem:[%s4814_s1 + $0x2b8] sm:$0xff]   ;;  %v3824_v40 = vld [vmem:[%s4815_s0 + $0x40] ss:$16 sps:$4 sm:$0xff]  }
  0x26   :  { %3445 = vmatprep.subr.bf16.mxu1 %v3759_v41  ;;  %697 = vmatprep.mubr.bf16.mxu0 %v3788_v5  ;;  %v3826_v41 = vld [vmem:[%s4815_s0 + $0x44] ss:$16 sps:$4 sm:$0xff]  }
  0x27   :  { %738 = vmatprep.mubr.bf16.mxu1 %v3791_v7  ;;  %v3855_v5 = vld [vmem:[%s4814_s1 + $0x3f0] sm:$0xff]  }
  0x28   :  { %3424 = vmatpush3.bf16.msra.mxu0 %v3760_v42  ;;  %v3827_v42 = vld [vmem:[%s4815_s0 + $0x48] ss:$16 sps:$4 sm:$0xff]   ;;  %v3857_v7 = vld [vmem:[%s4814_s1 + $0x3b0] sm:$0xff]  }
  0x29   :  { %3446 = vmatpush3.bf16.msra.mxu1 %v3761_v43  ;;  %3425 = vmatprep.subr.bf16.mxu0 %v3762_v44  ;;  %v3829_v43 = vld [vmem:[%s4815_s0 + $0x4c] ss:$16 sps:$4 sm:$0xff]   ;;  %v3830_v44 = vld [vmem:[%s4814_s1 + $0x340] sm:$0xff]  }
  0x2a   :  { %3447 = vmatprep.subr.bf16.mxu1 %v3763_v45  ;;  %v3831_v45 = vld [vmem:[%s4814_s1 + $0x3c0] sm:$0xff]  }
  0x2c   :  { %3426 = vmatpush3.bf16.msra.mxu0 %v3764_v46  ;;  %v3832_v46 = vld [vmem:[%s4814_s1 + $0x300] sm:$0xff]  }
  0x2d   :  { %3448 = vmatpush3.bf16.msra.mxu1 %v3765_v47  ;;  %3427 = vmatprep.subr.bf16.mxu0 %v3766_v48  ;;  %v3833_v47 = vld [vmem:[%s4814_s1 + $0x380] sm:$0xff]   ;;  %v3834_v48 = vld [vmem:[%s4814_s1 + $0x348] sm:$0xff]  }
  0x2e   :  { %3449 = vmatprep.subr.bf16.mxu1 %v3767_v49  ;;  %v3835_v49 = vld [vmem:[%s4814_s1 + $0x3c8] sm:$0xff]  }
  0x30   :  { %3428 = vmatpush3.bf16.msra.mxu0 %v3768_v50  ;;  %v3836_v50 = vld [vmem:[%s4814_s1 + $0x308] sm:$0xff]  }
  0x31   :  { %3450 = vmatpush3.bf16.msra.mxu1 %v3769_v51  ;;  %3429 = vmatprep.subr.bf16.mxu0 %v3770_v52  ;;  %v3837_v51 = vld [vmem:[%s4814_s1 + $0x388] sm:$0xff]   ;;  %v3838_v52 = vld [vmem:[%s4814_s1 + $0x350] sm:$0xff]  }
  0x32   :  { %3451 = vmatprep.subr.bf16.mxu1 %v3771_v53  ;;  %v3839_v53 = vld [vmem:[%s4814_s1 + $0x3d0] sm:$0xff]  }
  0x34   :  { %3430 = vmatpush3.bf16.msra.mxu0 %v3772_v54  ;;  %v3840_v54 = vld [vmem:[%s4814_s1 + $0x310] sm:$0xff]  }
  0x35   :  { %3452 = vmatpush3.bf16.msra.mxu1 %v3773_v55  ;;  %3431 = vmatprep.subr.bf16.mxu0 %v3774_v56  ;;  %v3841_v55 = vld [vmem:[%s4814_s1 + $0x390] sm:$0xff]   ;;  %v3842_v56 = vld [vmem:[%s4814_s1 + $0x358] sm:$0xff]  }
  0x36   :  { %3453 = vmatprep.subr.bf16.mxu1 %v3775_v57  ;;  %v3843_v57 = vld [vmem:[%s4814_s1 + $0x3d8] sm:$0xff]  }
  0x38   :  { %3432 = vmatpush3.bf16.msra.mxu0 %v3776_v58  ;;  %v3844_v58 = vld [vmem:[%s4814_s1 + $0x318] sm:$0xff]  }
  0x39   :  { %3454 = vmatpush3.bf16.msra.mxu1 %v3777_v59  ;;  %3433 = vmatprep.subr.bf16.mxu0 %v3778_v60  ;;  %v3845_v59 = vld [vmem:[%s4814_s1 + $0x398] sm:$0xff]   ;;  %v3846_v60 = vld [vmem:[%s4814_s1 + $0x360] sm:$0xff]  }
  0x3a   :  { %3455 = vmatprep.subr.bf16.mxu1 %v3779_v61  ;;  %v3847_v61 = vld [vmem:[%s4814_s1 + $0x3e0] sm:$0xff]  }
  0x3c   :  { %3434 = vmatpush3.bf16.msra.mxu0 %v3780_v62  ;;  %v3848_v62 = vld [vmem:[%s4814_s1 + $0x320] sm:$0xff]  }
  0x3d   :  { %3456 = vmatpush3.bf16.msra.mxu1 %v3781_v63  ;;  %3435 = vmatprep.subr.bf16.mxu0 %v3782_v0  ;;  %v3849_v63 = vld [vmem:[%s4814_s1 + $0x3a0] sm:$0xff]   ;;  %v3850_v0 = vld [vmem:[%s4814_s1 + $0x368] sm:$0xff]  }
  0x3e   :  { %3457 = vmatprep.subr.bf16.mxu1 %v3783_v1  ;;  %v3851_v1 = vld [vmem:[%s4814_s1 + $0x3e8] sm:$0xff]  }
  0x40   :  { %3436 = vmatpush3.bf16.msra.mxu0 %v3784_v2  ;;  %v3852_v2 = vld [vmem:[%s4814_s1 + $0x328] sm:$0xff]  }
  0x41   :  { %3458 = vmatpush3.bf16.msra.mxu1 %v3785_v3  ;;  %3465 = vmatprep.subr.bf16.mxu0 %v3792_v8  ;;  %v3853_v3 = vld [vmem:[%s4814_s1 + $0x3a8] sm:$0xff]   ;;  %v3858_v8 = vld [vmem:[%s4814_s1 + $0x378] sm:$0xff]  }
  0x42   :  { %3487 = vmatprep.subr.bf16.mxu1 %v3793_v9  ;;  %v3859_v9 = vld [vmem:[%s4814_s1 + $0x3f8] sm:$0xff]  }
  0x43   :  { %698 = vmatmul.mubr.bf16.vlgmr.msra.gmra.mrb[4].mxu0 %v3786_v4  ;;  %v3854_v4 = vld [vmem:[%s4814_s1 + $0x370] sm:$0xff]  }
  0x44   :  { %739 = vmatmul.mubr.bf16.vlgmr.msra.gmra.mrb[4].mxu1 %v3789_v6  ;;  %3466 = vmatpush3.bf16.msra.mxu0 %v3794_v10  ;;  %v3856_v6 = vld [vmem:[%s4814_s1 + $0x330] sm:$0xff]   ;;  %v3860_v10 = vld [vmem:[%s4814_s1 + $0x338] sm:$0xff]  }
  0x45   :  { %3488 = vmatpush3.bf16.msra.mxu1 %v3795_v11  ;;  %3467 = vmatprep.subr.bf16.mxu0 %v3796_v12  ;;  %v3861_v11 = vld [vmem:[%s4814_s1 + $0x3b8] sm:$0xff]   ;;  %v3862_v12 = vld [vmem:[%s4815_s0 + $0x60] ss:$16 sps:$4 sm:$0xff]  }
  0x46   :  { %3489 = vmatprep.subr.bf16.mxu1 %v3797_v13  ;;  %1061 = vmatprep.mubr.bf16.mxu0 %v3826_v41  ;;  %v3864_v13 = vld [vmem:[%s4815_s0 + $0x64] ss:$16 sps:$4 sm:$0xff]  }
  0x47   :  { %1102 = vmatprep.mubr.bf16.mxu1 %v3829_v43  ;;  %v3893_v41 = vld [vmem:[%s4814_s1 + $0x4f0] sm:$0xff]  }
  0x48   :  { %3468 = vmatpush3.bf16.msra.mxu0 %v3798_v14  ;;  %v3865_v14 = vld [vmem:[%s4815_s0 + $0x68] ss:$16 sps:$4 sm:$0xff]   ;;  %v3895_v43 = vld [vmem:[%s4814_s1 + $0x4b0] sm:$0xff]  }
  0x49   :  { %3490 = vmatpush3.bf16.msra.mxu1 %v3799_v15  ;;  %3469 = vmatprep.subr.bf16.mxu0 %v3800_v16  ;;  %v3867_v15 = vld [vmem:[%s4815_s0 + $0x6c] ss:$16 sps:$4 sm:$0xff]   ;;  %v3868_v16 = vld [vmem:[%s4814_s1 + $0x440] sm:$0xff]  }
  0x4a   :  { %3491 = vmatprep.subr.bf16.mxu1 %v3801_v17  ;;  %v3869_v17 = vld [vmem:[%s4814_s1 + $0x4c0] sm:$0xff]  }
  0x4c   :  { %3470 = vmatpush3.bf16.msra.mxu0 %v3802_v18  ;;  %v3870_v18 = vld [vmem:[%s4814_s1 + $0x400] sm:$0xff]  }
  0x4d   :  { %3492 = vmatpush3.bf16.msra.mxu1 %v3803_v19  ;;  %3471 = vmatprep.subr.bf16.mxu0 %v3804_v20  ;;  %v3871_v19 = vld [vmem:[%s4814_s1 + $0x480] sm:$0xff]   ;;  %v3872_v20 = vld [vmem:[%s4814_s1 + $0x448] sm:$0xff]  }
  0x4e   :  { %3493 = vmatprep.subr.bf16.mxu1 %v3805_v21  ;;  %v3873_v21 = vld [vmem:[%s4814_s1 + $0x4c8] sm:$0xff]  }
  0x50   :  { %3472 = vmatpush3.bf16.msra.mxu0 %v3806_v22  ;;  %v3874_v22 = vld [vmem:[%s4814_s1 + $0x408] sm:$0xff]  }
  0x51   :  { %3494 = vmatpush3.bf16.msra.mxu1 %v3807_v23  ;;  %3473 = vmatprep.subr.bf16.mxu0 %v3808_v24  ;;  %v3875_v23 = vld [vmem:[%s4814_s1 + $0x488] sm:$0xff]   ;;  %v3876_v24 = vld [vmem:[%s4814_s1 + $0x450] sm:$0xff]  }
  0x52   :  { %3495 = vmatprep.subr.bf16.mxu1 %v3809_v25  ;;  %v3877_v25 = vld [vmem:[%s4814_s1 + $0x4d0] sm:$0xff]  }
  0x54   :  { %3474 = vmatpush3.bf16.msra.mxu0 %v3810_v26  ;;  %v3878_v26 = vld [vmem:[%s4814_s1 + $0x410] sm:$0xff]  }
  0x55   :  { %3496 = vmatpush3.bf16.msra.mxu1 %v3811_v27  ;;  %3475 = vmatprep.subr.bf16.mxu0 %v3812_v28  ;;  %v3879_v27 = vld [vmem:[%s4814_s1 + $0x490] sm:$0xff]   ;;  %v3880_v28 = vld [vmem:[%s4814_s1 + $0x458] sm:$0xff]  }
  0x56   :  { %3497 = vmatprep.subr.bf16.mxu1 %v3813_v29  ;;  %v3881_v29 = vld [vmem:[%s4814_s1 + $0x4d8] sm:$0xff]  }
  0x58   :  { %3476 = vmatpush3.bf16.msra.mxu0 %v3814_v30  ;;  %v3882_v30 = vld [vmem:[%s4814_s1 + $0x418] sm:$0xff]  }
  0x59   :  { %3498 = vmatpush3.bf16.msra.mxu1 %v3815_v31  ;;  %3477 = vmatprep.subr.bf16.mxu0 %v3816_v32  ;;  %v3883_v31 = vld [vmem:[%s4814_s1 + $0x498] sm:$0xff]   ;;  %v3884_v32 = vld [vmem:[%s4814_s1 + $0x460] sm:$0xff]  }
  0x5a   :  { %3499 = vmatprep.subr.bf16.mxu1 %v3817_v33  ;;  %v3885_v33 = vld [vmem:[%s4814_s1 + $0x4e0] sm:$0xff]  }
  0x5c   :  { %3478 = vmatpush3.bf16.msra.mxu0 %v3818_v34  ;;  %v3886_v34 = vld [vmem:[%s4814_s1 + $0x420] sm:$0xff]  }
  0x5d   :  { %3500 = vmatpush3.bf16.msra.mxu1 %v3819_v35  ;;  %3479 = vmatprep.subr.bf16.mxu0 %v3820_v36  ;;  %v3887_v35 = vld [vmem:[%s4814_s1 + $0x4a0] sm:$0xff]   ;;  %v3888_v36 = vld [vmem:[%s4814_s1 + $0x468] sm:$0xff]  }
  0x5e   :  { %3501 = vmatprep.subr.bf16.mxu1 %v3821_v37  ;;  %v3889_v37 = vld [vmem:[%s4814_s1 + $0x4e8] sm:$0xff]  }
  0x60   :  { %3480 = vmatpush3.bf16.msra.mxu0 %v3822_v38  ;;  %v3890_v38 = vld [vmem:[%s4814_s1 + $0x428] sm:$0xff]  }
  0x61   :  { %3502 = vmatpush3.bf16.msra.mxu1 %v3823_v39  ;;  %3509 = vmatprep.subr.bf16.mxu0 %v3830_v44  ;;  %v3891_v39 = vld [vmem:[%s4814_s1 + $0x4a8] sm:$0xff]   ;;  %v3896_v44 = vld [vmem:[%s4814_s1 + $0x478] sm:$0xff]  }
  0x62   :  { %3531 = vmatprep.subr.bf16.mxu1 %v3831_v45  ;;  %v3897_v45 = vld [vmem:[%s4814_s1 + $0x4f8] sm:$0xff]  }
  0x63   :  { %1062 = vmatmul.mubr.bf16.vlgmr.msra.gmra.mrb[8].mxu0 %v3824_v40  ;;  %v3892_v40 = vld [vmem:[%s4814_s1 + $0x470] sm:$0xff]  }
  0x64   :  { %1103 = vmatmul.mubr.bf16.vlgmr.msra.gmra.mrb[8].mxu1 %v3827_v42  ;;  %3510 = vmatpush3.bf16.msra.mxu0 %v3832_v46  ;;  %v3894_v42 = vld [vmem:[%s4814_s1 + $0x430] sm:$0xff]   ;;  %v3898_v46 = vld [vmem:[%s4814_s1 + $0x438] sm:$0xff]  }
  0x65   :  { %3532 = vmatpush3.bf16.msra.mxu1 %v3833_v47  ;;  %3511 = vmatprep.subr.bf16.mxu0 %v3834_v48  ;;  %v3899_v47 = vld [vmem:[%s4814_s1 + $0x4b8] sm:$0xff]   ;;  %v3900_v48 = vld [vmem:[%s4815_s0 + $0x80] ss:$16 sps:$4 sm:$0xff]  }
  0x66   :  { %3533 = vmatprep.subr.bf16.mxu1 %v3835_v49  ;;  %1427 = vmatprep.mubr.bf16.mxu0 %v3864_v13  ;;  %v3902_v49 = vld [vmem:[%s4815_s0 + $0x84] ss:$16 sps:$4 sm:$0xff]  }
  0x67   :  { %1468 = vmatprep.mubr.bf16.mxu1 %v3867_v15  ;;  %v3931_v13 = vld [vmem:[%s4814_s1 + $0x5f0] sm:$0xff]  }
  0x68   :  { %3512 = vmatpush3.bf16.msra.mxu0 %v3836_v50  ;;  %v3903_v50 = vld [vmem:[%s4815_s0 + $0x88] ss:$16 sps:$4 sm:$0xff]   ;;  %v3933_v15 = vld [vmem:[%s4814_s1 + $0x5b0] sm:$0xff]  }
  0x69   :  { %3534 = vmatpush3.bf16.msra.mxu1 %v3837_v51  ;;  %3513 = vmatprep.subr.bf16.mxu0 %v3838_v52  ;;  %v3905_v51 = vld [vmem:[%s4815_s0 + $0x8c] ss:$16 sps:$4 sm:$0xff]   ;;  %v3906_v52 = vld [vmem:[%s4814_s1 + $0x540] sm:$0xff]  }
  0x6a   :  { %3535 = vmatprep.subr.bf16.mxu1 %v3839_v53  ;;  %v3907_v53 = vld [vmem:[%s4814_s1 + $0x5c0] sm:$0xff]  }
  0x6c   :  { %3514 = vmatpush3.bf16.msra.mxu0 %v3840_v54  ;;  %v3908_v54 = vld [vmem:[%s4814_s1 + $0x500] sm:$0xff]  }
  0x6d   :  { %3536 = vmatpush3.bf16.msra.mxu1 %v3841_v55  ;;  %3515 = vmatprep.subr.bf16.mxu0 %v3842_v56  ;;  %v3909_v55 = vld [vmem:[%s4814_s1 + $0x580] sm:$0xff]   ;;  %v3910_v56 = vld [vmem:[%s4814_s1 + $0x548] sm:$0xff]  }
  0x6e   :  { %3537 = vmatprep.subr.bf16.mxu1 %v3843_v57  ;;  %v3911_v57 = vld [vmem:[%s4814_s1 + $0x5c8] sm:$0xff]  }
  0x70   :  { %3516 = vmatpush3.bf16.msra.mxu0 %v3844_v58  ;;  %v3912_v58 = vld [vmem:[%s4814_s1 + $0x508] sm:$0xff]  }
  0x71   :  { %3538 = vmatpush3.bf16.msra.mxu1 %v3845_v59  ;;  %3517 = vmatprep.subr.bf16.mxu0 %v3846_v60  ;;  %v3913_v59 = vld [vmem:[%s4814_s1 + $0x588] sm:$0xff]   ;;  %v3914_v60 = vld [vmem:[%s4814_s1 + $0x550] sm:$0xff]  }
  0x72   :  { %3539 = vmatprep.subr.bf16.mxu1 %v3847_v61  ;;  %v3915_v61 = vld [vmem:[%s4814_s1 + $0x5d0] sm:$0xff]  }
  0x74   :  { %3518 = vmatpush3.bf16.msra.mxu0 %v3848_v62  ;;  %v3916_v62 = vld [vmem:[%s4814_s1 + $0x510] sm:$0xff]  }
  0x75   :  { %3540 = vmatpush3.bf16.msra.mxu1 %v3849_v63  ;;  %3519 = vmatprep.subr.bf16.mxu0 %v3850_v0  ;;  %v3917_v63 = vld [vmem:[%s4814_s1 + $0x590] sm:$0xff]   ;;  %v3918_v0 = vld [vmem:[%s4814_s1 + $0x558] sm:$0xff]  }
  0x76   :  { %3541 = vmatprep.subr.bf16.mxu1 %v3851_v1  ;;  %v3919_v1 = vld [vmem:[%s4814_s1 + $0x5d8] sm:$0xff]  }
  0x78   :  { %3520 = vmatpush3.bf16.msra.mxu0 %v3852_v2  ;;  %v3920_v2 = vld [vmem:[%s4814_s1 + $0x518] sm:$0xff]  }
  0x79   :  { %3542 = vmatpush3.bf16.msra.mxu1 %v3853_v3  ;;  %3521 = vmatprep.subr.bf16.mxu0 %v3854_v4  ;;  %v3921_v3 = vld [vmem:[%s4814_s1 + $0x598] sm:$0xff]   ;;  %v3922_v4 = vld [vmem:[%s4814_s1 + $0x560] sm:$0xff]  }
  0x7a   :  { %3543 = vmatprep.subr.bf16.mxu1 %v3855_v5  ;;  %v3923_v5 = vld [vmem:[%s4814_s1 + $0x5e0] sm:$0xff]  }
  0x7c   :  { %3522 = vmatpush3.bf16.msra.mxu0 %v3856_v6  ;;  %v3924_v6 = vld [vmem:[%s4814_s1 + $0x520] sm:$0xff]  }
  0x7d   :  { %3544 = vmatpush3.bf16.msra.mxu1 %v3857_v7  ;;  %3523 = vmatprep.subr.bf16.mxu0 %v3858_v8  ;;  %v3925_v7 = vld [vmem:[%s4814_s1 + $0x5a0] sm:$0xff]   ;;  %v3926_v8 = vld [vmem:[%s4814_s1 + $0x568] sm:$0xff]  }
  0x7e   :  { %3545 = vmatprep.subr.bf16.mxu1 %v3859_v9  ;;  %v3927_v9 = vld [vmem:[%s4814_s1 + $0x5e8] sm:$0xff]  }
  0x80   :  { %3524 = vmatpush3.bf16.msra.mxu0 %v3860_v10  ;;  %v3928_v10 = vld [vmem:[%s4814_s1 + $0x528] sm:$0xff]  }
  0x81   :  { %3546 = vmatpush3.bf16.msra.mxu1 %v3861_v11  ;;  %3553 = vmatprep.subr.bf16.mxu0 %v3868_v16  ;;  %v3929_v11 = vld [vmem:[%s4814_s1 + $0x5a8] sm:$0xff]   ;;  %v3934_v16 = vld [vmem:[%s4814_s1 + $0x578] sm:$0xff]  }
  0x82   :  { %3575 = vmatprep.subr.bf16.mxu1 %v3869_v17  ;;  %v3935_v17 = vld [vmem:[%s4814_s1 + $0x5f8] sm:$0xff]  }
  0x83   :  { %1428 = vmatmul.mubr.bf16.vlgmr.msra.gmra.mrb[12].mxu0 %v3862_v12  ;;  %v3930_v12 = vld [vmem:[%s4814_s1 + $0x570] sm:$0xff]  }
  0x84   :  { %1469 = vmatmul.mubr.bf16.vlgmr.msra.gmra.mrb[12].mxu1 %v3865_v14  ;;  %3554 = vmatpush3.bf16.msra.mxu0 %v3870_v18  ;;  %v3932_v14 = vld [vmem:[%s4814_s1 + $0x530] sm:$0xff]   ;;  %v3936_v18 = vld [vmem:[%s4814_s1 + $0x538] sm:$0xff]  }
  0x85   :  { %3576 = vmatpush3.bf16.msra.mxu1 %v3871_v19  ;;  %3555 = vmatprep.subr.bf16.mxu0 %v3872_v20  ;;  %v3937_v19 = vld [vmem:[%s4814_s1 + $0x5b8] sm:$0xff]   ;;  %v3938_v20 = vld [vmem:[%s4815_s0 + $0xa0] ss:$16 sps:$4 sm:$0xff]  }
  0x86   :  { %3577 = vmatprep.subr.bf16.mxu1 %v3873_v21  ;;  %1793 = vmatprep.mubr.bf16.mxu0 %v3902_v49  ;;  %v3940_v21 = vld [vmem:[%s4815_s0 + $0xa4] ss:$16 sps:$4 sm:$0xff]  }
  0x87   :  { %1834 = vmatprep.mubr.bf16.mxu1 %v3905_v51  ;;  %v3969_v49 = vld [vmem:[%s4814_s1 + $0x6f0] sm:$0xff]  }
  0x88   :  { %3556 = vmatpush3.bf16.msra.mxu0 %v3874_v22  ;;  %v3941_v22 = vld [vmem:[%s4815_s0 + $0xa8] ss:$16 sps:$4 sm:$0xff]   ;;  %v3971_v51 = vld [vmem:[%s4814_s1 + $0x6b0] sm:$0xff]  }
  0x89   :  { %3578 = vmatpush3.bf16.msra.mxu1 %v3875_v23  ;;  %3557 = vmatprep.subr.bf16.mxu0 %v3876_v24  ;;  %v3943_v23 = vld [vmem:[%s4815_s0 + $0xac] ss:$16 sps:$4 sm:$0xff]   ;;  %v3944_v24 = vld [vmem:[%s4814_s1 + $0x640] sm:$0xff]  }
  0x8a   :  { %3579 = vmatprep.subr.bf16.mxu1 %v3877_v25  ;;  %v3945_v25 = vld [vmem:[%s4814_s1 + $0x6c0] sm:$0xff]  }
  0x8c   :  { %3558 = vmatpush3.bf16.msra.mxu0 %v3878_v26  ;;  %v3946_v26 = vld [vmem:[%s4814_s1 + $0x600] sm:$0xff]  }
  0x8d   :  { %3580 = vmatpush3.bf16.msra.mxu1 %v3879_v27  ;;  %3559 = vmatprep.subr.bf16.mxu0 %v3880_v28  ;;  %v3947_v27 = vld [vmem:[%s4814_s1 + $0x680] sm:$0xff]   ;;  %v3948_v28 = vld [vmem:[%s4814_s1 + $0x648] sm:$0xff]  }
  0x8e   :  { %3581 = vmatprep.subr.bf16.mxu1 %v3881_v29  ;;  %v3949_v29 = vld [vmem:[%s4814_s1 + $0x6c8] sm:$0xff]  }
  0x90   :  { %3560 = vmatpush3.bf16.msra.mxu0 %v3882_v30  ;;  %v3950_v30 = vld [vmem:[%s4814_s1 + $0x608] sm:$0xff]  }
  0x91   :  { %3582 = vmatpush3.bf16.msra.mxu1 %v3883_v31  ;;  %3561 = vmatprep.subr.bf16.mxu0 %v3884_v32  ;;  %v3951_v31 = vld [vmem:[%s4814_s1 + $0x688] sm:$0xff]   ;;  %v3952_v32 = vld [vmem:[%s4814_s1 + $0x650] sm:$0xff]  }
  0x92   :  { %3583 = vmatprep.subr.bf16.mxu1 %v3885_v33  ;;  %v3953_v33 = vld [vmem:[%s4814_s1 + $0x6d0] sm:$0xff]  }
  0x94   :  { %3562 = vmatpush3.bf16.msra.mxu0 %v3886_v34  ;;  %v3954_v34 = vld [vmem:[%s4814_s1 + $0x610] sm:$0xff]  }
  0x95   :  { %3584 = vmatpush3.bf16.msra.mxu1 %v3887_v35  ;;  %3563 = vmatprep.subr.bf16.mxu0 %v3888_v36  ;;  %v3955_v35 = vld [vmem:[%s4814_s1 + $0x690] sm:$0xff]   ;;  %v3956_v36 = vld [vmem:[%s4814_s1 + $0x658] sm:$0xff]  }
  0x96   :  { %3585 = vmatprep.subr.bf16.mxu1 %v3889_v37  ;;  %v3957_v37 = vld [vmem:[%s4814_s1 + $0x6d8] sm:$0xff]  }
  0x98   :  { %3564 = vmatpush3.bf16.msra.mxu0 %v3890_v38  ;;  %v3958_v38 = vld [vmem:[%s4814_s1 + $0x618] sm:$0xff]  }
  0x99   :  { %3586 = vmatpush3.bf16.msra.mxu1 %v3891_v39  ;;  %3565 = vmatprep.subr.bf16.mxu0 %v3892_v40  ;;  %v3959_v39 = vld [vmem:[%s4814_s1 + $0x698] sm:$0xff]   ;;  %v3960_v40 = vld [vmem:[%s4814_s1 + $0x660] sm:$0xff]  }
  0x9a   :  { %3587 = vmatprep.subr.bf16.mxu1 %v3893_v41  ;;  %v3961_v41 = vld [vmem:[%s4814_s1 + $0x6e0] sm:$0xff]  }
  0x9c   :  { %3566 = vmatpush3.bf16.msra.mxu0 %v3894_v42  ;;  %v3962_v42 = vld [vmem:[%s4814_s1 + $0x620] sm:$0xff]  }
  0x9d   :  { %3588 = vmatpush3.bf16.msra.mxu1 %v3895_v43  ;;  %3567 = vmatprep.subr.bf16.mxu0 %v3896_v44  ;;  %v3963_v43 = vld [vmem:[%s4814_s1 + $0x6a0] sm:$0xff]   ;;  %v3964_v44 = vld [vmem:[%s4814_s1 + $0x668] sm:$0xff]  }
  0x9e   :  { %3589 = vmatprep.subr.bf16.mxu1 %v3897_v45  ;;  %v3965_v45 = vld [vmem:[%s4814_s1 + $0x6e8] sm:$0xff]  }
  0xa0   :  { %3568 = vmatpush3.bf16.msra.mxu0 %v3898_v46  ;;  %v3966_v46 = vld [vmem:[%s4814_s1 + $0x628] sm:$0xff]  }
  0xa1   :  { %3590 = vmatpush3.bf16.msra.mxu1 %v3899_v47  ;;  %3597 = vmatprep.subr.bf16.mxu0 %v3906_v52  ;;  %v3967_v47 = vld [vmem:[%s4814_s1 + $0x6a8] sm:$0xff]   ;;  %v3972_v52 = vld [vmem:[%s4814_s1 + $0x678] sm:$0xff]  }
  0xa2   :  { %3619 = vmatprep.subr.bf16.mxu1 %v3907_v53  ;;  %v3973_v53 = vld [vmem:[%s4814_s1 + $0x6f8] sm:$0xff]  }
  0xa3   :  { %1794 = vmatmul.mubr.bf16.vlgmr.msra.gmra.mrb[16].mxu0 %v3900_v48  ;;  %v3968_v48 = vld [vmem:[%s4814_s1 + $0x670] sm:$0xff]  }
  0xa4   :  { %1835 = vmatmul.mubr.bf16.vlgmr.msra.gmra.mrb[16].mxu1 %v3903_v50  ;;  %3598 = vmatpush3.bf16.msra.mxu0 %v3908_v54  ;;  %v3970_v50 = vld [vmem:[%s4814_s1 + $0x630] sm:$0xff]   ;;  %v3974_v54 = vld [vmem:[%s4814_s1 + $0x638] sm:$0xff]  }
  0xa5   :  { %3620 = vmatpush3.bf16.msra.mxu1 %v3909_v55  ;;  %3599 = vmatprep.subr.bf16.mxu0 %v3910_v56  ;;  %v3975_v55 = vld [vmem:[%s4814_s1 + $0x6b8] sm:$0xff]   ;;  %v3976_v56 = vld [vmem:[%s4815_s0 + $0xc0] ss:$16 sps:$4 sm:$0xff]  }
  0xa6   :  { %3621 = vmatprep.subr.bf16.mxu1 %v3911_v57  ;;  %2159 = vmatprep.mubr.bf16.mxu0 %v3940_v21  ;;  %v3978_v57 = vld [vmem:[%s4815_s0 + $0xc4] ss:$16 sps:$4 sm:$0xff]  }
  0xa7   :  { %2200 = vmatprep.mubr.bf16.mxu1 %v3943_v23 }
  0xa8   :  { %3600 = vmatpush3.bf16.msra.mxu0 %v3912_v58  ;;  %v3979_v58 = vld [vmem:[%s4815_s0 + $0xc8] ss:$16 sps:$4 sm:$0xff]  }
  0xa9   :  { %3622 = vmatpush3.bf16.msra.mxu1 %v3913_v59  ;;  %3601 = vmatprep.subr.bf16.mxu0 %v3914_v60  ;;  %v3981_v59 = vld [vmem:[%s4815_s0 + $0xcc] ss:$16 sps:$4 sm:$0xff]  }
  0xaa   :  { %3623 = vmatprep.subr.bf16.mxu1 %v3915_v61 }
  0xac   :  { %3602 = vmatpush3.bf16.msra.mxu0 %v3916_v62 }
  0xad   :  { %3624 = vmatpush3.bf16.msra.mxu1 %v3917_v63  ;;  %3603 = vmatprep.subr.bf16.mxu0 %v3918_v0 }
  0xae   :  { %3625 = vmatprep.subr.bf16.mxu1 %v3919_v1 }
  0xb0   :  { %3604 = vmatpush3.bf16.msra.mxu0 %v3920_v2 }
  0xb1   :  { %3626 = vmatpush3.bf16.msra.mxu1 %v3921_v3  ;;  %3605 = vmatprep.subr.bf16.mxu0 %v3922_v4 }
  0xb2   :  { %3627 = vmatprep.subr.bf16.mxu1 %v3923_v5 }
  0xb4   :  { %3606 = vmatpush3.bf16.msra.mxu0 %v3924_v6 }
  0xb5   :  { %3628 = vmatpush3.bf16.msra.mxu1 %v3925_v7  ;;  %3607 = vmatprep.subr.bf16.mxu0 %v3926_v8 }
  0xb6   :  { %3629 = vmatprep.subr.bf16.mxu1 %v3927_v9 }
  0xb8   :  { %3608 = vmatpush3.bf16.msra.mxu0 %v3928_v10 }
  0xb9   :  { %3630 = vmatpush3.bf16.msra.mxu1 %v3929_v11  ;;  %3609 = vmatprep.subr.bf16.mxu0 %v3930_v12 }
  0xba   :  { %3631 = vmatprep.subr.bf16.mxu1 %v3931_v13 }
  0xbc   :  { %3610 = vmatpush3.bf16.msra.mxu0 %v3932_v14 }
  0xbd   :  { %3632 = vmatpush3.bf16.msra.mxu1 %v3933_v15  ;;  %3611 = vmatprep.subr.bf16.mxu0 %v3934_v16 }
  0xbe   :  { %3633 = vmatprep.subr.bf16.mxu1 %v3935_v17 }
  0xc0   :  { %3612 = vmatpush3.bf16.msra.mxu0 %v3936_v18 }
  0xc1   :  { %3634 = vmatpush3.bf16.msra.mxu1 %v3937_v19  ;;  %3641 = vmatprep.subr.bf16.mxu0 %v3944_v24 }
  0xc2   :  { %3663 = vmatprep.subr.bf16.mxu1 %v3945_v25 }
  0xc3   :  { %2160 = vmatmul.mubr.bf16.vlgmr.msra.gmra.mrb[20].mxu0 %v3938_v20 }
  0xc4   :  { %2201 = vmatmul.mubr.bf16.vlgmr.msra.gmra.mrb[20].mxu1 %v3941_v22  ;;  %3642 = vmatpush3.bf16.msra.mxu0 %v3946_v26  ;;  %v3990_v26 = vmov 0.0  }
  0xc5   :  { %3664 = vmatpush3.bf16.msra.mxu1 %v3947_v27  ;;  %3643 = vmatprep.subr.bf16.mxu0 %v3948_v28  ;;  %v3982_v27 = vld [vmem:[%s4816_s3] sm:$0xff]   ;;  %v3983_v28 = vld [vmem:[%s4816_s3 + $0x8] sm:$0xff]  }
  0xc6   :  { %3665 = vmatprep.subr.bf16.mxu1 %v3949_v29  ;;  %2525 = vmatprep.mubr.bf16.mxu0 %v3978_v57  ;;  %v3984_v29 = vld [vmem:[%s4816_s3 + $0x10] sm:$0xff]  }
  0xc7   :  { %2566 = vmatprep.mubr.bf16.mxu1 %v3981_v59 }
  0xc8   :  { %3644 = vmatpush3.bf16.msra.mxu0 %v3950_v30  ;;  %v3985_v30 = vld [vmem:[%s4816_s3 + $0x18] sm:$0xff]  }
  0xc9   :  { %3666 = vmatpush3.bf16.msra.mxu1 %v3951_v31  ;;  %3645 = vmatprep.subr.bf16.mxu0 %v3952_v32 }
  0xca   :  { %3667 = vmatprep.subr.bf16.mxu1 %v3953_v33 }
  0xcc   :  { %3646 = vmatpush3.bf16.msra.mxu0 %v3954_v34 }
  0xcd   :  { %3668 = vmatpush3.bf16.msra.mxu1 %v3955_v35  ;;  %3647 = vmatprep.subr.bf16.mxu0 %v3956_v36 }
  0xce   :  { %3669 = vmatprep.subr.bf16.mxu1 %v3957_v37 }
  0xd0   :  { %3648 = vmatpush3.bf16.msra.mxu0 %v3958_v38 }
  0xd1   :  { %3670 = vmatpush3.bf16.msra.mxu1 %v3959_v39  ;;  %3649 = vmatprep.subr.bf16.mxu0 %v3960_v40 }
  0xd2   :  { %3671 = vmatprep.subr.bf16.mxu1 %v3961_v41 }
  0xd4   :  { %3650 = vmatpush3.bf16.msra.mxu0 %v3962_v42 }
  0xd5   :  { %3672 = vmatpush3.bf16.msra.mxu1 %v3963_v43  ;;  %3651 = vmatprep.subr.bf16.mxu0 %v3964_v44 }
  0xd6   :  { %3673 = vmatprep.subr.bf16.mxu1 %v3965_v45 }
  0xd8   :  { %3652 = vmatpush3.bf16.msra.mxu0 %v3966_v46 }
  0xd9   :  { %3674 = vmatpush3.bf16.msra.mxu1 %v3967_v47  ;;  %3653 = vmatprep.subr.bf16.mxu0 %v3968_v48  ;;  %v3986_v47 = vld [vmem:[%s4816_s3 + $0x20] sm:$0xff]   ;;  %v3987_v48 = vld [vmem:[%s4816_s3 + $0x28] sm:$0xff]  }
  0xda   :  { %3675 = vmatprep.subr.bf16.mxu1 %v3969_v49  ;;  %v3988_v49 = vld [vmem:[%s4816_s3 + $0x30] sm:$0xff]  }
  0xdc   :  { %3654 = vmatpush3.bf16.msra.mxu0 %v3970_v50  ;;  %v3989_v50 = vld [vmem:[%s4816_s3 + $0x38] sm:$0xff]  }
  0xdd   :  { %3676 = vmatpush3.bf16.msra.mxu1 %v3971_v51  ;;  %3655 = vmatprep.subr.bf16.mxu0 %v3972_v52 }
  0xde   :  { %3677 = vmatprep.subr.bf16.mxu1 %v3973_v53 }
  0xe0   :  { %3656 = vmatpush3.bf16.msra.mxu0 %v3974_v54 }
  0xe1   :  { %3678 = vmatpush3.bf16.msra.mxu1 %v3975_v55  ;;  %3694 = vmatprep.subr.bf16.mxu0 %v3990_v26 }
  0xe3   :  { %2526 = vmatmul.mubr.bf16.vlgmr.msra.gmra.mrb[24].mxu0 %v3976_v56 }
  0xe4   :  { %2567 = vmatmul.mubr.bf16.vlgmr.msra.gmra.mrb[24].mxu1 %v3979_v58  ;;  %3695 = vmatpush3.bf16.msra.mxu0 %v3982_v27 }
  0xe5   :  { %3696 = vmatprep.subr.bf16.mxu0 %v3990_v26  ;;  %3710 = vmatprep.mubr.msk.bf16.mxu0 %vm3991_vm0, %v3990_v26 }
  0xe8   :  { %3697 = vmatpush3.bf16.msra.mxu0 %v3983_v28 }
  0xe9   :  { %3698 = vmatprep.subr.bf16.mxu0 %v3990_v26 }
  0xec   :  { %3699 = vmatpush3.bf16.msra.mxu0 %v3984_v29 }
  0xed   :  { %3700 = vmatprep.subr.bf16.mxu0 %v3990_v26 }
  0xf0   :  { %3701 = vmatpush3.bf16.msra.mxu0 %v3985_v30 }
  0xf1   :  { %3702 = vmatprep.subr.bf16.mxu0 %v3990_v26 }
  0xf4   :  { %3703 = vmatpush3.bf16.msra.mxu0 %v3986_v47 }
  0xf5   :  { %3704 = vmatprep.subr.bf16.mxu0 %v3990_v26 }
  0xf6   :  { %v3393_v60 = vpop.f32.mrb[0].mxu0 }
  0xf7   :  { %v3415_v61 = vpop.f32.mrb[0].mxu1  ;;  %v3394_v62 = vpop.f32.mrb[1].mxu0 }
  0xf8   :  { %v3395_v63 = vadd.f32 %v3394_v62, %v3393_v60  ;;  %v3416_v0 = vpop.f32.mrb[1].mxu1  ;;  %v3396_v1 = vpop.f32.mrb[2].mxu0  ;;  %3705 = vmatpush3.bf16.msra.mxu0 %v3987_v48  ;;  %v3367_v48 = vld [vmem:[%s4817_s2] ss:$0 sm:$0xff] }
  0xf9   :  { %v3417_v2 = vadd.f32 %v3416_v0, %v3415_v61  ;;  %v3418_v3 = vpop.f32.mrb[2].mxu1  ;;  %v3397_v4 = vpop.f32.mrb[3].mxu0  ;;  %3706 = vmatprep.subr.bf16.mxu0 %v3990_v26 }
  0xfa   :  { %v3398_v5 = vadd.f32 %v3397_v4, %v3396_v1  ;;  %v3419_v6 = vpop.f32.mrb[3].mxu1 }
  0xfb   :  { %v447_v7 = vadd.f32 %v3417_v2, %v3395_v63  ;;  %v3420_v8 = vadd.f32 %v3419_v6, %v3418_v3 }
  0xfc   :  { %3707 = vmatpush3.bf16.msra.mxu0 %v3988_v49 }
  0xfd   :  { %v450_v9 = vadd.f32 %v3420_v8, %v3398_v5  ;;  %3708 = vmatprep.subr.bf16.mxu0 %v3990_v26 }
 0x100   :  { %3709 = vmatpush3.bf16.msra.mxu0 %v3989_v50 }
 0x116   :  { %v3437_v10 = vpop.f32.mrb[4].mxu0 }
 0x117   :  { %v3438_v11 = vpop.f32.mrb[5].mxu0  ;;  %v3459_v12 = vpop.f32.mrb[4].mxu1 }
 0x118   :  { %v3439_v13 = vadd.f32 %v3438_v11, %v3437_v10  ;;  %v3440_v14 = vpop.f32.mrb[6].mxu0  ;;  %v3460_v15 = vpop.f32.mrb[5].mxu1 }
 0x119   :  { %v3441_v16 = vpop.f32.mrb[7].mxu0  ;;  %v3461_v18 = vadd.f32 %v3460_v15, %v3459_v12  ;;  %v3462_v19 = vpop.f32.mrb[6].mxu1 }
 0x11a   :  { %v700_v17 = vadd.f32 %v3439_v13, %v447_v7  ;;  %v3442_v20 = vadd.f32 %v3441_v16, %v3440_v14  ;;  %v3463_v21 = vpop.f32.mrb[7].mxu1 }
 0x11b   :  { %v3464_v24 = vadd.f32 %v3463_v21, %v3462_v19 }
 0x11c   :  { %v741_v22 = vadd.f32 %v3461_v18, %v700_v17  ;;  %v703_v23 = vadd.f32 %v3442_v20, %v450_v9 }
 0x11e   :  { %v744_v25 = vadd.f32 %v3464_v24, %v703_v23 }
 0x136   :  { %v3481_v31 = vpop.f32.mrb[8].mxu0 }
 0x137   :  { %v3503_v32 = vpop.f32.mrb[8].mxu1  ;;  %v3482_v33 = vpop.f32.mrb[9].mxu0 }
 0x138   :  { %v3483_v34 = vadd.f32 %v3482_v33, %v3481_v31  ;;  %v3504_v35 = vpop.f32.mrb[9].mxu1  ;;  %v3484_v36 = vpop.f32.mrb[10].mxu0 }
 0x139   :  { %v3505_v37 = vadd.f32 %v3504_v35, %v3503_v32  ;;  %v3506_v38 = vpop.f32.mrb[10].mxu1  ;;  %v3485_v39 = vpop.f32.mrb[11].mxu0 }
 0x13a   :  { %v3486_v40 = vadd.f32 %v3485_v39, %v3484_v36  ;;  %v3507_v41 = vpop.f32.mrb[11].mxu1 }
 0x13b   :  { %v1105_v42 = vadd.f32 %v3505_v37, %v3483_v34  ;;  %v3508_v43 = vadd.f32 %v3507_v41, %v3506_v38 }
 0x13d   :  { %v1111_v44 = vadd.f32 %v1105_v42, %v741_v22  ;;  %v1108_v45 = vadd.f32 %v3508_v43, %v3486_v40 }
 0x13f   :  { %v1112_v46 = vadd.f32 %v1108_v45, %v744_v25 }
 0x156   :  { %v3525_v51 = vpop.f32.mrb[12].mxu0 }
 0x157   :  { %v3547_v52 = vpop.f32.mrb[12].mxu1  ;;  %v3526_v53 = vpop.f32.mrb[13].mxu0 }
 0x158   :  { %v3527_v54 = vadd.f32 %v3526_v53, %v3525_v51  ;;  %v3548_v55 = vpop.f32.mrb[13].mxu1  ;;  %v3528_v56 = vpop.f32.mrb[14].mxu0 }
 0x159   :  { %v3549_v57 = vadd.f32 %v3548_v55, %v3547_v52  ;;  %v3550_v58 = vpop.f32.mrb[14].mxu1  ;;  %v3529_v59 = vpop.f32.mrb[15].mxu0 }
 0x15a   :  { %v3530_v60 = vadd.f32 %v3529_v59, %v3528_v56  ;;  %v3551_v61 = vpop.f32.mrb[15].mxu1 }
 0x15b   :  { %v1471_v62 = vadd.f32 %v3549_v57, %v3527_v54  ;;  %v3552_v63 = vadd.f32 %v3551_v61, %v3550_v58  ;;  %v3368_v57 = vld [vmem:[%s4818_s4] ss:$0 sm:$0xff] }
 0x15d   :  { %v1477_v0 = vadd.f32 %v1471_v62, %v1111_v44  ;;  %v1474_v1 = vadd.f32 %v3552_v63, %v3530_v60 }
 0x15f   :  { %v1478_v2 = vadd.f32 %v1474_v1, %v1112_v46 }
 0x176   :  { %v3569_v3 = vpop.f32.mrb[16].mxu0 }
 0x177   :  { %v3570_v4 = vpop.f32.mrb[17].mxu0  ;;  %v3591_v5 = vpop.f32.mrb[16].mxu1 }
 0x178   :  { %v3571_v6 = vadd.f32 %v3570_v4, %v3569_v3  ;;  %v3572_v7 = vpop.f32.mrb[18].mxu0  ;;  %v3592_v8 = vpop.f32.mrb[17].mxu1 }
 0x179   :  { %v3573_v9 = vpop.f32.mrb[19].mxu0  ;;  %v3593_v10 = vadd.f32 %v3592_v8, %v3591_v5  ;;  %v3594_v11 = vpop.f32.mrb[18].mxu1 }
 0x17a   :  { %v3574_v12 = vadd.f32 %v3573_v9, %v3572_v7  ;;  %v3595_v13 = vpop.f32.mrb[19].mxu1 }
 0x17b   :  { %v1837_v14 = vadd.f32 %v3593_v10, %v3571_v6  ;;  %v3596_v15 = vadd.f32 %v3595_v13, %v3594_v11 }
 0x17d   :  { %v1843_v16 = vadd.f32 %v1837_v14, %v1477_v0  ;;  %v1840_v17 = vadd.f32 %v3596_v15, %v3574_v12 }
 0x17f   :  { %v1844_v18 = vadd.f32 %v1840_v17, %v1478_v2 }
 0x196   :  { %v3613_v19 = vpop.f32.mrb[20].mxu0 }
 0x197   :  { %v3635_v20 = vpop.f32.mrb[20].mxu1  ;;  %v3614_v21 = vpop.f32.mrb[21].mxu0 }
 0x198   :  { %v3615_v22 = vadd.f32 %v3614_v21, %v3613_v19  ;;  %v3636_v23 = vpop.f32.mrb[21].mxu1  ;;  %v3616_v24 = vpop.f32.mrb[22].mxu0 }
 0x199   :  { %v3637_v25 = vadd.f32 %v3636_v23, %v3635_v20  ;;  %v3638_v26 = vpop.f32.mrb[22].mxu1  ;;  %v3617_v27 = vpop.f32.mrb[23].mxu0 }
 0x19a   :  { %v3618_v28 = vadd.f32 %v3617_v27, %v3616_v24  ;;  %v3639_v29 = vpop.f32.mrb[23].mxu1 }
 0x19b   :  { %v2203_v30 = vadd.f32 %v3637_v25, %v3615_v22  ;;  %v3640_v31 = vadd.f32 %v3639_v29, %v3638_v26 }
 0x19d   :  { %v2209_v32 = vadd.f32 %v2203_v30, %v1843_v16  ;;  %v2206_v33 = vadd.f32 %v3640_v31, %v3618_v28 }
 0x19f   :  { %v2210_v34 = vadd.f32 %v2206_v33, %v1844_v18 }
 0x1b6   :  { %v3657_v35 = vpop.f32.mrb[24].mxu0 }
 0x1b7   :  { %v3679_v36 = vpop.f32.mrb[24].mxu1  ;;  %v3658_v37 = vpop.f32.mrb[25].mxu0 }
 0x1b8   :  { %v3659_v38 = vadd.f32 %v3658_v37, %v3657_v35  ;;  %v3680_v39 = vpop.f32.mrb[25].mxu1  ;;  %v3660_v40 = vpop.f32.mrb[26].mxu0 }
 0x1b9   :  { %v3681_v41 = vadd.f32 %v3680_v39, %v3679_v36  ;;  %v3682_v42 = vpop.f32.mrb[26].mxu1  ;;  %v3661_v43 = vpop.f32.mrb[27].mxu0 }
 0x1ba   :  { %v3662_v44 = vadd.f32 %v3661_v43, %v3660_v40  ;;  %v3683_v45 = vpop.f32.mrb[27].mxu1 }
 0x1bb   :  { %v2569_v46 = vadd.f32 %v3681_v41, %v3659_v38  ;;  %v3684_v47 = vadd.f32 %v3683_v45, %v3682_v42 }
 0x1bd   :  { %v2575_v49 = vadd.f32 %v2569_v46, %v2209_v32  ;;  %v2572_v50 = vadd.f32 %v3684_v47, %v3662_v44 }
 0x1bf   :  { %v2584_v51 = vadd.f32 %v3367_v48, %v2575_v49  ;;  %v2576_v52 = vadd.f32 %v2572_v50, %v2210_v34 }
 0x1c1   :  { %v2585_v53 = vadd.f32 %v3367_v48, %v2576_v52  ;;  %v2586_v54 = vmax.f32 %v2584_v51, 0.0 }
 0x1c3   :  { %v2587_v55 = vmax.f32 %v2585_v53, 0.0 }
 0x1c5   :  { %v2588_v56 = vpack.c.bf16 %v2587_v55, %v2586_v54 }
 0x1c7   :  { %3711 = vmatmul.mubr.bf16.vlgmr.msra.gmra.mrb[28].mxu0 %v2588_v56 }
 0x29a   :  { %v2694_v58 = vpop.f32.mrb[28].mxu0 }
 0x29b   :  { %v2695_v59 = vadd.f32 %v3368_v57, %v2694_v58  ;;  %v3712_v60 = vpop.f32.mrb[29].mxu0 }
 0x29c   :  { %v2697_v61 = vpop.f32.mrb[30].mxu0 }
 0x29d   :  { %2701 = vst [vmem:[%s4819_s5] sm:$0xff] %v2695_v59  ;;  %v2698_v62 = vadd.f32 %v3368_v57, %v2697_v61  ;;  %v3713_v63 = vpop.f32.mrb[31].mxu0 }
 0x29f   :  { %2702 = vst [vmem:[%s4819_s5 + $0x8] sm:$0xff] %v2698_v62 }

</bundles_post_ra>
